<compile_context>
chip_gen: v7x
topology: tpu7x:2x2x1
jax: 0.10.0
libtpu: 0.0.40
codegen_flags: <defaults>
</compile_context>

<pallas_src>
import jax
import jax.numpy as jnp
from jax.experimental import pallas as pl
from jax.experimental.pallas import tpu as pltpu

EPS = 1e-5


def _se_conv_bn_kernel(gate_ref, x_ref, w1_ref, g1_ref, b1_ref,
                       w2_hbm_ref, g2_ref, b2_ref, o_ref,
                       w2_vmem, w2_sem):
    # ---- prefetch w2 (only needed after matmul-1 + BN-1) --------------------
    w2_copy = pltpu.make_async_copy(w2_hbm_ref, w2_vmem, w2_sem)
    w2_copy.start()

    inv_p = 1.0 / x_ref.shape[1]                           # static P

    # ---- SE excitation: sigmoid(gate), lane-dense (1, Cin), recip on EUP ----
    s = pl.reciprocal(1.0 + jnp.exp(-gate_ref[...]), approx=True)   # (1, Cin)

    # ---- channels-on-lanes activation: (Cin, P) -> (P, Cin) on the XLU ------
    x_t = x_ref[...].T                                     # (P, Cin) f32
    xg = (x_t * s).astype(jnp.bfloat16)                    # (P, Cin) bf16

    # ---- conv2d79 (1x1, no bias): (P,Cin) @ (Cin,Cm) -> (P,Cm), f32 acc -----
    y1 = jnp.dot(xg, w1_ref[...], preferred_element_type=jnp.float32)

    # ---- batchnorm2d47 (training-mode batch stats, centered variance) -------
    m1 = jnp.sum(y1, axis=0, keepdims=True) * inv_p        # (1, Cm)
    d1 = y1 - m1
    v1 = jnp.sum(d1 * d1, axis=0, keepdims=True) * inv_p
    y1n = (d1 * (jax.lax.rsqrt(v1 + EPS) * g1_ref[...])
           + b1_ref[...]).astype(jnp.bfloat16)             # (P, Cm) bf16

    # ---- conv2d80 (1x1, no bias): (P,Cm) @ (Cm,Co) -> (P,Co) ----------------
    w2_copy.wait()
    y2 = jnp.dot(y1n, w2_vmem[...], preferred_element_type=jnp.float32)

    # ---- batchnorm2d48 -------------------------------------------------------
    m2 = jnp.sum(y2, axis=0, keepdims=True) * inv_p        # (1, Co)
    d2 = y2 - m2
    v2 = jnp.sum(d2 * d2, axis=0, keepdims=True) * inv_p
    y2n = d2 * (jax.lax.rsqrt(v2 + EPS) * g2_ref[...]) + b2_ref[...]

    # ---- back to channel-major (Co, P) so the NCHW wrapper reshape is free --
    o_ref[...] = y2n.T


def pack_params(w1, g1, b1, w2, g2, b2):
    """One-time parameter packing -- call OUTSIDE the hot path.

    w1: (Cm, Cin, 1, 1), w2: (Co, Cm, 1, 1)  (PyTorch Conv2d layout).
    Weights go to bf16 in channels-on-lanes layout: w1 -> (Cin, Cm),
    w2 -> (Cm, Co).  BN affine params become f32 row vectors (1, C) for
    lane-dense broadcast inside the kernel.
    """
    Cm, Cin = w1.shape[0], w1.shape[1]
    Co = w2.shape[0]
    return (jnp.transpose(w1.reshape(Cm, Cin)).astype(jnp.bfloat16),   # (Cin, Cm)
            g1.reshape(1, Cm).astype(jnp.float32),
            b1.reshape(1, Cm).astype(jnp.float32),
            jnp.transpose(w2.reshape(Co, Cm)).astype(jnp.bfloat16),    # (Cm, Co)
            g2.reshape(1, Co).astype(jnp.float32),
            b2.reshape(1, Co).astype(jnp.float32))


@jax.jit
def se_conv_bn_conv_bn(x_gate, x_act, w1p, g1p, b1p, w2p, g2p, b2p):
    """x_gate: (1, Cin, 1, 1), x_act: (1, Cin, H, W) NCHW; params pre-packed."""
    N, Cin, H, W = x_act.shape
    if N != 1:
        # TODO(synk): channel-major free-reshape path assumes N == 1 (as in the
        # reference module); N > 1 would need a per-sample batched contraction.
        raise NotImplementedError("kernel assumes batch size 1")
    Cm = w1p.shape[1]
    Co = w2p.shape[1]
    P = H * W

    x_cp = x_act.reshape(Cin, P)          # free reshape of NCHW (N == 1)
    gate = x_gate.reshape(1, Cin)         # free reshape

    full = lambda shape: pl.BlockSpec(shape, lambda: (0,) * len(shape))

    bytes_accessed = (4 * Cin            # gate f32
                      + 4 * Cin * P      # activations f32
                      + 2 * Cin * Cm     # w1 bf16
                      + 8 * Cm           # gamma1/beta1 f32
                      + 2 * Cm * Co      # w2 bf16
                      + 8 * Co           # gamma2/beta2 f32
                      + 4 * Co * P)      # output f32

    out = pl.pallas_call(
        _se_conv_bn_kernel,
        out_shape=jax.ShapeDtypeStruct((Co, P), jnp.float32),
        in_specs=[
            full((1, Cin)),                       # gate
            full((Cin, P)),                       # activations (channel-major)
            full((Cin, Cm)),                      # w1 (bf16, channels-on-lanes)
            full((1, Cm)),                        # gamma1
            full((1, Cm)),                        # beta1
            pl.BlockSpec(memory_space=pl.ANY),    # w2 (bf16) -- manual prefetch
            full((1, Co)),                        # gamma2
            full((1, Co)),                        # beta2
        ],
        out_specs=full((Co, P)),
        scratch_shapes=[
            pltpu.VMEM((Cm, Co), jnp.bfloat16),   # w2 landing buffer
            pltpu.SemaphoreType.DMA,              # w2 DMA completion
        ],
        compiler_params=pltpu.CompilerParams(vmem_limit_bytes=32 << 20),
        cost_estimate=pl.CostEstimate(
            flops=2 * P * (Cin * Cm + Cm * Co),
            transcendentals=Cin,
            bytes_accessed=bytes_accessed),
    )(gate, x_cp, w1p, g1p, b1p, w2p, g2p, b2p)

    # (Co, P) -> (1, Co, H, W): free reshape, output already channel-major.
    return out.reshape(N, Co, H, W)


def _reference(x_gate, x_act, w1, g1, b1, w2, g2, b2):
    """Pure-JAX f32 reference with identical math (training-mode BN)."""
    N, Cin, H, W = x_act.shape
    Cm, Co = w1.shape[0], w2.shape[0]
    P = N * H * W
    x = jnp.transpose(x_act, (0, 2, 3, 1)).reshape(P, Cin)
    x = x * jax.nn.sigmoid(x_gate.reshape(N, Cin))
    y1 = x @ w1.reshape(Cm, Cin).T
    m1, v1 = jnp.mean(y1, 0, keepdims=True), jnp.var(y1, 0, keepdims=True)
    y1 = (y1 - m1) / jnp.sqrt(v1 + EPS) * g1 + b1
    y2 = y1 @ w2.reshape(Co, Cm).T
    m2, v2 = jnp.mean(y2, 0, keepdims=True), jnp.var(y2, 0, keepdims=True)
    y2 = (y2 - m2) / jnp.sqrt(v2 + EPS) * g2 + b2
    return jnp.transpose(y2.reshape(N, H, W, Co), (0, 3, 1, 2))


if __name__ == "__main__":
    key = jax.random.PRNGKey(0)
    k = jax.random.split(key, 8)

    N, Cin, Cm, Co, H, W = 1, 1152, 320, 1280, 7, 7

    # forward inputs (match the PyTorch module's tensor shapes)
    x234 = jax.random.normal(k[0], (N, Cin, H, W), dtype=jnp.float32)   # activations
    x238 = jax.random.normal(k[1], (N, Cin, 1, 1), dtype=jnp.float32)   # SE gate

    # deterministic parameter init (conv weights, BN gamma/beta)
    w1 = jax.random.normal(k[2], (Cm, Cin, 1, 1), dtype=jnp.float32) * 0.02
    w2 = jax.random.normal(k[3], (Co, Cm, 1, 1), dtype=jnp.float32) * 0.02
    g1 = 1.0 + 0.1 * jax.random.normal(k[4], (Cm,), dtype=jnp.float32)
    b1 = 0.1 * jax.random.normal(k[5], (Cm,), dtype=jnp.float32)
    g2 = 1.0 + 0.1 * jax.random.normal(k[6], (Co,), dtype=jnp.float32)
    b2 = 0.1 * jax.random.normal(k[7], (Co,), dtype=jnp.float32)

    # one-time pre-pack (outside the hot path)
    packed = pack_params(w1, g1, b1, w2, g2, b2)

    out = se_conv_bn_conv_bn(x238, x234, *packed)
    out = jax.block_until_ready(out)

    ref = jax.block_until_ready(_reference(x238, x234, w1, g1, b1, w2, g2, b2))
    assert out.shape == (N, Co, H, W), out.shape
    assert jnp.allclose(out, ref, atol=5e-2, rtol=5e-2), float(
        jnp.max(jnp.abs(out - ref)))

    print("KERNEL_OK")
</pallas_src>

<mosaic_0001>
module attributes {stable_mosaic.version = 11 : i64} {
  func.func @_se_conv_bn_kernel(%arg0: memref<1x1152xf32, #tpu.memory_space<vmem>>, %arg1: memref<1152x49xf32, #tpu.memory_space<vmem>>, %arg2: memref<1152x320xbf16, #tpu.memory_space<vmem>>, %arg3: memref<1x320xf32, #tpu.memory_space<vmem>>, %arg4: memref<1x320xf32, #tpu.memory_space<vmem>>, %arg5: memref<320x1280xbf16, #tpu.memory_space<any>>, %arg6: memref<1x1280xf32, #tpu.memory_space<vmem>>, %arg7: memref<1x1280xf32, #tpu.memory_space<vmem>>, %arg8: memref<1280x49xf32, #tpu.memory_space<vmem>>, %arg9: memref<320x1280xbf16, #tpu.memory_space<vmem>>, %arg10: memref<!tpu.dma_semaphore, #tpu.memory_space<semaphore_mem>>) attributes {dimension_semantics = [], scalar_prefetch = 0 : i64, scratch_operands = 2 : i64, tpu.core_type = #tpu.core_type<tc>} {
    tpu.enqueue_dma source(%arg5 : memref<320x1280xbf16, #tpu.memory_space<any>>) target(%arg9 : memref<320x1280xbf16, #tpu.memory_space<vmem>>) target_semaphore(%arg10 : memref<!tpu.dma_semaphore, #tpu.memory_space<semaphore_mem>>)
    %c0 = arith.constant 0 : index
    %c0_0 = arith.constant 0 : index
    %0 = vector.load %arg0[%c0, %c0_0] : memref<1x1152xf32, #tpu.memory_space<vmem>>, vector<1x1152xf32>
    %cst = arith.constant 0.000000e+00 : f32
    %1 = vector.broadcast %cst : f32 to vector<1x1152xf32>
    %2 = arith.subf %1, %0 : vector<1x1152xf32>
    %3 = math.exp %2 : vector<1x1152xf32>
    %cst_1 = arith.constant 1.000000e+00 : f32
    %4 = vector.broadcast %cst_1 : f32 to vector<1x1152xf32>
    %5 = arith.addf %4, %3 : vector<1x1152xf32>
    %6 = tpu.reciprocal %5 {approx = true} : vector<1x1152xf32> -> vector<1x1152xf32>
    %c0_2 = arith.constant 0 : index
    %c0_3 = arith.constant 0 : index
    %7 = vector.load %arg1[%c0_2, %c0_3] : memref<1152x49xf32, #tpu.memory_space<vmem>>, vector<1152x49xf32>
    %8 = tpu.transpose %7, [1, 0] : vector<1152x49xf32> -> vector<49x1152xf32>
    %9 = vector.broadcast %6 : vector<1x1152xf32> to vector<49x1152xf32>
    %10 = arith.mulf %8, %9 : vector<49x1152xf32>
    %11 = arith.truncf %10 : vector<49x1152xf32> to vector<49x1152xbf16>
    %c0_4 = arith.constant 0 : index
    %c0_5 = arith.constant 0 : index
    %12 = vector.load %arg2[%c0_4, %c0_5] : memref<1152x320xbf16, #tpu.memory_space<vmem>>, vector<1152x320xbf16>
    %cst_6 = arith.constant dense<0.000000e+00> : vector<49x320xf32>
    %13 = tpu.matmul %11, %12, %cst_6 {dimension_numbers = #tpu.dot_dimension_numbers<[1], [0], [0], [1], [0, 0, 1, 1], [], []>} : vector<49x1152xbf16>, vector<1152x320xbf16>, vector<49x320xf32> -> vector<49x320xf32>
    %cst_7 = arith.constant dense<0.000000e+00> : vector<320xf32>
    %14 = vector.multi_reduction <add>, %13, %cst_7 [0] : vector<49x320xf32> to vector<320xf32>
    %15 = vector.shape_cast %14 : vector<320xf32> to vector<1x320xf32>
    %cst_8 = arith.constant 0.0204081628 : f32
    %16 = vector.broadcast %cst_8 : f32 to vector<1x320xf32>
    %17 = arith.mulf %15, %16 : vector<1x320xf32>
    %18 = vector.broadcast %17 : vector<1x320xf32> to vector<49x320xf32>
    %19 = arith.subf %13, %18 : vector<49x320xf32>
    %20 = arith.mulf %19, %19 : vector<49x320xf32>
    %cst_9 = arith.constant dense<0.000000e+00> : vector<320xf32>
    %21 = vector.multi_reduction <add>, %20, %cst_9 [0] : vector<49x320xf32> to vector<320xf32>
    %22 = vector.shape_cast %21 : vector<320xf32> to vector<1x320xf32>
    %cst_10 = arith.constant 0.0204081628 : f32
    %23 = vector.broadcast %cst_10 : f32 to vector<1x320xf32>
    %24 = arith.mulf %22, %23 : vector<1x320xf32>
    %cst_11 = arith.constant 9.99999974E-6 : f32
    %25 = vector.broadcast %cst_11 : f32 to vector<1x320xf32>
    %26 = arith.addf %24, %25 : vector<1x320xf32>
    %27 = math.rsqrt %26 : vector<1x320xf32>
    %c0_12 = arith.constant 0 : index
    %c0_13 = arith.constant 0 : index
    %28 = vector.load %arg3[%c0_12, %c0_13] : memref<1x320xf32, #tpu.memory_space<vmem>>, vector<1x320xf32>
    %29 = arith.mulf %27, %28 : vector<1x320xf32>
    %30 = vector.broadcast %29 : vector<1x320xf32> to vector<49x320xf32>
    %31 = arith.mulf %19, %30 : vector<49x320xf32>
    %c0_14 = arith.constant 0 : index
    %c0_15 = arith.constant 0 : index
    %32 = vector.load %arg4[%c0_14, %c0_15] : memref<1x320xf32, #tpu.memory_space<vmem>>, vector<1x320xf32>
    %33 = vector.broadcast %32 : vector<1x320xf32> to vector<49x320xf32>
    %34 = arith.addf %31, %33 : vector<49x320xf32>
    %35 = arith.truncf %34 : vector<49x320xf32> to vector<49x320xbf16>
    tpu.wait_dma2 semaphore(%arg10 : memref<!tpu.dma_semaphore, #tpu.memory_space<semaphore_mem>>) src(%arg5 : memref<320x1280xbf16, #tpu.memory_space<any>>) dst(%arg9 : memref<320x1280xbf16, #tpu.memory_space<vmem>>)
    %c0_16 = arith.constant 0 : index
    %c0_17 = arith.constant 0 : index
    %36 = vector.load %arg9[%c0_16, %c0_17] : memref<320x1280xbf16, #tpu.memory_space<vmem>>, vector<320x1280xbf16>
    %cst_18 = arith.constant dense<0.000000e+00> : vector<49x1280xf32>
    %37 = tpu.matmul %35, %36, %cst_18 {dimension_numbers = #tpu.dot_dimension_numbers<[1], [0], [0], [1], [0, 0, 1, 1], [], []>} : vector<49x320xbf16>, vector<320x1280xbf16>, vector<49x1280xf32> -> vector<49x1280xf32>
    %cst_19 = arith.constant dense<0.000000e+00> : vector<1280xf32>
    %38 = vector.multi_reduction <add>, %37, %cst_19 [0] : vector<49x1280xf32> to vector<1280xf32>
    %39 = vector.shape_cast %38 : vector<1280xf32> to vector<1x1280xf32>
    %cst_20 = arith.constant 0.0204081628 : f32
    %40 = vector.broadcast %cst_20 : f32 to vector<1x1280xf32>
    %41 = arith.mulf %39, %40 : vector<1x1280xf32>
    %42 = vector.broadcast %41 : vector<1x1280xf32> to vector<49x1280xf32>
    %43 = arith.subf %37, %42 : vector<49x1280xf32>
    %44 = arith.mulf %43, %43 : vector<49x1280xf32>
    %cst_21 = arith.constant dense<0.000000e+00> : vector<1280xf32>
    %45 = vector.multi_reduction <add>, %44, %cst_21 [0] : vector<49x1280xf32> to vector<1280xf32>
    %46 = vector.shape_cast %45 : vector<1280xf32> to vector<1x1280xf32>
    %cst_22 = arith.constant 0.0204081628 : f32
    %47 = vector.broadcast %cst_22 : f32 to vector<1x1280xf32>
    %48 = arith.mulf %46, %47 : vector<1x1280xf32>
    %cst_23 = arith.constant 9.99999974E-6 : f32
    %49 = vector.broadcast %cst_23 : f32 to vector<1x1280xf32>
    %50 = arith.addf %48, %49 : vector<1x1280xf32>
    %51 = math.rsqrt %50 : vector<1x1280xf32>
    %c0_24 = arith.constant 0 : index
    %c0_25 = arith.constant 0 : index
    %52 = vector.load %arg6[%c0_24, %c0_25] : memref<1x1280xf32, #tpu.memory_space<vmem>>, vector<1x1280xf32>
    %53 = arith.mulf %51, %52 : vector<1x1280xf32>
    %54 = vector.broadcast %53 : vector<1x1280xf32> to vector<49x1280xf32>
    %55 = arith.mulf %43, %54 : vector<49x1280xf32>
    %c0_26 = arith.constant 0 : index
    %c0_27 = arith.constant 0 : index
    %56 = vector.load %arg7[%c0_26, %c0_27] : memref<1x1280xf32, #tpu.memory_space<vmem>>, vector<1x1280xf32>
    %57 = vector.broadcast %56 : vector<1x1280xf32> to vector<49x1280xf32>
    %58 = arith.addf %55, %57 : vector<49x1280xf32>
    %59 = tpu.transpose %58, [1, 0] : vector<49x1280xf32> -> vector<1280x49xf32>
    %c0_28 = arith.constant 0 : index
    %c0_29 = arith.constant 0 : index
    %60 = vector.load %arg8[%c0_28, %c0_29] : memref<1280x49xf32, #tpu.memory_space<vmem>>, vector<1280x49xf32>
    tpu.vector_store %arg8[%c0_28, %c0_29], %59 {strides = array<i32>} : memref<1280x49xf32, #tpu.memory_space<vmem>>, vector<1280x49xf32>,
    return
  }
}

</mosaic_0001>

<bundles_post_ra>
// kernel: se_conv_bn_conv_bn.1
= control target key start
LH: loop header
LB: loop body
LE: loop exit
PB: predicated region body
PF: predicated region fallthrough
CT: control target
= control target key end

     0   :  { %s12014_s0 = inlined_call_operand.vmem [shape: f32[1,1152], index: 0, kind: input, shape index: {}]   ;;  %s12015_s1 = inlined_call_operand.vmem [shape: f32[1152,49], index: 1, kind: input, shape index: {}]   ;;  %s12016_s2 = inlined_call_operand.vmem [shape: bf16[1152,320], index: 2, kind: input, shape index: {}]   ;;  %s12017_s3 = inlined_call_operand.vmem [shape: f32[1,320], index: 3, kind: input, shape index: {}]   ;;  %s12018_s4 = inlined_call_operand.vmem [shape: f32[1,320], index: 4, kind: input, shape index: {}]   ;;  %s12019_s5 = inlined_call_operand.vmem [shape: bf16[320,1280], index: 5, kind: input, shape index: {}]   ;;  %s12020_s6 = inlined_call_operand.vmem [shape: f32[1,1280], index: 6, kind: input, shape index: {}]   ;;  %s12021_s7 = inlined_call_operand.vmem [shape: f32[1,1280], index: 7, kind: input, shape index: {}]   ;;  %s12022_s8 = inlined_call_operand.vmem [shape: f32[1280,49], index: 8, kind: output, shape index: {}]  }
   0x1   :  { %v45_v0 = vld [vmem:[%s12019_s5] sm:$0xf]  ;;  %v47_v1 = vld [vmem:[%s12019_s5 + $0x28] sm:$0xf]  ;;  %v49_v2 = vld [vmem:[%s12019_s5 + $0x4] sm:$0xf] }
   0x2   :  { %46 = vst [vmem:[#allocation2] sm:$0xf] %v45_v0  ;;  %48 = vst [vmem:[#allocation2 + $0x4] sm:$0xf] %v47_v1  ;;  %v51_v3 = vld [vmem:[%s12019_s5 + $0x2c] sm:$0xf] }
   0x3   :  { %50 = vst [vmem:[#allocation2 + $0x8] sm:$0xf] %v49_v2  ;;  %v53_v4 = vld [vmem:[%s12019_s5 + $0x8] sm:$0xf]  ;;  %v55_v5 = vld [vmem:[%s12019_s5 + $0x30] sm:$0xf] }
   0x4   :  { %52 = vst [vmem:[#allocation2 + $0xc] sm:$0xf] %v51_v3  ;;  %54 = vst [vmem:[#allocation2 + $0x10] sm:$0xf] %v53_v4  ;;  %v57_v6 = vld [vmem:[%s12019_s5 + $0xc] sm:$0xf] }
   0x5   :  { %56 = vst [vmem:[#allocation2 + $0x14] sm:$0xf] %v55_v5  ;;  %v59_v7 = vld [vmem:[%s12019_s5 + $0x34] sm:$0xf]  ;;  %v61_v8 = vld [vmem:[%s12019_s5 + $0x10] sm:$0xf] }
   0x6   :  { %58 = vst [vmem:[#allocation2 + $0x18] sm:$0xf] %v57_v6  ;;  %60 = vst [vmem:[#allocation2 + $0x1c] sm:$0xf] %v59_v7  ;;  %v63_v9 = vld [vmem:[%s12019_s5 + $0x38] sm:$0xf] }
   0x7   :  { %62 = vst [vmem:[#allocation2 + $0x20] sm:$0xf] %v61_v8  ;;  %v65_v10 = vld [vmem:[%s12019_s5 + $0x14] sm:$0xf]  ;;  %v67_v11 = vld [vmem:[%s12019_s5 + $0x3c] sm:$0xf] }
   0x8   :  { %64 = vst [vmem:[#allocation2 + $0x24] sm:$0xf] %v63_v9  ;;  %66 = vst [vmem:[#allocation2 + $0x28] sm:$0xf] %v65_v10  ;;  %v69_v12 = vld [vmem:[%s12019_s5 + $0x18] sm:$0xf] }
   0x9   :  { %68 = vst [vmem:[#allocation2 + $0x2c] sm:$0xf] %v67_v11  ;;  %v71_v13 = vld [vmem:[%s12019_s5 + $0x40] sm:$0xf]  ;;  %v73_v14 = vld [vmem:[%s12019_s5 + $0x1c] sm:$0xf] }
   0xa   :  { %70 = vst [vmem:[#allocation2 + $0x30] sm:$0xf] %v69_v12  ;;  %72 = vst [vmem:[#allocation2 + $0x34] sm:$0xf] %v71_v13  ;;  %v75_v15 = vld [vmem:[%s12019_s5 + $0x44] sm:$0xf] }
   0xb   :  { %74 = vst [vmem:[#allocation2 + $0x38] sm:$0xf] %v73_v14  ;;  %v77_v16 = vld [vmem:[%s12019_s5 + $0x20] sm:$0xf]  ;;  %v79_v17 = vld [vmem:[%s12019_s5 + $0x48] sm:$0xf] }
   0xc   :  { %76 = vst [vmem:[#allocation2 + $0x3c] sm:$0xf] %v75_v15  ;;  %78 = vst [vmem:[#allocation2 + $0x40] sm:$0xf] %v77_v16  ;;  %v81_v18 = vld [vmem:[%s12019_s5 + $0x24] sm:$0xf] }
   0xd   :  { %80 = vst [vmem:[#allocation2 + $0x44] sm:$0xf] %v79_v17  ;;  %v83_v19 = vld [vmem:[%s12019_s5 + $0x4c] sm:$0xff]   ;;  %v87_v20 = vld [vmem:[%s12019_s5 + $0x78] sm:$0xf]  ;;  %v123_v38 = vld [vmem:[%s12019_s5 + $0x9c] sm:$0xff]  }
   0xe   :  { %82 = vst [vmem:[#allocation2 + $0x48] sm:$0xf] %v81_v18  ;;  %84 = vst [vmem:[#allocation2 + $0x4c] sm:$0xff] %v83_v19   ;;  %v89_v21 = vld [vmem:[%s12019_s5 + $0x54] sm:$0xf]  ;;  %v163_v57 = vld [vmem:[%s12019_s5 + $0xec] sm:$0xff]  }
   0xf   :  { %88 = vst [vmem:[#allocation2 + $0x54] sm:$0xf] %v87_v20  ;;  %v91_v22 = vld [vmem:[%s12019_s5 + $0x7c] sm:$0xf]  ;;  %v93_v23 = vld [vmem:[%s12019_s5 + $0x58] sm:$0xf] }
  0x10   :  { %90 = vst [vmem:[#allocation2 + $0x58] sm:$0xf] %v89_v21  ;;  %92 = vst [vmem:[#allocation2 + $0x5c] sm:$0xf] %v91_v22  ;;  %v95_v24 = vld [vmem:[%s12019_s5 + $0x80] sm:$0xf] }
  0x11   :  { %94 = vst [vmem:[#allocation2 + $0x60] sm:$0xf] %v93_v23  ;;  %v97_v25 = vld [vmem:[%s12019_s5 + $0x5c] sm:$0xf]  ;;  %v99_v26 = vld [vmem:[%s12019_s5 + $0x84] sm:$0xf] }
  0x12   :  { %96 = vst [vmem:[#allocation2 + $0x64] sm:$0xf] %v95_v24  ;;  %98 = vst [vmem:[#allocation2 + $0x68] sm:$0xf] %v97_v25  ;;  %v101_v27 = vld [vmem:[%s12019_s5 + $0x60] sm:$0xf] }
  0x13   :  { %100 = vst [vmem:[#allocation2 + $0x6c] sm:$0xf] %v99_v26  ;;  %v103_v28 = vld [vmem:[%s12019_s5 + $0x88] sm:$0xf]  ;;  %v105_v29 = vld [vmem:[%s12019_s5 + $0x64] sm:$0xf] }
  0x14   :  { %102 = vst [vmem:[#allocation2 + $0x70] sm:$0xf] %v101_v27  ;;  %104 = vst [vmem:[#allocation2 + $0x74] sm:$0xf] %v103_v28  ;;  %v107_v30 = vld [vmem:[%s12019_s5 + $0x8c] sm:$0xf] }
  0x15   :  { %106 = vst [vmem:[#allocation2 + $0x78] sm:$0xf] %v105_v29  ;;  %v109_v31 = vld [vmem:[%s12019_s5 + $0x68] sm:$0xf]  ;;  %v111_v32 = vld [vmem:[%s12019_s5 + $0x90] sm:$0xf] }
  0x16   :  { %108 = vst [vmem:[#allocation2 + $0x7c] sm:$0xf] %v107_v30  ;;  %110 = vst [vmem:[#allocation2 + $0x80] sm:$0xf] %v109_v31  ;;  %v113_v33 = vld [vmem:[%s12019_s5 + $0x6c] sm:$0xf] }
  0x17   :  { %112 = vst [vmem:[#allocation2 + $0x84] sm:$0xf] %v111_v32  ;;  %v115_v34 = vld [vmem:[%s12019_s5 + $0x94] sm:$0xf]  ;;  %v117_v35 = vld [vmem:[%s12019_s5 + $0x70] sm:$0xf] }
  0x18   :  { %114 = vst [vmem:[#allocation2 + $0x88] sm:$0xf] %v113_v33  ;;  %116 = vst [vmem:[#allocation2 + $0x8c] sm:$0xf] %v115_v34  ;;  %v119_v36 = vld [vmem:[%s12019_s5 + $0x98] sm:$0xf] }
  0x19   :  { %118 = vst [vmem:[#allocation2 + $0x90] sm:$0xf] %v117_v35  ;;  %v121_v37 = vld [vmem:[%s12019_s5 + $0x74] sm:$0xf]  ;;  %120 = vst [vmem:[#allocation2 + $0x94] sm:$0xf] %v119_v36 }
  0x1a   :  { %122 = vst [vmem:[#allocation2 + $0x98] sm:$0xf] %v121_v37  ;;  %124 = vst [vmem:[#allocation2 + $0x9c] sm:$0xff] %v123_v38   ;;  %v127_v39 = vld [vmem:[%s12019_s5 + $0xc8] sm:$0xf]  ;;  %v203_v12 = vld [vmem:[%s12019_s5 + $0x13c] sm:$0xff]  }
  0x1b   :  { %v129_v40 = vld [vmem:[%s12019_s5 + $0xa4] sm:$0xf]  ;;  %v131_v41 = vld [vmem:[%s12019_s5 + $0xcc] sm:$0xf]  ;;  %128 = vst [vmem:[#allocation2 + $0xa4] sm:$0xf] %v127_v39 }
  0x1c   :  { %130 = vst [vmem:[#allocation2 + $0xa8] sm:$0xf] %v129_v40  ;;  %132 = vst [vmem:[#allocation2 + $0xac] sm:$0xf] %v131_v41  ;;  %v133_v42 = vld [vmem:[%s12019_s5 + $0xa8] sm:$0xf] }
  0x1d   :  { %v135_v43 = vld [vmem:[%s12019_s5 + $0xd0] sm:$0xf]  ;;  %v137_v44 = vld [vmem:[%s12019_s5 + $0xac] sm:$0xf]  ;;  %134 = vst [vmem:[#allocation2 + $0xb0] sm:$0xf] %v133_v42 }
  0x1e   :  { %136 = vst [vmem:[#allocation2 + $0xb4] sm:$0xf] %v135_v43  ;;  %138 = vst [vmem:[#allocation2 + $0xb8] sm:$0xf] %v137_v44  ;;  %v139_v45 = vld [vmem:[%s12019_s5 + $0xd4] sm:$0xf] }
  0x1f   :  { %v141_v46 = vld [vmem:[%s12019_s5 + $0xb0] sm:$0xf]  ;;  %v143_v47 = vld [vmem:[%s12019_s5 + $0xd8] sm:$0xf]  ;;  %140 = vst [vmem:[#allocation2 + $0xbc] sm:$0xf] %v139_v45 }
  0x20   :  { %142 = vst [vmem:[#allocation2 + $0xc0] sm:$0xf] %v141_v46  ;;  %144 = vst [vmem:[#allocation2 + $0xc4] sm:$0xf] %v143_v47  ;;  %v145_v48 = vld [vmem:[%s12019_s5 + $0xb4] sm:$0xf] }
  0x21   :  { %v147_v49 = vld [vmem:[%s12019_s5 + $0xdc] sm:$0xf]  ;;  %v149_v50 = vld [vmem:[%s12019_s5 + $0xb8] sm:$0xf]  ;;  %146 = vst [vmem:[#allocation2 + $0xc8] sm:$0xf] %v145_v48 }
  0x22   :  { %148 = vst [vmem:[#allocation2 + $0xcc] sm:$0xf] %v147_v49  ;;  %150 = vst [vmem:[#allocation2 + $0xd0] sm:$0xf] %v149_v50  ;;  %v151_v51 = vld [vmem:[%s12019_s5 + $0xe0] sm:$0xf] }
  0x23   :  { %v153_v52 = vld [vmem:[%s12019_s5 + $0xbc] sm:$0xf]  ;;  %v155_v53 = vld [vmem:[%s12019_s5 + $0xe4] sm:$0xf]  ;;  %152 = vst [vmem:[#allocation2 + $0xd4] sm:$0xf] %v151_v51 }
  0x24   :  { %154 = vst [vmem:[#allocation2 + $0xd8] sm:$0xf] %v153_v52  ;;  %156 = vst [vmem:[#allocation2 + $0xdc] sm:$0xf] %v155_v53  ;;  %v157_v54 = vld [vmem:[%s12019_s5 + $0xc0] sm:$0xf] }
  0x25   :  { %v159_v55 = vld [vmem:[%s12019_s5 + $0xe8] sm:$0xf]  ;;  %v161_v56 = vld [vmem:[%s12019_s5 + $0xc4] sm:$0xf]  ;;  %158 = vst [vmem:[#allocation2 + $0xe0] sm:$0xf] %v157_v54 }
  0x26   :  { %160 = vst [vmem:[#allocation2 + $0xe4] sm:$0xf] %v159_v55  ;;  %162 = vst [vmem:[#allocation2 + $0xe8] sm:$0xf] %v161_v56  ;;  %v167_v58 = vld [vmem:[%s12019_s5 + $0x118] sm:$0xf] }
  0x27   :  { %v169_v59 = vld [vmem:[%s12019_s5 + $0xf4] sm:$0xf]  ;;  %164 = vst [vmem:[#allocation2 + $0xec] sm:$0xff] %v163_v57   ;;  %168 = vst [vmem:[#allocation2 + $0xf4] sm:$0xf] %v167_v58  ;;  %v243_v31 = vld [vmem:[%s12019_s5 + $0x18c] sm:$0xff]  }
  0x28   :  { %170 = vst [vmem:[#allocation2 + $0xf8] sm:$0xf] %v169_v59  ;;  %v171_v60 = vld [vmem:[%s12019_s5 + $0x11c] sm:$0xf]  ;;  %v173_v61 = vld [vmem:[%s12019_s5 + $0xf8] sm:$0xf] }
  0x29   :  { %v175_v62 = vld [vmem:[%s12019_s5 + $0x120] sm:$0xf]  ;;  %172 = vst [vmem:[#allocation2 + $0xfc] sm:$0xf] %v171_v60  ;;  %174 = vst [vmem:[#allocation2 + $0x100] sm:$0xf] %v173_v61 }
  0x2a   :  { %176 = vst [vmem:[#allocation2 + $0x104] sm:$0xf] %v175_v62  ;;  %v177_v63 = vld [vmem:[%s12019_s5 + $0xfc] sm:$0xf]  ;;  %v179_v0 = vld [vmem:[%s12019_s5 + $0x124] sm:$0xf] }
  0x2b   :  { %v181_v1 = vld [vmem:[%s12019_s5 + $0x100] sm:$0xf]  ;;  %178 = vst [vmem:[#allocation2 + $0x108] sm:$0xf] %v177_v63  ;;  %180 = vst [vmem:[#allocation2 + $0x10c] sm:$0xf] %v179_v0 }
  0x2c   :  { %182 = vst [vmem:[#allocation2 + $0x110] sm:$0xf] %v181_v1  ;;  %v183_v2 = vld [vmem:[%s12019_s5 + $0x128] sm:$0xf]  ;;  %v185_v3 = vld [vmem:[%s12019_s5 + $0x104] sm:$0xf] }
  0x2d   :  { %v187_v4 = vld [vmem:[%s12019_s5 + $0x12c] sm:$0xf]  ;;  %184 = vst [vmem:[#allocation2 + $0x114] sm:$0xf] %v183_v2  ;;  %186 = vst [vmem:[#allocation2 + $0x118] sm:$0xf] %v185_v3 }
  0x2e   :  { %188 = vst [vmem:[#allocation2 + $0x11c] sm:$0xf] %v187_v4  ;;  %v189_v5 = vld [vmem:[%s12019_s5 + $0x108] sm:$0xf]  ;;  %v191_v6 = vld [vmem:[%s12019_s5 + $0x130] sm:$0xf] }
  0x2f   :  { %v193_v7 = vld [vmem:[%s12019_s5 + $0x10c] sm:$0xf]  ;;  %190 = vst [vmem:[#allocation2 + $0x120] sm:$0xf] %v189_v5  ;;  %192 = vst [vmem:[#allocation2 + $0x124] sm:$0xf] %v191_v6 }
  0x30   :  { %194 = vst [vmem:[#allocation2 + $0x128] sm:$0xf] %v193_v7  ;;  %v195_v8 = vld [vmem:[%s12019_s5 + $0x134] sm:$0xf]  ;;  %v197_v9 = vld [vmem:[%s12019_s5 + $0x110] sm:$0xf] }
  0x31   :  { %v199_v10 = vld [vmem:[%s12019_s5 + $0x138] sm:$0xf]  ;;  %196 = vst [vmem:[#allocation2 + $0x12c] sm:$0xf] %v195_v8  ;;  %198 = vst [vmem:[#allocation2 + $0x130] sm:$0xf] %v197_v9 }
  0x32   :  { %200 = vst [vmem:[#allocation2 + $0x134] sm:$0xf] %v199_v10  ;;  %v201_v11 = vld [vmem:[%s12019_s5 + $0x114] sm:$0xf]  ;;  %v207_v13 = vld [vmem:[%s12019_s5 + $0x168] sm:$0xf] }
  0x33   :  { %202 = vst [vmem:[#allocation2 + $0x138] sm:$0xf] %v201_v11  ;;  %204 = vst [vmem:[#allocation2 + $0x13c] sm:$0xff] %v203_v12   ;;  %v209_v14 = vld [vmem:[%s12019_s5 + $0x144] sm:$0xf]  ;;  %v283_v50 = vld [vmem:[%s12019_s5 + $0x1dc] sm:$0xff]  }
  0x34   :  { %208 = vst [vmem:[#allocation2 + $0x144] sm:$0xf] %v207_v13  ;;  %v211_v15 = vld [vmem:[%s12019_s5 + $0x16c] sm:$0xf]  ;;  %v213_v16 = vld [vmem:[%s12019_s5 + $0x148] sm:$0xf] }
  0x35   :  { %210 = vst [vmem:[#allocation2 + $0x148] sm:$0xf] %v209_v14  ;;  %212 = vst [vmem:[#allocation2 + $0x14c] sm:$0xf] %v211_v15  ;;  %v215_v17 = vld [vmem:[%s12019_s5 + $0x170] sm:$0xf] }
  0x36   :  { %214 = vst [vmem:[#allocation2 + $0x150] sm:$0xf] %v213_v16  ;;  %v217_v18 = vld [vmem:[%s12019_s5 + $0x14c] sm:$0xf]  ;;  %v219_v19 = vld [vmem:[%s12019_s5 + $0x174] sm:$0xf] }
  0x37   :  { %216 = vst [vmem:[#allocation2 + $0x154] sm:$0xf] %v215_v17  ;;  %218 = vst [vmem:[#allocation2 + $0x158] sm:$0xf] %v217_v18  ;;  %v221_v20 = vld [vmem:[%s12019_s5 + $0x150] sm:$0xf] }
  0x38   :  { %220 = vst [vmem:[#allocation2 + $0x15c] sm:$0xf] %v219_v19  ;;  %v223_v21 = vld [vmem:[%s12019_s5 + $0x178] sm:$0xf]  ;;  %v225_v22 = vld [vmem:[%s12019_s5 + $0x154] sm:$0xf] }
  0x39   :  { %222 = vst [vmem:[#allocation2 + $0x160] sm:$0xf] %v221_v20  ;;  %224 = vst [vmem:[#allocation2 + $0x164] sm:$0xf] %v223_v21  ;;  %v227_v23 = vld [vmem:[%s12019_s5 + $0x17c] sm:$0xf] }
  0x3a   :  { %226 = vst [vmem:[#allocation2 + $0x168] sm:$0xf] %v225_v22  ;;  %v229_v24 = vld [vmem:[%s12019_s5 + $0x158] sm:$0xf]  ;;  %v231_v25 = vld [vmem:[%s12019_s5 + $0x180] sm:$0xf] }
  0x3b   :  { %228 = vst [vmem:[#allocation2 + $0x16c] sm:$0xf] %v227_v23  ;;  %230 = vst [vmem:[#allocation2 + $0x170] sm:$0xf] %v229_v24  ;;  %v233_v26 = vld [vmem:[%s12019_s5 + $0x15c] sm:$0xf] }
  0x3c   :  { %232 = vst [vmem:[#allocation2 + $0x174] sm:$0xf] %v231_v25  ;;  %v235_v27 = vld [vmem:[%s12019_s5 + $0x184] sm:$0xf]  ;;  %v237_v28 = vld [vmem:[%s12019_s5 + $0x160] sm:$0xf] }
  0x3d   :  { %234 = vst [vmem:[#allocation2 + $0x178] sm:$0xf] %v233_v26  ;;  %236 = vst [vmem:[#allocation2 + $0x17c] sm:$0xf] %v235_v27  ;;  %v239_v29 = vld [vmem:[%s12019_s5 + $0x188] sm:$0xf] }
  0x3e   :  { %238 = vst [vmem:[#allocation2 + $0x180] sm:$0xf] %v237_v28  ;;  %v241_v30 = vld [vmem:[%s12019_s5 + $0x164] sm:$0xf]  ;;  %240 = vst [vmem:[#allocation2 + $0x184] sm:$0xf] %v239_v29 }
  0x3f   :  { %242 = vst [vmem:[#allocation2 + $0x188] sm:$0xf] %v241_v30  ;;  %244 = vst [vmem:[#allocation2 + $0x18c] sm:$0xff] %v243_v31   ;;  %v247_v32 = vld [vmem:[%s12019_s5 + $0x1b8] sm:$0xf]  ;;  %v323_v5 = vld [vmem:[%s12019_s5 + $0x22c] sm:$0xff]  }
  0x40   :  { %v249_v33 = vld [vmem:[%s12019_s5 + $0x194] sm:$0xf]  ;;  %v251_v34 = vld [vmem:[%s12019_s5 + $0x1bc] sm:$0xf]  ;;  %248 = vst [vmem:[#allocation2 + $0x194] sm:$0xf] %v247_v32 }
  0x41   :  { %250 = vst [vmem:[#allocation2 + $0x198] sm:$0xf] %v249_v33  ;;  %252 = vst [vmem:[#allocation2 + $0x19c] sm:$0xf] %v251_v34  ;;  %v253_v35 = vld [vmem:[%s12019_s5 + $0x198] sm:$0xf] }
  0x42   :  { %v255_v36 = vld [vmem:[%s12019_s5 + $0x1c0] sm:$0xf]  ;;  %v257_v37 = vld [vmem:[%s12019_s5 + $0x19c] sm:$0xf]  ;;  %254 = vst [vmem:[#allocation2 + $0x1a0] sm:$0xf] %v253_v35 }
  0x43   :  { %256 = vst [vmem:[#allocation2 + $0x1a4] sm:$0xf] %v255_v36  ;;  %258 = vst [vmem:[#allocation2 + $0x1a8] sm:$0xf] %v257_v37  ;;  %v259_v38 = vld [vmem:[%s12019_s5 + $0x1c4] sm:$0xf] }
  0x44   :  { %v261_v39 = vld [vmem:[%s12019_s5 + $0x1a0] sm:$0xf]  ;;  %v263_v40 = vld [vmem:[%s12019_s5 + $0x1c8] sm:$0xf]  ;;  %260 = vst [vmem:[#allocation2 + $0x1ac] sm:$0xf] %v259_v38 }
  0x45   :  { %262 = vst [vmem:[#allocation2 + $0x1b0] sm:$0xf] %v261_v39  ;;  %264 = vst [vmem:[#allocation2 + $0x1b4] sm:$0xf] %v263_v40  ;;  %v265_v41 = vld [vmem:[%s12019_s5 + $0x1a4] sm:$0xf] }
  0x46   :  { %v267_v42 = vld [vmem:[%s12019_s5 + $0x1cc] sm:$0xf]  ;;  %v269_v43 = vld [vmem:[%s12019_s5 + $0x1a8] sm:$0xf]  ;;  %266 = vst [vmem:[#allocation2 + $0x1b8] sm:$0xf] %v265_v41 }
  0x47   :  { %268 = vst [vmem:[#allocation2 + $0x1bc] sm:$0xf] %v267_v42  ;;  %270 = vst [vmem:[#allocation2 + $0x1c0] sm:$0xf] %v269_v43  ;;  %v271_v44 = vld [vmem:[%s12019_s5 + $0x1d0] sm:$0xf] }
  0x48   :  { %v273_v45 = vld [vmem:[%s12019_s5 + $0x1ac] sm:$0xf]  ;;  %v275_v46 = vld [vmem:[%s12019_s5 + $0x1d4] sm:$0xf]  ;;  %272 = vst [vmem:[#allocation2 + $0x1c4] sm:$0xf] %v271_v44 }
  0x49   :  { %274 = vst [vmem:[#allocation2 + $0x1c8] sm:$0xf] %v273_v45  ;;  %276 = vst [vmem:[#allocation2 + $0x1cc] sm:$0xf] %v275_v46  ;;  %v277_v47 = vld [vmem:[%s12019_s5 + $0x1b0] sm:$0xf] }
  0x4a   :  { %v279_v48 = vld [vmem:[%s12019_s5 + $0x1d8] sm:$0xf]  ;;  %v281_v49 = vld [vmem:[%s12019_s5 + $0x1b4] sm:$0xf]  ;;  %278 = vst [vmem:[#allocation2 + $0x1d0] sm:$0xf] %v277_v47 }
  0x4b   :  { %280 = vst [vmem:[#allocation2 + $0x1d4] sm:$0xf] %v279_v48  ;;  %282 = vst [vmem:[#allocation2 + $0x1d8] sm:$0xf] %v281_v49  ;;  %v287_v51 = vld [vmem:[%s12019_s5 + $0x208] sm:$0xf] }
  0x4c   :  { %v289_v52 = vld [vmem:[%s12019_s5 + $0x1e4] sm:$0xf]  ;;  %284 = vst [vmem:[#allocation2 + $0x1dc] sm:$0xff] %v283_v50   ;;  %288 = vst [vmem:[#allocation2 + $0x1e4] sm:$0xf] %v287_v51  ;;  %v363_v24 = vld [vmem:[%s12019_s5 + $0x27c] sm:$0xff]  }
  0x4d   :  { %290 = vst [vmem:[#allocation2 + $0x1e8] sm:$0xf] %v289_v52  ;;  %v291_v53 = vld [vmem:[%s12019_s5 + $0x20c] sm:$0xf]  ;;  %v293_v54 = vld [vmem:[%s12019_s5 + $0x1e8] sm:$0xf] }
  0x4e   :  { %v295_v55 = vld [vmem:[%s12019_s5 + $0x210] sm:$0xf]  ;;  %292 = vst [vmem:[#allocation2 + $0x1ec] sm:$0xf] %v291_v53  ;;  %294 = vst [vmem:[#allocation2 + $0x1f0] sm:$0xf] %v293_v54 }
  0x4f   :  { %296 = vst [vmem:[#allocation2 + $0x1f4] sm:$0xf] %v295_v55  ;;  %v297_v56 = vld [vmem:[%s12019_s5 + $0x1ec] sm:$0xf]  ;;  %v299_v57 = vld [vmem:[%s12019_s5 + $0x214] sm:$0xf] }
  0x50   :  { %v301_v58 = vld [vmem:[%s12019_s5 + $0x1f0] sm:$0xf]  ;;  %298 = vst [vmem:[#allocation2 + $0x1f8] sm:$0xf] %v297_v56  ;;  %300 = vst [vmem:[#allocation2 + $0x1fc] sm:$0xf] %v299_v57 }
  0x51   :  { %302 = vst [vmem:[#allocation2 + $0x200] sm:$0xf] %v301_v58  ;;  %v303_v59 = vld [vmem:[%s12019_s5 + $0x218] sm:$0xf]  ;;  %v305_v60 = vld [vmem:[%s12019_s5 + $0x1f4] sm:$0xf] }
  0x52   :  { %v307_v61 = vld [vmem:[%s12019_s5 + $0x21c] sm:$0xf]  ;;  %304 = vst [vmem:[#allocation2 + $0x204] sm:$0xf] %v303_v59  ;;  %306 = vst [vmem:[#allocation2 + $0x208] sm:$0xf] %v305_v60 }
  0x53   :  { %308 = vst [vmem:[#allocation2 + $0x20c] sm:$0xf] %v307_v61  ;;  %v309_v62 = vld [vmem:[%s12019_s5 + $0x1f8] sm:$0xf]  ;;  %v311_v63 = vld [vmem:[%s12019_s5 + $0x220] sm:$0xf] }
  0x54   :  { %v313_v0 = vld [vmem:[%s12019_s5 + $0x1fc] sm:$0xf]  ;;  %310 = vst [vmem:[#allocation2 + $0x210] sm:$0xf] %v309_v62  ;;  %312 = vst [vmem:[#allocation2 + $0x214] sm:$0xf] %v311_v63 }
  0x55   :  { %314 = vst [vmem:[#allocation2 + $0x218] sm:$0xf] %v313_v0  ;;  %v315_v1 = vld [vmem:[%s12019_s5 + $0x224] sm:$0xf]  ;;  %v317_v2 = vld [vmem:[%s12019_s5 + $0x200] sm:$0xf] }
  0x56   :  { %v319_v3 = vld [vmem:[%s12019_s5 + $0x228] sm:$0xf]  ;;  %316 = vst [vmem:[#allocation2 + $0x21c] sm:$0xf] %v315_v1  ;;  %318 = vst [vmem:[#allocation2 + $0x220] sm:$0xf] %v317_v2 }
  0x57   :  { %320 = vst [vmem:[#allocation2 + $0x224] sm:$0xf] %v319_v3  ;;  %v321_v4 = vld [vmem:[%s12019_s5 + $0x204] sm:$0xf]  ;;  %v327_v6 = vld [vmem:[%s12019_s5 + $0x258] sm:$0xf] }
  0x58   :  { %322 = vst [vmem:[#allocation2 + $0x228] sm:$0xf] %v321_v4  ;;  %324 = vst [vmem:[#allocation2 + $0x22c] sm:$0xff] %v323_v5   ;;  %v329_v7 = vld [vmem:[%s12019_s5 + $0x234] sm:$0xf]  ;;  %v403_v43 = vld [vmem:[%s12019_s5 + $0x2cc] sm:$0xff]  }
  0x59   :  { %328 = vst [vmem:[#allocation2 + $0x234] sm:$0xf] %v327_v6  ;;  %v331_v8 = vld [vmem:[%s12019_s5 + $0x25c] sm:$0xf]  ;;  %v333_v9 = vld [vmem:[%s12019_s5 + $0x238] sm:$0xf] }
  0x5a   :  { %330 = vst [vmem:[#allocation2 + $0x238] sm:$0xf] %v329_v7  ;;  %332 = vst [vmem:[#allocation2 + $0x23c] sm:$0xf] %v331_v8  ;;  %v335_v10 = vld [vmem:[%s12019_s5 + $0x260] sm:$0xf] }
  0x5b   :  { %334 = vst [vmem:[#allocation2 + $0x240] sm:$0xf] %v333_v9  ;;  %v337_v11 = vld [vmem:[%s12019_s5 + $0x23c] sm:$0xf]  ;;  %v339_v12 = vld [vmem:[%s12019_s5 + $0x264] sm:$0xf] }
  0x5c   :  { %336 = vst [vmem:[#allocation2 + $0x244] sm:$0xf] %v335_v10  ;;  %338 = vst [vmem:[#allocation2 + $0x248] sm:$0xf] %v337_v11  ;;  %v341_v13 = vld [vmem:[%s12019_s5 + $0x240] sm:$0xf] }
  0x5d   :  { %340 = vst [vmem:[#allocation2 + $0x24c] sm:$0xf] %v339_v12  ;;  %v343_v14 = vld [vmem:[%s12019_s5 + $0x268] sm:$0xf]  ;;  %v345_v15 = vld [vmem:[%s12019_s5 + $0x244] sm:$0xf] }
  0x5e   :  { %342 = vst [vmem:[#allocation2 + $0x250] sm:$0xf] %v341_v13  ;;  %344 = vst [vmem:[#allocation2 + $0x254] sm:$0xf] %v343_v14  ;;  %v347_v16 = vld [vmem:[%s12019_s5 + $0x26c] sm:$0xf] }
  0x5f   :  { %346 = vst [vmem:[#allocation2 + $0x258] sm:$0xf] %v345_v15  ;;  %v349_v17 = vld [vmem:[%s12019_s5 + $0x248] sm:$0xf]  ;;  %v351_v18 = vld [vmem:[%s12019_s5 + $0x270] sm:$0xf] }
  0x60   :  { %348 = vst [vmem:[#allocation2 + $0x25c] sm:$0xf] %v347_v16  ;;  %350 = vst [vmem:[#allocation2 + $0x260] sm:$0xf] %v349_v17  ;;  %v353_v19 = vld [vmem:[%s12019_s5 + $0x24c] sm:$0xf] }
  0x61   :  { %352 = vst [vmem:[#allocation2 + $0x264] sm:$0xf] %v351_v18  ;;  %v355_v20 = vld [vmem:[%s12019_s5 + $0x274] sm:$0xf]  ;;  %v357_v21 = vld [vmem:[%s12019_s5 + $0x250] sm:$0xf] }
  0x62   :  { %354 = vst [vmem:[#allocation2 + $0x268] sm:$0xf] %v353_v19  ;;  %356 = vst [vmem:[#allocation2 + $0x26c] sm:$0xf] %v355_v20  ;;  %v359_v22 = vld [vmem:[%s12019_s5 + $0x278] sm:$0xf] }
  0x63   :  { %358 = vst [vmem:[#allocation2 + $0x270] sm:$0xf] %v357_v21  ;;  %v361_v23 = vld [vmem:[%s12019_s5 + $0x254] sm:$0xf]  ;;  %360 = vst [vmem:[#allocation2 + $0x274] sm:$0xf] %v359_v22 }
  0x64   :  { %362 = vst [vmem:[#allocation2 + $0x278] sm:$0xf] %v361_v23  ;;  %364 = vst [vmem:[#allocation2 + $0x27c] sm:$0xff] %v363_v24   ;;  %v367_v25 = vld [vmem:[%s12019_s5 + $0x2a8] sm:$0xf]  ;;  %v443_v62 = vld [vmem:[%s12019_s5 + $0x31c] sm:$0xff]  }
  0x65   :  { %v369_v26 = vld [vmem:[%s12019_s5 + $0x284] sm:$0xf]  ;;  %v371_v27 = vld [vmem:[%s12019_s5 + $0x2ac] sm:$0xf]  ;;  %368 = vst [vmem:[#allocation2 + $0x284] sm:$0xf] %v367_v25 }
  0x66   :  { %370 = vst [vmem:[#allocation2 + $0x288] sm:$0xf] %v369_v26  ;;  %372 = vst [vmem:[#allocation2 + $0x28c] sm:$0xf] %v371_v27  ;;  %v373_v28 = vld [vmem:[%s12019_s5 + $0x288] sm:$0xf] }
  0x67   :  { %v375_v29 = vld [vmem:[%s12019_s5 + $0x2b0] sm:$0xf]  ;;  %v377_v30 = vld [vmem:[%s12019_s5 + $0x28c] sm:$0xf]  ;;  %374 = vst [vmem:[#allocation2 + $0x290] sm:$0xf] %v373_v28 }
  0x68   :  { %376 = vst [vmem:[#allocation2 + $0x294] sm:$0xf] %v375_v29  ;;  %378 = vst [vmem:[#allocation2 + $0x298] sm:$0xf] %v377_v30  ;;  %v379_v31 = vld [vmem:[%s12019_s5 + $0x2b4] sm:$0xf] }
  0x69   :  { %v381_v32 = vld [vmem:[%s12019_s5 + $0x290] sm:$0xf]  ;;  %v383_v33 = vld [vmem:[%s12019_s5 + $0x2b8] sm:$0xf]  ;;  %380 = vst [vmem:[#allocation2 + $0x29c] sm:$0xf] %v379_v31 }
  0x6a   :  { %382 = vst [vmem:[#allocation2 + $0x2a0] sm:$0xf] %v381_v32  ;;  %384 = vst [vmem:[#allocation2 + $0x2a4] sm:$0xf] %v383_v33  ;;  %v385_v34 = vld [vmem:[%s12019_s5 + $0x294] sm:$0xf] }
  0x6b   :  { %v387_v35 = vld [vmem:[%s12019_s5 + $0x2bc] sm:$0xf]  ;;  %v389_v36 = vld [vmem:[%s12019_s5 + $0x298] sm:$0xf]  ;;  %386 = vst [vmem:[#allocation2 + $0x2a8] sm:$0xf] %v385_v34 }
  0x6c   :  { %388 = vst [vmem:[#allocation2 + $0x2ac] sm:$0xf] %v387_v35  ;;  %390 = vst [vmem:[#allocation2 + $0x2b0] sm:$0xf] %v389_v36  ;;  %v391_v37 = vld [vmem:[%s12019_s5 + $0x2c0] sm:$0xf] }
  0x6d   :  { %v393_v38 = vld [vmem:[%s12019_s5 + $0x29c] sm:$0xf]  ;;  %v395_v39 = vld [vmem:[%s12019_s5 + $0x2c4] sm:$0xf]  ;;  %392 = vst [vmem:[#allocation2 + $0x2b4] sm:$0xf] %v391_v37 }
  0x6e   :  { %394 = vst [vmem:[#allocation2 + $0x2b8] sm:$0xf] %v393_v38  ;;  %396 = vst [vmem:[#allocation2 + $0x2bc] sm:$0xf] %v395_v39  ;;  %v397_v40 = vld [vmem:[%s12019_s5 + $0x2a0] sm:$0xf] }
  0x6f   :  { %v399_v41 = vld [vmem:[%s12019_s5 + $0x2c8] sm:$0xf]  ;;  %v401_v42 = vld [vmem:[%s12019_s5 + $0x2a4] sm:$0xf]  ;;  %398 = vst [vmem:[#allocation2 + $0x2c0] sm:$0xf] %v397_v40 }
  0x70   :  { %400 = vst [vmem:[#allocation2 + $0x2c4] sm:$0xf] %v399_v41  ;;  %402 = vst [vmem:[#allocation2 + $0x2c8] sm:$0xf] %v401_v42  ;;  %v407_v44 = vld [vmem:[%s12019_s5 + $0x2f8] sm:$0xf] }
  0x71   :  { %v409_v45 = vld [vmem:[%s12019_s5 + $0x2d4] sm:$0xf]  ;;  %404 = vst [vmem:[#allocation2 + $0x2cc] sm:$0xff] %v403_v43   ;;  %408 = vst [vmem:[#allocation2 + $0x2d4] sm:$0xf] %v407_v44  ;;  %v483_v17 = vld [vmem:[%s12019_s5 + $0x36c] sm:$0xff]  }
  0x72   :  { %410 = vst [vmem:[#allocation2 + $0x2d8] sm:$0xf] %v409_v45  ;;  %v411_v46 = vld [vmem:[%s12019_s5 + $0x2fc] sm:$0xf]  ;;  %v413_v47 = vld [vmem:[%s12019_s5 + $0x2d8] sm:$0xf] }
  0x73   :  { %v415_v48 = vld [vmem:[%s12019_s5 + $0x300] sm:$0xf]  ;;  %412 = vst [vmem:[#allocation2 + $0x2dc] sm:$0xf] %v411_v46  ;;  %414 = vst [vmem:[#allocation2 + $0x2e0] sm:$0xf] %v413_v47 }
  0x74   :  { %416 = vst [vmem:[#allocation2 + $0x2e4] sm:$0xf] %v415_v48  ;;  %v417_v49 = vld [vmem:[%s12019_s5 + $0x2dc] sm:$0xf]  ;;  %v419_v50 = vld [vmem:[%s12019_s5 + $0x304] sm:$0xf] }
  0x75   :  { %v421_v51 = vld [vmem:[%s12019_s5 + $0x2e0] sm:$0xf]  ;;  %418 = vst [vmem:[#allocation2 + $0x2e8] sm:$0xf] %v417_v49  ;;  %420 = vst [vmem:[#allocation2 + $0x2ec] sm:$0xf] %v419_v50 }
  0x76   :  { %422 = vst [vmem:[#allocation2 + $0x2f0] sm:$0xf] %v421_v51  ;;  %v423_v52 = vld [vmem:[%s12019_s5 + $0x308] sm:$0xf]  ;;  %v425_v53 = vld [vmem:[%s12019_s5 + $0x2e4] sm:$0xf] }
  0x77   :  { %v427_v54 = vld [vmem:[%s12019_s5 + $0x30c] sm:$0xf]  ;;  %424 = vst [vmem:[#allocation2 + $0x2f4] sm:$0xf] %v423_v52  ;;  %426 = vst [vmem:[#allocation2 + $0x2f8] sm:$0xf] %v425_v53 }
  0x78   :  { %428 = vst [vmem:[#allocation2 + $0x2fc] sm:$0xf] %v427_v54  ;;  %v429_v55 = vld [vmem:[%s12019_s5 + $0x2e8] sm:$0xf]  ;;  %v431_v56 = vld [vmem:[%s12019_s5 + $0x310] sm:$0xf] }
  0x79   :  { %v433_v57 = vld [vmem:[%s12019_s5 + $0x2ec] sm:$0xf]  ;;  %430 = vst [vmem:[#allocation2 + $0x300] sm:$0xf] %v429_v55  ;;  %432 = vst [vmem:[#allocation2 + $0x304] sm:$0xf] %v431_v56 }
  0x7a   :  { %434 = vst [vmem:[#allocation2 + $0x308] sm:$0xf] %v433_v57  ;;  %v435_v58 = vld [vmem:[%s12019_s5 + $0x314] sm:$0xf]  ;;  %v437_v59 = vld [vmem:[%s12019_s5 + $0x2f0] sm:$0xf] }
  0x7b   :  { %v439_v60 = vld [vmem:[%s12019_s5 + $0x318] sm:$0xf]  ;;  %436 = vst [vmem:[#allocation2 + $0x30c] sm:$0xf] %v435_v58  ;;  %438 = vst [vmem:[#allocation2 + $0x310] sm:$0xf] %v437_v59 }
  0x7c   :  { %440 = vst [vmem:[#allocation2 + $0x314] sm:$0xf] %v439_v60  ;;  %v441_v61 = vld [vmem:[%s12019_s5 + $0x2f4] sm:$0xf]  ;;  %v447_v63 = vld [vmem:[%s12019_s5 + $0x348] sm:$0xf] }
  0x7d   :  { %442 = vst [vmem:[#allocation2 + $0x318] sm:$0xf] %v441_v61  ;;  %444 = vst [vmem:[#allocation2 + $0x31c] sm:$0xff] %v443_v62   ;;  %v449_v0 = vld [vmem:[%s12019_s5 + $0x324] sm:$0xf]  ;;  %v523_v36 = vld [vmem:[%s12019_s5 + $0x3bc] sm:$0xff]  }
  0x7e   :  { %448 = vst [vmem:[#allocation2 + $0x324] sm:$0xf] %v447_v63  ;;  %v451_v1 = vld [vmem:[%s12019_s5 + $0x34c] sm:$0xf]  ;;  %v453_v2 = vld [vmem:[%s12019_s5 + $0x328] sm:$0xf] }
  0x7f   :  { %450 = vst [vmem:[#allocation2 + $0x328] sm:$0xf] %v449_v0  ;;  %452 = vst [vmem:[#allocation2 + $0x32c] sm:$0xf] %v451_v1  ;;  %v455_v3 = vld [vmem:[%s12019_s5 + $0x350] sm:$0xf] }
  0x80   :  { %454 = vst [vmem:[#allocation2 + $0x330] sm:$0xf] %v453_v2  ;;  %v457_v4 = vld [vmem:[%s12019_s5 + $0x32c] sm:$0xf]  ;;  %v459_v5 = vld [vmem:[%s12019_s5 + $0x354] sm:$0xf] }
  0x81   :  { %456 = vst [vmem:[#allocation2 + $0x334] sm:$0xf] %v455_v3  ;;  %458 = vst [vmem:[#allocation2 + $0x338] sm:$0xf] %v457_v4  ;;  %v461_v6 = vld [vmem:[%s12019_s5 + $0x330] sm:$0xf] }
  0x82   :  { %460 = vst [vmem:[#allocation2 + $0x33c] sm:$0xf] %v459_v5  ;;  %v463_v7 = vld [vmem:[%s12019_s5 + $0x358] sm:$0xf]  ;;  %v465_v8 = vld [vmem:[%s12019_s5 + $0x334] sm:$0xf] }
  0x83   :  { %462 = vst [vmem:[#allocation2 + $0x340] sm:$0xf] %v461_v6  ;;  %464 = vst [vmem:[#allocation2 + $0x344] sm:$0xf] %v463_v7  ;;  %v467_v9 = vld [vmem:[%s12019_s5 + $0x35c] sm:$0xf] }
  0x84   :  { %466 = vst [vmem:[#allocation2 + $0x348] sm:$0xf] %v465_v8  ;;  %v469_v10 = vld [vmem:[%s12019_s5 + $0x338] sm:$0xf]  ;;  %v471_v11 = vld [vmem:[%s12019_s5 + $0x360] sm:$0xf] }
  0x85   :  { %468 = vst [vmem:[#allocation2 + $0x34c] sm:$0xf] %v467_v9  ;;  %470 = vst [vmem:[#allocation2 + $0x350] sm:$0xf] %v469_v10  ;;  %v473_v12 = vld [vmem:[%s12019_s5 + $0x33c] sm:$0xf] }
  0x86   :  { %472 = vst [vmem:[#allocation2 + $0x354] sm:$0xf] %v471_v11  ;;  %v475_v13 = vld [vmem:[%s12019_s5 + $0x364] sm:$0xf]  ;;  %v477_v14 = vld [vmem:[%s12019_s5 + $0x340] sm:$0xf] }
  0x87   :  { %474 = vst [vmem:[#allocation2 + $0x358] sm:$0xf] %v473_v12  ;;  %476 = vst [vmem:[#allocation2 + $0x35c] sm:$0xf] %v475_v13  ;;  %v479_v15 = vld [vmem:[%s12019_s5 + $0x368] sm:$0xf] }
  0x88   :  { %478 = vst [vmem:[#allocation2 + $0x360] sm:$0xf] %v477_v14  ;;  %v481_v16 = vld [vmem:[%s12019_s5 + $0x344] sm:$0xf]  ;;  %480 = vst [vmem:[#allocation2 + $0x364] sm:$0xf] %v479_v15 }
  0x89   :  { %482 = vst [vmem:[#allocation2 + $0x368] sm:$0xf] %v481_v16  ;;  %484 = vst [vmem:[#allocation2 + $0x36c] sm:$0xff] %v483_v17   ;;  %v487_v18 = vld [vmem:[%s12019_s5 + $0x398] sm:$0xf]  ;;  %v563_v55 = vld [vmem:[%s12019_s5 + $0x40c] sm:$0xff]  }
  0x8a   :  { %v489_v19 = vld [vmem:[%s12019_s5 + $0x374] sm:$0xf]  ;;  %v491_v20 = vld [vmem:[%s12019_s5 + $0x39c] sm:$0xf]  ;;  %488 = vst [vmem:[#allocation2 + $0x374] sm:$0xf] %v487_v18 }
  0x8b   :  { %490 = vst [vmem:[#allocation2 + $0x378] sm:$0xf] %v489_v19  ;;  %492 = vst [vmem:[#allocation2 + $0x37c] sm:$0xf] %v491_v20  ;;  %v493_v21 = vld [vmem:[%s12019_s5 + $0x378] sm:$0xf] }
  0x8c   :  { %v495_v22 = vld [vmem:[%s12019_s5 + $0x3a0] sm:$0xf]  ;;  %v497_v23 = vld [vmem:[%s12019_s5 + $0x37c] sm:$0xf]  ;;  %494 = vst [vmem:[#allocation2 + $0x380] sm:$0xf] %v493_v21 }
  0x8d   :  { %496 = vst [vmem:[#allocation2 + $0x384] sm:$0xf] %v495_v22  ;;  %498 = vst [vmem:[#allocation2 + $0x388] sm:$0xf] %v497_v23  ;;  %v499_v24 = vld [vmem:[%s12019_s5 + $0x3a4] sm:$0xf] }
  0x8e   :  { %v501_v25 = vld [vmem:[%s12019_s5 + $0x380] sm:$0xf]  ;;  %v503_v26 = vld [vmem:[%s12019_s5 + $0x3a8] sm:$0xf]  ;;  %500 = vst [vmem:[#allocation2 + $0x38c] sm:$0xf] %v499_v24 }
  0x8f   :  { %502 = vst [vmem:[#allocation2 + $0x390] sm:$0xf] %v501_v25  ;;  %504 = vst [vmem:[#allocation2 + $0x394] sm:$0xf] %v503_v26  ;;  %v505_v27 = vld [vmem:[%s12019_s5 + $0x384] sm:$0xf] }
  0x90   :  { %v507_v28 = vld [vmem:[%s12019_s5 + $0x3ac] sm:$0xf]  ;;  %v509_v29 = vld [vmem:[%s12019_s5 + $0x388] sm:$0xf]  ;;  %506 = vst [vmem:[#allocation2 + $0x398] sm:$0xf] %v505_v27 }
  0x91   :  { %508 = vst [vmem:[#allocation2 + $0x39c] sm:$0xf] %v507_v28  ;;  %510 = vst [vmem:[#allocation2 + $0x3a0] sm:$0xf] %v509_v29  ;;  %v511_v30 = vld [vmem:[%s12019_s5 + $0x3b0] sm:$0xf] }
  0x92   :  { %v513_v31 = vld [vmem:[%s12019_s5 + $0x38c] sm:$0xf]  ;;  %v515_v32 = vld [vmem:[%s12019_s5 + $0x3b4] sm:$0xf]  ;;  %512 = vst [vmem:[#allocation2 + $0x3a4] sm:$0xf] %v511_v30 }
  0x93   :  { %514 = vst [vmem:[#allocation2 + $0x3a8] sm:$0xf] %v513_v31  ;;  %516 = vst [vmem:[#allocation2 + $0x3ac] sm:$0xf] %v515_v32  ;;  %v517_v33 = vld [vmem:[%s12019_s5 + $0x390] sm:$0xf] }
  0x94   :  { %v519_v34 = vld [vmem:[%s12019_s5 + $0x3b8] sm:$0xf]  ;;  %v521_v35 = vld [vmem:[%s12019_s5 + $0x394] sm:$0xf]  ;;  %518 = vst [vmem:[#allocation2 + $0x3b0] sm:$0xf] %v517_v33 }
  0x95   :  { %520 = vst [vmem:[#allocation2 + $0x3b4] sm:$0xf] %v519_v34  ;;  %522 = vst [vmem:[#allocation2 + $0x3b8] sm:$0xf] %v521_v35  ;;  %v527_v37 = vld [vmem:[%s12019_s5 + $0x3e8] sm:$0xf] }
  0x96   :  { %v529_v38 = vld [vmem:[%s12019_s5 + $0x3c4] sm:$0xf]  ;;  %524 = vst [vmem:[#allocation2 + $0x3bc] sm:$0xff] %v523_v36   ;;  %528 = vst [vmem:[#allocation2 + $0x3c4] sm:$0xf] %v527_v37  ;;  %v603_v10 = vld [vmem:[%s12019_s5 + $0x45c] sm:$0xff]  }
  0x97   :  { %530 = vst [vmem:[#allocation2 + $0x3c8] sm:$0xf] %v529_v38  ;;  %v531_v39 = vld [vmem:[%s12019_s5 + $0x3ec] sm:$0xf]  ;;  %v533_v40 = vld [vmem:[%s12019_s5 + $0x3c8] sm:$0xf] }
  0x98   :  { %v535_v41 = vld [vmem:[%s12019_s5 + $0x3f0] sm:$0xf]  ;;  %532 = vst [vmem:[#allocation2 + $0x3cc] sm:$0xf] %v531_v39  ;;  %534 = vst [vmem:[#allocation2 + $0x3d0] sm:$0xf] %v533_v40 }
  0x99   :  { %536 = vst [vmem:[#allocation2 + $0x3d4] sm:$0xf] %v535_v41  ;;  %v537_v42 = vld [vmem:[%s12019_s5 + $0x3cc] sm:$0xf]  ;;  %v539_v43 = vld [vmem:[%s12019_s5 + $0x3f4] sm:$0xf] }
  0x9a   :  { %v541_v44 = vld [vmem:[%s12019_s5 + $0x3d0] sm:$0xf]  ;;  %538 = vst [vmem:[#allocation2 + $0x3d8] sm:$0xf] %v537_v42  ;;  %540 = vst [vmem:[#allocation2 + $0x3dc] sm:$0xf] %v539_v43 }
  0x9b   :  { %542 = vst [vmem:[#allocation2 + $0x3e0] sm:$0xf] %v541_v44  ;;  %v543_v45 = vld [vmem:[%s12019_s5 + $0x3f8] sm:$0xf]  ;;  %v545_v46 = vld [vmem:[%s12019_s5 + $0x3d4] sm:$0xf] }
  0x9c   :  { %v547_v47 = vld [vmem:[%s12019_s5 + $0x3fc] sm:$0xf]  ;;  %544 = vst [vmem:[#allocation2 + $0x3e4] sm:$0xf] %v543_v45  ;;  %546 = vst [vmem:[#allocation2 + $0x3e8] sm:$0xf] %v545_v46 }
  0x9d   :  { %548 = vst [vmem:[#allocation2 + $0x3ec] sm:$0xf] %v547_v47  ;;  %v549_v48 = vld [vmem:[%s12019_s5 + $0x3d8] sm:$0xf]  ;;  %v551_v49 = vld [vmem:[%s12019_s5 + $0x400] sm:$0xf] }
  0x9e   :  { %v553_v50 = vld [vmem:[%s12019_s5 + $0x3dc] sm:$0xf]  ;;  %550 = vst [vmem:[#allocation2 + $0x3f0] sm:$0xf] %v549_v48  ;;  %552 = vst [vmem:[#allocation2 + $0x3f4] sm:$0xf] %v551_v49 }
  0x9f   :  { %554 = vst [vmem:[#allocation2 + $0x3f8] sm:$0xf] %v553_v50  ;;  %v555_v51 = vld [vmem:[%s12019_s5 + $0x404] sm:$0xf]  ;;  %v557_v52 = vld [vmem:[%s12019_s5 + $0x3e0] sm:$0xf] }
  0xa0   :  { %v559_v53 = vld [vmem:[%s12019_s5 + $0x408] sm:$0xf]  ;;  %556 = vst [vmem:[#allocation2 + $0x3fc] sm:$0xf] %v555_v51  ;;  %558 = vst [vmem:[#allocation2 + $0x400] sm:$0xf] %v557_v52 }
  0xa1   :  { %560 = vst [vmem:[#allocation2 + $0x404] sm:$0xf] %v559_v53  ;;  %v561_v54 = vld [vmem:[%s12019_s5 + $0x3e4] sm:$0xf]  ;;  %v567_v56 = vld [vmem:[%s12019_s5 + $0x438] sm:$0xf] }
  0xa2   :  { %562 = vst [vmem:[#allocation2 + $0x408] sm:$0xf] %v561_v54  ;;  %564 = vst [vmem:[#allocation2 + $0x40c] sm:$0xff] %v563_v55   ;;  %v569_v57 = vld [vmem:[%s12019_s5 + $0x414] sm:$0xf]  ;;  %v643_v29 = vld [vmem:[%s12019_s5 + $0x4ac] sm:$0xff]  }
  0xa3   :  { %568 = vst [vmem:[#allocation2 + $0x414] sm:$0xf] %v567_v56  ;;  %v571_v58 = vld [vmem:[%s12019_s5 + $0x43c] sm:$0xf]  ;;  %v573_v59 = vld [vmem:[%s12019_s5 + $0x418] sm:$0xf] }
  0xa4   :  { %570 = vst [vmem:[#allocation2 + $0x418] sm:$0xf] %v569_v57  ;;  %572 = vst [vmem:[#allocation2 + $0x41c] sm:$0xf] %v571_v58  ;;  %v575_v60 = vld [vmem:[%s12019_s5 + $0x440] sm:$0xf] }
  0xa5   :  { %574 = vst [vmem:[#allocation2 + $0x420] sm:$0xf] %v573_v59  ;;  %v577_v61 = vld [vmem:[%s12019_s5 + $0x41c] sm:$0xf]  ;;  %v579_v62 = vld [vmem:[%s12019_s5 + $0x444] sm:$0xf] }
  0xa6   :  { %576 = vst [vmem:[#allocation2 + $0x424] sm:$0xf] %v575_v60  ;;  %578 = vst [vmem:[#allocation2 + $0x428] sm:$0xf] %v577_v61  ;;  %v581_v63 = vld [vmem:[%s12019_s5 + $0x420] sm:$0xf] }
  0xa7   :  { %580 = vst [vmem:[#allocation2 + $0x42c] sm:$0xf] %v579_v62  ;;  %v583_v0 = vld [vmem:[%s12019_s5 + $0x448] sm:$0xf]  ;;  %v585_v1 = vld [vmem:[%s12019_s5 + $0x424] sm:$0xf] }
  0xa8   :  { %582 = vst [vmem:[#allocation2 + $0x430] sm:$0xf] %v581_v63  ;;  %584 = vst [vmem:[#allocation2 + $0x434] sm:$0xf] %v583_v0  ;;  %v587_v2 = vld [vmem:[%s12019_s5 + $0x44c] sm:$0xf] }
  0xa9   :  { %586 = vst [vmem:[#allocation2 + $0x438] sm:$0xf] %v585_v1  ;;  %v589_v3 = vld [vmem:[%s12019_s5 + $0x428] sm:$0xf]  ;;  %v591_v4 = vld [vmem:[%s12019_s5 + $0x450] sm:$0xf] }
  0xaa   :  { %588 = vst [vmem:[#allocation2 + $0x43c] sm:$0xf] %v587_v2  ;;  %590 = vst [vmem:[#allocation2 + $0x440] sm:$0xf] %v589_v3  ;;  %v593_v5 = vld [vmem:[%s12019_s5 + $0x42c] sm:$0xf] }
  0xab   :  { %592 = vst [vmem:[#allocation2 + $0x444] sm:$0xf] %v591_v4  ;;  %v595_v6 = vld [vmem:[%s12019_s5 + $0x454] sm:$0xf]  ;;  %v597_v7 = vld [vmem:[%s12019_s5 + $0x430] sm:$0xf] }
  0xac   :  { %594 = vst [vmem:[#allocation2 + $0x448] sm:$0xf] %v593_v5  ;;  %596 = vst [vmem:[#allocation2 + $0x44c] sm:$0xf] %v595_v6  ;;  %v599_v8 = vld [vmem:[%s12019_s5 + $0x458] sm:$0xf] }
  0xad   :  { %598 = vst [vmem:[#allocation2 + $0x450] sm:$0xf] %v597_v7  ;;  %v601_v9 = vld [vmem:[%s12019_s5 + $0x434] sm:$0xf]  ;;  %600 = vst [vmem:[#allocation2 + $0x454] sm:$0xf] %v599_v8 }
  0xae   :  { %602 = vst [vmem:[#allocation2 + $0x458] sm:$0xf] %v601_v9  ;;  %604 = vst [vmem:[#allocation2 + $0x45c] sm:$0xff] %v603_v10   ;;  %v607_v11 = vld [vmem:[%s12019_s5 + $0x488] sm:$0xf]  ;;  %v683_v48 = vld [vmem:[%s12019_s5 + $0x4fc] sm:$0xff]  }
  0xaf   :  { %v609_v12 = vld [vmem:[%s12019_s5 + $0x464] sm:$0xf]  ;;  %v611_v13 = vld [vmem:[%s12019_s5 + $0x48c] sm:$0xf]  ;;  %608 = vst [vmem:[#allocation2 + $0x464] sm:$0xf] %v607_v11 }
  0xb0   :  { %610 = vst [vmem:[#allocation2 + $0x468] sm:$0xf] %v609_v12  ;;  %612 = vst [vmem:[#allocation2 + $0x46c] sm:$0xf] %v611_v13  ;;  %v613_v14 = vld [vmem:[%s12019_s5 + $0x468] sm:$0xf] }
  0xb1   :  { %v615_v15 = vld [vmem:[%s12019_s5 + $0x490] sm:$0xf]  ;;  %v617_v16 = vld [vmem:[%s12019_s5 + $0x46c] sm:$0xf]  ;;  %614 = vst [vmem:[#allocation2 + $0x470] sm:$0xf] %v613_v14 }
  0xb2   :  { %616 = vst [vmem:[#allocation2 + $0x474] sm:$0xf] %v615_v15  ;;  %618 = vst [vmem:[#allocation2 + $0x478] sm:$0xf] %v617_v16  ;;  %v619_v17 = vld [vmem:[%s12019_s5 + $0x494] sm:$0xf] }
  0xb3   :  { %v621_v18 = vld [vmem:[%s12019_s5 + $0x470] sm:$0xf]  ;;  %v623_v19 = vld [vmem:[%s12019_s5 + $0x498] sm:$0xf]  ;;  %620 = vst [vmem:[#allocation2 + $0x47c] sm:$0xf] %v619_v17 }
  0xb4   :  { %622 = vst [vmem:[#allocation2 + $0x480] sm:$0xf] %v621_v18  ;;  %624 = vst [vmem:[#allocation2 + $0x484] sm:$0xf] %v623_v19  ;;  %v625_v20 = vld [vmem:[%s12019_s5 + $0x474] sm:$0xf] }
  0xb5   :  { %v627_v21 = vld [vmem:[%s12019_s5 + $0x49c] sm:$0xf]  ;;  %v629_v22 = vld [vmem:[%s12019_s5 + $0x478] sm:$0xf]  ;;  %626 = vst [vmem:[#allocation2 + $0x488] sm:$0xf] %v625_v20 }
  0xb6   :  { %628 = vst [vmem:[#allocation2 + $0x48c] sm:$0xf] %v627_v21  ;;  %630 = vst [vmem:[#allocation2 + $0x490] sm:$0xf] %v629_v22  ;;  %v631_v23 = vld [vmem:[%s12019_s5 + $0x4a0] sm:$0xf] }
  0xb7   :  { %v633_v24 = vld [vmem:[%s12019_s5 + $0x47c] sm:$0xf]  ;;  %v635_v25 = vld [vmem:[%s12019_s5 + $0x4a4] sm:$0xf]  ;;  %632 = vst [vmem:[#allocation2 + $0x494] sm:$0xf] %v631_v23 }
  0xb8   :  { %634 = vst [vmem:[#allocation2 + $0x498] sm:$0xf] %v633_v24  ;;  %636 = vst [vmem:[#allocation2 + $0x49c] sm:$0xf] %v635_v25  ;;  %v637_v26 = vld [vmem:[%s12019_s5 + $0x480] sm:$0xf] }
  0xb9   :  { %v639_v27 = vld [vmem:[%s12019_s5 + $0x4a8] sm:$0xf]  ;;  %v641_v28 = vld [vmem:[%s12019_s5 + $0x484] sm:$0xf]  ;;  %638 = vst [vmem:[#allocation2 + $0x4a0] sm:$0xf] %v637_v26 }
  0xba   :  { %640 = vst [vmem:[#allocation2 + $0x4a4] sm:$0xf] %v639_v27  ;;  %642 = vst [vmem:[#allocation2 + $0x4a8] sm:$0xf] %v641_v28  ;;  %v647_v30 = vld [vmem:[%s12019_s5 + $0x4d8] sm:$0xf] }
  0xbb   :  { %v649_v31 = vld [vmem:[%s12019_s5 + $0x4b4] sm:$0xf]  ;;  %644 = vst [vmem:[#allocation2 + $0x4ac] sm:$0xff] %v643_v29   ;;  %648 = vst [vmem:[#allocation2 + $0x4b4] sm:$0xf] %v647_v30  ;;  %v723_v3 = vld [vmem:[%s12019_s5 + $0x54c] sm:$0xff]  }
  0xbc   :  { %650 = vst [vmem:[#allocation2 + $0x4b8] sm:$0xf] %v649_v31  ;;  %v651_v32 = vld [vmem:[%s12019_s5 + $0x4dc] sm:$0xf]  ;;  %v653_v33 = vld [vmem:[%s12019_s5 + $0x4b8] sm:$0xf] }
  0xbd   :  { %v655_v34 = vld [vmem:[%s12019_s5 + $0x4e0] sm:$0xf]  ;;  %652 = vst [vmem:[#allocation2 + $0x4bc] sm:$0xf] %v651_v32  ;;  %654 = vst [vmem:[#allocation2 + $0x4c0] sm:$0xf] %v653_v33 }
  0xbe   :  { %656 = vst [vmem:[#allocation2 + $0x4c4] sm:$0xf] %v655_v34  ;;  %v657_v35 = vld [vmem:[%s12019_s5 + $0x4bc] sm:$0xf]  ;;  %v659_v36 = vld [vmem:[%s12019_s5 + $0x4e4] sm:$0xf] }
  0xbf   :  { %v661_v37 = vld [vmem:[%s12019_s5 + $0x4c0] sm:$0xf]  ;;  %658 = vst [vmem:[#allocation2 + $0x4c8] sm:$0xf] %v657_v35  ;;  %660 = vst [vmem:[#allocation2 + $0x4cc] sm:$0xf] %v659_v36 }
  0xc0   :  { %662 = vst [vmem:[#allocation2 + $0x4d0] sm:$0xf] %v661_v37  ;;  %v663_v38 = vld [vmem:[%s12019_s5 + $0x4e8] sm:$0xf]  ;;  %v665_v39 = vld [vmem:[%s12019_s5 + $0x4c4] sm:$0xf] }
  0xc1   :  { %v667_v40 = vld [vmem:[%s12019_s5 + $0x4ec] sm:$0xf]  ;;  %664 = vst [vmem:[#allocation2 + $0x4d4] sm:$0xf] %v663_v38  ;;  %666 = vst [vmem:[#allocation2 + $0x4d8] sm:$0xf] %v665_v39 }
  0xc2   :  { %668 = vst [vmem:[#allocation2 + $0x4dc] sm:$0xf] %v667_v40  ;;  %v669_v41 = vld [vmem:[%s12019_s5 + $0x4c8] sm:$0xf]  ;;  %v671_v42 = vld [vmem:[%s12019_s5 + $0x4f0] sm:$0xf] }
  0xc3   :  { %v673_v43 = vld [vmem:[%s12019_s5 + $0x4cc] sm:$0xf]  ;;  %670 = vst [vmem:[#allocation2 + $0x4e0] sm:$0xf] %v669_v41  ;;  %672 = vst [vmem:[#allocation2 + $0x4e4] sm:$0xf] %v671_v42 }
  0xc4   :  { %674 = vst [vmem:[#allocation2 + $0x4e8] sm:$0xf] %v673_v43  ;;  %v675_v44 = vld [vmem:[%s12019_s5 + $0x4f4] sm:$0xf]  ;;  %v677_v45 = vld [vmem:[%s12019_s5 + $0x4d0] sm:$0xf] }
  0xc5   :  { %v679_v46 = vld [vmem:[%s12019_s5 + $0x4f8] sm:$0xf]  ;;  %676 = vst [vmem:[#allocation2 + $0x4ec] sm:$0xf] %v675_v44  ;;  %678 = vst [vmem:[#allocation2 + $0x4f0] sm:$0xf] %v677_v45 }
  0xc6   :  { %680 = vst [vmem:[#allocation2 + $0x4f4] sm:$0xf] %v679_v46  ;;  %v681_v47 = vld [vmem:[%s12019_s5 + $0x4d4] sm:$0xf]  ;;  %v687_v49 = vld [vmem:[%s12019_s5 + $0x528] sm:$0xf] }
  0xc7   :  { %682 = vst [vmem:[#allocation2 + $0x4f8] sm:$0xf] %v681_v47  ;;  %684 = vst [vmem:[#allocation2 + $0x4fc] sm:$0xff] %v683_v48   ;;  %v689_v50 = vld [vmem:[%s12019_s5 + $0x504] sm:$0xf]  ;;  %v763_v22 = vld [vmem:[%s12019_s5 + $0x59c] sm:$0xff]  }
  0xc8   :  { %688 = vst [vmem:[#allocation2 + $0x504] sm:$0xf] %v687_v49  ;;  %v691_v51 = vld [vmem:[%s12019_s5 + $0x52c] sm:$0xf]  ;;  %v693_v52 = vld [vmem:[%s12019_s5 + $0x508] sm:$0xf] }
  0xc9   :  { %690 = vst [vmem:[#allocation2 + $0x508] sm:$0xf] %v689_v50  ;;  %692 = vst [vmem:[#allocation2 + $0x50c] sm:$0xf] %v691_v51  ;;  %v695_v53 = vld [vmem:[%s12019_s5 + $0x530] sm:$0xf] }
  0xca   :  { %694 = vst [vmem:[#allocation2 + $0x510] sm:$0xf] %v693_v52  ;;  %v697_v54 = vld [vmem:[%s12019_s5 + $0x50c] sm:$0xf]  ;;  %v699_v55 = vld [vmem:[%s12019_s5 + $0x534] sm:$0xf] }
  0xcb   :  { %696 = vst [vmem:[#allocation2 + $0x514] sm:$0xf] %v695_v53  ;;  %698 = vst [vmem:[#allocation2 + $0x518] sm:$0xf] %v697_v54  ;;  %v701_v56 = vld [vmem:[%s12019_s5 + $0x510] sm:$0xf] }
  0xcc   :  { %700 = vst [vmem:[#allocation2 + $0x51c] sm:$0xf] %v699_v55  ;;  %v703_v57 = vld [vmem:[%s12019_s5 + $0x538] sm:$0xf]  ;;  %v705_v58 = vld [vmem:[%s12019_s5 + $0x514] sm:$0xf] }
  0xcd   :  { %702 = vst [vmem:[#allocation2 + $0x520] sm:$0xf] %v701_v56  ;;  %704 = vst [vmem:[#allocation2 + $0x524] sm:$0xf] %v703_v57  ;;  %v707_v59 = vld [vmem:[%s12019_s5 + $0x53c] sm:$0xf] }
  0xce   :  { %706 = vst [vmem:[#allocation2 + $0x528] sm:$0xf] %v705_v58  ;;  %v709_v60 = vld [vmem:[%s12019_s5 + $0x518] sm:$0xf]  ;;  %v711_v61 = vld [vmem:[%s12019_s5 + $0x540] sm:$0xf] }
  0xcf   :  { %708 = vst [vmem:[#allocation2 + $0x52c] sm:$0xf] %v707_v59  ;;  %710 = vst [vmem:[#allocation2 + $0x530] sm:$0xf] %v709_v60  ;;  %v713_v62 = vld [vmem:[%s12019_s5 + $0x51c] sm:$0xf] }
  0xd0   :  { %712 = vst [vmem:[#allocation2 + $0x534] sm:$0xf] %v711_v61  ;;  %v715_v63 = vld [vmem:[%s12019_s5 + $0x544] sm:$0xf]  ;;  %v717_v0 = vld [vmem:[%s12019_s5 + $0x520] sm:$0xf] }
  0xd1   :  { %714 = vst [vmem:[#allocation2 + $0x538] sm:$0xf] %v713_v62  ;;  %716 = vst [vmem:[#allocation2 + $0x53c] sm:$0xf] %v715_v63  ;;  %v719_v1 = vld [vmem:[%s12019_s5 + $0x548] sm:$0xf] }
  0xd2   :  { %718 = vst [vmem:[#allocation2 + $0x540] sm:$0xf] %v717_v0  ;;  %v721_v2 = vld [vmem:[%s12019_s5 + $0x524] sm:$0xf]  ;;  %720 = vst [vmem:[#allocation2 + $0x544] sm:$0xf] %v719_v1 }
  0xd3   :  { %722 = vst [vmem:[#allocation2 + $0x548] sm:$0xf] %v721_v2  ;;  %724 = vst [vmem:[#allocation2 + $0x54c] sm:$0xff] %v723_v3   ;;  %v727_v4 = vld [vmem:[%s12019_s5 + $0x578] sm:$0xf]  ;;  %v803_v41 = vld [vmem:[%s12019_s5 + $0x5ec] sm:$0xff]  }
  0xd4   :  { %v729_v5 = vld [vmem:[%s12019_s5 + $0x554] sm:$0xf]  ;;  %v731_v6 = vld [vmem:[%s12019_s5 + $0x57c] sm:$0xf]  ;;  %728 = vst [vmem:[#allocation2 + $0x554] sm:$0xf] %v727_v4 }
  0xd5   :  { %730 = vst [vmem:[#allocation2 + $0x558] sm:$0xf] %v729_v5  ;;  %732 = vst [vmem:[#allocation2 + $0x55c] sm:$0xf] %v731_v6  ;;  %v733_v7 = vld [vmem:[%s12019_s5 + $0x558] sm:$0xf] }
  0xd6   :  { %v735_v8 = vld [vmem:[%s12019_s5 + $0x580] sm:$0xf]  ;;  %v737_v9 = vld [vmem:[%s12019_s5 + $0x55c] sm:$0xf]  ;;  %734 = vst [vmem:[#allocation2 + $0x560] sm:$0xf] %v733_v7 }
  0xd7   :  { %736 = vst [vmem:[#allocation2 + $0x564] sm:$0xf] %v735_v8  ;;  %738 = vst [vmem:[#allocation2 + $0x568] sm:$0xf] %v737_v9  ;;  %v739_v10 = vld [vmem:[%s12019_s5 + $0x584] sm:$0xf] }
  0xd8   :  { %v741_v11 = vld [vmem:[%s12019_s5 + $0x560] sm:$0xf]  ;;  %v743_v12 = vld [vmem:[%s12019_s5 + $0x588] sm:$0xf]  ;;  %740 = vst [vmem:[#allocation2 + $0x56c] sm:$0xf] %v739_v10 }
  0xd9   :  { %742 = vst [vmem:[#allocation2 + $0x570] sm:$0xf] %v741_v11  ;;  %744 = vst [vmem:[#allocation2 + $0x574] sm:$0xf] %v743_v12  ;;  %v745_v13 = vld [vmem:[%s12019_s5 + $0x564] sm:$0xf] }
  0xda   :  { %v747_v14 = vld [vmem:[%s12019_s5 + $0x58c] sm:$0xf]  ;;  %v749_v15 = vld [vmem:[%s12019_s5 + $0x568] sm:$0xf]  ;;  %746 = vst [vmem:[#allocation2 + $0x578] sm:$0xf] %v745_v13 }
  0xdb   :  { %748 = vst [vmem:[#allocation2 + $0x57c] sm:$0xf] %v747_v14  ;;  %750 = vst [vmem:[#allocation2 + $0x580] sm:$0xf] %v749_v15  ;;  %v751_v16 = vld [vmem:[%s12019_s5 + $0x590] sm:$0xf] }
  0xdc   :  { %v753_v17 = vld [vmem:[%s12019_s5 + $0x56c] sm:$0xf]  ;;  %v755_v18 = vld [vmem:[%s12019_s5 + $0x594] sm:$0xf]  ;;  %752 = vst [vmem:[#allocation2 + $0x584] sm:$0xf] %v751_v16 }
  0xdd   :  { %754 = vst [vmem:[#allocation2 + $0x588] sm:$0xf] %v753_v17  ;;  %756 = vst [vmem:[#allocation2 + $0x58c] sm:$0xf] %v755_v18  ;;  %v757_v19 = vld [vmem:[%s12019_s5 + $0x570] sm:$0xf] }
  0xde   :  { %v759_v20 = vld [vmem:[%s12019_s5 + $0x598] sm:$0xf]  ;;  %v761_v21 = vld [vmem:[%s12019_s5 + $0x574] sm:$0xf]  ;;  %758 = vst [vmem:[#allocation2 + $0x590] sm:$0xf] %v757_v19 }
  0xdf   :  { %760 = vst [vmem:[#allocation2 + $0x594] sm:$0xf] %v759_v20  ;;  %762 = vst [vmem:[#allocation2 + $0x598] sm:$0xf] %v761_v21  ;;  %v767_v23 = vld [vmem:[%s12019_s5 + $0x5c8] sm:$0xf] }
  0xe0   :  { %v769_v24 = vld [vmem:[%s12019_s5 + $0x5a4] sm:$0xf]  ;;  %764 = vst [vmem:[#allocation2 + $0x59c] sm:$0xff] %v763_v22   ;;  %768 = vst [vmem:[#allocation2 + $0x5a4] sm:$0xf] %v767_v23  ;;  %v1705_v63 = vld [vmem:[%s12015_s1 + $0x88] sm:$0xff] }
  0xe1   :  { %770 = vst [vmem:[#allocation2 + $0x5a8] sm:$0xf] %v769_v24  ;;  %v771_v25 = vld [vmem:[%s12019_s5 + $0x5cc] sm:$0xf]  ;;  %v773_v26 = vld [vmem:[%s12019_s5 + $0x5a8] sm:$0xf] }
  0xe2   :  { %v775_v27 = vld [vmem:[%s12019_s5 + $0x5d0] sm:$0xf]  ;;  %772 = vst [vmem:[#allocation2 + $0x5ac] sm:$0xf] %v771_v25  ;;  %774 = vst [vmem:[#allocation2 + $0x5b0] sm:$0xf] %v773_v26 }
  0xe3   :  { %776 = vst [vmem:[#allocation2 + $0x5b4] sm:$0xf] %v775_v27  ;;  %v777_v28 = vld [vmem:[%s12019_s5 + $0x5ac] sm:$0xf]  ;;  %v779_v29 = vld [vmem:[%s12019_s5 + $0x5d4] sm:$0xf] }
  0xe4   :  { %v781_v30 = vld [vmem:[%s12019_s5 + $0x5b0] sm:$0xf]  ;;  %778 = vst [vmem:[#allocation2 + $0x5b8] sm:$0xf] %v777_v28  ;;  %780 = vst [vmem:[#allocation2 + $0x5bc] sm:$0xf] %v779_v29 }
  0xe5   :  { %782 = vst [vmem:[#allocation2 + $0x5c0] sm:$0xf] %v781_v30  ;;  %v783_v31 = vld [vmem:[%s12019_s5 + $0x5d8] sm:$0xf]  ;;  %v785_v32 = vld [vmem:[%s12019_s5 + $0x5b4] sm:$0xf] }
  0xe6   :  { %v787_v33 = vld [vmem:[%s12019_s5 + $0x5dc] sm:$0xf]  ;;  %784 = vst [vmem:[#allocation2 + $0x5c4] sm:$0xf] %v783_v31  ;;  %786 = vst [vmem:[#allocation2 + $0x5c8] sm:$0xf] %v785_v32 }
  0xe7   :  { %788 = vst [vmem:[#allocation2 + $0x5cc] sm:$0xf] %v787_v33  ;;  %v789_v34 = vld [vmem:[%s12019_s5 + $0x5b8] sm:$0xf]  ;;  %v791_v35 = vld [vmem:[%s12019_s5 + $0x5e0] sm:$0xf] }
  0xe8   :  { %v793_v36 = vld [vmem:[%s12019_s5 + $0x5bc] sm:$0xf]  ;;  %790 = vst [vmem:[#allocation2 + $0x5d0] sm:$0xf] %v789_v34  ;;  %792 = vst [vmem:[#allocation2 + $0x5d4] sm:$0xf] %v791_v35 }
  0xe9   :  { %794 = vst [vmem:[#allocation2 + $0x5d8] sm:$0xf] %v793_v36  ;;  %v795_v37 = vld [vmem:[%s12019_s5 + $0x5e4] sm:$0xf]  ;;  %v797_v38 = vld [vmem:[%s12019_s5 + $0x5c0] sm:$0xf] }
  0xea   :  { %v799_v39 = vld [vmem:[%s12019_s5 + $0x5e8] sm:$0xf]  ;;  %796 = vst [vmem:[#allocation2 + $0x5dc] sm:$0xf] %v795_v37  ;;  %798 = vst [vmem:[#allocation2 + $0x5e0] sm:$0xf] %v797_v38 }
  0xeb   :  { %800 = vst [vmem:[#allocation2 + $0x5e4] sm:$0xf] %v799_v39  ;;  %v801_v40 = vld [vmem:[%s12019_s5 + $0x5c4] sm:$0xf]  ;;  %v807_v42 = vld [vmem:[%s12019_s5 + $0x618] sm:$0xf] }
  0xec   :  { %802 = vst [vmem:[#allocation2 + $0x5e8] sm:$0xf] %v801_v40  ;;  %804 = vst [vmem:[#allocation2 + $0x5ec] sm:$0xff] %v803_v41   ;;  %v809_v43 = vld [vmem:[%s12019_s5 + $0x5f4] sm:$0xf]  ;;  %v1704_v61 = vld [vmem:[%s12015_s1 + $0x80] sm:$0xff] }
  0xed   :  { %808 = vst [vmem:[#allocation2 + $0x5f4] sm:$0xf] %v807_v42  ;;  %v811_v44 = vld [vmem:[%s12019_s5 + $0x61c] sm:$0xf]  ;;  %v813_v45 = vld [vmem:[%s12019_s5 + $0x5f8] sm:$0xf] }
  0xee   :  { %810 = vst [vmem:[#allocation2 + $0x5f8] sm:$0xf] %v809_v43  ;;  %812 = vst [vmem:[#allocation2 + $0x5fc] sm:$0xf] %v811_v44  ;;  %v815_v46 = vld [vmem:[%s12019_s5 + $0x620] sm:$0xf] }
  0xef   :  { %814 = vst [vmem:[#allocation2 + $0x600] sm:$0xf] %v813_v45  ;;  %v817_v47 = vld [vmem:[%s12019_s5 + $0x5fc] sm:$0xf]  ;;  %v819_v48 = vld [vmem:[%s12019_s5 + $0x624] sm:$0xf] }
  0xf0   :  { %816 = vst [vmem:[#allocation2 + $0x604] sm:$0xf] %v815_v46  ;;  %818 = vst [vmem:[#allocation2 + $0x608] sm:$0xf] %v817_v47  ;;  %v821_v49 = vld [vmem:[%s12019_s5 + $0x600] sm:$0xf] }
  0xf1   :  { %820 = vst [vmem:[#allocation2 + $0x60c] sm:$0xf] %v819_v48  ;;  %v823_v50 = vld [vmem:[%s12019_s5 + $0x628] sm:$0xf]  ;;  %v825_v51 = vld [vmem:[%s12019_s5 + $0x604] sm:$0xf] }
  0xf2   :  { %822 = vst [vmem:[#allocation2 + $0x610] sm:$0xf] %v821_v49  ;;  %824 = vst [vmem:[#allocation2 + $0x614] sm:$0xf] %v823_v50  ;;  %v827_v52 = vld [vmem:[%s12019_s5 + $0x62c] sm:$0xf] }
  0xf3   :  { %826 = vst [vmem:[#allocation2 + $0x618] sm:$0xf] %v825_v51  ;;  %v829_v53 = vld [vmem:[%s12019_s5 + $0x608] sm:$0xf]  ;;  %v831_v54 = vld [vmem:[%s12019_s5 + $0x630] sm:$0xf] }
  0xf4   :  { %828 = vst [vmem:[#allocation2 + $0x61c] sm:$0xf] %v827_v52  ;;  %830 = vst [vmem:[#allocation2 + $0x620] sm:$0xf] %v829_v53  ;;  %v833_v55 = vld [vmem:[%s12019_s5 + $0x60c] sm:$0xf] }
  0xf5   :  { %832 = vst [vmem:[#allocation2 + $0x624] sm:$0xf] %v831_v54  ;;  %v835_v56 = vld [vmem:[%s12019_s5 + $0x634] sm:$0xf]  ;;  %v837_v57 = vld [vmem:[%s12019_s5 + $0x610] sm:$0xf] }
  0xf6   :  { %834 = vst [vmem:[#allocation2 + $0x628] sm:$0xf] %v833_v55  ;;  %836 = vst [vmem:[#allocation2 + $0x62c] sm:$0xf] %v835_v56  ;;  %v839_v58 = vld [vmem:[%s12019_s5 + $0x638] sm:$0xf] }
  0xf7   :  { %838 = vst [vmem:[#allocation2 + $0x630] sm:$0xf] %v837_v57  ;;  %v841_v59 = vld [vmem:[%s12019_s5 + $0x614] sm:$0xf]  ;;  %v843_v60 = vld [vmem:[%s12019_s5 + $0x63c] sm:$0xf] }
  0xf8   :  { %840 = vst [vmem:[#allocation2 + $0x634] sm:$0xf] %v839_v58  ;;  %842 = vst [vmem:[#allocation2 + $0x638] sm:$0xf] %v841_v59  ;;  %v1688_v62 = vld [vmem:[%s12015_s1] sm:$0xff]  ;;  %1864 = vxpose.xlu0.b32.start [1/16] (narrow) %v1704_v61, 56 }
  0xf9   :  { %844 = vst [vmem:[#allocation2 + $0x63c] sm:$0xf] %v843_v60  ;;  %1832 = vxpose.xlu1.b32.start [1/16] (narrow) %v1688_v62, 56  ;;  %v1689_v0 = vld [vmem:[%s12015_s1 + $0x8] sm:$0xff]  ;;  %v1706_v1 = vld [vmem:[%s12015_s1 + $0x90] sm:$0xff]  ;;  %v1707_v3 = vld [vmem:[%s12015_s1 + $0x98] sm:$0xff] }
  0xfa   :  { %v1690_v2 = vld [vmem:[%s12015_s1 + $0x10] sm:$0xff]  ;;  %v1691_v4 = vld [vmem:[%s12015_s1 + $0x18] sm:$0xff]  ;;  %v1708_v5 = vld [vmem:[%s12015_s1 + $0xa0] sm:$0xff] }
  0xfb   :  { %v1692_v6 = vld [vmem:[%s12015_s1 + $0x20] sm:$0xff]  ;;  %v1709_v7 = vld [vmem:[%s12015_s1 + $0xa8] sm:$0xff] }
  0xfc   :  { %1865 = vxpose.xlu0.b32.cont [2/16] (narrow) %v1705_v63, 56 }
  0xfd   :  { %1833 = vxpose.xlu1.b32.cont [2/16] (narrow) %v1689_v0, 56 }
 0x100   :  { %1866 = vxpose.xlu0.b32.cont [3/16] (narrow) %v1706_v1, 56 }
 0x101   :  { %1834 = vxpose.xlu1.b32.cont [3/16] (narrow) %v1690_v2, 56 }
 0x104   :  { %1867 = vxpose.xlu0.b32.cont [4/16] (narrow) %v1707_v3, 56 }
 0x105   :  { %1835 = vxpose.xlu1.b32.cont [4/16] (narrow) %v1691_v4, 56 }
 0x108   :  { %1868 = vxpose.xlu0.b32.cont [5/16] (narrow) %v1708_v5, 56 }
 0x109   :  { %1836 = vxpose.xlu1.b32.cont [5/16] (narrow) %v1692_v6, 56 }
 0x10a   :  { %1675 = vsyncadd [#allocation3], 25600  ;;  %v1693_v8 = vld [vmem:[%s12015_s1 + $0x28] sm:$0xff]  ;;  %v7385_v9 = vld [vmem:[%s12016_s2 + $0x4] ss:$12 sps:$4 sm:$0xff]   ;;  %vm4408_vm0 = vcmask 523264  }
 0x10b   :  { %v7387_v10 = vld [vmem:[%s12016_s2] ss:$12 sps:$4 sm:$0xff]   ;;  %3706 = vmatprep.subr.bf16.mxu0 %v7385_v9  ;;  %v7388_v11 = vld [vmem:[%s12016_s2 + $0x1c] ss:$12 sps:$4 sm:$0xff]   ;;  %v1710_v12 = vld [vmem:[%s12015_s1 + $0xb0] sm:$0xff]  ;;  %vm4386_vm1 = vcmask 1040384  }
 0x10c   :  { %1869 = vxpose.xlu0.b32.cont [6/16] (narrow) %v1709_v7, 56  ;;  %v1694_v13 = vld [vmem:[%s12015_s1 + $0x30] sm:$0xff]  ;;  %3707 = vmatpush1.bf16.msra.mxu0 %v7387_v10  ;;  %v7390_v14 = vld [vmem:[%s12016_s2 + $0x18] ss:$12 sps:$4 sm:$0xff]   ;;  %v1713_v24 = vld [vmem:[%s12015_s1 + $0xc8] sm:$0xff]  ;;  %vm4420_vm2 = vcmask 516096  }
 0x10d   :  { %1837 = vxpose.xlu1.b32.cont [6/16] (narrow) %v1693_v8, 56  ;;  %3708 = vmatprep.subr.bf16.mxu0 %v7388_v11  ;;  %v7391_v15 = vld [vmem:[%s12016_s2 + $0x34] ss:$12 sps:$4 sm:$0xff]   ;;  %v1711_v16 = vld [vmem:[%s12015_s1 + $0xb8] sm:$0xff]  ;;  %v7397_v23 = vld [vmem:[%s12016_s2 + $0x64] ss:$12 sps:$4 sm:$0xff]  }
 0x10e   :  { %v1695_v17 = vld [vmem:[%s12015_s1 + $0x38] sm:$0xff]  ;;  %v1712_v20 = vld [vmem:[%s12015_s1 + $0xc0] sm:$0xff]  ;;  %v7396_v22 = vld [vmem:[%s12016_s2 + $0x48] ss:$12 sps:$4 sm:$0xff]  }
 0x10f   :  { %v7393_v18 = vld [vmem:[%s12016_s2 + $0x30] ss:$12 sps:$4 sm:$0xff]   ;;  %v7394_v19 = vld [vmem:[%s12016_s2 + $0x4c] ss:$12 sps:$4 sm:$0xff]   ;;  %v1696_v21 = vld [vmem:[%s12015_s1 + $0x40] sm:$0xff] }
 0x110   :  { %1870 = vxpose.xlu0.b32.cont [7/16] (narrow) %v1710_v12, 56  ;;  %3709 = vmatpush1.bf16.msra.mxu0 %v7390_v14  ;;  %v1697_v25 = vld [vmem:[%s12015_s1 + $0x48] sm:$0xff]  ;;  %v1714_v30 = vld [vmem:[%s12015_s1 + $0xd0] sm:$0xff]  ;;  %v7402_v32 = vld [vmem:[%s12016_s2 + $0x78] ss:$12 sps:$4 sm:$0xff]  }
 0x111   :  { %1838 = vxpose.xlu1.b32.cont [7/16] (narrow) %v1694_v13, 56  ;;  %3710 = vmatprep.subr.bf16.mxu0 %v7391_v15  ;;  %v7399_v26 = vld [vmem:[%s12016_s2 + $0x60] ss:$12 sps:$4 sm:$0xff]   ;;  %v7400_v27 = vld [vmem:[%s12016_s2 + $0x7c] ss:$12 sps:$4 sm:$0xff]   ;;  %v1698_v31 = vld [vmem:[%s12015_s1 + $0x50] sm:$0xff] }
 0x112   :  { %v7409_v28 = vld [vmem:[%s12016_s2 + $0xc8] ss:$12 sps:$4 sm:$0xff]   ;;  %v7414_v34 = vld [vmem:[%s12016_s2 + $0xe0] ss:$12 sps:$4 sm:$0xff]   ;;  %v1715_v36 = vld [vmem:[%s12015_s1 + $0xd8] sm:$0xff] }
 0x113   :  { %v7410_v29 = vld [vmem:[%s12016_s2 + $0x8] ss:$12 sps:$4 sm:$0xff]   ;;  %7037 = vmatprep.subr.bf16.mxu1 %v7409_v28  ;;  %v7415_v35 = vld [vmem:[%s12016_s2 + $0x20] ss:$12 sps:$4 sm:$0xff]   ;;  %v1699_v37 = vld [vmem:[%s12015_s1 + $0x58] sm:$0xff] }
 0x114   :  { %1871 = vxpose.xlu0.b32.cont [8/16] (narrow) %v1711_v16, 56  ;;  %3711 = vmatpush1.bf16.msra.mxu0 %v7393_v18  ;;  %v7403_v33 = vld [vmem:[%s12016_s2 + $0x94] ss:$12 sps:$4 sm:$0xff]   ;;  %v7405_v38 = vld [vmem:[%s12016_s2 + $0x90] ss:$12 sps:$4 sm:$0xff]   ;;  %v1717_v48 = vld [vmem:[%s12015_s1 + $0xe8] sm:$0xff] }
 0x115   :  { %1839 = vxpose.xlu1.b32.cont [8/16] (narrow) %v1695_v17, 56  ;;  %3712 = vmatprep.subr.bf16.mxu0 %v7394_v19  ;;  %v7406_v39 = vld [vmem:[%s12016_s2 + $0xac] ss:$12 sps:$4 sm:$0xff]   ;;  %v1716_v42 = vld [vmem:[%s12015_s1 + $0xe0] sm:$0xff]  ;;  %v7408_v44 = vld [vmem:[%s12016_s2 + $0xa8] ss:$12 sps:$4 sm:$0xff]  }
 0x116   :  { %7038 = vmatpush3.bf16.msra.mxu1 %v7410_v29  ;;  %v7419_v40 = vld [vmem:[%s12016_s2 + $0xf8] ss:$12 sps:$4 sm:$0xff]   ;;  %v7424_v46 = vld [vmem:[%s12016_s2 + $0x110] ss:$12 sps:$4 sm:$0xff]   ;;  %v1701_v49 = vld [vmem:[%s12015_s1 + $0x68] sm:$0xff] }
 0x117   :  { %7039 = vmatprep.subr.bf16.mxu1 %v7414_v34  ;;  %v7420_v41 = vld [vmem:[%s12016_s2 + $0x38] ss:$12 sps:$4 sm:$0xff]   ;;  %v7425_v47 = vld [vmem:[%s12016_s2 + $0x50] ss:$12 sps:$4 sm:$0xff]   ;;  %v7413_v50 = vld [vmem:[%s12016_s2 + $0xc0] ss:$12 sps:$4 sm:$0xff]  }
 0x118   :  { %1872 = vxpose.xlu0.b32.cont [9/16] (narrow) %v1712_v20, 56  ;;  %3713 = vmatpush1.bf16.msra.mxu0 %v7396_v22  ;;  %v1700_v43 = vld [vmem:[%s12015_s1 + $0x60] sm:$0xff]  ;;  %v7416_v51 = vld [vmem:[%s12016_s2 + $0xdc] ss:$12 sps:$4 sm:$0xff]   ;;  %v1718_v54 = vld [vmem:[%s12015_s1 + $0xf0] sm:$0xff] }
 0x119   :  { %1840 = vxpose.xlu1.b32.cont [9/16] (narrow) %v1696_v21, 56  ;;  %3714 = vmatprep.subr.bf16.mxu0 %v7397_v23  ;;  %v7411_v45 = vld [vmem:[%s12016_s2 + $0xc4] ss:$12 sps:$4 sm:$0xff]   ;;  %v7429_v52 = vld [vmem:[%s12016_s2 + $0x128] ss:$12 sps:$4 sm:$0xff]   ;;  %v1719_v60 = vld [vmem:[%s12015_s1 + $0xf8] sm:$0xff] }
 0x11a   :  { %7040 = vmatpush3.bf16.msra.mxu1 %v7415_v35  ;;  %v7430_v53 = vld [vmem:[%s12016_s2 + $0x68] ss:$12 sps:$4 sm:$0xff]   ;;  %v7418_v56 = vld [vmem:[%s12016_s2 + $0xd8] ss:$12 sps:$4 sm:$0xff]   ;;  %v7434_v58 = vld [vmem:[%s12016_s2 + $0x140] ss:$12 sps:$4 sm:$0xff]  }
 0x11b   :  { %7041 = vmatprep.subr.bf16.mxu1 %v7419_v40  ;;  %v1702_v55 = vld [vmem:[%s12015_s1 + $0x70] sm:$0xff]  ;;  %v7435_v59 = vld [vmem:[%s12016_s2 + $0x80] ss:$12 sps:$4 sm:$0xff]   ;;  %v1703_v61 = vld [vmem:[%s12015_s1 + $0x78] sm:$0xff] }
 0x11c   :  { %1873 = vxpose.xlu0.b32.cont [10/16] (narrow) %v1713_v24, 56  ;;  %3715 = vmatpush1.bf16.msra.mxu0 %v7399_v26  ;;  %v7421_v57 = vld [vmem:[%s12016_s2 + $0xf4] ss:$12 sps:$4 sm:$0xff]   ;;  %v7423_v62 = vld [vmem:[%s12016_s2 + $0xf0] ss:$12 sps:$4 sm:$0xff]   ;;  %v1737_v8 = vld [vmem:[%s12015_s1 + $0x188] sm:$0xff] }
 0x11d   :  { %1841 = vxpose.xlu1.b32.cont [10/16] (narrow) %v1697_v25, 56  ;;  %3716 = vmatprep.subr.bf16.mxu0 %v7400_v27  ;;  %v7426_v63 = vld [vmem:[%s12016_s2 + $0x10c] ss:$12 sps:$4 sm:$0xff]   ;;  %v1736_v2 = vld [vmem:[%s12015_s1 + $0x180] sm:$0xff]  ;;  %v7428_v4 = vld [vmem:[%s12016_s2 + $0x108] ss:$12 sps:$4 sm:$0xff]  }
 0x11e   :  { %7042 = vmatpush3.bf16.msra.mxu1 %v7420_v41  ;;  %v7439_v0 = vld [vmem:[%s12016_s2 + $0x158] ss:$12 sps:$4 sm:$0xff]   ;;  %v7444_v6 = vld [vmem:[%s12016_s2 + $0x170] ss:$12 sps:$4 sm:$0xff]   ;;  %v1721_v9 = vld [vmem:[%s12015_s1 + $0x108] sm:$0xff] }
 0x11f   :  { %7043 = vmatprep.subr.bf16.mxu1 %v7424_v46  ;;  %v7440_v1 = vld [vmem:[%s12016_s2 + $0x98] ss:$12 sps:$4 sm:$0xff]   ;;  %v7445_v7 = vld [vmem:[%s12016_s2 + $0xb0] ss:$12 sps:$4 sm:$0xff]   ;;  %v7433_v10 = vld [vmem:[%s12016_s2 + $0x120] ss:$12 sps:$4 sm:$0xff]  }
 0x120   :  { %1874 = vxpose.xlu0.b32.cont [11/16] (narrow) %v1714_v30, 56  ;;  %3717 = vmatpush1.bf16.msra.mxu0 %v7402_v32  ;;  %v1720_v3 = vld [vmem:[%s12015_s1 + $0x100] sm:$0xff]  ;;  %v7436_v11 = vld [vmem:[%s12016_s2 + $0x13c] ss:$12 sps:$4 sm:$0xff]   ;;  %v1738_v12 = vld [vmem:[%s12015_s1 + $0x190] sm:$0xff] }
 0x121   :  { %1842 = vxpose.xlu1.b32.cont [11/16] (narrow) %v1698_v31, 56  ;;  %3718 = vmatprep.subr.bf16.mxu0 %v7403_v33  ;;  %v7431_v5 = vld [vmem:[%s12016_s2 + $0x124] ss:$12 sps:$4 sm:$0xff]   ;;  %v7452_v14 = vld [vmem:[%s12016_s2 + $0x248] ss:$12 sps:$4 sm:$0xff]   ;;  %v1739_v17 = vld [vmem:[%s12015_s1 + $0x198] sm:$0xff] }
 0x122   :  { %7044 = vmatpush3.bf16.msra.mxu1 %v7425_v47  ;;  %v1722_v13 = vld [vmem:[%s12015_s1 + $0x110] sm:$0xff]  ;;  %v7438_v15 = vld [vmem:[%s12016_s2 + $0x138] ss:$12 sps:$4 sm:$0xff]   ;;  %v1741_v25 = vld [vmem:[%s12015_s1 + $0x1a8] sm:$0xff] }
 0x123   :  { %7045 = vmatprep.subr.bf16.mxu1 %v7429_v52  ;;  %v7441_v16 = vld [vmem:[%s12016_s2 + $0x154] ss:$12 sps:$4 sm:$0xff]   ;;  %v1723_v18 = vld [vmem:[%s12015_s1 + $0x118] sm:$0xff]  ;;  %v7451_v24 = vld [vmem:[%s12016_s2 + $0x184] ss:$12 sps:$4 sm:$0xff]  }
 0x124   :  { %1875 = vxpose.xlu0.b32.cont [12/16] (narrow) %v1715_v36, 56  ;;  %3719 = vmatpush1.bf16.msra.mxu0 %v7405_v38  ;;  %v7443_v19 = vld [vmem:[%s12016_s2 + $0x150] ss:$12 sps:$4 sm:$0xff]   ;;  %v7446_v20 = vld [vmem:[%s12016_s2 + $0x16c] ss:$12 sps:$4 sm:$0xff]   ;;  %v1740_v21 = vld [vmem:[%s12015_s1 + $0x1a0] sm:$0xff] }
 0x125   :  { %1843 = vxpose.xlu1.b32.cont [12/16] (narrow) %v1699_v37, 56  ;;  %3720 = vmatprep.subr.bf16.mxu0 %v7406_v39  ;;  %v1724_v22 = vld [vmem:[%s12015_s1 + $0x120] sm:$0xff]  ;;  %v7448_v23 = vld [vmem:[%s12016_s2 + $0x168] ss:$12 sps:$4 sm:$0xff]   ;;  %v1743_v30 = vld [vmem:[%s12015_s1 + $0x1b8] sm:$0xff] }
 0x126   :  { %7046 = vmatpush3.bf16.msra.mxu1 %v7430_v53  ;;  %v1725_v26 = vld [vmem:[%s12015_s1 + $0x128] sm:$0xff]  ;;  %v1742_v27 = vld [vmem:[%s12015_s1 + $0x1b0] sm:$0xff]  ;;  %v1676_v29 = vld [vmem:[%s12014_s0] sm:$0xff] }
 0x127   :  { %7047 = vmatprep.subr.bf16.mxu1 %v7434_v58  ;;  %v1726_v28 = vld [vmem:[%s12015_s1 + $0x130] sm:$0xff]  ;;  %v1727_v31 = vld [vmem:[%s12015_s1 + $0x138] sm:$0xff]  ;;  %v1678_v32 = vsub.f32 0.0, %v1676_v29  ;;  %v1744_v33 = vld [vmem:[%s12015_s1 + $0x1c0] sm:$0xff] }
 0x128   :  { %1876 = vxpose.xlu0.b32.cont [13/16] (narrow) %v1716_v42, 56  ;;  %3721 = vmatpush1.bf16.msra.mxu0 %v7408_v44  ;;  %v1728_v34 = vld [vmem:[%s12015_s1 + $0x140] sm:$0xff]  ;;  %v1745_v36 = vld [vmem:[%s12015_s1 + $0x1c8] sm:$0xff]  ;;  %v1746_v38 = vld [vmem:[%s12015_s1 + $0x1d0] sm:$0xff] }
 0x129   :  { %1844 = vxpose.xlu1.b32.cont [13/16] (narrow) %v1700_v43, 56  ;;  %3722 = vmatprep.subr.bf16.mxu0 %v7411_v45  ;;  %v1680_v35 = vmul.f32 1.442695, %v1678_v32  ;;  %v1729_v37 = vld [vmem:[%s12015_s1 + $0x148] sm:$0xff]  ;;  %v1730_v39 = vld [vmem:[%s12015_s1 + $0x150] sm:$0xff]  ;;  %v1747_v40 = vld [vmem:[%s12015_s1 + $0x1d8] sm:$0xff] }
 0x12a   :  { %7048 = vmatpush3.bf16.msra.mxu1 %v7435_v59  ;;  %v1731_v41 = vld [vmem:[%s12015_s1 + $0x158] sm:$0xff]  ;;  %v1748_v43 = vld [vmem:[%s12015_s1 + $0x1e0] sm:$0xff]  ;;  %v1749_v46 = vld [vmem:[%s12015_s1 + $0x1e8] sm:$0xff] }
 0x12b   :  { %7049 = vmatprep.subr.bf16.mxu1 %v7439_v0  ;;  %7673 = vpow2.f32 %v1680_v35  ;;  %v1732_v44 = vld [vmem:[%s12015_s1 + $0x160] sm:$0xff]  ;;  %v1733_v47 = vld [vmem:[%s12015_s1 + $0x168] sm:$0xff]  ;;  %v1751_v52 = vld [vmem:[%s12015_s1 + $0x1f8] sm:$0xff] }
 0x12c   :  { %1877 = vxpose.xlu0.b32.cont [14/16] (narrow) %v1717_v48, 56  ;;  %3723 = vmatpush1.bf16.msra.mxu0 %v7413_v50  ;;  %v2122_v48 = vlaneseq  ;;  %v1734_v50 = vld [vmem:[%s12015_s1 + $0x170] sm:$0xff]  ;;  %v1735_v53 = vld [vmem:[%s12015_s1 + $0x178] sm:$0xff]  ;;  %v1752_v58 = vld [vmem:[%s12015_s1 + $0x200] sm:$0xff] }
 0x12d   :  { %1845 = vxpose.xlu1.b32.cont [14/16] (narrow) %v1701_v49, 56  ;;  %3724 = vmatprep.subr.bf16.mxu0 %v7416_v51  ;;  %v1750_v49 = vld [vmem:[%s12015_s1 + $0x1f0] sm:$0xff]  ;;  %v1753_v0 = vld [vmem:[%s12015_s1 + $0x208] sm:$0xff] }
 0x12e   :  { %7050 = vmatpush3.bf16.msra.mxu1 %v7440_v1  ;;  %v9239_v51 = vshrl.u32 %v2122_v48, 7  ;;  %v7461_v29 = vld [vmem:[%s12016_s2 + $0x1b4] ss:$12 sps:$4 sm:$0xff]   ;;  %v1773_v32 = vld [vmem:[%s12015_s1 + $0x2a8] sm:$0xff] }
 0x12f   :  { %7051 = vmatprep.subr.bf16.mxu1 %v7444_v6  ;;  %v1754_v6 = vld [vmem:[%s12015_s1 + $0x210] sm:$0xff] }
 0x130   :  { %1878 = vxpose.xlu0.b32.cont [15/16] (narrow) %v1718_v54, 56  ;;  %3725 = vmatpush1.bf16.msra.mxu0 %v7418_v56  ;;  %v9248_v54 = vsub.s32 1, %v9239_v51  ;;  %v1758_v48 = vld [vmem:[%s12015_s1 + $0x230] sm:$0xff] }
 0x131   :  { %1846 = vxpose.xlu1.b32.cont [15/16] (narrow) %v1702_v55, 56  ;;  %3726 = vmatprep.subr.bf16.mxu0 %v7421_v57  ;;  %v9251_v55 = vsub.s32 0, %v9239_v51  ;;  %v1768_v57 = vld [vmem:[%s12015_s1 + $0x280] sm:$0xff] }
 0x132   :  { %7052 = vmatpush3.bf16.msra.mxu1 %v7445_v7  ;;  %12037 = vst [vmem:[#allocation6_spill] sm:$0xff] %v9248_v54 }
 0x133   :  { %7077 = vmatprep.subr.bf16.mxu1 %v7452_v14  ;;  %v7453_v14 = vld [vmem:[%s12016_s2 + $0x188] ss:$12 sps:$4 sm:$0xff]  }
 0x134   :  { %1879 = vxpose.xlu0.b32.end [16/16] (narrow) %v1719_v60, 56  ;;  %3727 = vmatpush1.bf16.msra.mxu0 %v7423_v62 }
 0x135   :  { %1847 = vxpose.xlu1.b32.end [16/16] (narrow) %v1703_v61, 56  ;;  %3728 = vmatprep.subr.bf16.mxu0 %v7426_v63  ;;  %v7674_v42 = vpop.eup %7673  ;;  %v1769_v61 = vld [vmem:[%s12015_s1 + $0x288] sm:$0xff] }
 0x136   :  { %v1684_v45 = vadd.f32 1.0, %v7674_v42 }
 0x138   :  { %1928 = vxpose.xlu0.b32.start [1/16] (narrow) %v1736_v2, 56  ;;  %3729 = vmatpush1.bf16.msra.mxu0 %v7428_v4  ;;  %7675 = vrcp.f32 %v1684_v45 }
 0x139   :  { %1896 = vxpose.xlu1.b32.start [1/16] (narrow) %v1720_v3, 56  ;;  %3730 = vmatprep.subr.bf16.mxu0 %v7431_v5  ;;  %v1770_v3 = vld [vmem:[%s12015_s1 + $0x290] sm:$0xff] }
 0x13c   :  { %1929 = vxpose.xlu0.b32.cont [2/16] (narrow) %v1737_v8, 56  ;;  %3731 = vmatpush1.bf16.msra.mxu0 %v7433_v10  ;;  %v1755_v10 = vld [vmem:[%s12015_s1 + $0x218] sm:$0xff] }
 0x13d   :  { %1897 = vxpose.xlu1.b32.cont [2/16] (narrow) %v1721_v9, 56  ;;  %3732 = vmatprep.subr.bf16.mxu0 %v7436_v11  ;;  %v1771_v9 = vld [vmem:[%s12015_s1 + $0x298] sm:$0xff] }
 0x140   :  { %1930 = vxpose.xlu0.b32.cont [3/16] (narrow) %v1738_v12, 56  ;;  %3733 = vmatpush1.bf16.msra.mxu0 %v7438_v15 }
 0x141   :  { %1898 = vxpose.xlu1.b32.cont [3/16] (narrow) %v1722_v13, 56  ;;  %3734 = vmatprep.subr.bf16.mxu0 %v7441_v16  ;;  %v7449_v13 = vld [vmem:[%s12016_s2 + $0x180] ss:$12 sps:$4 sm:$0xff]  }
 0x142   :  { %v9253_v56 = vpop.eup %7675 }
 0x143   :  { %v9263_v59 = vrot.slane %v9253_v56, %v9248_v54  ;;  %v9267_v60 = vrot.slane %v9253_v56, %v9251_v55 }
 0x144   :  { %1931 = vxpose.xlu0.b32.cont [4/16] (narrow) %v1739_v17, 56  ;;  %3735 = vmatpush1.bf16.msra.mxu0 %v7443_v19  ;;  %v7456_v17 = vld [vmem:[%s12016_s2 + $0x19c] ss:$12 sps:$4 sm:$0xff]   ;;  %v1772_v19 = vld [vmem:[%s12015_s1 + $0x2a0] sm:$0xff] }
 0x145   :  { %1899 = vxpose.xlu1.b32.cont [4/16] (narrow) %v1723_v18, 56  ;;  %3736 = vmatprep.subr.bf16.mxu0 %v7446_v20  ;;  %v7457_v18 = vld [vmem:[%s12016_s2 + $0x260] ss:$12 sps:$4 sm:$0xff]  }
 0x146   :  { %v1756_v20 = vld [vmem:[%s12015_s1 + $0x220] sm:$0xff] }
 0x148   :  { %1932 = vxpose.xlu0.b32.cont [5/16] (narrow) %v1740_v21, 56  ;;  %3737 = vmatpush1.bf16.msra.mxu0 %v7448_v23  ;;  %v7454_v23 = vld [vmem:[%s12016_s2 + $0x198] ss:$12 sps:$4 sm:$0xff]  }
 0x149   :  { %1900 = vxpose.xlu1.b32.cont [5/16] (narrow) %v1724_v22, 56  ;;  %3777 = vmatprep.subr.bf16.mxu0 %v7451_v24  ;;  %v7458_v24 = vld [vmem:[%s12016_s2 + $0x1a0] ss:$12 sps:$4 sm:$0xff]  }
 0x14c   :  { %1933 = vxpose.xlu0.b32.cont [6/16] (narrow) %v1741_v25, 56 }
 0x14d   :  { %1901 = vxpose.xlu1.b32.cont [6/16] (narrow) %v1725_v26, 56 }
 0x150   :  { %1934 = vxpose.xlu0.b32.cont [7/16] (narrow) %v1742_v27, 56 }
 0x151   :  { %1902 = vxpose.xlu1.b32.cont [7/16] (narrow) %v1726_v28, 56 }
 0x154   :  { %1935 = vxpose.xlu0.b32.cont [8/16] (narrow) %v1743_v30, 56  ;;  %v7459_v30 = vld [vmem:[%s12016_s2 + $0x1b0] ss:$12 sps:$4 sm:$0xff]  }
 0x155   :  { %1903 = vxpose.xlu1.b32.cont [8/16] (narrow) %v1727_v31, 56  ;;  %v7462_v31 = vld [vmem:[%s12016_s2 + $0x278] ss:$12 sps:$4 sm:$0xff]  }
 0x158   :  { %1936 = vxpose.xlu0.b32.cont [9/16] (narrow) %v1744_v33, 56  ;;  %v1757_v33 = vld [vmem:[%s12015_s1 + $0x228] sm:$0xff] }
 0x159   :  { %1904 = vxpose.xlu1.b32.cont [9/16] (narrow) %v1728_v34, 56 }
 0x15c   :  { %1937 = vxpose.xlu0.b32.cont [10/16] (narrow) %v1745_v36, 56  ;;  %v7463_v36 = vld [vmem:[%s12016_s2 + $0x1b8] ss:$12 sps:$4 sm:$0xff]  }
 0x15d   :  { %1905 = vxpose.xlu1.b32.cont [10/16] (narrow) %v1729_v37, 56  ;;  %v7466_v37 = vld [vmem:[%s12016_s2 + $0x1cc] ss:$12 sps:$4 sm:$0xff]  }
 0x160   :  { %1938 = vxpose.xlu0.b32.cont [11/16] (narrow) %v1746_v38, 56 }
 0x161   :  { %1906 = vxpose.xlu1.b32.cont [11/16] (narrow) %v1730_v39, 56 }
 0x164   :  { %1939 = vxpose.xlu0.b32.cont [12/16] (narrow) %v1747_v40, 56  ;;  %v7467_v40 = vld [vmem:[%s12016_s2 + $0x290] ss:$12 sps:$4 sm:$0xff]  }
 0x165   :  { %1907 = vxpose.xlu1.b32.cont [12/16] (narrow) %v1731_v41, 56 }
 0x168   :  { %1940 = vxpose.xlu0.b32.cont [13/16] (narrow) %v1748_v43, 56  ;;  %v7464_v43 = vld [vmem:[%s12016_s2 + $0x1c8] ss:$12 sps:$4 sm:$0xff]  }
 0x169   :  { %1908 = vxpose.xlu1.b32.cont [13/16] (narrow) %v1732_v44, 56  ;;  %v7468_v44 = vld [vmem:[%s12016_s2 + $0x1d0] ss:$12 sps:$4 sm:$0xff]  }
 0x16c   :  { %1941 = vxpose.xlu0.b32.cont [14/16] (narrow) %v1749_v46, 56 }
 0x16d   :  { %1909 = vxpose.xlu1.b32.cont [14/16] (narrow) %v1733_v47, 56  ;;  %v1774_v47 = vld [vmem:[%s12015_s1 + $0x2b0] sm:$0xff] }
 0x170   :  { %1942 = vxpose.xlu0.b32.cont [15/16] (narrow) %v1750_v49, 56 }
 0x171   :  { %1910 = vxpose.xlu1.b32.cont [15/16] (narrow) %v1734_v50, 56 }
 0x174   :  { %1943 = vxpose.xlu0.b32.end [16/16] (narrow) %v1751_v52, 56  ;;  %v7471_v52 = vld [vmem:[%s12016_s2 + $0x1e4] ss:$12 sps:$4 sm:$0xff]  }
 0x175   :  { %1911 = vxpose.xlu1.b32.end [16/16] (narrow) %v1735_v53, 56  ;;  %v7472_v53 = vld [vmem:[%s12016_s2 + $0x2a8] ss:$12 sps:$4 sm:$0xff]  }
 0x178   :  { %1992 = vxpose.xlu0.b32.start [1/16] (narrow) %v1768_v57, 56  ;;  %v1880_v62 = vpop.trf.xlu0  ;;  %v1775_v57 = vld [vmem:[%s12015_s1 + $0x2b8] sm:$0xff] }
 0x179   :  { %1960 = vxpose.xlu1.b32.start [1/16] (narrow) %v1752_v58, 56  ;;  %v1848_v63 = vpop.trf.xlu1  ;;  %v2168_v1 = vmul.f32 %v9263_v59, %v1880_v62  ;;  %v7469_v62 = vld [vmem:[%s12016_s2 + $0x1e0] ss:$12 sps:$4 sm:$0xff]  }
 0x17a   :  { %v2167_v2 = vmul.f32 %v9267_v60, %v1848_v63  ;;  %v7473_v63 = vld [vmem:[%s12016_s2 + $0x1e8] ss:$12 sps:$4 sm:$0xff]  }
 0x17c   :  { %1993 = vxpose.xlu0.b32.cont [2/16] (narrow) %v1769_v61, 56  ;;  %v1881_v4 = vpop.trf.xlu0 }
 0x17d   :  { %1961 = vxpose.xlu1.b32.cont [2/16] (narrow) %v1753_v0, 56  ;;  %v1849_v5 = vpop.trf.xlu1  ;;  %v2177_v7 = vmul.f32 %v9263_v59, %v1881_v4  ;;  %v1759_v0 = vld [vmem:[%s12015_s1 + $0x238] sm:$0xff] }
 0x17e   :  { %v2176_v8 = vmul.f32 %v9267_v60, %v1849_v5  ;;  %v7477_v5 = vld [vmem:[%s12016_s2 + $0x2c0] ss:$12 sps:$4 sm:$0xff]  }
 0x17f   :  { %v2231_v12 = vpack.c.bf16 %v2177_v7, %v2168_v1 }
 0x180   :  { %v2230_v11 = vpack.c.bf16 %v2176_v8, %v2167_v2  ;;  %1994 = vxpose.xlu0.b32.cont [3/16] (narrow) %v1770_v3, 56  ;;  %v1882_v15 = vpop.trf.xlu0  ;;  %v7476_v2 = vld [vmem:[%s12016_s2 + $0x1fc] ss:$12 sps:$4 sm:$0xff]   ;;  %v7478_v8 = vld [vmem:[%s12016_s2 + $0x200] ss:$12 sps:$4 sm:$0xff]  }
 0x181   :  { %1962 = vxpose.xlu1.b32.cont [3/16] (narrow) %v1754_v6, 56  ;;  %v1850_v16 = vpop.trf.xlu1  ;;  %4093 = vmatprep.mubr.bf16.mxu1 %v2231_v12  ;;  %v2186_v21 = vmul.f32 %v9263_v59, %v1882_v15  ;;  %v7474_v6 = vld [vmem:[%s12016_s2 + $0x1f8] ss:$12 sps:$4 sm:$0xff]   ;;  %v1777_v15 = vld [vmem:[%s12015_s1 + $0x2c8] sm:$0xff] }
 0x182   :  { %3738 = vmatprep.mubr.bf16.mxu0 %v2231_v12  ;;  %4094 = vmatmul.mubr.bf16.vlgmr.msra.gmra.mrb[0].mxu1 %v2230_v11  ;;  %v2185_v22 = vmul.f32 %v9267_v60, %v1850_v16  ;;  %v7479_v12 = vld [vmem:[%s12016_s2 + $0x210] ss:$12 sps:$4 sm:$0xff]   ;;  %v1761_v16 = vld [vmem:[%s12015_s1 + $0x248] sm:$0xff] }
 0x183   :  { %3739 = vmatmul.mubr.bf16.vlgmr.msra.gmra.mrb[0].mxu0 %v2230_v11  ;;  %7078 = vmatpush3.bf16.msra.mxu1 %v7453_v14  ;;  %v7482_v11 = vld [vmem:[%s12016_s2 + $0x2d8] ss:$12 sps:$4 sm:$0xff]  }
 0x184   :  { %3778 = vmatpush1.bf16.msra.mxu0 %v7449_v13  ;;  %1995 = vxpose.xlu0.b32.cont [4/16] (narrow) %v1771_v9, 56  ;;  %v1883_v25 = vpop.trf.xlu0  ;;  %v7483_v14 = vld [vmem:[%s12016_s2 + $0x218] ss:$12 sps:$4 sm:$0xff]  }
 0x185   :  { %1963 = vxpose.xlu1.b32.cont [4/16] (narrow) %v1755_v10, 56  ;;  %v1851_v26 = vpop.trf.xlu1  ;;  %v2195_v27 = vmul.f32 %v9263_v59, %v1883_v25  ;;  %3779 = vmatprep.subr.bf16.mxu0 %v7456_v17  ;;  %v7481_v10 = vld [vmem:[%s12016_s2 + $0x214] ss:$12 sps:$4 sm:$0xff]   ;;  %v7486_v17 = vld [vmem:[%s12016_s2 + $0x22c] ss:$12 sps:$4 sm:$0xff]  }
 0x186   :  { %v2194_v28 = vmul.f32 %v9267_v60, %v1851_v26  ;;  %7079 = vmatprep.subr.bf16.mxu1 %v7457_v18  ;;  %v7487_v18 = vld [vmem:[%s12016_s2 + $0x2f0] ss:$12 sps:$4 sm:$0xff]   ;;  %v7489_v25 = vld [vmem:[%s12016_s2 + $0x240] ss:$12 sps:$4 sm:$0xff]  }
 0x187   :  { %v2240_v34 = vpack.c.bf16 %v2195_v27, %v2186_v21  ;;  %7080 = vmatpush3.bf16.msra.mxu1 %v7458_v24  ;;  %v1762_v21 = vld [vmem:[%s12015_s1 + $0x250] sm:$0xff]  ;;  %v1779_v26 = vld [vmem:[%s12015_s1 + $0x2d8] sm:$0xff] }
 0x188   :  { %v9334_v35 = vpack.c.bf16 %v2194_v28, %v2185_v22  ;;  %3780 = vmatpush1.bf16.msra.mxu0 %v7454_v23  ;;  %1996 = vxpose.xlu0.b32.cont [5/16] (narrow) %v1772_v19, 56  ;;  %v1884_v38 = vpop.trf.xlu0  ;;  %v7484_v19 = vld [vmem:[%s12016_s2 + $0x228] ss:$12 sps:$4 sm:$0xff]   ;;  %v7488_v22 = vld [vmem:[%s12016_s2 + $0x230] ss:$12 sps:$4 sm:$0xff]  }
 0x189   :  { %1964 = vxpose.xlu1.b32.cont [5/16] (narrow) %v1756_v20, 56  ;;  %v1852_v39 = vpop.trf.xlu1  ;;  %3781 = vmatprep.subr.bf16.mxu0 %v7461_v29  ;;  %v2204_v41 = vmul.f32 %v9263_v59, %v1884_v38  ;;  %v1778_v20 = vld [vmem:[%s12015_s1 + $0x2d0] sm:$0xff]  ;;  %v1763_v27 = vld [vmem:[%s12015_s1 + $0x258] sm:$0xff] }
 0x18a   :  { %4101 = vmatprep.mubr.bf16.mxu1 %v2240_v34  ;;  %7081 = vmatprep.subr.bf16.mxu1 %v7462_v31  ;;  %v2203_v42 = vmul.f32 %v9267_v60, %v1852_v39  ;;  %v7491_v23 = vld [vmem:[%s12016_s2 + $0x244] ss:$12 sps:$4 sm:$0xff]   ;;  %v7516_v24 = vld [vmem:[%s12016_s2 + $0x3c8] ss:$12 sps:$4 sm:$0xff]  }
 0x18b   :  { %4102 = vmatmul.mubr.bf16.gmra.mrb[4].mxu1 %v9334_v35  ;;  %3748 = vmatprep.mubr.bf16.mxu0 %v2240_v34  ;;  %v7494_v28 = vld [vmem:[%s12016_s2 + $0x25c] ss:$12 sps:$4 sm:$0xff]   ;;  %v7492_v29 = vld [vmem:[%s12016_s2 + $0x258] ss:$12 sps:$4 sm:$0xff]   ;;  %v1782_v38 = vld [vmem:[%s12015_s1 + $0x2f0] sm:$0xff] }
 0x18c   :  { %3782 = vmatpush1.bf16.msra.mxu0 %v7459_v30  ;;  %7082 = vmatpush3.bf16.msra.mxu1 %v7463_v36  ;;  %v1885_v45 = vpop.trf.xlu0  ;;  %v1780_v30 = vld [vmem:[%s12015_s1 + $0x2e0] sm:$0xff]  ;;  %v1781_v34 = vld [vmem:[%s12015_s1 + $0x2e8] sm:$0xff]  ;;  %v1766_v39 = vld [vmem:[%s12015_s1 + $0x270] sm:$0xff] }
 0x18d   :  { %1997 = vxpose.xlu0.b32.cont [6/16] (narrow) %v1773_v32, 56  ;;  %1965 = vxpose.xlu1.b32.cont [6/16] (narrow) %v1757_v33, 56  ;;  %v1853_v46 = vpop.trf.xlu1  ;;  %v2213_v49 = vmul.f32 %v9263_v59, %v1885_v45  ;;  %v1764_v31 = vld [vmem:[%s12015_s1 + $0x260] sm:$0xff]  ;;  %v7495_v33 = vld [vmem:[%s12016_s2 + $0x270] ss:$12 sps:$4 sm:$0xff]   ;;  %v9504_v45 = vsub.s32 3, %v9239_v51 }
 0x18e   :  { %3783 = vmatprep.subr.bf16.mxu0 %v7466_v37  ;;  %v2212_v50 = vmul.f32 %v9267_v60, %v1853_v46  ;;  %7083 = vmatprep.subr.bf16.mxu1 %v7467_v40  ;;  %v7497_v32 = vld [vmem:[%s12016_s2 + $0x274] ss:$12 sps:$4 sm:$0xff]   ;;  %v7500_v36 = vld [vmem:[%s12016_s2 + $0x28c] ss:$12 sps:$4 sm:$0xff]   ;;  %v7503_v40 = vld [vmem:[%s12016_s2 + $0x2a4] ss:$12 sps:$4 sm:$0xff]  }
 0x18f   :  { %v2249_v58 = vpack.c.bf16 %v2213_v49, %v2204_v41  ;;  %3749 = vmatmul.mubr.bf16.gmra.mrb[4].mxu0 %v9334_v35  ;;  %v1765_v35 = vld [vmem:[%s12015_s1 + $0x268] sm:$0xff]  ;;  %v9507_v46 = vsub.s32 2, %v9239_v51  ;;  %v1784_v49 = vld [vmem:[%s12015_s1 + $0x300] sm:$0xff] }
 0x190   :  { %v2248_v61 = vpack.c.bf16 %v2212_v50, %v2203_v42  ;;  %3784 = vmatpush1.bf16.msra.mxu0 %v7464_v43  ;;  %7084 = vmatpush3.bf16.msra.mxu1 %v7468_v44  ;;  %v1886_v1 = vpop.trf.xlu0  ;;  %v7498_v37 = vld [vmem:[%s12016_s2 + $0x288] ss:$12 sps:$4 sm:$0xff]   ;;  %v7501_v41 = vld [vmem:[%s12016_s2 + $0x2a0] ss:$12 sps:$4 sm:$0xff]   ;;  %v1783_v42 = vld [vmem:[%s12015_s1 + $0x2f8] sm:$0xff] }
 0x191   :  { %1998 = vxpose.xlu0.b32.cont [7/16] (narrow) %v1774_v47, 56  ;;  %1966 = vxpose.xlu1.b32.cont [7/16] (narrow) %v1758_v48, 56  ;;  %v1854_v3 = vpop.trf.xlu1  ;;  %v2222_v4 = vmul.f32 %v9263_v59, %v1886_v1  ;;  %v1776_v59 = vld [vmem:[%s12015_s1 + $0x2c0] sm:$0xff]  ;;  %v1767_v43 = vld [vmem:[%s12015_s1 + $0x278] sm:$0xff] }
 0x192   :  { %3785 = vmatprep.subr.bf16.mxu0 %v7471_v52  ;;  %4109 = vmatprep.mubr.bf16.mxu1 %v2249_v58  ;;  %v2221_v7 = vmul.f32 %v9267_v60, %v1854_v3  ;;  %v1760_v60 = vld [vmem:[%s12015_s1 + $0x240] sm:$0xff]  ;;  %v7506_v44 = vld [vmem:[%s12016_s2 + $0x2bc] ss:$12 sps:$4 sm:$0xff]   ;;  %v9523_v52 = vrot.slane %v9253_v56, %v9504_v45  ;;  %v1802_v3 = vld [vmem:[%s12015_s1 + $0x390] sm:$0xff] }
 0x193   :  { %4110 = vmatmul.mubr.bf16.gmra.mrb[8].mxu1 %v2248_v61  ;;  %7085 = vmatprep.subr.bf16.mxu1 %v7472_v53  ;;  %v2258_v9 = vpack.c.bf16 %v2222_v4, %v2222_v4  ;;  %v7504_v47 = vld [vmem:[%s12016_s2 + $0x2b8] ss:$12 sps:$4 sm:$0xff]   ;;  %v7509_v50 = vld [vmem:[%s12016_s2 + $0x2d4] ss:$12 sps:$4 sm:$0xff]   ;;  %v9527_v53 = vrot.slane %v9253_v56, %v9507_v46 }
 0x194   :  { %3786 = vmatpush1.bf16.msra.mxu0 %v7469_v62  ;;  %7086 = vmatpush3.bf16.msra.mxu1 %v7473_v63  ;;  %v2257_v13 = vpack.c.bf16 %v2221_v7, %v2221_v7  ;;  %v1800_v48 = vld [vmem:[%s12015_s1 + $0x380] sm:$0xff]  ;;  %v1785_v63 = vld [vmem:[%s12015_s1 + $0x308] sm:$0xff]  ;;  %v1786_v7 = vld [vmem:[%s12015_s1 + $0x310] sm:$0xff] }
 0x195   :  { %1999 = vxpose.xlu0.b32.cont [8/16] (narrow) %v1775_v57, 56  ;;  %1967 = vxpose.xlu1.b32.cont [8/16] (narrow) %v1759_v0, 56  ;;  %v1801_v57 = vld [vmem:[%s12015_s1 + $0x388] sm:$0xff] }
 0x196   :  { %3787 = vmatprep.subr.bf16.mxu0 %v7476_v2  ;;  %7087 = vmatprep.subr.bf16.mxu1 %v7477_v5  ;;  %v7512_v0 = vld [vmem:[%s12016_s2 + $0x2ec] ss:$12 sps:$4 sm:$0xff]   ;;  %v7510_v4 = vld [vmem:[%s12016_s2 + $0x2e8] ss:$12 sps:$4 sm:$0xff]  }
 0x197   :  { %4117 = vmatprep.mubr.bf16.mxu1 %v2258_v9  ;;  %3758 = vmatprep.mubr.bf16.mxu0 %v2249_v58  ;;  %v7507_v58 = vld [vmem:[%s12016_s2 + $0x2d0] ss:$12 sps:$4 sm:$0xff]  }
 0x198   :  { %3788 = vmatpush1.bf16.msra.mxu0 %v7474_v6  ;;  %7088 = vmatpush3.bf16.msra.mxu1 %v7478_v8 }
 0x199   :  { %2000 = vxpose.xlu0.b32.cont [9/16] (narrow) %v1776_v59, 56  ;;  %1968 = vxpose.xlu1.b32.cont [9/16] (narrow) %v1760_v60, 56 }
 0x19a   :  { %3789 = vmatprep.subr.bf16.mxu0 %v7481_v10  ;;  %7089 = vmatprep.subr.bf16.mxu1 %v7482_v11  ;;  %v7517_v10 = vld [vmem:[%s12016_s2 + $0x308] ss:$12 sps:$4 sm:$0xff]  }
 0x19b   :  { %4118 = vmatmul.mubr.bf16.gmra.mrb[12].mxu1 %v2257_v13  ;;  %3759 = vmatmul.mubr.bf16.gmra.mrb[8].mxu0 %v2248_v61 }
 0x19c   :  { %3790 = vmatpush1.bf16.msra.mxu0 %v7479_v12  ;;  %7090 = vmatpush3.bf16.msra.mxu1 %v7483_v14  ;;  %v1803_v12 = vld [vmem:[%s12015_s1 + $0x398] sm:$0xff]  ;;  %v7513_v14 = vld [vmem:[%s12016_s2 + $0x300] ss:$12 sps:$4 sm:$0xff]  }
 0x19d   :  { %2001 = vxpose.xlu0.b32.cont [10/16] (narrow) %v1777_v15, 56  ;;  %1969 = vxpose.xlu1.b32.cont [10/16] (narrow) %v1761_v16, 56  ;;  %v7521_v15 = vld [vmem:[%s12016_s2 + $0x3e0] ss:$12 sps:$4 sm:$0xff]  }
 0x19e   :  { %3791 = vmatprep.subr.bf16.mxu0 %v7486_v17  ;;  %7091 = vmatprep.subr.bf16.mxu1 %v7487_v18  ;;  %v7520_v18 = vld [vmem:[%s12016_s2 + $0x31c] ss:$12 sps:$4 sm:$0xff]  }
 0x19f   :  { %3768 = vmatprep.mubr.bf16.mxu0 %v2258_v9  ;;  %v7515_v9 = vld [vmem:[%s12016_s2 + $0x304] ss:$12 sps:$4 sm:$0xff]  }
 0x1a0   :  { %3792 = vmatpush1.bf16.msra.mxu0 %v7484_v19  ;;  %7092 = vmatpush3.bf16.msra.mxu1 %v7488_v22  ;;  %v1788_v22 = vld [vmem:[%s12015_s1 + $0x320] sm:$0xff] }
 0x1a1   :  { %2002 = vxpose.xlu0.b32.cont [11/16] (narrow) %v1778_v20, 56  ;;  %1970 = vxpose.xlu1.b32.cont [11/16] (narrow) %v1762_v21, 56  ;;  %v1804_v21 = vld [vmem:[%s12015_s1 + $0x3a0] sm:$0xff] }
 0x1a2   :  { %3793 = vmatprep.subr.bf16.mxu0 %v7491_v23  ;;  %7117 = vmatprep.subr.bf16.mxu1 %v7516_v24  ;;  %v7518_v23 = vld [vmem:[%s12016_s2 + $0x318] ss:$12 sps:$4 sm:$0xff]   ;;  %v7522_v24 = vld [vmem:[%s12016_s2 + $0x320] ss:$12 sps:$4 sm:$0xff]  }
 0x1a3   :  { %3769 = vmatmul.mubr.bf16.gmra.mrb[12].mxu0 %v2257_v13  ;;  %v1787_v13 = vld [vmem:[%s12015_s1 + $0x318] sm:$0xff] }
 0x1a4   :  { %3794 = vmatpush1.bf16.msra.mxu0 %v7489_v25 }
 0x1a5   :  { %2003 = vxpose.xlu0.b32.cont [12/16] (narrow) %v1779_v26, 56  ;;  %1971 = vxpose.xlu1.b32.cont [12/16] (narrow) %v1763_v27, 56 }
 0x1a6   :  { %3795 = vmatprep.subr.bf16.mxu0 %v7494_v28 }
 0x1a8   :  { %3796 = vmatpush1.bf16.msra.mxu0 %v7492_v29  ;;  %v7525_v29 = vld [vmem:[%s12016_s2 + $0x334] ss:$12 sps:$4 sm:$0xff]  }
 0x1a9   :  { %2004 = vxpose.xlu0.b32.cont [13/16] (narrow) %v1780_v30, 56  ;;  %1972 = vxpose.xlu1.b32.cont [13/16] (narrow) %v1764_v31, 56 }
 0x1aa   :  { %3797 = vmatprep.subr.bf16.mxu0 %v7497_v32  ;;  %v1805_v32 = vld [vmem:[%s12015_s1 + $0x3a8] sm:$0xff] }
 0x1ac   :  { %3798 = vmatpush1.bf16.msra.mxu0 %v7495_v33  ;;  %v1789_v33 = vld [vmem:[%s12015_s1 + $0x328] sm:$0xff] }
 0x1ad   :  { %2005 = vxpose.xlu0.b32.cont [14/16] (narrow) %v1781_v34, 56  ;;  %1973 = vxpose.xlu1.b32.cont [14/16] (narrow) %v1765_v35, 56  ;;  %v7526_v34 = vld [vmem:[%s12016_s2 + $0x3f8] ss:$12 sps:$4 sm:$0xff]  }
 0x1ae   :  { %3799 = vmatprep.subr.bf16.mxu0 %v7500_v36 }
 0x1b0   :  { %3800 = vmatpush1.bf16.msra.mxu0 %v7498_v37  ;;  %v7523_v37 = vld [vmem:[%s12016_s2 + $0x330] ss:$12 sps:$4 sm:$0xff]  }
 0x1b1   :  { %2006 = vxpose.xlu0.b32.cont [15/16] (narrow) %v1782_v38, 56  ;;  %1974 = vxpose.xlu1.b32.cont [15/16] (narrow) %v1766_v39, 56  ;;  %v7527_v38 = vld [vmem:[%s12016_s2 + $0x338] ss:$12 sps:$4 sm:$0xff]  }
 0x1b2   :  { %3801 = vmatprep.subr.bf16.mxu0 %v7503_v40  ;;  %v7530_v39 = vld [vmem:[%s12016_s2 + $0x34c] ss:$12 sps:$4 sm:$0xff]   ;;  %v7531_v40 = vld [vmem:[%s12016_s2 + $0x410] ss:$12 sps:$4 sm:$0xff]  }
 0x1b4   :  { %3802 = vmatpush1.bf16.msra.mxu0 %v7501_v41 }
 0x1b5   :  { %2007 = vxpose.xlu0.b32.end [16/16] (narrow) %v1783_v42, 56  ;;  %1975 = vxpose.xlu1.b32.end [16/16] (narrow) %v1767_v43, 56 }
 0x1b6   :  { %3803 = vmatprep.subr.bf16.mxu0 %v7506_v44 }
 0x1b8   :  { %3804 = vmatpush1.bf16.msra.mxu0 %v7504_v47  ;;  %v1944_v61 = vpop.trf.xlu0 }
 0x1b9   :  { %2056 = vxpose.xlu0.b32.start [1/16] (narrow) %v1800_v48, 56  ;;  %2024 = vxpose.xlu1.b32.start [1/16] (narrow) %v1784_v49, 56  ;;  %v1912_v62 = vpop.trf.xlu1  ;;  %v2170_v1 = vmul.f32 %v9523_v52, %v1944_v61  ;;  %v1806_v49 = vld [vmem:[%s12015_s1 + $0x3b0] sm:$0xff] }
 0x1ba   :  { %3805 = vmatprep.subr.bf16.mxu0 %v7509_v50  ;;  %v2169_v2 = vmul.f32 %v9527_v53, %v1912_v62  ;;  %v1790_v50 = vld [vmem:[%s12015_s1 + $0x330] sm:$0xff] }
 0x1bc   :  { %3806 = vmatpush1.bf16.msra.mxu0 %v7507_v58  ;;  %v1945_v5 = vpop.trf.xlu0  ;;  %v7535_v58 = vld [vmem:[%s12016_s2 + $0x364] ss:$12 sps:$4 sm:$0xff]  }
 0x1bd   :  { %2057 = vxpose.xlu0.b32.cont [2/16] (narrow) %v1801_v57, 56  ;;  %2025 = vxpose.xlu1.b32.cont [2/16] (narrow) %v1785_v63, 56  ;;  %v1913_v6 = vpop.trf.xlu1  ;;  %v2179_v8 = vmul.f32 %v9523_v52, %v1945_v5  ;;  %v7528_v57 = vld [vmem:[%s12016_s2 + $0x348] ss:$12 sps:$4 sm:$0xff]   ;;  %v7532_v63 = vld [vmem:[%s12016_s2 + $0x350] ss:$12 sps:$4 sm:$0xff]  }
 0x1be   :  { %v2178_v59 = vmul.f32 %v9527_v53, %v1913_v6  ;;  %3807 = vmatprep.subr.bf16.mxu0 %v7512_v0  ;;  %v7533_v5 = vld [vmem:[%s12016_s2 + $0x360] ss:$12 sps:$4 sm:$0xff]  }
 0x1bf   :  { %v2233_v60 = vpack.c.bf16 %v2179_v8, %v2170_v1 }
 0x1c0   :  { %v2232_v11 = vpack.c.bf16 %v2178_v59, %v2169_v2  ;;  %3808 = vmatpush1.bf16.msra.mxu0 %v7510_v4  ;;  %v1946_v16 = vpop.trf.xlu0  ;;  %v1807_v2 = vld [vmem:[%s12015_s1 + $0x3b8] sm:$0xff]  ;;  %v7537_v59 = vld [vmem:[%s12016_s2 + $0x368] ss:$12 sps:$4 sm:$0xff]  }
 0x1c1   :  { %2058 = vxpose.xlu0.b32.cont [3/16] (narrow) %v1802_v3, 56  ;;  %2026 = vxpose.xlu1.b32.cont [3/16] (narrow) %v1786_v7, 56  ;;  %v1914_v17 = vpop.trf.xlu1  ;;  %v2188_v19 = vmul.f32 %v9523_v52, %v1946_v16  ;;  %v1791_v4 = vld [vmem:[%s12015_s1 + $0x338] sm:$0xff]  ;;  %v7536_v7 = vld [vmem:[%s12016_s2 + $0x428] ss:$12 sps:$4 sm:$0xff]  }
 0x1c2   :  { %4157 = vmatprep.mubr.bf16.mxu1 %v2233_v60  ;;  %3809 = vmatprep.mubr.bf16.mxu0 %v2233_v60  ;;  %v2187_v20 = vmul.f32 %v9527_v53, %v1914_v17  ;;  %v7541_v60 = vld [vmem:[%s12016_s2 + $0x440] ss:$12 sps:$4 sm:$0xff]   ;;  %v7543_v16 = vld [vmem:[%s12016_s2 + $0x390] ss:$12 sps:$4 sm:$0xff]   ;;  %v7546_v17 = vld [vmem:[%s12016_s2 + $0x458] ss:$12 sps:$4 sm:$0xff]  }
 0x1c3   :  { %4158 = vmatmul.mubr.bf16.vlgmr.msra.gmra.mrb[16].mxu1 %v2232_v11  ;;  %3810 = vmatmul.mubr.bf16.vlgmr.msra.gmra.mrb[0].mxu0 %v2232_v11 }
 0x1c4   :  { %3848 = vmatprep.subr.bf16.mxu0 %v7515_v9  ;;  %7118 = vmatpush3.bf16.msra.mxu1 %v7517_v10  ;;  %v1947_v25 = vpop.trf.xlu0  ;;  %v1792_v9 = vld [vmem:[%s12015_s1 + $0x340] sm:$0xff] }
 0x1c5   :  { %2059 = vxpose.xlu0.b32.cont [4/16] (narrow) %v1803_v12, 56  ;;  %2027 = vxpose.xlu1.b32.cont [4/16] (narrow) %v1787_v13, 56  ;;  %v1915_v26 = vpop.trf.xlu1  ;;  %v2197_v27 = vmul.f32 %v9523_v52, %v1947_v25  ;;  %v7538_v10 = vld [vmem:[%s12016_s2 + $0x378] ss:$12 sps:$4 sm:$0xff]   ;;  %v7545_v12 = vld [vmem:[%s12016_s2 + $0x394] ss:$12 sps:$4 sm:$0xff]  }
 0x1c6   :  { %v2196_v28 = vmul.f32 %v9527_v53, %v1915_v26  ;;  %3849 = vmatpush1.bf16.msra.mxu0 %v7513_v14  ;;  %7119 = vmatprep.subr.bf16.mxu1 %v7521_v15  ;;  %v7542_v13 = vld [vmem:[%s12016_s2 + $0x380] ss:$12 sps:$4 sm:$0xff]   ;;  %v7552_v25 = vld [vmem:[%s12016_s2 + $0x3b0] ss:$12 sps:$4 sm:$0xff]  }
 0x1c7   :  { %3850 = vmatprep.subr.bf16.mxu0 %v7520_v18  ;;  %v2242_v30 = vpack.c.bf16 %v2197_v27, %v2188_v19  ;;  %v1809_v14 = vld [vmem:[%s12015_s1 + $0x3c8] sm:$0xff]  ;;  %v7547_v19 = vld [vmem:[%s12016_s2 + $0x398] ss:$12 sps:$4 sm:$0xff]  }
 0x1c8   :  { %v2241_v31 = vpack.c.bf16 %v2196_v28, %v2187_v20  ;;  %7120 = vmatpush3.bf16.msra.mxu1 %v7522_v24  ;;  %v1948_v35 = vpop.trf.xlu0  ;;  %v1793_v15 = vld [vmem:[%s12015_s1 + $0x348] sm:$0xff]  ;;  %v1810_v20 = vld [vmem:[%s12015_s1 + $0x3d0] sm:$0xff]  ;;  %v1811_v26 = vld [vmem:[%s12015_s1 + $0x3d8] sm:$0xff] }
 0x1c9   :  { %2060 = vxpose.xlu0.b32.cont [5/16] (narrow) %v1804_v21, 56  ;;  %2028 = vxpose.xlu1.b32.cont [5/16] (narrow) %v1788_v22, 56  ;;  %v1916_v36 = vpop.trf.xlu1  ;;  %v2206_v41 = vmul.f32 %v9523_v52, %v1948_v35  ;;  %v7550_v18 = vld [vmem:[%s12016_s2 + $0x3ac] ss:$12 sps:$4 sm:$0xff]   ;;  %v1794_v21 = vld [vmem:[%s12015_s1 + $0x350] sm:$0xff] }
 0x1ca   :  { %4165 = vmatprep.mubr.bf16.mxu1 %v2242_v30  ;;  %3851 = vmatpush1.bf16.msra.mxu0 %v7518_v23  ;;  %v2205_v42 = vmul.f32 %v9527_v53, %v1916_v36  ;;  %v7548_v22 = vld [vmem:[%s12016_s2 + $0x3a8] ss:$12 sps:$4 sm:$0xff]   ;;  %v7551_v23 = vld [vmem:[%s12016_s2 + $0x470] ss:$12 sps:$4 sm:$0xff]   ;;  %v7553_v28 = vld [vmem:[%s12016_s2 + $0x3c0] ss:$12 sps:$4 sm:$0xff]  }
 0x1cb   :  { %4166 = vmatmul.mubr.bf16.gmra.mrb[20].mxu1 %v2241_v31  ;;  %3852 = vmatprep.subr.bf16.mxu0 %v7525_v29  ;;  %v7555_v24 = vld [vmem:[%s12016_s2 + $0x3c4] ss:$12 sps:$4 sm:$0xff]   ;;  %v1795_v27 = vld [vmem:[%s12015_s1 + $0x358] sm:$0xff]  ;;  %v7580_v29 = vld [vmem:[%s12016_s2 + $0x548] ss:$12 sps:$4 sm:$0xff]  }
 0x1cc   :  { %7121 = vmatprep.subr.bf16.mxu1 %v7526_v34  ;;  %3819 = vmatprep.mubr.bf16.mxu0 %v2242_v30  ;;  %v1949_v43 = vpop.trf.xlu0  ;;  %v7558_v30 = vld [vmem:[%s12016_s2 + $0x3dc] ss:$12 sps:$4 sm:$0xff]   ;;  %v7561_v34 = vld [vmem:[%s12016_s2 + $0x3f4] ss:$12 sps:$4 sm:$0xff]  }
 0x1cd   :  { %2061 = vxpose.xlu0.b32.cont [6/16] (narrow) %v1805_v32, 56  ;;  %2029 = vxpose.xlu1.b32.cont [6/16] (narrow) %v1789_v33, 56  ;;  %v1917_v44 = vpop.trf.xlu1  ;;  %v2215_v47 = vmul.f32 %v9523_v52, %v1949_v43  ;;  %v1796_v32 = vld [vmem:[%s12015_s1 + $0x360] sm:$0xff]  ;;  %v1813_v35 = vld [vmem:[%s12015_s1 + $0x3e8] sm:$0xff]  ;;  %v1815_v43 = vld [vmem:[%s12015_s1 + $0x3f8] sm:$0xff] }
 0x1ce   :  { %v2214_v48 = vmul.f32 %v9527_v53, %v1917_v44  ;;  %3853 = vmatpush1.bf16.msra.mxu0 %v7523_v37  ;;  %7122 = vmatpush3.bf16.msra.mxu1 %v7527_v38  ;;  %v7556_v33 = vld [vmem:[%s12016_s2 + $0x3d8] ss:$12 sps:$4 sm:$0xff]   ;;  %v1797_v36 = vld [vmem:[%s12015_s1 + $0x368] sm:$0xff]  ;;  %v7559_v37 = vld [vmem:[%s12016_s2 + $0x3f0] ss:$12 sps:$4 sm:$0xff]  }
 0x1cf   :  { %3854 = vmatprep.subr.bf16.mxu0 %v7530_v39  ;;  %7123 = vmatprep.subr.bf16.mxu1 %v7531_v40  ;;  %v2251_v61 = vpack.c.bf16 %v2215_v47, %v2206_v41  ;;  %v7564_v38 = vld [vmem:[%s12016_s2 + $0x40c] ss:$12 sps:$4 sm:$0xff]   ;;  %v1814_v39 = vld [vmem:[%s12015_s1 + $0x3f0] sm:$0xff] }
 0x1d0   :  { %v2250_v62 = vpack.c.bf16 %v2214_v48, %v2205_v42  ;;  %3820 = vmatmul.mubr.bf16.gmra.mrb[4].mxu0 %v2241_v31  ;;  %v1950_v0 = vpop.trf.xlu0  ;;  %v1812_v31 = vld [vmem:[%s12015_s1 + $0x3e0] sm:$0xff]  ;;  %v1798_v40 = vld [vmem:[%s12015_s1 + $0x370] sm:$0xff]  ;;  %v1799_v44 = vld [vmem:[%s12015_s1 + $0x378] sm:$0xff] }
 0x1d1   :  { %2062 = vxpose.xlu0.b32.cont [7/16] (narrow) %v1806_v49, 56  ;;  %2030 = vxpose.xlu1.b32.cont [7/16] (narrow) %v1790_v50, 56  ;;  %v1918_v1 = vpop.trf.xlu1  ;;  %v2224_v3 = vmul.f32 %v9523_v52, %v1950_v0  ;;  %v7540_v52 = vld [vmem:[%s12016_s2 + $0x37c] ss:$12 sps:$4 sm:$0xff]   ;;  %v7567_v42 = vld [vmem:[%s12016_s2 + $0x424] ss:$12 sps:$4 sm:$0xff]  }
 0x1d2   :  { %4173 = vmatprep.mubr.bf16.mxu1 %v2251_v61  ;;  %3855 = vmatpush1.bf16.msra.mxu0 %v7528_v57  ;;  %v2223_v6 = vmul.f32 %v9527_v53, %v1918_v1  ;;  %v1808_v53 = vld [vmem:[%s12015_s1 + $0x3c0] sm:$0xff]  ;;  %v7562_v41 = vld [vmem:[%s12016_s2 + $0x408] ss:$12 sps:$4 sm:$0xff]   ;;  %v9772_v49 = vsub.s32 5, %v9239_v51  ;;  %v9775_v50 = vsub.s32 4, %v9239_v51 }
 0x1d3   :  { %4174 = vmatmul.mubr.bf16.gmra.mrb[24].mxu1 %v2250_v62  ;;  %3856 = vmatprep.subr.bf16.mxu0 %v7535_v58  ;;  %v2260_v8 = vpack.c.bf16 %v2224_v3, %v2224_v3  ;;  %v7565_v47 = vld [vmem:[%s12016_s2 + $0x420] ss:$12 sps:$4 sm:$0xff]   ;;  %v7570_v48 = vld [vmem:[%s12016_s2 + $0x43c] ss:$12 sps:$4 sm:$0xff]   ;;  %v7568_v58 = vld [vmem:[%s12016_s2 + $0x438] ss:$12 sps:$4 sm:$0xff]  }
 0x1d4   :  { %7124 = vmatpush3.bf16.msra.mxu1 %v7532_v63  ;;  %3829 = vmatprep.mubr.bf16.mxu0 %v2251_v61  ;;  %v2259_v11 = vpack.c.bf16 %v2223_v6, %v2223_v6  ;;  %v1816_v57 = vld [vmem:[%s12015_s1 + $0x400] sm:$0xff]  ;;  %v9792_v63 = vrot.slane %v9253_v56, %v9775_v50  ;;  %v7571_v3 = vld [vmem:[%s12016_s2 + $0x450] ss:$12 sps:$4 sm:$0xff]  }
 0x1d5   :  { %2063 = vxpose.xlu0.b32.cont [8/16] (narrow) %v1807_v2, 56  ;;  %2031 = vxpose.xlu1.b32.cont [8/16] (narrow) %v1791_v4, 56  ;;  %v7573_v61 = vld [vmem:[%s12016_s2 + $0x454] ss:$12 sps:$4 sm:$0xff]   ;;  %v1817_v2 = vld [vmem:[%s12015_s1 + $0x408] sm:$0xff] }
 0x1d6   :  { %4181 = vmatprep.mubr.bf16.mxu1 %v2260_v8  ;;  %3857 = vmatpush1.bf16.msra.mxu0 %v7533_v5  ;;  %v7576_v4 = vld [vmem:[%s12016_s2 + $0x46c] ss:$12 sps:$4 sm:$0xff]  }
 0x1d7   :  { %7125 = vmatprep.subr.bf16.mxu1 %v7536_v7  ;;  %3858 = vmatprep.subr.bf16.mxu0 %v7540_v52 }
 0x1d8   :  { %7126 = vmatpush3.bf16.msra.mxu1 %v7537_v59  ;;  %3830 = vmatmul.mubr.bf16.gmra.mrb[8].mxu0 %v2250_v62  ;;  %v9788_v62 = vrot.slane %v9253_v56, %v9772_v49 }
 0x1d9   :  { %2064 = vxpose.xlu0.b32.cont [9/16] (narrow) %v1808_v53, 56  ;;  %2032 = vxpose.xlu1.b32.cont [9/16] (narrow) %v1792_v9, 56  ;;  %v1818_v53 = vld [vmem:[%s12015_s1 + $0x410] sm:$0xff] }
 0x1da   :  { %3859 = vmatpush1.bf16.msra.mxu0 %v7538_v10  ;;  %7127 = vmatprep.subr.bf16.mxu1 %v7541_v60  ;;  %v7574_v9 = vld [vmem:[%s12016_s2 + $0x468] ss:$12 sps:$4 sm:$0xff]  }
 0x1db   :  { %4182 = vmatmul.mubr.bf16.gmra.mrb[28].mxu1 %v2259_v11  ;;  %3860 = vmatprep.subr.bf16.mxu0 %v7545_v12  ;;  %v7581_v12 = vld [vmem:[%s12016_s2 + $0x488] ss:$12 sps:$4 sm:$0xff]  }
 0x1dc   :  { %7128 = vmatpush3.bf16.msra.mxu1 %v7542_v13  ;;  %3839 = vmatprep.mubr.bf16.mxu0 %v2260_v8 }
 0x1dd   :  { %2065 = vxpose.xlu0.b32.cont [10/16] (narrow) %v1809_v14, 56  ;;  %2033 = vxpose.xlu1.b32.cont [10/16] (narrow) %v1793_v15, 56  ;;  %v1819_v15 = vld [vmem:[%s12015_s1 + $0x418] sm:$0xff] }
 0x1de   :  { %3861 = vmatpush1.bf16.msra.mxu0 %v7543_v16  ;;  %7129 = vmatprep.subr.bf16.mxu1 %v7546_v17  ;;  %v7577_v16 = vld [vmem:[%s12016_s2 + $0x480] ss:$12 sps:$4 sm:$0xff]  }
 0x1df   :  { %3862 = vmatprep.subr.bf16.mxu0 %v7550_v18  ;;  %v7585_v17 = vld [vmem:[%s12016_s2 + $0x560] ss:$12 sps:$4 sm:$0xff]   ;;  %v7584_v18 = vld [vmem:[%s12016_s2 + $0x49c] ss:$12 sps:$4 sm:$0xff]  }
 0x1e0   :  { %7130 = vmatpush3.bf16.msra.mxu1 %v7547_v19  ;;  %3840 = vmatmul.mubr.bf16.gmra.mrb[12].mxu0 %v2259_v11  ;;  %v7579_v11 = vld [vmem:[%s12016_s2 + $0x484] ss:$12 sps:$4 sm:$0xff]  }
 0x1e1   :  { %2066 = vxpose.xlu0.b32.cont [11/16] (narrow) %v1810_v20, 56  ;;  %2034 = vxpose.xlu1.b32.cont [11/16] (narrow) %v1794_v21, 56  ;;  %v7586_v21 = vld [vmem:[%s12016_s2 + $0x4a0] ss:$12 sps:$4 sm:$0xff]  }
 0x1e2   :  { %3863 = vmatpush1.bf16.msra.mxu0 %v7548_v22  ;;  %7131 = vmatprep.subr.bf16.mxu1 %v7551_v23 }
 0x1e3   :  { %3864 = vmatprep.subr.bf16.mxu0 %v7555_v24  ;;  %v7590_v24 = vld [vmem:[%s12016_s2 + $0x578] ss:$12 sps:$4 sm:$0xff]  }
 0x1e4   :  { %7132 = vmatpush3.bf16.msra.mxu1 %v7552_v25 }
 0x1e5   :  { %2067 = vxpose.xlu0.b32.cont [12/16] (narrow) %v1811_v26, 56  ;;  %2035 = vxpose.xlu1.b32.cont [12/16] (narrow) %v1795_v27, 56  ;;  %v1820_v27 = vld [vmem:[%s12015_s1 + $0x420] sm:$0xff] }
 0x1e6   :  { %3865 = vmatpush1.bf16.msra.mxu0 %v7553_v28  ;;  %7157 = vmatprep.subr.bf16.mxu1 %v7580_v29  ;;  %v7582_v28 = vld [vmem:[%s12016_s2 + $0x498] ss:$12 sps:$4 sm:$0xff]   ;;  %v7589_v29 = vld [vmem:[%s12016_s2 + $0x4b4] ss:$12 sps:$4 sm:$0xff]  }
 0x1e7   :  { %3866 = vmatprep.subr.bf16.mxu0 %v7558_v30 }
 0x1e9   :  { %2068 = vxpose.xlu0.b32.cont [13/16] (narrow) %v1812_v31, 56  ;;  %2036 = vxpose.xlu1.b32.cont [13/16] (narrow) %v1796_v32, 56  ;;  %v7591_v32 = vld [vmem:[%s12016_s2 + $0x4b8] ss:$12 sps:$4 sm:$0xff]  }
 0x1ea   :  { %3867 = vmatpush1.bf16.msra.mxu0 %v7556_v33 }
 0x1eb   :  { %3868 = vmatprep.subr.bf16.mxu0 %v7561_v34 }
 0x1ed   :  { %2069 = vxpose.xlu0.b32.cont [14/16] (narrow) %v1813_v35, 56  ;;  %2037 = vxpose.xlu1.b32.cont [14/16] (narrow) %v1797_v36, 56  ;;  %v7595_v35 = vld [vmem:[%s12016_s2 + $0x590] ss:$12 sps:$4 sm:$0xff]   ;;  %v1821_v36 = vld [vmem:[%s12015_s1 + $0x428] sm:$0xff] }
 0x1ee   :  { %3869 = vmatpush1.bf16.msra.mxu0 %v7559_v37  ;;  %v7587_v37 = vld [vmem:[%s12016_s2 + $0x4b0] ss:$12 sps:$4 sm:$0xff]  }
 0x1ef   :  { %3870 = vmatprep.subr.bf16.mxu0 %v7564_v38  ;;  %v7594_v38 = vld [vmem:[%s12016_s2 + $0x4cc] ss:$12 sps:$4 sm:$0xff]  }
 0x1f1   :  { %2070 = vxpose.xlu0.b32.cont [15/16] (narrow) %v1814_v39, 56  ;;  %2038 = vxpose.xlu1.b32.cont [15/16] (narrow) %v1798_v40, 56 }
 0x1f2   :  { %3871 = vmatpush1.bf16.msra.mxu0 %v7562_v41  ;;  %v7596_v41 = vld [vmem:[%s12016_s2 + $0x4d0] ss:$12 sps:$4 sm:$0xff]  }
 0x1f3   :  { %3872 = vmatprep.subr.bf16.mxu0 %v7567_v42 }
 0x1f5   :  { %2071 = vxpose.xlu0.b32.end [16/16] (narrow) %v1815_v43, 56  ;;  %2039 = vxpose.xlu1.b32.end [16/16] (narrow) %v1799_v44, 56  ;;  %v7600_v44 = vld [vmem:[%s12016_s2 + $0x5a8] ss:$12 sps:$4 sm:$0xff]  }
 0x1f6   :  { %3873 = vmatpush1.bf16.msra.mxu0 %v7565_v47 }
 0x1f7   :  { %3874 = vmatprep.subr.bf16.mxu0 %v7570_v48 }
 0x1f9   :  { %2088 = vxpose.xlu0.b32.start [1/16] (narrow) %v1816_v57, 56  ;;  %v2008_v0 = vpop.trf.xlu0  ;;  %v1976_v1 = vpop.trf.xlu1  ;;  %v1822_v57 = vld [vmem:[%s12015_s1 + $0x430] sm:$0xff] }
 0x1fa   :  { %3875 = vmatpush1.bf16.msra.mxu0 %v7568_v58  ;;  %v2172_v5 = vmul.f32 %v9788_v62, %v2008_v0  ;;  %v2171_v6 = vmul.f32 %v9792_v63, %v1976_v1  ;;  %v7592_v58 = vld [vmem:[%s12016_s2 + $0x4c8] ss:$12 sps:$4 sm:$0xff]  }
 0x1fb   :  { %3876 = vmatprep.subr.bf16.mxu0 %v7573_v61  ;;  %v7599_v61 = vld [vmem:[%s12016_s2 + $0x4e4] ss:$12 sps:$4 sm:$0xff]  }
 0x1fd   :  { %2089 = vxpose.xlu0.b32.cont [2/16] (narrow) %v1817_v2, 56  ;;  %v2009_v7 = vpop.trf.xlu0  ;;  %v1977_v52 = vpop.trf.xlu1  ;;  %v7601_v2 = vld [vmem:[%s12016_s2 + $0x4e8] ss:$12 sps:$4 sm:$0xff]  }
 0x1fe   :  { %v2181_v8 = vmul.f32 %v9788_v62, %v2009_v7  ;;  %v2180_v59 = vmul.f32 %v9792_v63, %v1977_v52  ;;  %3877 = vmatpush1.bf16.msra.mxu0 %v7571_v3  ;;  %v7597_v52 = vld [vmem:[%s12016_s2 + $0x4e0] ss:$12 sps:$4 sm:$0xff]  }
 0x1ff   :  { %3878 = vmatprep.subr.bf16.mxu0 %v7576_v4 }
 0x200   :  { %v2235_v10 = vpack.c.bf16 %v2181_v8, %v2172_v5  ;;  %v2234_v60 = vpack.c.bf16 %v2180_v59, %v2171_v6  ;;  %v7605_v5 = vld [vmem:[%s12016_s2 + $0x5c0] ss:$12 sps:$4 sm:$0xff]   ;;  %v1823_v6 = vld [vmem:[%s12015_s1 + $0x438] sm:$0xff] }
 0x201   :  { %2090 = vxpose.xlu0.b32.cont [3/16] (narrow) %v1818_v53, 56  ;;  %v2010_v13 = vpop.trf.xlu0  ;;  %v1978_v14 = vpop.trf.xlu1  ;;  %v7604_v59 = vld [vmem:[%s12016_s2 + $0x4fc] ss:$12 sps:$4 sm:$0xff]  }
 0x202   :  { %4221 = vmatprep.mubr.bf16.mxu1 %v2235_v10  ;;  %3879 = vmatpush1.bf16.msra.mxu0 %v7574_v9  ;;  %v2190_v19 = vmul.f32 %v9788_v62, %v2010_v13  ;;  %v2189_v20 = vmul.f32 %v9792_v63, %v1978_v14  ;;  %v7606_v9 = vld [vmem:[%s12016_s2 + $0x500] ss:$12 sps:$4 sm:$0xff]   ;;  %v7615_v13 = vld [vmem:[%s12016_s2 + $0x5f0] ss:$12 sps:$4 sm:$0xff]  }
 0x203   :  { %4222 = vmatmul.mubr.bf16.vlgmr.msra.gmra.mrb[32].mxu1 %v2234_v60  ;;  %3880 = vmatprep.mubr.bf16.mxu0 %v2235_v10  ;;  %v7602_v10 = vld [vmem:[%s12016_s2 + $0x4f8] ss:$12 sps:$4 sm:$0xff]   ;;  %v1825_v14 = vld [vmem:[%s12015_s1 + $0x448] sm:$0xff] }
 0x204   :  { %3919 = vmatprep.subr.bf16.mxu0 %v7579_v11  ;;  %7158 = vmatpush3.bf16.msra.mxu1 %v7581_v12  ;;  %v7609_v11 = vld [vmem:[%s12016_s2 + $0x514] ss:$12 sps:$4 sm:$0xff]   ;;  %v7611_v12 = vld [vmem:[%s12016_s2 + $0x518] ss:$12 sps:$4 sm:$0xff]  }
 0x205   :  { %2091 = vxpose.xlu0.b32.cont [4/16] (narrow) %v1819_v15, 56  ;;  %v2011_v22 = vpop.trf.xlu0  ;;  %v1979_v23 = vpop.trf.xlu1  ;;  %3881 = vmatmul.mubr.bf16.vlgmr.msra.gmra.mrb[0].mxu0 %v2234_v60  ;;  %v7607_v15 = vld [vmem:[%s12016_s2 + $0x510] ss:$12 sps:$4 sm:$0xff]  }
 0x206   :  { %v2199_v25 = vmul.f32 %v9788_v62, %v2011_v22  ;;  %v2198_v26 = vmul.f32 %v9792_v63, %v1979_v23  ;;  %3920 = vmatpush1.bf16.msra.mxu0 %v7577_v16  ;;  %7159 = vmatprep.subr.bf16.mxu1 %v7585_v17  ;;  %v7614_v16 = vld [vmem:[%s12016_s2 + $0x52c] ss:$12 sps:$4 sm:$0xff]   ;;  %v7616_v17 = vld [vmem:[%s12016_s2 + $0x530] ss:$12 sps:$4 sm:$0xff]  }
 0x207   :  { %3921 = vmatprep.subr.bf16.mxu0 %v7584_v18  ;;  %v9937_v18 = vld [vmem:[%s12016_s2 + $0x608] ss:$12 sps:$4 sm:$0xff]   ;;  %v1827_v22 = vld [vmem:[%s12015_s1 + $0x458] sm:$0xff]  ;;  %v7617_v23 = vld [vmem:[%s12016_s2 + $0x540] ss:$12 sps:$4 sm:$0xff]  }
 0x208   :  { %v2244_v30 = vpack.c.bf16 %v2199_v25, %v2190_v19  ;;  %v2243_v31 = vpack.c.bf16 %v2198_v26, %v2189_v20  ;;  %7160 = vmatpush3.bf16.msra.mxu1 %v7586_v21  ;;  %v1826_v19 = vld [vmem:[%s12015_s1 + $0x450] sm:$0xff]  ;;  %v1828_v25 = vld [vmem:[%s12015_s1 + $0x460] sm:$0xff] }
 0x209   :  { %2092 = vxpose.xlu0.b32.cont [5/16] (narrow) %v1820_v27, 56  ;;  %v2012_v33 = vpop.trf.xlu0  ;;  %v1980_v34 = vpop.trf.xlu1  ;;  %7161 = vmatprep.subr.bf16.mxu1 %v7590_v24  ;;  %v7612_v20 = vld [vmem:[%s12016_s2 + $0x528] ss:$12 sps:$4 sm:$0xff]   ;;  %v7619_v21 = vld [vmem:[%s12016_s2 + $0x544] ss:$12 sps:$4 sm:$0xff]  }
 0x20a   :  { %4229 = vmatprep.mubr.bf16.mxu1 %v2244_v30  ;;  %3922 = vmatpush1.bf16.msra.mxu0 %v7582_v28  ;;  %v2208_v39 = vmul.f32 %v9788_v62, %v2012_v33  ;;  %v2207_v40 = vmul.f32 %v9792_v63, %v1980_v34  ;;  %v7622_v24 = vld [vmem:[%s12016_s2 + $0x55c] ss:$12 sps:$4 sm:$0xff]   ;;  %v7620_v26 = vld [vmem:[%s12016_s2 + $0x558] ss:$12 sps:$4 sm:$0xff]   ;;  %v7625_v27 = vld [vmem:[%s12016_s2 + $0x574] ss:$12 sps:$4 sm:$0xff]  }
 0x20b   :  { %4230 = vmatmul.mubr.bf16.gmra.mrb[36].mxu1 %v2243_v31  ;;  %3923 = vmatprep.subr.bf16.mxu0 %v7589_v29  ;;  %v1829_v28 = vld [vmem:[%s12015_s1 + $0x468] sm:$0xff]  ;;  %v7623_v29 = vld [vmem:[%s12016_s2 + $0x570] ss:$12 sps:$4 sm:$0xff]  }
 0x20c   :  { %7162 = vmatpush3.bf16.msra.mxu1 %v7591_v32  ;;  %3890 = vmatprep.mubr.bf16.mxu0 %v2244_v30  ;;  %v7628_v30 = vld [vmem:[%s12016_s2 + $0x58c] ss:$12 sps:$4 sm:$0xff]   ;;  %v7626_v32 = vld [vmem:[%s12016_s2 + $0x588] ss:$12 sps:$4 sm:$0xff]   ;;  %v7631_v33 = vld [vmem:[%s12016_s2 + $0x5a4] ss:$12 sps:$4 sm:$0xff]  }
 0x20d   :  { %2093 = vxpose.xlu0.b32.cont [6/16] (narrow) %v1821_v36, 56  ;;  %v2013_v42 = vpop.trf.xlu0  ;;  %v1981_v43 = vpop.trf.xlu1  ;;  %7163 = vmatprep.subr.bf16.mxu1 %v7595_v35  ;;  %v1831_v34 = vld [vmem:[%s12015_s1 + $0x478] sm:$0xff]  ;;  %v7629_v35 = vld [vmem:[%s12016_s2 + $0x5a0] ss:$12 sps:$4 sm:$0xff]  }
 0x20e   :  { %v2217_v47 = vmul.f32 %v9788_v62, %v2013_v42  ;;  %v2216_v48 = vmul.f32 %v9792_v63, %v1981_v43  ;;  %3924 = vmatpush1.bf16.msra.mxu0 %v7587_v37  ;;  %v7634_v36 = vld [vmem:[%s12016_s2 + $0x5bc] ss:$12 sps:$4 sm:$0xff]   ;;  %v9995_v37 = vsub.s32 7, %v9239_v51 }
 0x20f   :  { %3925 = vmatprep.subr.bf16.mxu0 %v7594_v38  ;;  %3891 = vmatmul.mubr.bf16.gmra.mrb[4].mxu0 %v2243_v31  ;;  %v1830_v31 = vld [vmem:[%s12015_s1 + $0x470] sm:$0xff]  ;;  %v9998_v38 = vsub.s32 6, %v9239_v51 }
 0x210   :  { %v2253_v0 = vpack.c.bf16 %v2217_v47, %v2208_v39  ;;  %v2252_v1 = vpack.c.bf16 %v2216_v48, %v2207_v40  ;;  %7164 = vmatpush3.bf16.msra.mxu1 %v7596_v41  ;;  %12038 = vst [vmem:[#allocation7_spill] sm:$0xff] %v9995_v37  ;;  %v7632_v39 = vld [vmem:[%s12016_s2 + $0x5b8] ss:$12 sps:$4 sm:$0xff]   ;;  %v7637_v40 = vld [vmem:[%s12016_s2 + $0x5d4] ss:$12 sps:$4 sm:$0xff]   ;;  %v10008_v41 = vrot.slane %v9253_v56, %v9995_v37 }
 0x211   :  { %2094 = vxpose.xlu0.b32.cont [7/16] (narrow) %v1822_v57, 56  ;;  %v2014_v3 = vpop.trf.xlu0  ;;  %v1982_v4 = vpop.trf.xlu1  ;;  %7165 = vmatprep.subr.bf16.mxu1 %v7600_v44  ;;  %12039 = vst [vmem:[#allocation8_spill] sm:$0xff] %v9998_v38  ;;  %v10012_v42 = vrot.slane %v9253_v56, %v9998_v38  ;;  %v7635_v44 = vld [vmem:[%s12016_s2 + $0x5d0] ss:$12 sps:$4 sm:$0xff]   ;;  %v7640_v47 = vld [vmem:[%s12016_s2 + $0x5ec] ss:$12 sps:$4 sm:$0xff]  }
 0x212   :  { %4237 = vmatprep.mubr.bf16.mxu1 %v2253_v0  ;;  %v2226_v7 = vmul.f32 %v9788_v62, %v2014_v3  ;;  %3926 = vmatpush1.bf16.msra.mxu0 %v7592_v58  ;;  %v2225_v8 = vmul.f32 %v9792_v63, %v1982_v4  ;;  %v7610_v62 = vld [vmem:[%s12016_s2 + $0x5d8] ss:$12 sps:$4 sm:$0xff]  }
 0x213   :  { %4238 = vmatmul.mubr.bf16.gmra.mrb[40].mxu1 %v2252_v1  ;;  %3927 = vmatprep.subr.bf16.mxu0 %v7599_v61  ;;  %v1824_v63 = vld [vmem:[%s12015_s1 + $0x440] sm:$0xff] }
 0x214   :  { %v2262_v53 = vpack.c.bf16 %v2226_v7, %v2226_v7  ;;  %7166 = vmatpush3.bf16.msra.mxu1 %v7601_v2  ;;  %3900 = vmatprep.mubr.bf16.mxu0 %v2253_v0  ;;  %v2261_v60 = vpack.c.bf16 %v2225_v8, %v2225_v8  ;;  %v7643_v4 = vld [vmem:[%s12016_s2 + $0x604] ss:$12 sps:$4 sm:$0xff]   ;;  %v7654_v7 = vld [vmem:[%s12016_s2 + $0x620] ss:$12 sps:$4 sm:$0xff]   ;;  %v7646_v8 = vld [vmem:[%s12016_s2 + $0x61c] ss:$12 sps:$4 sm:$0xff]  }
 0x215   :  { %2095 = vxpose.xlu0.b32.cont [8/16] (narrow) %v1823_v6, 56  ;;  %7167 = vmatprep.subr.bf16.mxu1 %v7605_v5 }
 0x216   :  { %4245 = vmatprep.mubr.bf16.mxu1 %v2262_v53  ;;  %3928 = vmatpush1.bf16.msra.mxu0 %v7597_v52  ;;  %v7641_v52 = vld [vmem:[%s12016_s2 + $0x600] ss:$12 sps:$4 sm:$0xff]  }
 0x217   :  { %3929 = vmatprep.subr.bf16.mxu0 %v7604_v59  ;;  %3901 = vmatmul.mubr.bf16.gmra.mrb[8].mxu0 %v2252_v1  ;;  %v7638_v1 = vld [vmem:[%s12016_s2 + $0x5e8] ss:$12 sps:$4 sm:$0xff]  }
 0x218   :  { %7168 = vmatpush3.bf16.msra.mxu1 %v7606_v9  ;;  %3910 = vmatprep.mubr.bf16.mxu0 %v2262_v53 }
 0x219   :  { %2096 = vxpose.xlu0.b32.cont [9/16] (narrow) %v1824_v63, 56  ;;  %7169 = vmatprep.subr.bf16.mxu1 %v7610_v62  ;;  %v7658_v63 = vld [vmem:[%s12016_s2 + $0x638] ss:$12 sps:$4 sm:$0xff]  }
 0x21a   :  { %3930 = vmatpush1.bf16.msra.mxu0 %v7602_v10 }
 0x21b   :  { %4246 = vmatmul.mubr.bf16.gmra.mrb[44].mxu1 %v2261_v60  ;;  %3931 = vmatprep.subr.bf16.mxu0 %v7609_v11  ;;  %v7644_v11 = vld [vmem:[%s12016_s2 + $0x618] ss:$12 sps:$4 sm:$0xff]  }
 0x21c   :  { %7170 = vmatpush3.bf16.msra.mxu1 %v7611_v12 }
 0x21d   :  { %2097 = vxpose.xlu0.b32.cont [10/16] (narrow) %v1825_v14, 56  ;;  %7171 = vmatprep.subr.bf16.mxu1 %v7615_v13  ;;  %v7649_v14 = vld [vmem:[%s12016_s2 + $0x634] ss:$12 sps:$4 sm:$0xff]  }
 0x21e   :  { %3932 = vmatpush1.bf16.msra.mxu0 %v7607_v15 }
 0x21f   :  { %3933 = vmatprep.subr.bf16.mxu0 %v7614_v16  ;;  %3911 = vmatmul.mubr.bf16.gmra.mrb[12].mxu0 %v2261_v60 }
 0x220   :  { %7172 = vmatpush3.bf16.msra.mxu1 %v7616_v17  ;;  %v7662_v17 = vld [vmem:[%s12016_s2 + $0x650] ss:$12 sps:$4 sm:$0xff]  }
 0x221   :  { %2098 = vxpose.xlu0.b32.cont [11/16] (narrow) %v1826_v19, 56  ;;  %7209 = vmatprep.subr.bf16.mxu1 %v9937_v18  ;;  %v7653_v19 = vld [vmem:[%s12016_s2 + $0x64c] ss:$12 sps:$4 sm:$0xff]  }
 0x222   :  { %3934 = vmatpush1.bf16.msra.mxu0 %v7612_v20 }
 0x223   :  { %3935 = vmatprep.subr.bf16.mxu0 %v7619_v21 }
 0x225   :  { %2099 = vxpose.xlu0.b32.cont [12/16] (narrow) %v1827_v22, 56 }
 0x226   :  { %3936 = vmatpush1.bf16.msra.mxu0 %v7617_v23 }
 0x227   :  { %3937 = vmatprep.subr.bf16.mxu0 %v7622_v24  ;;  %v7666_v24 = vld [vmem:[%s12016_s2 + $0x668] ss:$12 sps:$4 sm:$0xff]  }
 0x229   :  { %2100 = vxpose.xlu0.b32.cont [13/16] (narrow) %v1828_v25, 56 }
 0x22a   :  { %3938 = vmatpush1.bf16.msra.mxu0 %v7620_v26 }
 0x22b   :  { %3939 = vmatprep.subr.bf16.mxu0 %v7625_v27  ;;  %v7651_v27 = vld [vmem:[%s12016_s2 + $0x648] ss:$12 sps:$4 sm:$0xff]  }
 0x22d   :  { %2101 = vxpose.xlu0.b32.cont [14/16] (narrow) %v1829_v28, 56 }
 0x22e   :  { %3940 = vmatpush1.bf16.msra.mxu0 %v7623_v29 }
 0x22f   :  { %3941 = vmatprep.subr.bf16.mxu0 %v7628_v30  ;;  %v7657_v30 = vld [vmem:[%s12016_s2 + $0x664] ss:$12 sps:$4 sm:$0xff]  }
 0x231   :  { %2102 = vxpose.xlu0.b32.cont [15/16] (narrow) %v1830_v31, 56 }
 0x232   :  { %3942 = vmatpush1.bf16.msra.mxu0 %v7626_v32 }
 0x233   :  { %3943 = vmatprep.subr.bf16.mxu0 %v7631_v33  ;;  %v1677_v33 = vld [vmem:[%s12014_s0 + $0x8] sm:$0x1] }
 0x235   :  { %2103 = vxpose.xlu0.b32.end [16/16] (narrow) %v1831_v34, 56  ;;  %v7670_v34 = vld [vmem:[%s12016_s2 + $0x680] ss:$12 sps:$4 sm:$0xff]  }
 0x236   :  { %3944 = vmatpush1.bf16.msra.mxu0 %v7629_v35 }
 0x237   :  { %3945 = vmatprep.subr.bf16.mxu0 %v7634_v36  ;;  %v7655_v36 = vld [vmem:[%s12016_s2 + $0x660] ss:$12 sps:$4 sm:$0xff]  }
 0x239   :  { %v2072_v51 = vpop.trf.xlu0  ;;  %v2040_v43 = vpop.trf.xlu1 }
 0x23a   :  { %3946 = vmatpush1.bf16.msra.mxu0 %v7632_v39  ;;  %v2174_v48 = vmul.f32 %v10008_v41, %v2072_v51  ;;  %v2173_v57 = vmul.f32 %v10012_v42, %v2040_v43  ;;  %v1679_v43 = vsub.f32 0.0, %v1677_v33 }
 0x23b   :  { %3947 = vmatprep.subr.bf16.mxu0 %v7637_v40  ;;  %v7661_v40 = vld [vmem:[%s12016_s2 + $0x67c] ss:$12 sps:$4 sm:$0xff]  }
 0x23d   :  { %v2073_v58 = vpop.trf.xlu0  ;;  %v2041_v61 = vpop.trf.xlu1 }
 0x23e   :  { %v2183_v56 = vmul.f32 %v10008_v41, %v2073_v58  ;;  %v2182_v0 = vmul.f32 %v10012_v42, %v2041_v61  ;;  %3948 = vmatpush1.bf16.msra.mxu0 %v7635_v44 }
 0x23f   :  { %3949 = vmatprep.subr.bf16.mxu0 %v7640_v47 }
 0x240   :  { %v2237_v2 = vpack.c.bf16 %v2183_v56, %v2174_v48  ;;  %v2236_v3 = vpack.c.bf16 %v2182_v0, %v2173_v57  ;;  %v7665_v57 = vld [vmem:[%s12016_s2 + $0x694] ss:$12 sps:$4 sm:$0xff]   ;;  %v1682_v56 = vmul.f32 1.442695, %v1679_v43 }
 0x241   :  { %v2074_v5 = vpop.trf.xlu0  ;;  %v2042_v6 = vpop.trf.xlu1 }
 0x242   :  { %4285 = vmatprep.mubr.bf16.mxu1 %v2237_v2  ;;  %3950 = vmatpush1.bf16.msra.mxu0 %v7638_v1  ;;  %v2192_v59 = vmul.f32 %v10008_v41, %v2074_v5  ;;  %v2191_v53 = vmul.f32 %v10012_v42, %v2042_v6  ;;  %v7672_v1 = vld [vmem:[%s12016_s2 + $0x6b0] ss:$12 sps:$4 sm:$0xff]   ;;  %7677 = vpow2.f32 %v1682_v56  ;;  %v7667_v5 = vld [vmem:[%s12016_s2 + $0x6a8] ss:$12 sps:$4 sm:$0xff]   ;;  %v7711_v6 = vmov 0  }
 0x243   :  { %4286 = vmatmul.mubr.bf16.vlgmr.msra.gmra.mrb[48].mxu1 %v2236_v3  ;;  %3951 = vmatprep.mubr.bf16.mxu0 %v2237_v2 }
 0x244   :  { %3990 = vmatprep.subr.bf16.mxu0 %v7643_v4  ;;  %7210 = vmatpush3.bf16.msra.mxu1 %v9937_v18  ;;  %v7647_v18 = vld [vmem:[%s12016_s2 + $0x630] ss:$12 sps:$4 sm:$0xff]   ;;  %v7669_v4 = vld [vmem:[%s12016_s2 + $0x6ac] ss:$12 sps:$4 sm:$0xff]  }
 0x245   :  { %v2075_v9 = vpop.trf.xlu0  ;;  %v2043_v62 = vpop.trf.xlu1  ;;  %3952 = vmatmul.mubr.bf16.vlgmr.msra.gmra.mrb[0].mxu0 %v2236_v3  ;;  %7211 = vmatprep.subr.bf16.mxu1 %v7654_v7  ;;  %v7663_v3 = vld [vmem:[%s12016_s2 + $0x690] ss:$12 sps:$4 sm:$0xff]  }
 0x246   :  { %v2201_v10 = vmul.f32 %v10008_v41, %v2075_v9  ;;  %v2200_v60 = vmul.f32 %v10012_v42, %v2043_v62  ;;  %3991 = vmatpush1.bf16.msra.mxu0 %v7641_v52 }
 0x247   :  { %3992 = vmatprep.subr.bf16.mxu0 %v7646_v8 }
 0x248   :  { %v2246_v12 = vpack.c.bf16 %v2201_v10, %v2192_v59  ;;  %v2245_v13 = vpack.c.bf16 %v2200_v60, %v2191_v53  ;;  %7212 = vmatpush3.bf16.msra.mxu1 %v7654_v7 }
 0x249   :  { %v2076_v15 = vpop.trf.xlu0  ;;  %v2044_v16 = vpop.trf.xlu1  ;;  %7213 = vmatprep.subr.bf16.mxu1 %v7658_v63 }
 0x24a   :  { %4293 = vmatprep.mubr.bf16.mxu1 %v2246_v12  ;;  %3993 = vmatpush1.bf16.msra.mxu0 %v7644_v11  ;;  %v2210_v20 = vmul.f32 %v10008_v41, %v2076_v15  ;;  %v2209_v21 = vmul.f32 %v10012_v42, %v2044_v16 }
 0x24b   :  { %4294 = vmatmul.mubr.bf16.gmra.mrb[52].mxu1 %v2245_v13  ;;  %3961 = vmatprep.mubr.bf16.mxu0 %v2246_v12 }
 0x24c   :  { %3994 = vmatprep.subr.bf16.mxu0 %v7649_v14  ;;  %7214 = vmatpush3.bf16.msra.mxu1 %v7658_v63  ;;  %v7678_v62 = vpop.eup %7677 }
 0x24d   :  { %v2077_v22 = vpop.trf.xlu0  ;;  %v2045_v23 = vpop.trf.xlu1  ;;  %3962 = vmatmul.mubr.bf16.gmra.mrb[4].mxu0 %v2245_v13  ;;  %7215 = vmatprep.subr.bf16.mxu1 %v7662_v17  ;;  %v1685_v12 = vadd.f32 1.0, %v7678_v62 }
 0x24e   :  { %v2219_v25 = vmul.f32 %v10008_v41, %v2077_v22  ;;  %v2218_v26 = vmul.f32 %v10012_v42, %v2045_v23  ;;  %3995 = vmatpush1.bf16.msra.mxu0 %v7647_v18 }
 0x24f   :  { %3996 = vmatprep.subr.bf16.mxu0 %v7653_v19  ;;  %7679 = vrcp.f32 %v1685_v12 }
 0x250   :  { %v2255_v28 = vpack.c.bf16 %v2219_v25, %v2210_v20  ;;  %v2254_v29 = vpack.c.bf16 %v2218_v26, %v2209_v21  ;;  %7216 = vmatpush3.bf16.msra.mxu1 %v7662_v17 }
 0x251   :  { %v2078_v31 = vpop.trf.xlu0  ;;  %v2046_v32 = vpop.trf.xlu1  ;;  %7217 = vmatprep.subr.bf16.mxu1 %v7666_v24 }
 0x252   :  { %4301 = vmatprep.mubr.bf16.mxu1 %v2255_v28  ;;  %v2228_v35 = vmul.f32 %v10008_v41, %v2078_v31  ;;  %3997 = vmatpush1.bf16.msra.mxu0 %v7651_v27  ;;  %v2227_v39 = vmul.f32 %v10012_v42, %v2046_v32  ;;  %v7671_v41 = vld [vmem:[%s12016_s2 + $0x698] ss:$12 sps:$4 sm:$0xff]  }
 0x253   :  { %4302 = vmatmul.mubr.bf16.gmra.mrb[56].mxu1 %v2254_v29  ;;  %3971 = vmatprep.mubr.bf16.mxu0 %v2255_v28  ;;  %v7659_v42 = vld [vmem:[%s12016_s2 + $0x678] ss:$12 sps:$4 sm:$0xff]  }
 0x254   :  { %v2264_v51 = vpack.c.bf16 %v2228_v35, %v2228_v35  ;;  %3998 = vmatprep.subr.bf16.mxu0 %v7657_v30  ;;  %7218 = vmatpush3.bf16.msra.mxu1 %v7666_v24  ;;  %v2263_v47 = vpack.c.bf16 %v2227_v39, %v2227_v39 }
 0x255   :  { %3972 = vmatmul.mubr.bf16.gmra.mrb[8].mxu0 %v2254_v29  ;;  %7219 = vmatprep.subr.bf16.mxu1 %v7670_v34  ;;  %v7053_v44 = vpop.f32.mrb[0].mxu1 }
 0x256   :  { %4309 = vmatprep.mubr.bf16.mxu1 %v2264_v51  ;;  %3999 = vmatpush1.bf16.msra.mxu0 %v7655_v36  ;;  %v7054_v48 = vpop.f32.mrb[1].mxu1 }
 0x257   :  { %4000 = vmatprep.subr.bf16.mxu0 %v7661_v40  ;;  %3981 = vmatprep.mubr.bf16.mxu0 %v2264_v51  ;;  %v10098_v58 = vadd.f32 %v7054_v48, %v7053_v44  ;;  %v7056_v61 = vpop.f32.mrb[2].mxu1 }
 0x258   :  { %7220 = vmatpush3.bf16.msra.mxu1 %v7670_v34  ;;  %v7057_v0 = vpop.f32.mrb[3].mxu1 }
 0x259   :  { %7221 = vmatprep.subr.bf16.mxu1 %v7671_v41  ;;  %v10103_v2 = vadd.f32 %v7057_v0, %v7056_v61  ;;  %v7680_v20 = vpop.eup %7679 }
 0x25a   :  { %4001 = vmatpush1.bf16.msra.mxu0 %v7659_v42  ;;  %v2157_v22 = vrot.slane %v7680_v20, %v9251_v55 }
 0x25b   :  { %4310 = vmatmul.mubr.bf16.gmra.mrb[60].mxu1 %v2263_v47  ;;  %4002 = vmatprep.subr.bf16.mxu0 %v7665_v57 }
 0x25c   :  { %7222 = vmatpush3.bf16.msra.mxu1 %v7671_v41 }
 0x25d   :  { %3982 = vmatmul.mubr.bf16.gmra.mrb[12].mxu0 %v2263_v47  ;;  %7223 = vmatprep.subr.bf16.mxu1 %v7672_v1 }
 0x25e   :  { %4003 = vmatpush1.bf16.msra.mxu0 %v7663_v3  ;;  %4022 = vmatprep.mubr.bf16.mxu0 %v7711_v6  ;;  %v7059_v7 = vpop.f32.mrb[4].mxu1 }
 0x25f   :  { %4004 = vmatprep.subr.bf16.mxu0 %v7669_v4  ;;  %v7060_v52 = vpop.f32.mrb[5].mxu1 }
 0x260   :  { %7224 = vmatpush3.bf16.msra.mxu1 %v7672_v1  ;;  %v10115_v8 = vadd.f32 %v7060_v52, %v7059_v7  ;;  %v7062_v59 = vpop.f32.mrb[6].mxu1 }
 0x261   :  { %v7063_v53 = vpop.f32.mrb[7].mxu1 }
 0x262   :  { %4005 = vmatpush1.bf16.msra.mxu0 %v7667_v5  ;;  %v7064_v9 = vadd.f32 %v7063_v53, %v7062_v59 }
 0x266   :  { %v7065_v63 = vpop.f32.mrb[8].mxu1 }
 0x267   :  { %v7066_v10 = vpop.f32.mrb[9].mxu1 }
 0x268   :  { %v10117_v60 = vadd.f32 %v7066_v10, %v7065_v63  ;;  %v7068_v11 = vpop.f32.mrb[10].mxu1 }
 0x269   :  { %v7069_v13 = vpop.f32.mrb[11].mxu1 }
 0x26a   :  { %v7070_v14 = vadd.f32 %v7069_v13, %v7068_v11 }
 0x26e   :  { %v7071_v15 = vpop.f32.mrb[12].mxu1 }
 0x26f   :  { %v7072_v16 = vpop.f32.mrb[13].mxu1 }
 0x270   :  { %v10119_v17 = vadd.f32 %v7072_v16, %v7071_v15  ;;  %v7074_v18 = vpop.f32.mrb[14].mxu1 }
 0x271   :  { %v7075_v19 = vpop.f32.mrb[15].mxu1 }
 0x279   :  { %v2104_v21 = vpop.trf.xlu0 }
 0x27a   :  { %v2175_v24 = vmul.f32 %v2157_v22, %v2104_v21 }
 0x27d   :  { %v2105_v23 = vpop.trf.xlu0 }
 0x27e   :  { %v2184_v25 = vmul.f32 %v2157_v22, %v2105_v23 }
 0x280   :  { %v2238_v26 = vpack.c.bf16 %v2184_v25, %v2175_v24 }
 0x281   :  { %v2106_v27 = vpop.trf.xlu0 }
 0x282   :  { %4023 = vmatmul.mubr.bf16.vlgmr.msra.gmra.mrb[0].mxu0 %v2238_v26  ;;  %7225 = vmatprep.mubr.bf16.mxu1 %v2238_v26  ;;  %v2193_v29 = vmul.f32 %v2157_v22, %v2106_v27 }
 0x283   :  { %4032 = vmatprep.mubr.bf16.mxu0 %v7711_v6 }
 0x285   :  { %v2107_v28 = vpop.trf.xlu0 }
 0x286   :  { %v2202_v30 = vmul.f32 %v2157_v22, %v2107_v28 }
 0x288   :  { %v2247_v31 = vpack.c.bf16 %v2202_v30, %v2193_v29 }
 0x289   :  { %v2108_v32 = vpop.trf.xlu0 }
 0x28a   :  { %4033 = vmatmul.mubr.bf16.gmra.mrb[4].mxu0 %v2247_v31  ;;  %7226 = vmatmul.mubr.bf16.vlgmr.msra.gmra.mrb[64].mxu1 %v2247_v31  ;;  %v2211_v34 = vmul.f32 %v2157_v22, %v2108_v32 }
 0x28b   :  { %4042 = vmatprep.mubr.bf16.mxu0 %v7711_v6 }
 0x28d   :  { %v2109_v33 = vpop.trf.xlu0 }
 0x28e   :  { %v2220_v35 = vmul.f32 %v2157_v22, %v2109_v33 }
 0x290   :  { %v2256_v36 = vpack.c.bf16 %v2220_v35, %v2211_v34 }
 0x291   :  { %v2110_v39 = vpop.trf.xlu0 }
 0x292   :  { %v2229_v40 = vmul.f32 %v2157_v22, %v2110_v39  ;;  %4043 = vmatmul.mubr.bf16.gmra.mrb[8].mxu0 %v2256_v36  ;;  %7229 = vmatprep.mubr.bf16.mxu1 %v2256_v36 }
 0x293   :  { %4052 = vmatprep.mubr.bf16.mxu0 %v7711_v6 }
 0x294   :  { %v2265_v51 = vpack.c.bf16 %v2229_v40, %v2229_v40 }
 0x296   :  { %v7093_v43 = vpop.f32.mrb[16].mxu1  ;;  %7230 = vmatmul.mubr.bf16.gmra.mrb[68].mxu1 %v2265_v51 }
 0x297   :  { %v7094_v41 = vpop.f32.mrb[17].mxu1 }
 0x298   :  { %v7095_v44 = vadd.f32 %v7094_v41, %v7093_v43  ;;  %v7096_v42 = vpop.f32.mrb[18].mxu1 }
 0x299   :  { %v7097_v47 = vpop.f32.mrb[19].mxu1 }
 0x29a   :  { %v4160_v48 = vadd.f32 %v7095_v44, %v10098_v58  ;;  %v7098_v57 = vadd.f32 %v7097_v47, %v7096_v42  ;;  %4053 = vmatmul.mubr.bf16.gmra.mrb[12].mxu0 %v2265_v51 }
 0x29c   :  { %v4163_v61 = vadd.f32 %v7098_v57, %v10103_v2 }
 0x29e   :  { %v7099_v56 = vpop.f32.mrb[20].mxu1 }
 0x29f   :  { %v7100_v0 = vpop.f32.mrb[21].mxu1 }
 0x2a0   :  { %v7101_v1 = vadd.f32 %v7100_v0, %v7099_v56  ;;  %v7102_v3 = vpop.f32.mrb[22].mxu1 }
 0x2a1   :  { %v7103_v4 = vpop.f32.mrb[23].mxu1 }
 0x2a2   :  { %v4168_v5 = vadd.f32 %v7101_v1, %v10115_v8  ;;  %v7104_v7 = vadd.f32 %v7103_v4, %v7102_v3 }
 0x2a4   :  { %v4171_v52 = vadd.f32 %v7104_v7, %v7064_v9 }
 0x2a6   :  { %v7105_v59 = vpop.f32.mrb[24].mxu1 }
 0x2a7   :  { %v7106_v53 = vpop.f32.mrb[25].mxu1 }
 0x2a8   :  { %v7107_v62 = vadd.f32 %v7106_v53, %v7105_v59  ;;  %v7108_v63 = vpop.f32.mrb[26].mxu1 }
 0x2a9   :  { %v7109_v10 = vpop.f32.mrb[27].mxu1 }
 0x2aa   :  { %v4176_v58 = vadd.f32 %v7107_v62, %v10117_v60  ;;  %v7110_v11 = vadd.f32 %v7109_v10, %v7108_v63 }
 0x2ac   :  { %v4179_v12 = vadd.f32 %v7110_v11, %v7070_v14 }
 0x2ae   :  { %v7111_v13 = vpop.f32.mrb[28].mxu1 }
 0x2af   :  { %v7112_v2 = vpop.f32.mrb[29].mxu1 }
 0x2b0   :  { %v7113_v15 = vadd.f32 %v7112_v2, %v7111_v13  ;;  %v7114_v16 = vpop.f32.mrb[30].mxu1 }
 0x2b1   :  { %v7115_v18 = vpop.f32.mrb[31].mxu1 }
 0x2b2   :  { %v4184_v19 = vadd.f32 %v7113_v15, %v10119_v17 }
 0x2d6   :  { %v7133_v20 = vpop.f32.mrb[32].mxu1 }
 0x2d7   :  { %v7134_v8 = vpop.f32.mrb[33].mxu1 }
 0x2d8   :  { %v7135_v21 = vadd.f32 %v7134_v8, %v7133_v20  ;;  %v7136_v9 = vpop.f32.mrb[34].mxu1 }
 0x2d9   :  { %v7137_v22 = vpop.f32.mrb[35].mxu1 }
 0x2da   :  { %v4224_v23 = vadd.f32 %v7135_v21, %v4160_v48  ;;  %v7138_v24 = vadd.f32 %v7137_v22, %v7136_v9 }
 0x2dc   :  { %v4227_v25 = vadd.f32 %v7138_v24, %v4163_v61 }
 0x2de   :  { %v7139_v26 = vpop.f32.mrb[36].mxu1 }
 0x2df   :  { %v7140_v27 = vpop.f32.mrb[37].mxu1 }
 0x2e0   :  { %v7141_v60 = vadd.f32 %v7140_v27, %v7139_v26  ;;  %v7142_v28 = vpop.f32.mrb[38].mxu1 }
 0x2e1   :  { %v7143_v14 = vpop.f32.mrb[39].mxu1 }
 0x2e2   :  { %v4232_v29 = vadd.f32 %v7141_v60, %v4168_v5  ;;  %v7144_v30 = vadd.f32 %v7143_v14, %v7142_v28 }
 0x2e4   :  { %v4235_v31 = vadd.f32 %v7144_v30, %v4171_v52 }
 0x2e6   :  { %v7145_v32 = vpop.f32.mrb[40].mxu1 }
 0x2e7   :  { %v7146_v33 = vpop.f32.mrb[41].mxu1 }
 0x2e8   :  { %v7147_v34 = vadd.f32 %v7146_v33, %v7145_v32  ;;  %v7148_v17 = vpop.f32.mrb[42].mxu1 }
 0x2e9   :  { %v7149_v35 = vpop.f32.mrb[43].mxu1 }
 0x2ea   :  { %v4240_v36 = vadd.f32 %v7147_v34, %v4176_v58  ;;  %v7150_v39 = vadd.f32 %v7149_v35, %v7148_v17 }
 0x2ec   :  { %v4243_v40 = vadd.f32 %v7150_v39, %v4179_v12 }
 0x2ee   :  { %v7151_v51 = vpop.f32.mrb[44].mxu1 }
 0x2ef   :  { %v7152_v43 = vpop.f32.mrb[45].mxu1 }
 0x2f0   :  { %v7153_v41 = vadd.f32 %v7152_v43, %v7151_v51  ;;  %v7154_v44 = vpop.f32.mrb[46].mxu1 }
 0x2f1   :  { %v7155_v42 = vpop.f32.mrb[47].mxu1 }
 0x2f2   :  { %v4248_v47 = vadd.f32 %v7153_v41, %v4184_v19 }
 0x316   :  { %v7173_v48 = vpop.f32.mrb[48].mxu1 }
 0x317   :  { %v7174_v57 = vpop.f32.mrb[49].mxu1 }
 0x318   :  { %v7175_v61 = vadd.f32 %v7174_v57, %v7173_v48  ;;  %v7176_v56 = vpop.f32.mrb[50].mxu1 }
 0x319   :  { %v7177_v0 = vpop.f32.mrb[51].mxu1 }
 0x31a   :  { %v7178_v1 = vadd.f32 %v7177_v0, %v7176_v56  ;;  %v4288_v3 = vadd.f32 %v7175_v61, %v4224_v23 }
 0x31c   :  { %v4291_v4 = vadd.f32 %v7178_v1, %v4227_v25 }
 0x31e   :  { %v7179_v5 = vpop.f32.mrb[52].mxu1 }
 0x31f   :  { %v7180_v7 = vpop.f32.mrb[53].mxu1 }
 0x320   :  { %v7181_v52 = vadd.f32 %v7180_v7, %v7179_v5  ;;  %v7182_v59 = vpop.f32.mrb[54].mxu1 }
 0x321   :  { %v7183_v53 = vpop.f32.mrb[55].mxu1 }
 0x322   :  { %v7184_v62 = vadd.f32 %v7183_v53, %v7182_v59  ;;  %v4296_v63 = vadd.f32 %v7181_v52, %v4232_v29 }
 0x324   :  { %v4299_v10 = vadd.f32 %v7184_v62, %v4235_v31 }
 0x326   :  { %v7185_v58 = vpop.f32.mrb[56].mxu1 }
 0x327   :  { %v7186_v11 = vpop.f32.mrb[57].mxu1 }
 0x328   :  { %v7187_v12 = vadd.f32 %v7186_v11, %v7185_v58  ;;  %v7188_v13 = vpop.f32.mrb[58].mxu1 }
 0x329   :  { %v7189_v2 = vpop.f32.mrb[59].mxu1 }
 0x32a   :  { %v7190_v15 = vadd.f32 %v7189_v2, %v7188_v13  ;;  %v4304_v16 = vadd.f32 %v7187_v12, %v4240_v36 }
 0x32c   :  { %v4307_v18 = vadd.f32 %v7190_v15, %v4243_v40 }
 0x32e   :  { %v7191_v19 = vpop.f32.mrb[60].mxu1 }
 0x32f   :  { %v7192_v20 = vpop.f32.mrb[61].mxu1 }
 0x330   :  { %v7193_v8 = vadd.f32 %v7192_v20, %v7191_v19  ;;  %v7194_v21 = vpop.f32.mrb[62].mxu1 }
 0x331   :  { %v7195_v9 = vpop.f32.mrb[63].mxu1 }
 0x332   :  { %v4312_v22 = vadd.f32 %v7193_v8, %v4248_v47 }
 0x355   :  { %v10130_v23 = vpop.f32.mrb[0].mxu0 }
 0x356   :  { %v10132_v24 = vpop.f32.mrb[1].mxu0 }
 0x357   :  { %v10134_v25 = vpop.f32.mrb[2].mxu0 }
 0x358   :  { %v4381_v26 = vadd.f32 %v10134_v25, %v10130_v23  ;;  %v10138_v27 = vpop.f32.mrb[3].mxu0 }
 0x359   :  { %v4395_v60 = vadd.f32 %v10138_v27, %v10132_v24 }
 0x35d   :  { %v10142_v28 = vpop.f32.mrb[4].mxu0  ;;  %v7227_v14 = vpop.f32.mrb[64].mxu1 }
 0x35e   :  { %v4382_v29 = vadd.f32 %v4381_v26, %v10142_v28  ;;  %v10145_v30 = vadd.f32 %v7227_v14, %v4296_v63  ;;  %v10147_v31 = vpop.f32.mrb[5].mxu0  ;;  %v4351_v32 = vpop.f32.mrb[65].mxu1 }
 0x35f   :  { %v4396_v33 = vadd.f32 %v4395_v60, %v10147_v31  ;;  %v10150_v34 = vadd.f32 %v4351_v32, %v4288_v3  ;;  %v10152_v17 = vpop.f32.mrb[6].mxu0  ;;  %v7228_v35 = vpop.f32.mrb[66].mxu1 }
 0x360   :  { %v4383_v36 = vadd.f32 %v4382_v29, %v10152_v17  ;;  %v10155_v39 = vadd.f32 %v7228_v35, %v4299_v10  ;;  %v10157_v40 = vpop.f32.mrb[7].mxu0  ;;  %v4354_v51 = vpop.f32.mrb[67].mxu1  ;;  %v4412_v48 = vsel %vm4408_vm0, %v10145_v30, 0.0 }
 0x361   :  { %v4397_v43 = vadd.f32 %v4396_v33, %v10157_v40  ;;  %v10160_v41 = vadd.f32 %v4354_v51, %v4291_v4  ;;  %v4409_v44 = vsel %vm4408_vm0, %v10150_v34, 0.0 }
 0x362   :  { %v4414_v1 = vsel %vm4408_vm0, %v10155_v39, 0.0 }
 0x363   :  { %v4410_v42 = vsel %vm4408_vm0, %v10160_v41, 0.0 }
 0x364   :  { %v4411_v47 = vadd.f32 %v4410_v42, %v4409_v44 }
 0x365   :  { %v4044_v57 = vpop.f32.mrb[8].mxu0 }
 0x366   :  { %v4413_v61 = vadd.f32 %v4412_v48, %v4411_v47  ;;  %v4384_v56 = vadd.f32 %v4383_v36, %v4044_v57  ;;  %v10168_v0 = vpop.f32.mrb[9].mxu0 }
 0x367   :  { %v4398_v3 = vadd.f32 %v4397_v43, %v10168_v0  ;;  %v4048_v4 = vpop.f32.mrb[10].mxu0 }
 0x368   :  { %v4385_v5 = vadd.f32 %v4384_v56, %v4048_v4  ;;  %v10173_v7 = vpop.f32.mrb[11].mxu0  ;;  %v4415_v52 = vadd.f32 %v4414_v1, %v4413_v61 }
 0x369   :  { %v4399_v59 = vadd.f32 %v4398_v3, %v10173_v7  ;;  %v7231_v53 = vpop.f32.mrb[68].mxu1 }
 0x36a   :  { %v4376_v62 = vadd.f32 %v7231_v53, %v4312_v22  ;;  %v4367_v63 = vpop.f32.mrb[69].mxu1 }
 0x36b   :  { %v4368_v10 = vadd.f32 %v4367_v63, %v4304_v16  ;;  %v7232_v58 = vpop.f32.mrb[70].mxu1 }
 0x36c   :  { %v4370_v11 = vpop.f32.mrb[71].mxu1  ;;  %v4421_v14 = vsel %vm4420_vm2, %v4376_v62, 0.0 }
 0x36d   :  { %v4416_v12 = vsel %vm4408_vm0, %v4368_v10, 0.0  ;;  %v4371_v13 = vadd.f32 %v4370_v11, %v4307_v18  ;;  %v4054_v2 = vpop.f32.mrb[12].mxu0 }
 0x36e   :  { %v4417_v15 = vadd.f32 %v4416_v12, %v4415_v52  ;;  %v4387_v19 = vsel %vm4386_vm1, %v4054_v2, 0.0  ;;  %v10178_v20 = vpop.f32.mrb[13].mxu0 }
 0x36f   :  { %v4418_v8 = vsel %vm4408_vm0, %v4371_v13, 0.0  ;;  %v4388_v21 = vadd.f32 %v4387_v19, %v4385_v5  ;;  %v4400_v9 = vsel %vm4386_vm1, %v10178_v20, 0.0  ;;  %v4058_v16 = vpop.f32.mrb[14].mxu0 }
 0x370   :  { %v4419_v22 = vadd.f32 %v4418_v8, %v4417_v15  ;;  %v4401_v26 = vadd.f32 %v4400_v9, %v4399_v59  ;;  %v4059_v60 = vpop.f32.mrb[15].mxu0 }
 0x371   :  { %v4389_v18 = vrot.slane %v4388_v21, 4 }
 0x372   :  { %v4422_v29 = vadd.f32 %v4421_v14, %v4419_v22  ;;  %v4402_v32 = vrot.slane %v4401_v26, 4 }
 0x373   :  { %v4390_v33 = vadd.f32 %v4389_v18, %v4388_v21 }
 0x374   :  { %v4423_v35 = vrot.slane %v4422_v29, 4  ;;  %v4403_v36 = vadd.f32 %v4402_v32, %v4401_v26 }
 0x375   :  { %v4391_v51 = vrot.slane %v4390_v33, 2 }
 0x376   :  { %v4424_v43 = vadd.f32 %v4423_v35, %v4422_v29  ;;  %v4404_v44 = vrot.slane %v4403_v36, 2 }
 0x377   :  { %v4392_v42 = vadd.f32 %v4391_v51, %v4390_v33 }
 0x378   :  { %v4425_v47 = vrot.slane %v4424_v43, 2  ;;  %v4405_v48 = vadd.f32 %v4404_v44, %v4403_v36 }
 0x379   :  { %v4393_v61 = vrot.slane %v4392_v42, 1 }
 0x37a   :  { %v4426_v56 = vadd.f32 %v4425_v47, %v4424_v43  ;;  %v4406_v1 = vrot.slane %v4405_v48, 1 }
 0x37b   :  { %v4394_v3 = vadd.f32 %v4393_v61, %v4392_v42 }
 0x37c   :  { %v4427_v5 = vrot.slane %v4426_v56, 1  ;;  %v4407_v59 = vadd.f32 %v4406_v1, %v4405_v48 }
 0x37d   :  { %v4429_v52 = vmul.f32 0.020408163, %v4394_v3 }
 0x37e   :  { %v4428_v53 = vadd.f32 %v4427_v5, %v4426_v56  ;;  %v4430_v9 = vmul.f32 0.020408163, %v4407_v59 }
 0x37f   :  { %v10185_v63 = vsub.f32 %v10130_v23, %v4429_v52  ;;  %v10188_v58 = vsub.f32 %v10134_v25, %v4429_v52  ;;  %v10191_v11 = vsub.f32 %v10142_v28, %v4429_v52  ;;  %v10194_v12 = vsub.f32 %v10152_v17, %v4429_v52 }
 0x380   :  { %v4431_v15 = vmul.f32 0.020408163, %v4428_v53  ;;  %v10196_v19 = vsub.f32 %v4044_v57, %v4429_v52  ;;  %v10198_v8 = vsub.f32 %v4048_v4, %v4429_v52  ;;  %v10200_v21 = vsub.f32 %v4054_v2, %v4429_v52 }
 0x381   :  { %v4453_v2 = vmul.f32 %v10185_v63, %v10185_v63  ;;  %v4459_v22 = vmul.f32 %v10191_v11, %v10191_v11  ;;  %v4462_v18 = vmul.f32 %v10194_v12, %v10194_v12  ;;  %v10244_v33 = vsub.f32 %v10132_v24, %v4430_v9 }
 0x382   :  { %v10203_v23 = vsub.f32 %v10150_v34, %v4431_v15  ;;  %v10206_v25 = vsub.f32 %v10160_v41, %v4431_v15  ;;  %v10209_v28 = vsub.f32 %v10145_v30, %v4431_v15  ;;  %v10212_v17 = vsub.f32 %v10155_v39, %v4431_v15 }
 0x383   :  { %v10214_v16 = vsub.f32 %v4368_v10, %v4431_v15  ;;  %v10216_v57 = vsub.f32 %v4371_v13, %v4431_v15  ;;  %v10218_v4 = vsub.f32 %v4376_v62, %v4431_v15  ;;  %v4456_v39 = vmul.f32 %v10188_v58, %v10188_v58 }
 0x384   :  { %v4455_v34 = vmul.f32 %v10203_v23, %v10203_v23  ;;  %v4458_v41 = vmul.f32 %v10206_v25, %v10206_v25  ;;  %v4461_v30 = vmul.f32 %v10209_v28, %v10209_v28  ;;  %v4464_v10 = vmul.f32 %v10212_v17, %v10212_v17 }
 0x385   :  { %v4467_v26 = vmul.f32 %v10214_v16, %v10214_v16  ;;  %v4470_v60 = vmul.f32 %v10216_v57, %v10216_v57  ;;  %v4474_v32 = vadd.f32 %v4456_v39, %v4453_v2  ;;  %v10247_v35 = vsub.f32 %v10138_v27, %v4430_v9 }
 0x386   :  { %v4500_v62 = vsel %vm4408_vm0, %v4455_v34, 0.0  ;;  %v4501_v13 = vsel %vm4408_vm0, %v4458_v41, 0.0  ;;  %v4503_v29 = vsel %vm4408_vm0, %v4461_v30, 0.0  ;;  %v10250_v51 = vsub.f32 %v10147_v31, %v4430_v9 }
 0x387   :  { %v4502_v14 = vadd.f32 %v4501_v13, %v4500_v62  ;;  %v10253_v43 = vsub.f32 %v10157_v40, %v4430_v9  ;;  %v10256_v44 = vsub.f32 %v10168_v0, %v4430_v9  ;;  %v4505_v42 = vsel %vm4408_vm0, %v4464_v10, 0.0 }
 0x388   :  { %v4475_v47 = vadd.f32 %v4474_v32, %v4459_v22  ;;  %v10260_v48 = vsub.f32 %v10173_v7, %v4430_v9  ;;  %v10263_v24 = vsub.f32 %v10178_v20, %v4430_v9  ;;  %v4454_v31 = vmul.f32 %v10244_v33, %v10244_v33 }
 0x389   :  { %v4504_v36 = vadd.f32 %v4503_v29, %v4502_v14  ;;  %v4457_v40 = vmul.f32 %v10247_v35, %v10247_v35  ;;  %v4473_v0 = vmul.f32 %v10218_v4, %v10218_v4  ;;  %v4507_v61 = vsel %vm4408_vm0, %v4467_v26, 0.0 }
 0x38a   :  { %v4465_v56 = vmul.f32 %v10196_v19, %v10196_v19  ;;  %v4476_v7 = vadd.f32 %v4475_v47, %v4462_v18  ;;  %v4471_v20 = vmul.f32 %v10200_v21, %v10200_v21  ;;  %v4460_v3 = vmul.f32 %v10250_v51, %v10250_v51 }
 0x38b   :  { %v4506_v27 = vadd.f32 %v4505_v42, %v4504_v36  ;;  %v4487_v5 = vadd.f32 %v4457_v40, %v4454_v31  ;;  %v4509_v52 = vsel %vm4408_vm0, %v4470_v60, 0.0  ;;  %v4468_v59 = vmul.f32 %v10198_v8, %v10198_v8 }
 0x38c   :  { %v4477_v53 = vadd.f32 %v4476_v7, %v4465_v56  ;;  %v4463_v9 = vmul.f32 %v10253_v43, %v10253_v43  ;;  %v4511_v34 = vsel %vm4420_vm2, %v4473_v0, 0.0  ;;  %v4479_v39 = vsel %vm4386_vm1, %v4471_v20, 0.0 }
 0x38d   :  { %v4508_v1 = vadd.f32 %v4507_v61, %v4506_v27  ;;  %v4488_v2 = vadd.f32 %v4487_v5, %v4460_v3  ;;  %v4466_v10 = vmul.f32 %v10256_v44, %v10256_v44  ;;  %v4472_v22 = vmul.f32 %v10263_v24, %v10263_v24 }
 0x38e   :  { %v4478_v41 = vadd.f32 %v4477_v53, %v4468_v59  ;;  %v4469_v60 = vmul.f32 %v10260_v48, %v10260_v48 }
 0x38f   :  { %v4510_v15 = vadd.f32 %v4509_v52, %v4508_v1  ;;  %v4489_v62 = vadd.f32 %v4488_v2, %v4463_v9  ;;  %v4492_v42 = vsel %vm4386_vm1, %v4472_v22, 0.0 }
 0x390   :  { %v4480_v13 = vadd.f32 %v4479_v39, %v4478_v41 }
 0x391   :  { %v4512_v30 = vadd.f32 %v4511_v34, %v4510_v15  ;;  %v4490_v14 = vadd.f32 %v4489_v62, %v4466_v10 }
 0x392   :  { %v4481_v18 = vrot.slane %v4480_v13, 4 }
 0x393   :  { %v4513_v26 = vrot.slane %v4512_v30, 4  ;;  %v4491_v32 = vadd.f32 %v4490_v14, %v4469_v60  ;;  %v4581_v60 = vld [vmem:[%s12018_s4] sm:$0x7] }
 0x394   :  { %v4482_v36 = vadd.f32 %v4481_v18, %v4480_v13 }
 0x395   :  { %v4514_v29 = vadd.f32 %v4513_v26, %v4512_v30  ;;  %v4493_v27 = vadd.f32 %v4492_v42, %v4491_v32  ;;  %v4528_v30 = vld [vmem:[%s12017_s3] sm:$0x7] }
 0x396   :  { %v4483_v31 = vrot.slane %v4482_v36, 2  ;;  %v4541_v10 = vrot.slane %v4528_v30, %v9507_v46  ;;  %v4533_v62 = vrot.slane %v4528_v30, %v9251_v55  ;;  %v4537_v42 = vrot.slane %v4528_v30, %v9248_v54 }
 0x397   :  { %v4515_v47 = vrot.slane %v4514_v29, 2  ;;  %v4494_v0 = vrot.slane %v4493_v27, 4 }
 0x398   :  { %v4484_v61 = vadd.f32 %v4483_v31, %v4482_v36  ;;  %v4586_v36 = vrot.slane %v4581_v60, %v9251_v55 }
 0x399   :  { %v4516_v40 = vadd.f32 %v4515_v47, %v4514_v29  ;;  %v4495_v7 = vadd.f32 %v4494_v0, %v4493_v27  ;;  %v4594_v29 = vrot.slane %v4581_v60, %v9507_v46 }
 0x39a   :  { %v4485_v1 = vrot.slane %v4484_v61, 1 }
 0x39b   :  { %v4517_v56 = vrot.slane %v4516_v40, 1  ;;  %v4496_v3 = vrot.slane %v4495_v7, 2 }
 0x39c   :  { %v4486_v5 = vadd.f32 %v4485_v1, %v4484_v61 }
 0x39d   :  { %v4518_v20 = vadd.f32 %v4517_v56, %v4516_v40  ;;  %v4497_v59 = vadd.f32 %v4496_v3, %v4495_v7 }
 0x39e   :  { %v4519_v53 = vmul.f32 0.020408163, %v4486_v5 }
 0x39f   :  { %v4521_v52 = vmul.f32 0.020408163, %v4518_v20  ;;  %v4498_v9 = vrot.slane %v4497_v59, 1 }
 0x3a0   :  { %v4522_v2 = vadd.f32 1e-05, %v4519_v53 }
 0x3a1   :  { %v4524_v15 = vadd.f32 1e-05, %v4521_v52  ;;  %v4499_v34 = vadd.f32 %v4498_v9, %v4497_v59 }
 0x3a3   :  { %7681 = vrsqrt.f32 %v4524_v15  ;;  %v4520_v41 = vmul.f32 0.020408163, %v4499_v34 }
 0x3a4   :  { %7683 = vrsqrt.f32 %v4522_v2 }
 0x3a5   :  { %v4523_v39 = vadd.f32 1e-05, %v4520_v41 }
 0x3a7   :  { %7685 = vrsqrt.f32 %v4523_v39 }
 0x3ad   :  { %v7682_v13 = vpop.eup %7681 }
 0x3ae   :  { %v7684_v22 = vpop.eup %7683  ;;  %v4547_v26 = vmul.f32 %v7682_v13, %v4541_v10 }
 0x3af   :  { %v4545_v14 = vmul.f32 %v7684_v22, %v4533_v62 }
 0x3b0   :  { %v4559_v18 = vrot.slane %v4547_v26, %v9251_v55 }
 0x3b1   :  { %v4551_v32 = vrot.slane %v4545_v14, %v9251_v55 }
 0x3b2   :  { %v4562_v47 = vmul.f32 %v4559_v18, %v10203_v23  ;;  %v4565_v27 = vmul.f32 %v4559_v18, %v10206_v25  ;;  %v4568_v31 = vmul.f32 %v4559_v18, %v10209_v28  ;;  %v4571_v40 = vmul.f32 %v4559_v18, %v10212_v17  ;;  %v7686_v28 = vpop.eup %7685 }
 0x3b3   :  { %v4574_v0 = vmul.f32 %v4559_v18, %v10214_v16  ;;  %v4577_v61 = vmul.f32 %v4559_v18, %v10216_v57  ;;  %v4580_v56 = vmul.f32 %v4559_v18, %v10218_v4  ;;  %v4560_v7 = vmul.f32 %v4551_v32, %v10185_v63 }
 0x3b4   :  { %v4600_v1 = vadd.f32 %v4594_v29, %v4562_v47  ;;  %v4603_v20 = vadd.f32 %v4594_v29, %v4565_v27  ;;  %v4606_v3 = vadd.f32 %v4594_v29, %v4568_v31  ;;  %v4609_v5 = vadd.f32 %v4594_v29, %v4571_v40 }
 0x3b5   :  { %v4612_v52 = vadd.f32 %v4594_v29, %v4574_v0  ;;  %v4615_v23 = vadd.f32 %v4594_v29, %v4577_v61  ;;  %v4618_v59 = vadd.f32 %v4594_v29, %v4580_v56  ;;  %v4563_v25 = vmul.f32 %v4551_v32, %v10188_v58 }
 0x3b6   :  { %v10314_v53 = vpack.c.bf16 %v4603_v20, %v4600_v1  ;;  %v10316_v17 = vpack.c.bf16 %v4609_v5, %v4606_v3  ;;  %v4566_v16 = vmul.f32 %v4551_v32, %v10191_v11  ;;  %v4569_v57 = vmul.f32 %v4551_v32, %v10194_v12 }
 0x3b7   :  { %v10320_v4 = vpack.c.bf16 %v4615_v23, %v4612_v52  ;;  %v10322_v63 = vpack.c.bf16 %v4618_v59, %v4618_v59  ;;  %v4572_v15 = vmul.f32 %v4551_v32, %v10196_v19  ;;  %v4575_v9 = vmul.f32 %v4551_v32, %v10198_v8 }
 0x3b8   :  { %v4578_v2 = vmul.f32 %v4551_v32, %v10200_v21  ;;  %v4598_v58 = vadd.f32 %v4586_v36, %v4560_v7  ;;  %v4601_v34 = vadd.f32 %v4586_v36, %v4563_v25  ;;  %v4604_v41 = vadd.f32 %v4586_v36, %v4566_v16 }
 0x3b9   :  { %v4607_v30 = vadd.f32 %v4586_v36, %v4569_v57  ;;  %v4610_v39 = vadd.f32 %v4586_v36, %v4572_v15  ;;  %v4613_v10 = vadd.f32 %v4586_v36, %v4575_v9  ;;  %v4546_v62 = vmul.f32 %v7686_v28, %v4537_v42 }
 0x3ba   :  { %v4616_v11 = vadd.f32 %v4586_v36, %v4578_v2  ;;  %v10327_v13 = vpack.c.bf16 %v4601_v34, %v4598_v58  ;;  %v4590_v8 = vrot.slane %v4581_v60, %v9248_v54 }
 0x3bb   :  { %v10329_v12 = vpack.c.bf16 %v4607_v30, %v4604_v41  ;;  %v10331_v22 = vpack.c.bf16 %v4613_v10, %v4610_v39  ;;  %v4555_v19 = vrot.slane %v4546_v62, %v9251_v55 }
 0x3bc   :  { %v10335_v26 = vpack.c.bf16 %v4616_v11, %v4616_v11 }
 0x3bd   :  { %v4561_v21 = vmul.f32 %v4555_v19, %v10244_v33  ;;  %v4564_v14 = vmul.f32 %v4555_v19, %v10247_v35  ;;  %v4567_v18 = vmul.f32 %v4555_v19, %v10250_v51  ;;  %v4570_v29 = vmul.f32 %v4555_v19, %v10253_v43 }
 0x3be   :  { %v4573_v32 = vmul.f32 %v4555_v19, %v10256_v44  ;;  %v4576_v36 = vmul.f32 %v4555_v19, %v10260_v48  ;;  %v4579_v42 = vmul.f32 %v4555_v19, %v10263_v24 }
 0x3bf   :  { %v4599_v47 = vadd.f32 %v4590_v8, %v4561_v21  ;;  %v4602_v27 = vadd.f32 %v4590_v8, %v4564_v14  ;;  %v4605_v31 = vadd.f32 %v4590_v8, %v4567_v18  ;;  %v4608_v60 = vadd.f32 %v4590_v8, %v4570_v29 }
 0x3c0   :  { %v4611_v40 = vadd.f32 %v4590_v8, %v4573_v32  ;;  %v4614_v0 = vadd.f32 %v4590_v8, %v4576_v36  ;;  %v4617_v61 = vadd.f32 %v4590_v8, %v4579_v42 }
 0x3c1   :  { %v10344_v33 = vpack.c.bf16 %v4602_v27, %v4599_v47  ;;  %v10346_v35 = vpack.c.bf16 %v4608_v60, %v4605_v31 }
 0x3c2   :  { %v10348_v51 = vpack.c.bf16 %v4614_v0, %v4611_v40  ;;  %v10350_v43 = vpack.c.bf16 %v4617_v61, %v4617_v61 }
 0x3c3   :  { %7709 = dma.done.wait [#allocation3], 25600 }
 0x3c4   :  { %7710 = vsyncadd [#allocation3], 4294941696  ;;  %4879 = vmatprep.mubr.bf16.mxu1 %v10344_v33  ;;  %5163 = vmatprep.mubr.bf16.mxu0 %v10344_v33  ;;  %v4636_v44 = vld [vmem:[#allocation2 + $0x8] sm:$0xff]  ;;  %v4635_v24 = vld [vmem:[#allocation2] sm:$0xff]  ;;  %vm6615_vm3 = vcmask 400384  }
 0x3c5   :  { %v4640_v48 = vld [vmem:[#allocation2 + $0x28] sm:$0xff]  ;;  %4847 = vmatprep.subr.bf16.mxu1 %v4636_v44  ;;  %v4639_v56 = vld [vmem:[#allocation2 + $0x20] sm:$0xff]  ;;  %v4646_v7 = vld [vmem:[#allocation2 + $0x58] sm:$0xff] }
 0x3c6   :  { %5131 = vmatprep.subr.bf16.mxu0 %v4640_v48  ;;  %v4650_v1 = vld [vmem:[#allocation2 + $0x78] sm:$0xff]  ;;  %4848 = vmatpush1.bf16.msra.mxu1 %v4635_v24  ;;  %v4645_v20 = vld [vmem:[#allocation2 + $0x50] sm:$0xff]  ;;  %v4656_v5 = vld [vmem:[#allocation2 + $0xa8] sm:$0xff] }
 0x3c7   :  { %5132 = vmatpush1.bf16.msra.mxu0 %v4639_v56  ;;  %4849 = vmatprep.subr.bf16.mxu1 %v4646_v7  ;;  %v4649_v3 = vld [vmem:[#allocation2 + $0x70] sm:$0xff]  ;;  %v4660_v52 = vld [vmem:[#allocation2 + $0xc8] sm:$0xff]  ;;  %v4655_v23 = vld [vmem:[#allocation2 + $0xa0] sm:$0xff] }
 0x3c8   :  { %5133 = vmatprep.subr.bf16.mxu0 %v4650_v1  ;;  %v4659_v59 = vld [vmem:[#allocation2 + $0xc0] sm:$0xff]  ;;  %v4666_v25 = vld [vmem:[#allocation2 + $0xf8] sm:$0xff]  ;;  %v4665_v16 = vld [vmem:[#allocation2 + $0xf0] sm:$0xff] }
 0x3c9   :  { %v4670_v28 = vld [vmem:[#allocation2 + $0x118] sm:$0xff]  ;;  %v4669_v57 = vld [vmem:[#allocation2 + $0x110] sm:$0xff]  ;;  %v4676_v15 = vld [vmem:[#allocation2 + $0x148] sm:$0xff] }
 0x3ca   :  { %4850 = vmatpush1.bf16.msra.mxu1 %v4645_v20  ;;  %v4680_v9 = vld [vmem:[#allocation2 + $0x168] sm:$0xff]  ;;  %v4675_v2 = vld [vmem:[#allocation2 + $0x140] sm:$0xff]  ;;  %v4686_v34 = vld [vmem:[#allocation2 + $0x198] sm:$0xff] }
 0x3cb   :  { %5134 = vmatpush1.bf16.msra.mxu0 %v4649_v3  ;;  %4851 = vmatprep.subr.bf16.mxu1 %v4656_v5  ;;  %v4679_v58 = vld [vmem:[#allocation2 + $0x160] sm:$0xff]  ;;  %v4690_v41 = vld [vmem:[#allocation2 + $0x1b8] sm:$0xff]  ;;  %v4685_v30 = vld [vmem:[#allocation2 + $0x190] sm:$0xff] }
 0x3cc   :  { %5135 = vmatprep.subr.bf16.mxu0 %v4660_v52  ;;  %v4689_v39 = vld [vmem:[#allocation2 + $0x1b0] sm:$0xff]  ;;  %v4696_v10 = vld [vmem:[#allocation2 + $0x1e8] sm:$0xff]  ;;  %v4695_v11 = vld [vmem:[#allocation2 + $0x1e0] sm:$0xff] }
 0x3cd   :  { %v4700_v62 = vld [vmem:[#allocation2 + $0x208] sm:$0xff]  ;;  %v4699_v19 = vld [vmem:[#allocation2 + $0x200] sm:$0xff]  ;;  %v4706_v8 = vld [vmem:[#allocation2 + $0x238] sm:$0xff] }
 0x3ce   :  { %4852 = vmatpush1.bf16.msra.mxu1 %v4655_v23  ;;  %v4710_v21 = vld [vmem:[#allocation2 + $0x258] sm:$0xff]  ;;  %v4705_v14 = vld [vmem:[#allocation2 + $0x230] sm:$0xff]  ;;  %v4716_v29 = vld [vmem:[#allocation2 + $0x288] sm:$0xff] }
 0x3cf   :  { %5136 = vmatpush1.bf16.msra.mxu0 %v4659_v59  ;;  %4853 = vmatprep.subr.bf16.mxu1 %v4666_v25  ;;  %v4709_v18 = vld [vmem:[#allocation2 + $0x250] sm:$0xff]  ;;  %v4720_v32 = vld [vmem:[#allocation2 + $0x2a8] sm:$0xff]  ;;  %v4715_v36 = vld [vmem:[#allocation2 + $0x280] sm:$0xff] }
 0x3d0   :  { %5137 = vmatprep.subr.bf16.mxu0 %v4670_v28  ;;  %v4719_v42 = vld [vmem:[#allocation2 + $0x2a0] sm:$0xff]  ;;  %v4726_v47 = vld [vmem:[#allocation2 + $0x2d8] sm:$0xff]  ;;  %v4725_v31 = vld [vmem:[#allocation2 + $0x2d0] sm:$0xff] }
 0x3d1   :  { %v4730_v27 = vld [vmem:[#allocation2 + $0x2f8] sm:$0xff]  ;;  %v4729_v60 = vld [vmem:[#allocation2 + $0x2f0] sm:$0xff]  ;;  %v4736_v40 = vld [vmem:[#allocation2 + $0x328] sm:$0xff] }
 0x3d2   :  { %4854 = vmatpush1.bf16.msra.mxu1 %v4665_v16  ;;  %v4740_v0 = vld [vmem:[#allocation2 + $0x348] sm:$0xff]  ;;  %v4735_v61 = vld [vmem:[#allocation2 + $0x320] sm:$0xff]  ;;  %v4746_v48 = vld [vmem:[#allocation2 + $0x378] sm:$0xff] }
 0x3d3   :  { %5138 = vmatpush1.bf16.msra.mxu0 %v4669_v57  ;;  %4855 = vmatprep.subr.bf16.mxu1 %v4676_v15  ;;  %v4739_v44 = vld [vmem:[#allocation2 + $0x340] sm:$0xff]  ;;  %v4750_v24 = vld [vmem:[#allocation2 + $0x398] sm:$0xff]  ;;  %v4745_v56 = vld [vmem:[#allocation2 + $0x370] sm:$0xff] }
 0x3d4   :  { %5139 = vmatprep.subr.bf16.mxu0 %v4680_v9  ;;  %v4749_v7 = vld [vmem:[#allocation2 + $0x390] sm:$0xff]  ;;  %v4756_v1 = vld [vmem:[#allocation2 + $0x3c8] sm:$0xff]  ;;  %v4755_v3 = vld [vmem:[#allocation2 + $0x3c0] sm:$0xff] }
 0x3d5   :  { %v4760_v20 = vld [vmem:[#allocation2 + $0x3e8] sm:$0xff]  ;;  %v4759_v5 = vld [vmem:[#allocation2 + $0x3e0] sm:$0xff]  ;;  %v4766_v52 = vld [vmem:[#allocation2 + $0x418] sm:$0xff] }
 0x3d6   :  { %4856 = vmatpush1.bf16.msra.mxu1 %v4675_v2  ;;  %v4770_v23 = vld [vmem:[#allocation2 + $0x438] sm:$0xff]  ;;  %v4765_v59 = vld [vmem:[#allocation2 + $0x410] sm:$0xff]  ;;  %v4776_v28 = vld [vmem:[#allocation2 + $0x468] sm:$0xff] }
 0x3d7   :  { %5140 = vmatpush1.bf16.msra.mxu0 %v4679_v58  ;;  %4857 = vmatprep.subr.bf16.mxu1 %v4686_v34  ;;  %v4769_v25 = vld [vmem:[#allocation2 + $0x430] sm:$0xff]  ;;  %v4780_v16 = vld [vmem:[#allocation2 + $0x488] sm:$0xff]  ;;  %v4775_v57 = vld [vmem:[#allocation2 + $0x460] sm:$0xff] }
 0x3d8   :  { %5141 = vmatprep.subr.bf16.mxu0 %v4690_v41  ;;  %v4779_v15 = vld [vmem:[#allocation2 + $0x480] sm:$0xff]  ;;  %v4786_v9 = vld [vmem:[#allocation2 + $0x4b8] sm:$0xff]  ;;  %v4785_v58 = vld [vmem:[#allocation2 + $0x4b0] sm:$0xff] }
 0x3d9   :  { %v4790_v2 = vld [vmem:[#allocation2 + $0x4d8] sm:$0xff]  ;;  %v4789_v34 = vld [vmem:[#allocation2 + $0x4d0] sm:$0xff]  ;;  %v4796_v41 = vld [vmem:[#allocation2 + $0x508] sm:$0xff] }
 0x3da   :  { %4858 = vmatpush1.bf16.msra.mxu1 %v4685_v30  ;;  %v4800_v30 = vld [vmem:[#allocation2 + $0x528] sm:$0xff] }
 0x3db   :  { %5142 = vmatpush1.bf16.msra.mxu0 %v4689_v39  ;;  %4859 = vmatprep.subr.bf16.mxu1 %v4696_v10  ;;  %v4795_v39 = vld [vmem:[#allocation2 + $0x500] sm:$0xff]  ;;  %v4806_v10 = vld [vmem:[#allocation2 + $0x558] sm:$0xff] }
 0x3dc   :  { %5143 = vmatprep.subr.bf16.mxu0 %v4700_v62  ;;  %v4799_v62 = vld [vmem:[#allocation2 + $0x520] sm:$0xff] }
 0x3de   :  { %4860 = vmatpush1.bf16.msra.mxu1 %v4695_v11  ;;  %v4810_v11 = vld [vmem:[#allocation2 + $0x578] sm:$0xff] }
 0x3df   :  { %5144 = vmatpush1.bf16.msra.mxu0 %v4699_v19  ;;  %4861 = vmatprep.subr.bf16.mxu1 %v4706_v8  ;;  %v4805_v19 = vld [vmem:[#allocation2 + $0x550] sm:$0xff]  ;;  %v4816_v8 = vld [vmem:[#allocation2 + $0x5a8] sm:$0xff] }
 0x3e0   :  { %5145 = vmatprep.subr.bf16.mxu0 %v4710_v21  ;;  %v4809_v21 = vld [vmem:[#allocation2 + $0x570] sm:$0xff] }
 0x3e2   :  { %4862 = vmatpush1.bf16.msra.mxu1 %v4705_v14  ;;  %v4815_v14 = vld [vmem:[#allocation2 + $0x5a0] sm:$0xff] }
 0x3e3   :  { %5146 = vmatpush1.bf16.msra.mxu0 %v4709_v18  ;;  %4863 = vmatprep.subr.bf16.mxu1 %v4716_v29  ;;  %v4820_v18 = vld [vmem:[#allocation2 + $0x5c8] sm:$0xff]  ;;  %v4826_v29 = vld [vmem:[#allocation2 + $0x5f8] sm:$0xff] }
 0x3e4   :  { %5147 = vmatprep.subr.bf16.mxu0 %v4720_v32  ;;  %v4819_v32 = vld [vmem:[#allocation2 + $0x5c0] sm:$0xff] }
 0x3e6   :  { %4864 = vmatpush1.bf16.msra.mxu1 %v4715_v36  ;;  %v4830_v36 = vld [vmem:[#allocation2 + $0x618] sm:$0xff] }
 0x3e7   :  { %5148 = vmatpush1.bf16.msra.mxu0 %v4719_v42  ;;  %4865 = vmatprep.subr.bf16.mxu1 %v4726_v47  ;;  %v4825_v42 = vld [vmem:[#allocation2 + $0x5f0] sm:$0xff] }
 0x3e8   :  { %5149 = vmatprep.subr.bf16.mxu0 %v4730_v27  ;;  %v4829_v47 = vld [vmem:[#allocation2 + $0x610] sm:$0xff]  ;;  %v4638_v27 = vld [vmem:[#allocation2 + $0x18] sm:$0xff] }
 0x3ea   :  { %4866 = vmatpush1.bf16.msra.mxu1 %v4725_v31  ;;  %v4644_v31 = vld [vmem:[#allocation2 + $0x48] sm:$0xff] }
 0x3eb   :  { %5150 = vmatpush1.bf16.msra.mxu0 %v4729_v60  ;;  %4867 = vmatprep.subr.bf16.mxu1 %v4736_v40  ;;  %v4637_v60 = vld [vmem:[#allocation2 + $0x10] sm:$0xff]  ;;  %v4648_v40 = vld [vmem:[#allocation2 + $0x68] sm:$0xff] }
 0x3ec   :  { %5151 = vmatprep.subr.bf16.mxu0 %v4740_v0  ;;  %v4643_v0 = vld [vmem:[#allocation2 + $0x40] sm:$0xff] }
 0x3ee   :  { %4868 = vmatpush1.bf16.msra.mxu1 %v4735_v61  ;;  %v4654_v61 = vld [vmem:[#allocation2 + $0x98] sm:$0xff] }
 0x3ef   :  { %5152 = vmatpush1.bf16.msra.mxu0 %v4739_v44  ;;  %4869 = vmatprep.subr.bf16.mxu1 %v4746_v48  ;;  %v4647_v44 = vld [vmem:[#allocation2 + $0x60] sm:$0xff]  ;;  %v4658_v48 = vld [vmem:[#allocation2 + $0xb8] sm:$0xff] }
 0x3f0   :  { %5153 = vmatprep.subr.bf16.mxu0 %v4750_v24  ;;  %v4653_v24 = vld [vmem:[#allocation2 + $0x90] sm:$0xff] }
 0x3f2   :  { %4870 = vmatpush1.bf16.msra.mxu1 %v4745_v56  ;;  %v4657_v56 = vld [vmem:[#allocation2 + $0xb0] sm:$0xff] }
 0x3f3   :  { %5154 = vmatpush1.bf16.msra.mxu0 %v4749_v7  ;;  %4871 = vmatprep.subr.bf16.mxu1 %v4756_v1  ;;  %v4668_v7 = vld [vmem:[#allocation2 + $0x108] sm:$0xff] }
 0x3f4   :  { %5155 = vmatprep.subr.bf16.mxu0 %v4760_v20  ;;  %v4664_v1 = vld [vmem:[#allocation2 + $0xe8] sm:$0xff]  ;;  %v4663_v20 = vld [vmem:[#allocation2 + $0xe0] sm:$0xff] }
 0x3f6   :  { %4872 = vmatpush1.bf16.msra.mxu1 %v4755_v3  ;;  %v4667_v3 = vld [vmem:[#allocation2 + $0x100] sm:$0xff] }
 0x3f7   :  { %5156 = vmatpush1.bf16.msra.mxu0 %v4759_v5  ;;  %4873 = vmatprep.subr.bf16.mxu1 %v4766_v52  ;;  %v4674_v5 = vld [vmem:[#allocation2 + $0x138] sm:$0xff] }
 0x3f8   :  { %5157 = vmatprep.subr.bf16.mxu0 %v4770_v23  ;;  %v4678_v52 = vld [vmem:[#allocation2 + $0x158] sm:$0xff]  ;;  %v4677_v23 = vld [vmem:[#allocation2 + $0x150] sm:$0xff] }
 0x3fa   :  { %4874 = vmatpush1.bf16.msra.mxu1 %v4765_v59  ;;  %v4688_v59 = vld [vmem:[#allocation2 + $0x1a8] sm:$0xff] }
 0x3fb   :  { %5158 = vmatpush1.bf16.msra.mxu0 %v4769_v25  ;;  %4875 = vmatprep.subr.bf16.mxu1 %v4776_v28  ;;  %v4673_v25 = vld [vmem:[#allocation2 + $0x130] sm:$0xff]  ;;  %v4684_v28 = vld [vmem:[#allocation2 + $0x188] sm:$0xff] }
 0x3fc   :  { %5159 = vmatprep.subr.bf16.mxu0 %v4780_v16  ;;  %v4687_v16 = vld [vmem:[#allocation2 + $0x1a0] sm:$0xff] }
 0x3fe   :  { %4876 = vmatpush1.bf16.msra.mxu1 %v4775_v57  ;;  %v4698_v57 = vld [vmem:[#allocation2 + $0x1f8] sm:$0xff] }
 0x3ff   :  { %5160 = vmatpush1.bf16.msra.mxu0 %v4779_v15  ;;  %4877 = vmatprep.subr.bf16.mxu1 %v4786_v9  ;;  %v4683_v15 = vld [vmem:[#allocation2 + $0x180] sm:$0xff]  ;;  %v4697_v9 = vld [vmem:[#allocation2 + $0x1f0] sm:$0xff] }
 0x400   :  { %5161 = vmatprep.subr.bf16.mxu0 %v4790_v2  ;;  %v4708_v2 = vld [vmem:[#allocation2 + $0x248] sm:$0xff] }
 0x402   :  { %4878 = vmatpush1.bf16.msra.mxu1 %v4785_v58  ;;  %v4694_v58 = vld [vmem:[#allocation2 + $0x1d8] sm:$0xff] }
 0x403   :  { %5162 = vmatpush1.bf16.msra.mxu0 %v4789_v34  ;;  %4918 = vmatprep.subr.bf16.mxu1 %v4796_v41  ;;  %v4693_v34 = vld [vmem:[#allocation2 + $0x1d0] sm:$0xff]  ;;  %v4704_v41 = vld [vmem:[#allocation2 + $0x228] sm:$0xff] }
 0x404   :  { %5202 = vmatprep.subr.bf16.mxu0 %v4800_v30  ;;  %v4707_v30 = vld [vmem:[#allocation2 + $0x240] sm:$0xff] }
 0x405   :  { %4880 = vmatmul.mubr.bf16.vlgmr.msra.gmra.mrb[72].mxu1 %v10327_v13 }
 0x406   :  { %5164 = vmatmul.mubr.bf16.vlgmr.msra.gmra.mrb[16].mxu0 %v10327_v13  ;;  %4919 = vmatpush1.bf16.msra.mxu1 %v4795_v39  ;;  %v4718_v39 = vld [vmem:[#allocation2 + $0x298] sm:$0xff] }
 0x407   :  { %4889 = vmatprep.mubr.bf16.mxu1 %v10346_v35  ;;  %5173 = vmatprep.mubr.bf16.mxu0 %v10346_v35 }
 0x408   :  { %4920 = vmatprep.subr.bf16.mxu1 %v4806_v10  ;;  %5203 = vmatpush1.bf16.msra.mxu0 %v4799_v62  ;;  %v4703_v10 = vld [vmem:[#allocation2 + $0x220] sm:$0xff]  ;;  %v4714_v62 = vld [vmem:[#allocation2 + $0x278] sm:$0xff] }
 0x409   :  { %5204 = vmatprep.subr.bf16.mxu0 %v4810_v11  ;;  %v4717_v11 = vld [vmem:[#allocation2 + $0x290] sm:$0xff] }
 0x40a   :  { %4921 = vmatpush1.bf16.msra.mxu1 %v4805_v19  ;;  %v4728_v19 = vld [vmem:[#allocation2 + $0x2e8] sm:$0xff] }
 0x40b   :  { %4922 = vmatprep.subr.bf16.mxu1 %v4816_v8  ;;  %v4713_v8 = vld [vmem:[#allocation2 + $0x270] sm:$0xff] }
 0x40c   :  { %5205 = vmatpush1.bf16.msra.mxu0 %v4809_v21  ;;  %v4724_v21 = vld [vmem:[#allocation2 + $0x2c8] sm:$0xff] }
 0x40d   :  { %4890 = vmatmul.mubr.bf16.gmra.mrb[76].mxu1 %v10329_v12  ;;  %5206 = vmatprep.subr.bf16.mxu0 %v4820_v18  ;;  %v4738_v18 = vld [vmem:[#allocation2 + $0x338] sm:$0xff] }
 0x40e   :  { %5174 = vmatmul.mubr.bf16.gmra.mrb[20].mxu0 %v10329_v12  ;;  %4899 = vmatprep.mubr.bf16.mxu1 %v10348_v51 }
 0x40f   :  { %5183 = vmatprep.mubr.bf16.mxu0 %v10348_v51  ;;  %4923 = vmatpush1.bf16.msra.mxu1 %v4815_v14  ;;  %v4727_v14 = vld [vmem:[#allocation2 + $0x2e0] sm:$0xff] }
 0x410   :  { %4924 = vmatprep.subr.bf16.mxu1 %v4826_v29  ;;  %5207 = vmatpush1.bf16.msra.mxu0 %v4819_v32  ;;  %v4723_v29 = vld [vmem:[#allocation2 + $0x2c0] sm:$0xff]  ;;  %v4734_v32 = vld [vmem:[#allocation2 + $0x318] sm:$0xff] }
 0x411   :  { %5208 = vmatprep.subr.bf16.mxu0 %v4830_v36  ;;  %v4737_v36 = vld [vmem:[#allocation2 + $0x330] sm:$0xff] }
 0x413   :  { %4925 = vmatpush1.bf16.msra.mxu1 %v4825_v42  ;;  %v4748_v42 = vld [vmem:[#allocation2 + $0x388] sm:$0xff] }
 0x414   :  { %5209 = vmatpush1.bf16.msra.mxu0 %v4829_v47  ;;  %4989 = vmatprep.subr.bf16.mxu1 %v4638_v27  ;;  %v4733_v47 = vld [vmem:[#allocation2 + $0x310] sm:$0xff]  ;;  %v4744_v27 = vld [vmem:[#allocation2 + $0x368] sm:$0xff] }
 0x415   :  { %4900 = vmatmul.mubr.bf16.gmra.mrb[80].mxu1 %v10331_v22  ;;  %5415 = vmatprep.subr.bf16.mxu0 %v4644_v31  ;;  %v4747_v31 = vld [vmem:[#allocation2 + $0x380] sm:$0xff] }
 0x416   :  { %5184 = vmatmul.mubr.bf16.gmra.mrb[24].mxu0 %v10331_v22  ;;  %4909 = vmatprep.mubr.bf16.mxu1 %v10350_v43 }
 0x417   :  { %5193 = vmatprep.mubr.bf16.mxu0 %v10350_v43 }
 0x41d   :  { %4910 = vmatmul.mubr.bf16.gmra.mrb[84].mxu1 %v10335_v26 }
 0x41e   :  { %5194 = vmatmul.mubr.bf16.gmra.mrb[28].mxu0 %v10335_v26  ;;  %4950 = vmatprep.mubr.bf16.mxu1 %v7711_v6 }
 0x41f   :  { %5234 = vmatprep.mubr.bf16.mxu0 %v7711_v6 }
 0x425   :  { %7016 = vmatmul.mubr.msk.bf16.vlgmr.msra.gmra.mrb[72].mxu1 %vm4408_vm0, %v10314_v53 }
 0x426   :  { %7024 = vmatmul.mubr.msk.bf16.vlgmr.msra.gmra.mrb[16].mxu0 %vm4408_vm0, %v10314_v53  ;;  %4990 = vmatpush1.bf16.msra.mxu1 %v4637_v60  ;;  %v4758_v60 = vld [vmem:[#allocation2 + $0x3d8] sm:$0xff] }
 0x427   :  { %4960 = vmatprep.mubr.bf16.mxu1 %v7711_v6  ;;  %4991 = vmatprep.subr.bf16.mxu1 %v4648_v40  ;;  %v4743_v40 = vld [vmem:[#allocation2 + $0x360] sm:$0xff] }
 0x428   :  { %5244 = vmatprep.mubr.bf16.mxu0 %v7711_v6  ;;  %5416 = vmatpush1.bf16.msra.mxu0 %v4643_v0  ;;  %v4754_v0 = vld [vmem:[#allocation2 + $0x3b8] sm:$0xff] }
 0x429   :  { %5417 = vmatprep.subr.bf16.mxu0 %v4654_v61  ;;  %v4757_v61 = vld [vmem:[#allocation2 + $0x3d0] sm:$0xff] }
 0x42a   :  { %4992 = vmatpush1.bf16.msra.mxu1 %v4647_v44  ;;  %v4768_v44 = vld [vmem:[#allocation2 + $0x428] sm:$0xff] }
 0x42b   :  { %4993 = vmatprep.subr.bf16.mxu1 %v4658_v48  ;;  %v4753_v48 = vld [vmem:[#allocation2 + $0x3b0] sm:$0xff] }
 0x42c   :  { %5418 = vmatpush1.bf16.msra.mxu0 %v4653_v24  ;;  %v4764_v24 = vld [vmem:[#allocation2 + $0x408] sm:$0xff] }
 0x42d   :  { %7017 = vmatmul.mubr.msk.bf16.gmra.mrb[76].mxu1 %vm4408_vm0, %v10316_v17  ;;  %5419 = vmatprep.subr.bf16.mxu0 %v4664_v1  ;;  %v4763_v1 = vld [vmem:[#allocation2 + $0x400] sm:$0xff] }
 0x42e   :  { %7025 = vmatmul.mubr.msk.bf16.gmra.mrb[20].mxu0 %vm4408_vm0, %v10316_v17  ;;  %4994 = vmatpush1.bf16.msra.mxu1 %v4657_v56  ;;  %v4767_v56 = vld [vmem:[#allocation2 + $0x420] sm:$0xff] }
 0x42f   :  { %4970 = vmatprep.mubr.bf16.mxu1 %v7711_v6  ;;  %4995 = vmatprep.subr.bf16.mxu1 %v4668_v7  ;;  %v4778_v7 = vld [vmem:[#allocation2 + $0x478] sm:$0xff] }
 0x430   :  { %5254 = vmatprep.mubr.bf16.mxu0 %v7711_v6  ;;  %5420 = vmatpush1.bf16.msra.mxu0 %v4663_v20  ;;  %v4774_v20 = vld [vmem:[#allocation2 + $0x458] sm:$0xff] }
 0x431   :  { %5421 = vmatprep.subr.bf16.mxu0 %v4674_v5  ;;  %v4788_v5 = vld [vmem:[#allocation2 + $0x4c8] sm:$0xff] }
 0x432   :  { %4996 = vmatpush1.bf16.msra.mxu1 %v4667_v3  ;;  %v4777_v3 = vld [vmem:[#allocation2 + $0x470] sm:$0xff] }
 0x433   :  { %4997 = vmatprep.subr.bf16.mxu1 %v4678_v52  ;;  %v4773_v52 = vld [vmem:[#allocation2 + $0x450] sm:$0xff] }
 0x434   :  { %5422 = vmatpush1.bf16.msra.mxu0 %v4673_v25  ;;  %v4798_v25 = vld [vmem:[#allocation2 + $0x518] sm:$0xff] }
 0x435   :  { %7018 = vmatmul.mubr.msk.bf16.gmra.mrb[80].mxu1 %vm4408_vm0, %v10320_v4  ;;  %5423 = vmatprep.subr.bf16.mxu0 %v4684_v28  ;;  %v4783_v28 = vld [vmem:[#allocation2 + $0x4a0] sm:$0xff] }
 0x436   :  { %7026 = vmatmul.mubr.msk.bf16.gmra.mrb[24].mxu0 %vm4408_vm0, %v10320_v4  ;;  %4998 = vmatpush1.bf16.msra.mxu1 %v4677_v23  ;;  %v4784_v23 = vld [vmem:[#allocation2 + $0x4a8] sm:$0xff] }
 0x437   :  { %4980 = vmatprep.mubr.bf16.mxu1 %v7711_v6  ;;  %4999 = vmatprep.subr.bf16.mxu1 %v4688_v59  ;;  %v4787_v59 = vld [vmem:[#allocation2 + $0x4c0] sm:$0xff] }
 0x438   :  { %5264 = vmatprep.mubr.bf16.mxu0 %v7711_v6  ;;  %5424 = vmatpush1.bf16.msra.mxu0 %v4683_v15  ;;  %v4808_v15 = vld [vmem:[#allocation2 + $0x568] sm:$0xff] }
 0x439   :  { %5425 = vmatprep.subr.bf16.mxu0 %v4694_v58  ;;  %v4818_v58 = vld [vmem:[#allocation2 + $0x5b8] sm:$0xff] }
 0x43a   :  { %5000 = vmatpush1.bf16.msra.mxu1 %v4687_v16  ;;  %v4794_v16 = vld [vmem:[#allocation2 + $0x4f8] sm:$0xff] }
 0x43b   :  { %5001 = vmatprep.subr.bf16.mxu1 %v4698_v57  ;;  %v4797_v57 = vld [vmem:[#allocation2 + $0x510] sm:$0xff] }
 0x43c   :  { %5426 = vmatpush1.bf16.msra.mxu0 %v4693_v34  ;;  %v4817_v34 = vld [vmem:[#allocation2 + $0x5b0] sm:$0xff] }
 0x43d   :  { %7019 = vmatmul.mubr.msk.bf16.gmra.mrb[84].mxu1 %vm4408_vm0, %v10322_v63  ;;  %5427 = vmatprep.subr.bf16.mxu0 %v4704_v41  ;;  %v4828_v41 = vld [vmem:[#allocation2 + $0x608] sm:$0xff] }
 0x43e   :  { %7027 = vmatmul.mubr.msk.bf16.gmra.mrb[28].mxu0 %vm4408_vm0, %v10322_v63  ;;  %5002 = vmatpush1.bf16.msra.mxu1 %v4697_v9  ;;  %v4793_v9 = vld [vmem:[#allocation2 + $0x4f0] sm:$0xff] }
 0x43f   :  { %5021 = vmatprep.mubr.bf16.mxu1 %v10344_v33  ;;  %5003 = vmatprep.subr.bf16.mxu1 %v4708_v2  ;;  %v4807_v2 = vld [vmem:[#allocation2 + $0x560] sm:$0xff] }
 0x440   :  { %5447 = vmatprep.mubr.bf16.mxu0 %v10344_v33  ;;  %5428 = vmatpush1.bf16.msra.mxu0 %v4703_v10  ;;  %v10404_v10 = vld [vmem:[#allocation2 + $0x598] sm:$0xff] }
 0x441   :  { %5429 = vmatprep.subr.bf16.mxu0 %v4714_v62  ;;  %v4827_v62 = vld [vmem:[#allocation2 + $0x600] sm:$0xff] }
 0x442   :  { %5004 = vmatpush1.bf16.msra.mxu1 %v4707_v30  ;;  %v10399_v30 = vld [vmem:[#allocation2 + $0x548] sm:$0xff] }
 0x443   :  { %5005 = vmatprep.subr.bf16.mxu1 %v4718_v39  ;;  %v10401_v39 = vld [vmem:[#allocation2 + $0x540] sm:$0xff] }
 0x444   :  { %5430 = vmatpush1.bf16.msra.mxu0 %v4713_v8  ;;  %v10415_v8 = vld [vmem:[#allocation2 + $0x5e8] sm:$0xff] }
 0x445   :  { %5431 = vmatprep.subr.bf16.mxu0 %v4724_v21  ;;  %v10419_v21 = vld [vmem:[#allocation2 + $0x5e0] sm:$0xff] }
 0x446   :  { %5006 = vmatpush1.bf16.msra.mxu1 %v4717_v11  ;;  %v4642_v11 = vld [vmem:[#allocation2 + $0x38] sm:$0xff] }
 0x447   :  { %5007 = vmatprep.subr.bf16.mxu1 %v4728_v19  ;;  %v10411_v19 = vld [vmem:[#allocation2 + $0x590] sm:$0xff] }
 0x448   :  { %5432 = vmatpush1.bf16.msra.mxu0 %v4723_v29  ;;  %v4641_v29 = vld [vmem:[#allocation2 + $0x30] sm:$0xff] }
 0x449   :  { %5433 = vmatprep.subr.bf16.mxu0 %v4734_v32  ;;  %v4652_v32 = vld [vmem:[#allocation2 + $0x88] sm:$0xff] }
 0x44a   :  { %5008 = vmatpush1.bf16.msra.mxu1 %v4727_v14  ;;  %v10423_v14 = vld [vmem:[#allocation2 + $0x638] sm:$0xff] }
 0x44b   :  { %5009 = vmatprep.subr.bf16.mxu1 %v4738_v18  ;;  %v10427_v18 = vld [vmem:[#allocation2 + $0x630] sm:$0xff] }
 0x44c   :  { %5434 = vmatpush1.bf16.msra.mxu0 %v4733_v47  ;;  %v4661_v47 = vld [vmem:[#allocation2 + $0xd0] sm:$0xff] }
 0x44d   :  { %5435 = vmatprep.subr.bf16.mxu0 %v4744_v27  ;;  %v4672_v27 = vld [vmem:[#allocation2 + $0x128] sm:$0xff] }
 0x44e   :  { %5010 = vmatpush1.bf16.msra.mxu1 %v4737_v36  ;;  %v4651_v36 = vld [vmem:[#allocation2 + $0x80] sm:$0xff] }
 0x44f   :  { %5011 = vmatprep.subr.bf16.mxu1 %v4748_v42  ;;  %v4662_v42 = vld [vmem:[#allocation2 + $0xd8] sm:$0xff] }
 0x450   :  { %5436 = vmatpush1.bf16.msra.mxu0 %v4743_v40  ;;  %v4681_v40 = vld [vmem:[#allocation2 + $0x170] sm:$0xff] }
 0x451   :  { %5437 = vmatprep.subr.bf16.mxu0 %v4754_v0  ;;  %v4692_v0 = vld [vmem:[#allocation2 + $0x1c8] sm:$0xff] }
 0x452   :  { %5012 = vmatpush1.bf16.msra.mxu1 %v4747_v31  ;;  %v4671_v31 = vld [vmem:[#allocation2 + $0x120] sm:$0xff] }
 0x453   :  { %5013 = vmatprep.subr.bf16.mxu1 %v4758_v60  ;;  %v4682_v60 = vld [vmem:[#allocation2 + $0x178] sm:$0xff] }
 0x454   :  { %5438 = vmatpush1.bf16.msra.mxu0 %v4753_v48  ;;  %v4701_v48 = vld [vmem:[#allocation2 + $0x210] sm:$0xff] }
 0x455   :  { %5439 = vmatprep.subr.bf16.mxu0 %v4764_v24  ;;  %v4712_v24 = vld [vmem:[#allocation2 + $0x268] sm:$0xff] }
 0x456   :  { %5014 = vmatpush1.bf16.msra.mxu1 %v4757_v61  ;;  %v4691_v61 = vld [vmem:[#allocation2 + $0x1c0] sm:$0xff] }
 0x457   :  { %5015 = vmatprep.subr.bf16.mxu1 %v4768_v44  ;;  %v4702_v44 = vld [vmem:[#allocation2 + $0x218] sm:$0xff] }
 0x458   :  { %5440 = vmatpush1.bf16.msra.mxu0 %v4763_v1  ;;  %v4721_v1 = vld [vmem:[#allocation2 + $0x2b0] sm:$0xff] }
 0x459   :  { %5441 = vmatprep.subr.bf16.mxu0 %v4774_v20  ;;  %v4732_v20 = vld [vmem:[#allocation2 + $0x308] sm:$0xff] }
 0x45a   :  { %5016 = vmatpush1.bf16.msra.mxu1 %v4767_v56  ;;  %v4711_v56 = vld [vmem:[#allocation2 + $0x260] sm:$0xff] }
 0x45b   :  { %5017 = vmatprep.subr.bf16.mxu1 %v4778_v7  ;;  %v4722_v7 = vld [vmem:[#allocation2 + $0x2b8] sm:$0xff] }
 0x45c   :  { %5442 = vmatpush1.bf16.msra.mxu0 %v4773_v52  ;;  %v4741_v52 = vld [vmem:[#allocation2 + $0x350] sm:$0xff] }
 0x45d   :  { %5443 = vmatprep.subr.bf16.mxu0 %v4784_v23  ;;  %v4752_v23 = vld [vmem:[#allocation2 + $0x3a8] sm:$0xff] }
 0x45e   :  { %5018 = vmatpush1.bf16.msra.mxu1 %v4777_v3  ;;  %v4731_v3 = vld [vmem:[#allocation2 + $0x300] sm:$0xff] }
 0x45f   :  { %5019 = vmatprep.subr.bf16.mxu1 %v4788_v5  ;;  %v4742_v5 = vld [vmem:[#allocation2 + $0x358] sm:$0xff] }
 0x460   :  { %5444 = vmatpush1.bf16.msra.mxu0 %v4783_v28  ;;  %v4772_v28 = vld [vmem:[#allocation2 + $0x448] sm:$0xff] }
 0x461   :  { %5445 = vmatprep.subr.bf16.mxu0 %v4794_v16  ;;  %v4771_v16 = vld [vmem:[#allocation2 + $0x440] sm:$0xff] }
 0x462   :  { %5020 = vmatpush1.bf16.msra.mxu1 %v4787_v59  ;;  %v4751_v59 = vld [vmem:[#allocation2 + $0x3a0] sm:$0xff] }
 0x463   :  { %5060 = vmatprep.subr.bf16.mxu1 %v4798_v25  ;;  %v4762_v25 = vld [vmem:[#allocation2 + $0x3f8] sm:$0xff] }
 0x464   :  { %5446 = vmatpush1.bf16.msra.mxu0 %v4793_v9  ;;  %v4792_v9 = vld [vmem:[#allocation2 + $0x4e8] sm:$0xff] }
 0x465   :  { %5022 = vmatmul.mubr.bf16.vlgmr.msra.gmra.mrb[88].mxu1 %v10327_v13  ;;  %5486 = vmatprep.subr.bf16.mxu0 %v10399_v30 }
 0x466   :  { %5061 = vmatpush1.bf16.msra.mxu1 %v4797_v57  ;;  %5031 = vmatprep.mubr.bf16.mxu1 %v10346_v35  ;;  %v4782_v57 = vld [vmem:[#allocation2 + $0x498] sm:$0xff] }
 0x467   :  { %5062 = vmatprep.subr.bf16.mxu1 %v4808_v15  ;;  %5448 = vmatmul.mubr.bf16.vlgmr.msra.gmra.mrb[32].mxu0 %v10327_v13  ;;  %v4781_v15 = vld [vmem:[#allocation2 + $0x490] sm:$0xff] }
 0x468   :  { %5457 = vmatprep.mubr.bf16.mxu0 %v10346_v35  ;;  %5487 = vmatpush1.bf16.msra.mxu0 %v10401_v39 }
 0x469   :  { %5488 = vmatprep.subr.bf16.mxu0 %v10404_v10 }
 0x46a   :  { %5063 = vmatpush1.bf16.msra.mxu1 %v4807_v2  ;;  %v4791_v2 = vld [vmem:[#allocation2 + $0x4e0] sm:$0xff] }
 0x46b   :  { %5064 = vmatprep.subr.bf16.mxu1 %v4818_v58  ;;  %v4802_v58 = vld [vmem:[#allocation2 + $0x538] sm:$0xff] }
 0x46c   :  { %5489 = vmatpush1.bf16.msra.mxu0 %v10411_v19 }
 0x46d   :  { %5032 = vmatmul.mubr.bf16.gmra.mrb[92].mxu1 %v10329_v12  ;;  %5490 = vmatprep.subr.bf16.mxu0 %v10415_v8 }
 0x46e   :  { %5041 = vmatprep.mubr.bf16.mxu1 %v10348_v51  ;;  %5065 = vmatpush1.bf16.msra.mxu1 %v4817_v34  ;;  %v4801_v34 = vld [vmem:[#allocation2 + $0x530] sm:$0xff] }
 0x46f   :  { %5066 = vmatprep.subr.bf16.mxu1 %v4828_v41  ;;  %5458 = vmatmul.mubr.bf16.gmra.mrb[36].mxu0 %v10329_v12  ;;  %v4812_v41 = vld [vmem:[#allocation2 + $0x588] sm:$0xff] }
 0x470   :  { %5467 = vmatprep.mubr.bf16.mxu0 %v10348_v51  ;;  %5491 = vmatpush1.bf16.msra.mxu0 %v10419_v21 }
 0x471   :  { %5492 = vmatprep.subr.bf16.mxu0 %v10423_v14 }
 0x472   :  { %5067 = vmatpush1.bf16.msra.mxu1 %v4827_v62  ;;  %v4811_v62 = vld [vmem:[#allocation2 + $0x580] sm:$0xff] }
 0x473   :  { %5273 = vmatprep.subr.bf16.mxu1 %v4642_v11  ;;  %v4822_v11 = vld [vmem:[#allocation2 + $0x5d8] sm:$0xff] }
 0x474   :  { %5493 = vmatpush1.bf16.msra.mxu0 %v10427_v18 }
 0x475   :  { %5042 = vmatmul.mubr.bf16.gmra.mrb[96].mxu1 %v10331_v22 }
 0x476   :  { %5051 = vmatprep.mubr.bf16.mxu1 %v10350_v43 }
 0x477   :  { %5468 = vmatmul.mubr.bf16.gmra.mrb[40].mxu0 %v10331_v22 }
 0x478   :  { %5477 = vmatprep.mubr.bf16.mxu0 %v10350_v43 }
 0x47d   :  { %5052 = vmatmul.mubr.bf16.gmra.mrb[100].mxu1 %v10335_v26 }
 0x47e   :  { %5092 = vmatprep.mubr.bf16.mxu1 %v7711_v6 }
 0x47f   :  { %5478 = vmatmul.mubr.bf16.gmra.mrb[44].mxu0 %v10335_v26 }
 0x480   :  { %5518 = vmatprep.mubr.bf16.mxu0 %v7711_v6 }
 0x485   :  { %7020 = vmatmul.mubr.msk.bf16.vlgmr.msra.gmra.mrb[88].mxu1 %vm4408_vm0, %v10314_v53 }
 0x486   :  { %5274 = vmatpush1.bf16.msra.mxu1 %v4641_v29  ;;  %5102 = vmatprep.mubr.bf16.mxu1 %v7711_v6  ;;  %v4821_v29 = vld [vmem:[#allocation2 + $0x5d0] sm:$0xff] }
 0x487   :  { %5275 = vmatprep.subr.bf16.mxu1 %v4652_v32  ;;  %7032 = vmatmul.mubr.msk.bf16.vlgmr.msra.gmra.mrb[32].mxu0 %vm4408_vm0, %v10314_v53  ;;  %v4832_v32 = vld [vmem:[#allocation2 + $0x628] sm:$0xff] }
 0x488   :  { %5528 = vmatprep.mubr.bf16.mxu0 %v7711_v6 }
 0x48a   :  { %5276 = vmatpush1.bf16.msra.mxu1 %v4651_v36  ;;  %v4831_v36 = vld [vmem:[#allocation2 + $0x620] sm:$0xff] }
 0x48b   :  { %5277 = vmatprep.subr.bf16.mxu1 %v4662_v42 }
 0x48d   :  { %7021 = vmatmul.mubr.msk.bf16.gmra.mrb[92].mxu1 %vm4408_vm0, %v10316_v17 }
 0x48e   :  { %5278 = vmatpush1.bf16.msra.mxu1 %v4661_v47  ;;  %5112 = vmatprep.mubr.bf16.mxu1 %v7711_v6 }
 0x48f   :  { %5279 = vmatprep.subr.bf16.mxu1 %v4672_v27  ;;  %7033 = vmatmul.mubr.msk.bf16.gmra.mrb[36].mxu0 %vm4408_vm0, %v10316_v17 }
 0x492   :  { %5280 = vmatpush1.bf16.msra.mxu1 %v4671_v31 }
 0x493   :  { %5281 = vmatprep.subr.bf16.mxu1 %v4682_v60 }
 0x495   :  { %7022 = vmatmul.mubr.msk.bf16.gmra.mrb[96].mxu1 %vm4408_vm0, %v10320_v4 }
 0x496   :  { %5282 = vmatpush1.bf16.msra.mxu1 %v4681_v40  ;;  %5122 = vmatprep.mubr.bf16.mxu1 %v7711_v6 }
 0x497   :  { %5283 = vmatprep.subr.bf16.mxu1 %v4692_v0 }
 0x49a   :  { %5284 = vmatpush1.bf16.msra.mxu1 %v4691_v61 }
 0x49b   :  { %5285 = vmatprep.subr.bf16.mxu1 %v4702_v44 }
 0x49d   :  { %7023 = vmatmul.mubr.msk.bf16.gmra.mrb[100].mxu1 %vm4408_vm0, %v10322_v63 }
 0x49e   :  { %5286 = vmatpush1.bf16.msra.mxu1 %v4701_v48  ;;  %5305 = vmatprep.mubr.bf16.mxu1 %v10344_v33  ;;  %v4761_v33 = vld [vmem:[#allocation2 + $0x3f0] sm:$0xff] }
 0x49f   :  { %5287 = vmatprep.subr.bf16.mxu1 %v4712_v24 }
 0x4a2   :  { %5288 = vmatpush1.bf16.msra.mxu1 %v4711_v56 }
 0x4a3   :  { %5289 = vmatprep.subr.bf16.mxu1 %v4722_v7 }
 0x4a6   :  { %5290 = vmatpush1.bf16.msra.mxu1 %v4721_v1 }
 0x4a7   :  { %5291 = vmatprep.subr.bf16.mxu1 %v4732_v20 }
 0x4aa   :  { %5292 = vmatpush1.bf16.msra.mxu1 %v4731_v3 }
 0x4ab   :  { %5293 = vmatprep.subr.bf16.mxu1 %v4742_v5 }
 0x4ae   :  { %5294 = vmatpush1.bf16.msra.mxu1 %v4741_v52 }
 0x4af   :  { %5295 = vmatprep.subr.bf16.mxu1 %v4752_v23 }
 0x4b2   :  { %5296 = vmatpush1.bf16.msra.mxu1 %v4751_v59 }
 0x4b3   :  { %5297 = vmatprep.subr.bf16.mxu1 %v4762_v25 }
 0x4b6   :  { %5298 = vmatpush1.bf16.msra.mxu1 %v4761_v33 }
 0x4b7   :  { %5299 = vmatprep.subr.bf16.mxu1 %v4772_v28 }
 0x4ba   :  { %5300 = vmatpush1.bf16.msra.mxu1 %v4771_v16 }
 0x4bb   :  { %5301 = vmatprep.subr.bf16.mxu1 %v4782_v57 }
 0x4be   :  { %5302 = vmatpush1.bf16.msra.mxu1 %v4781_v15 }
 0x4bf   :  { %5303 = vmatprep.subr.bf16.mxu1 %v4792_v9 }
 0x4c2   :  { %5304 = vmatpush1.bf16.msra.mxu1 %v4791_v2 }
 0x4c3   :  { %5344 = vmatprep.subr.bf16.mxu1 %v4802_v58 }
 0x4c5   :  { %5306 = vmatmul.mubr.bf16.vlgmr.msra.gmra.mrb[104].mxu1 %v10327_v13 }
 0x4c6   :  { %5345 = vmatpush1.bf16.msra.mxu1 %v4801_v34  ;;  %5315 = vmatprep.mubr.bf16.mxu1 %v10346_v35 }
 0x4c7   :  { %5346 = vmatprep.subr.bf16.mxu1 %v4812_v41 }
 0x4ca   :  { %5347 = vmatpush1.bf16.msra.mxu1 %v4811_v62 }
 0x4cb   :  { %5348 = vmatprep.subr.bf16.mxu1 %v4822_v11 }
 0x4cd   :  { %5316 = vmatmul.mubr.bf16.gmra.mrb[108].mxu1 %v10329_v12 }
 0x4ce   :  { %5325 = vmatprep.mubr.bf16.mxu1 %v10348_v51  ;;  %5349 = vmatpush1.bf16.msra.mxu1 %v4821_v29 }
 0x4cf   :  { %5350 = vmatprep.subr.bf16.mxu1 %v4832_v32 }
 0x4d2   :  { %5351 = vmatpush1.bf16.msra.mxu1 %v4831_v36 }
 0x4d3   :  { %7233 = vmatprep.subr.bf16.mxu1 %v10399_v30 }
 0x4d5   :  { %5326 = vmatmul.mubr.bf16.gmra.mrb[112].mxu1 %v10331_v22 }
 0x4d6   :  { %5335 = vmatprep.mubr.bf16.mxu1 %v10350_v43 }
 0x4dd   :  { %5336 = vmatmul.mubr.bf16.gmra.mrb[116].mxu1 %v10335_v26 }
 0x4de   :  { %5376 = vmatprep.mubr.bf16.mxu1 %v7711_v6 }
 0x4e5   :  { %7028 = vmatmul.mubr.msk.bf16.vlgmr.msra.gmra.mrb[104].mxu1 %vm4408_vm0, %v10314_v53 }
 0x4e6   :  { %5386 = vmatprep.mubr.bf16.mxu1 %v7711_v6  ;;  %7237 = vmatpush1.bf16.msra.mxu1 %v10401_v39 }
 0x4e7   :  { %7234 = vmatprep.subr.bf16.mxu1 %v10404_v10 }
 0x4ea   :  { %7238 = vmatpush1.bf16.msra.mxu1 %v10411_v19 }
 0x4eb   :  { %7235 = vmatprep.subr.bf16.mxu1 %v10415_v8 }
 0x4ed   :  { %7029 = vmatmul.mubr.msk.bf16.gmra.mrb[108].mxu1 %vm4408_vm0, %v10316_v17 }
 0x4ee   :  { %5396 = vmatprep.mubr.bf16.mxu1 %v7711_v6  ;;  %7239 = vmatpush1.bf16.msra.mxu1 %v10419_v21 }
 0x4ef   :  { %7236 = vmatprep.subr.bf16.mxu1 %v10423_v14 }
 0x4f2   :  { %7240 = vmatpush1.bf16.msra.mxu1 %v10427_v18 }
 0x4f5   :  { %7030 = vmatmul.mubr.msk.bf16.gmra.mrb[112].mxu1 %vm4408_vm0, %v10320_v4 }
 0x4f6   :  { %5406 = vmatprep.mubr.bf16.mxu1 %v7711_v6 }
 0x4f8   :  { %v10476_v53 = vpop.f32.mrb[72].mxu1 }
 0x4f9   :  { %v10478_v13 = vpop.f32.mrb[16].mxu0  ;;  %v10480_v12 = vpop.f32.mrb[73].mxu1 }
 0x4fa   :  { %v10482_v17 = vpop.f32.mrb[17].mxu0  ;;  %v10484_v22 = vpop.f32.mrb[74].mxu1 }
 0x4fb   :  { %v10486_v26 = vpop.f32.mrb[18].mxu0  ;;  %v5557_v35 = vadd.f32 %v10484_v22, %v10476_v53  ;;  %v10490_v51 = vpop.f32.mrb[75].mxu1 }
 0x4fc   :  { %v5609_v43 = vadd.f32 %v10486_v26, %v10478_v13  ;;  %v10494_v30 = vpop.f32.mrb[19].mxu0  ;;  %v5570_v39 = vadd.f32 %v10490_v51, %v10480_v12 }
 0x4fd   :  { %v5622_v10 = vadd.f32 %v10494_v30, %v10482_v17  ;;  %7031 = vmatmul.mubr.msk.bf16.gmra.mrb[116].mxu1 %vm4408_vm0, %v10322_v63 }
 0x4fe   :  { %5538 = vmatprep.mubr.bf16.mxu1 %v7711_v6 }
 0x500   :  { %v10503_v19 = vpop.f32.mrb[76].mxu1 }
 0x501   :  { %v10505_v8 = vpop.f32.mrb[20].mxu0  ;;  %v5558_v21 = vadd.f32 %v5557_v35, %v10503_v19  ;;  %v10508_v14 = vpop.f32.mrb[77].mxu1 }
 0x502   :  { %v5610_v18 = vadd.f32 %v5609_v43, %v10505_v8  ;;  %v10511_v42 = vpop.f32.mrb[21].mxu0  ;;  %v5571_v47 = vadd.f32 %v5570_v39, %v10508_v14  ;;  %v10514_v27 = vpop.f32.mrb[78].mxu1 }
 0x503   :  { %v5623_v31 = vadd.f32 %v5622_v10, %v10511_v42  ;;  %v10517_v60 = vpop.f32.mrb[22].mxu0  ;;  %v5559_v40 = vadd.f32 %v5558_v21, %v10514_v27  ;;  %v10520_v0 = vpop.f32.mrb[79].mxu1 }
 0x504   :  { %v5611_v61 = vadd.f32 %v5610_v18, %v10517_v60  ;;  %v10523_v44 = vpop.f32.mrb[23].mxu0  ;;  %v5572_v48 = vadd.f32 %v5571_v47, %v10520_v0 }
 0x505   :  { %v5624_v24 = vadd.f32 %v5623_v31, %v10523_v44  ;;  %7034 = vmatmul.mubr.msk.bf16.vlgmr.msra.gmra.mrb[120].mxu1 %vm4408_vm0, %v10320_v4 }
 0x506   :  { %5548 = vmatprep.mubr.bf16.mxu1 %v7711_v6 }
 0x508   :  { %v10530_v56 = vpop.f32.mrb[80].mxu1 }
 0x509   :  { %v10532_v7 = vpop.f32.mrb[24].mxu0  ;;  %v5560_v1 = vadd.f32 %v5559_v40, %v10530_v56  ;;  %v10535_v20 = vpop.f32.mrb[81].mxu1 }
 0x50a   :  { %v5612_v3 = vadd.f32 %v5611_v61, %v10532_v7  ;;  %v10538_v5 = vpop.f32.mrb[25].mxu0  ;;  %v5573_v52 = vadd.f32 %v5572_v48, %v10535_v20  ;;  %v10541_v23 = vpop.f32.mrb[82].mxu1 }
 0x50b   :  { %v5625_v4 = vadd.f32 %v5624_v24, %v10538_v5  ;;  %v5260_v59 = vpop.f32.mrb[26].mxu0  ;;  %v5561_v6 = vadd.f32 %v5560_v1, %v10541_v23  ;;  %v10545_v25 = vpop.f32.mrb[83].mxu1 }
 0x50c   :  { %v5613_v33 = vadd.f32 %v5612_v3, %v5260_v59  ;;  %v10547_v28 = vpop.f32.mrb[27].mxu0  ;;  %v5574_v16 = vadd.f32 %v5573_v52, %v10545_v25 }
 0x50d   :  { %v5626_v57 = vadd.f32 %v5625_v4, %v10547_v28  ;;  %7035 = vmatmul.mubr.msk.bf16.gmra.mrb[124].mxu1 %vm4408_vm0, %v10322_v63 }
 0x510   :  { %v4982_v15 = vpop.f32.mrb[84].mxu1 }
 0x511   :  { %v5266_v9 = vpop.f32.mrb[28].mxu0  ;;  %v5562_v2 = vsel %vm4386_vm1, %v4982_v15, 0.0  ;;  %v4984_v34 = vpop.f32.mrb[85].mxu1 }
 0x512   :  { %v5614_v58 = vsel %vm4386_vm1, %v5266_v9, 0.0  ;;  %v5268_v41 = vpop.f32.mrb[29].mxu0  ;;  %v5563_v62 = vadd.f32 %v5562_v2, %v5561_v6  ;;  %v5575_v29 = vsel %vm4386_vm1, %v4984_v34, 0.0  ;;  %v4986_v36 = vpop.f32.mrb[86].mxu1 }
 0x513   :  { %v5615_v11 = vadd.f32 %v5614_v58, %v5613_v33  ;;  %v5627_v32 = vsel %vm4386_vm1, %v5268_v41, 0.0  ;;  %v5270_v35 = vpop.f32.mrb[30].mxu0  ;;  %v5576_v43 = vadd.f32 %v5575_v29, %v5574_v16  ;;  %v4987_v10 = vpop.f32.mrb[87].mxu1 }
 0x514   :  { %v5628_v39 = vadd.f32 %v5627_v32, %v5626_v57  ;;  %v5271_v63 = vpop.f32.mrb[31].mxu0  ;;  %v5564_v21 = vrot.slane %v5563_v62, 4 }
 0x515   :  { %v5616_v18 = vrot.slane %v5615_v11, 4  ;;  %v5577_v47 = vrot.slane %v5576_v43, 4 }
 0x516   :  { %v5629_v31 = vrot.slane %v5628_v39, 4  ;;  %v5565_v40 = vadd.f32 %v5564_v21, %v5563_v62 }
 0x517   :  { %v5617_v61 = vadd.f32 %v5616_v18, %v5615_v11  ;;  %v5578_v48 = vadd.f32 %v5577_v47, %v5576_v43 }
 0x518   :  { %v5630_v24 = vadd.f32 %v5629_v31, %v5628_v39  ;;  %v5566_v1 = vrot.slane %v5565_v40, 2 }
 0x519   :  { %v5618_v3 = vrot.slane %v5617_v61, 2  ;;  %v5579_v52 = vrot.slane %v5578_v48, 2 }
 0x51a   :  { %v5631_v4 = vrot.slane %v5630_v24, 2  ;;  %v5567_v6 = vadd.f32 %v5566_v1, %v5565_v40 }
 0x51b   :  { %v5619_v33 = vadd.f32 %v5618_v3, %v5617_v61  ;;  %v5580_v2 = vadd.f32 %v5579_v52, %v5578_v48 }
 0x51c   :  { %v5632_v58 = vadd.f32 %v5631_v4, %v5630_v24  ;;  %v5568_v16 = vrot.slane %v5567_v6, 1 }
 0x51d   :  { %v5620_v57 = vrot.slane %v5619_v33, 1  ;;  %v5581_v29 = vrot.slane %v5580_v2, 1 }
 0x51e   :  { %v5633_v32 = vrot.slane %v5632_v58, 1  ;;  %v5569_v36 = vadd.f32 %v5568_v16, %v5567_v6 }
 0x51f   :  { %v5621_v35 = vadd.f32 %v5620_v57, %v5619_v33  ;;  %v5582_v10 = vadd.f32 %v5581_v29, %v5580_v2 }
 0x520   :  { %v5634_v63 = vadd.f32 %v5633_v32, %v5632_v58  ;;  %v5687_v62 = vmul.f32 0.020408163, %v5569_v36 }
 0x521   :  { %v5691_v11 = vmul.f32 0.020408163, %v5621_v35  ;;  %v5688_v43 = vmul.f32 0.020408163, %v5582_v10 }
 0x522   :  { %v5692_v39 = vmul.f32 0.020408163, %v5634_v63  ;;  %v10557_v21 = vsub.f32 %v4982_v15, %v5687_v62  ;;  %v10626_v57 = vsub.f32 %v10476_v53, %v5687_v62  ;;  %v10629_v32 = vsub.f32 %v10484_v22, %v5687_v62 }
 0x523   :  { %v10560_v18 = vsub.f32 %v10478_v13, %v5691_v11  ;;  %v10563_v47 = vsub.f32 %v10486_v26, %v5691_v11  ;;  %v10566_v31 = vsub.f32 %v10505_v8, %v5691_v11  ;;  %v10569_v40 = vsub.f32 %v10517_v60, %v5691_v11 }
 0x524   :  { %v10572_v61 = vsub.f32 %v10532_v7, %v5691_v11  ;;  %v10574_v48 = vsub.f32 %v5260_v59, %v5691_v11  ;;  %v10576_v24 = vsub.f32 %v5266_v9, %v5691_v11  ;;  %v10586_v1 = vsub.f32 %v4984_v34, %v5688_v43 }
 0x525   :  { %v5771_v13 = vmul.f32 %v10560_v18, %v10560_v18  ;;  %v5781_v26 = vmul.f32 %v10563_v47, %v10563_v47  ;;  %v5791_v8 = vmul.f32 %v10566_v31, %v10566_v31  ;;  %v10589_v7 = vsub.f32 %v10482_v17, %v5692_v39 }
 0x526   :  { %v5831_v60 = vmul.f32 %v10576_v24, %v10576_v24  ;;  %v5801_v59 = vmul.f32 %v10569_v40, %v10569_v40  ;;  %v10594_v9 = vsub.f32 %v10494_v30, %v5692_v39  ;;  %v10597_v3 = vsub.f32 %v10511_v42, %v5692_v39 }
 0x527   :  { %v5889_v15 = vadd.f32 %v5781_v26, %v5771_v13  ;;  %v10600_v52 = vsub.f32 %v10523_v44, %v5692_v39  ;;  %v5811_v4 = vmul.f32 %v10572_v61, %v10572_v61  ;;  %v10605_v6 = vsub.f32 %v10538_v5, %v5692_v39 }
 0x528   :  { %v10608_v17 = vsub.f32 %v10547_v28, %v5692_v39  ;;  %v10610_v33 = vsub.f32 %v5268_v41, %v5692_v39  ;;  %v5772_v30 = vmul.f32 %v10589_v7, %v10589_v7  ;;  %v5782_v42 = vmul.f32 %v10594_v9, %v10594_v9 }
 0x529   :  { %v5890_v34 = vadd.f32 %v5889_v15, %v5791_v8  ;;  %v5821_v44 = vmul.f32 %v10574_v48, %v10574_v48  ;;  %v5894_v58 = vsel %vm4386_vm1, %v5831_v60, 0.0  ;;  %v5792_v5 = vmul.f32 %v10597_v3, %v10597_v3 }
 0x52a   :  { %v5802_v28 = vmul.f32 %v10600_v52, %v10600_v52  ;;  %v5832_v41 = vmul.f32 %v10610_v33, %v10610_v33  ;;  %v5902_v16 = vadd.f32 %v5782_v42, %v5772_v30  ;;  %v10632_v36 = vsub.f32 %v10503_v19, %v5687_v62 }
 0x52b   :  { %v5891_v2 = vadd.f32 %v5890_v34, %v5801_v59  ;;  %v10635_v35 = vsub.f32 %v10514_v27, %v5687_v62  ;;  %v5812_v10 = vmul.f32 %v10605_v6, %v10605_v6  ;;  %v10640_v11 = vsub.f32 %v10530_v56, %v5687_v62 }
 0x52c   :  { %v5903_v63 = vadd.f32 %v5902_v16, %v5792_v5  ;;  %v10643_v53 = vsub.f32 %v10541_v23, %v5687_v62  ;;  %v5822_v22 = vmul.f32 %v10608_v17, %v10608_v17  ;;  %v5767_v19 = vmul.f32 %v10626_v57, %v10626_v57 }
 0x52d   :  { %v5892_v29 = vadd.f32 %v5891_v2, %v5811_v4  ;;  %v5777_v27 = vmul.f32 %v10629_v32, %v10629_v32  ;;  %v5907_v26 = vsel %vm4386_vm1, %v5832_v41, 0.0  ;;  %v5787_v56 = vmul.f32 %v10632_v36, %v10632_v36 }
 0x52e   :  { %v5904_v13 = vadd.f32 %v5903_v63, %v5802_v28  ;;  %v5797_v23 = vmul.f32 %v10635_v35, %v10635_v35  ;;  %v10657_v60 = vsub.f32 %v10480_v12, %v5688_v43  ;;  %v10660_v15 = vsub.f32 %v10490_v51, %v5688_v43 }
 0x52f   :  { %v5893_v39 = vadd.f32 %v5892_v29, %v5821_v44  ;;  %v5837_v8 = vadd.f32 %v5777_v27, %v5767_v19  ;;  %v10663_v4 = vsub.f32 %v10508_v14, %v5688_v43  ;;  %v10666_v34 = vsub.f32 %v10520_v0, %v5688_v43 }
 0x530   :  { %v5905_v59 = vadd.f32 %v5904_v13, %v5812_v10  ;;  %v10669_v30 = vsub.f32 %v10535_v20, %v5688_v43  ;;  %v10672_v2 = vsub.f32 %v10545_v25, %v5688_v43  ;;  %v5768_v12 = vmul.f32 %v10657_v60, %v10657_v60 }
 0x531   :  { %v5895_v62 = vadd.f32 %v5894_v58, %v5893_v39  ;;  %v5838_v44 = vadd.f32 %v5837_v8, %v5787_v56  ;;  %v5778_v58 = vmul.f32 %v10660_v15, %v10660_v15  ;;  %v5807_v0 = vmul.f32 %v10640_v11, %v10640_v11 }
 0x532   :  { %v5906_v51 = vadd.f32 %v5905_v59, %v5822_v22  ;;  %v5827_v20 = vmul.f32 %v10557_v21, %v10557_v21  ;;  %v5788_v25 = vmul.f32 %v10663_v4, %v10663_v4  ;;  %v5817_v16 = vmul.f32 %v10643_v53, %v10643_v53 }
 0x533   :  { %v5896_v42 = vrot.slane %v5895_v62, 4  ;;  %v5839_v5 = vadd.f32 %v5838_v44, %v5797_v23  ;;  %v5850_v43 = vadd.f32 %v5778_v58, %v5768_v12  ;;  %v5798_v63 = vmul.f32 %v10666_v34, %v10666_v34 }
 0x534   :  { %v5908_v28 = vadd.f32 %v5907_v26, %v5906_v51  ;;  %v5842_v27 = vsel %vm4386_vm1, %v5827_v20, 0.0  ;;  %v5808_v26 = vmul.f32 %v10669_v30, %v10669_v30 }
 0x535   :  { %v5897_v14 = vadd.f32 %v5896_v42, %v5895_v62  ;;  %v5840_v29 = vadd.f32 %v5839_v5, %v5807_v0  ;;  %v5851_v39 = vadd.f32 %v5850_v43, %v5788_v25  ;;  %v5828_v62 = vmul.f32 %v10586_v1, %v10586_v1 }
 0x536   :  { %v5909_v10 = vrot.slane %v5908_v28, 4  ;;  %v5818_v42 = vmul.f32 %v10672_v2, %v10672_v2 }
 0x537   :  { %v5898_v41 = vrot.slane %v5897_v14, 2  ;;  %v5841_v19 = vadd.f32 %v5840_v29, %v5817_v16  ;;  %v5852_v56 = vadd.f32 %v5851_v39, %v5798_v63  ;;  %v5855_v5 = vsel %vm4386_vm1, %v5828_v62, 0.0 }
 0x538   :  { %v5910_v13 = vadd.f32 %v5909_v10, %v5908_v28 }
 0x539   :  { %v5899_v22 = vadd.f32 %v5898_v41, %v5897_v14  ;;  %v5843_v8 = vadd.f32 %v5842_v27, %v5841_v19  ;;  %v5853_v44 = vadd.f32 %v5852_v56, %v5808_v26 }
 0x53a   :  { %v5911_v59 = vrot.slane %v5910_v13, 2 }
 0x53b   :  { %v5900_v23 = vrot.slane %v5899_v22, 1  ;;  %v5844_v51 = vrot.slane %v5843_v8, 4  ;;  %v5854_v14 = vadd.f32 %v5853_v44, %v5818_v42 }
 0x53c   :  { %v5912_v58 = vadd.f32 %v5911_v59, %v5910_v13  ;;  %v10699_v13 = vld [vmem:[%s12020_s6] sm:$0xff] }
 0x53d   :  { %v5901_v12 = vadd.f32 %v5900_v23, %v5899_v22  ;;  %v5845_v20 = vadd.f32 %v5844_v51, %v5843_v8  ;;  %v5856_v25 = vadd.f32 %v5855_v5, %v5854_v14  ;;  %v6020_v62 = vrot.slane %v10699_v13, %v9775_v50 }
 0x53e   :  { %v5913_v28 = vrot.slane %v5912_v58, 1 }
 0x53f   :  { %v5971_v0 = vmul.f32 0.020408163, %v5901_v12  ;;  %v5846_v41 = vrot.slane %v5845_v20, 2  ;;  %v5857_v29 = vrot.slane %v5856_v25, 4 }
 0x540   :  { %v5914_v16 = vadd.f32 %v5913_v28, %v5912_v58  ;;  %v6024_v58 = vrot.slane %v10699_v13, %v9772_v49 }
 0x541   :  { %v5981_v43 = vadd.f32 1e-05, %v5971_v0  ;;  %v5847_v10 = vadd.f32 %v5846_v41, %v5845_v20  ;;  %v5858_v39 = vadd.f32 %v5857_v29, %v5856_v25 }
 0x542   :  { %v5972_v63 = vmul.f32 0.020408163, %v5914_v16 }
 0x543   :  { %7687 = vrsqrt.f32 %v5981_v43  ;;  %v5848_v19 = vrot.slane %v5847_v10, 1  ;;  %v5859_v22 = vrot.slane %v5858_v39, 2 }
 0x544   :  { %v5982_v27 = vadd.f32 1e-05, %v5972_v63 }
 0x545   :  { %v5849_v26 = vadd.f32 %v5848_v19, %v5847_v10  ;;  %v5860_v56 = vadd.f32 %v5859_v22, %v5858_v39 }
 0x546   :  { %7689 = vrsqrt.f32 %v5982_v27 }
 0x547   :  { %v5967_v23 = vmul.f32 0.020408163, %v5849_v26  ;;  %v5861_v8 = vrot.slane %v5860_v56, 1 }
 0x549   :  { %v5977_v59 = vadd.f32 1e-05, %v5967_v23  ;;  %v5862_v42 = vadd.f32 %v5861_v8, %v5860_v56 }
 0x54a   :  { %v10705_v14 = vpop.f32.mrb[40].mxu0 }
 0x54b   :  { %7691 = vrsqrt.f32 %v5977_v59  ;;  %v5968_v51 = vmul.f32 0.020408163, %v5862_v42 }
 0x54d   :  { %v7688_v44 = vpop.eup %7687  ;;  %v5978_v5 = vadd.f32 1e-05, %v5968_v51 }
 0x54e   :  { %v6055_v12 = vmul.f32 %v7688_v44, %v6020_v62 }
 0x54f   :  { %7693 = vrsqrt.f32 %v5978_v5 }
 0x550   :  { %v6080_v0 = vrot.slane %v6055_v12, %v9251_v55  ;;  %v7690_v20 = vpop.eup %7689 }
 0x551   :  { %v6056_v41 = vmul.f32 %v7690_v20, %v6024_v58 }
 0x552   :  { %v10709_v28 = vmul.f32 %v6080_v0, %v10576_v24  ;;  %v10712_v25 = vmul.f32 %v6080_v0, %v10560_v18  ;;  %v10715_v43 = vmul.f32 %v6080_v0, %v10563_v47  ;;  %v10718_v16 = vmul.f32 %v6080_v0, %v10566_v31  ;;  %v10738_v31 = vld [vmem:[%s12021_s7] sm:$0xff] }
 0x553   :  { %v10721_v29 = vmul.f32 %v6080_v0, %v10569_v40  ;;  %v10724_v10 = vmul.f32 %v6080_v0, %v10572_v61  ;;  %v6004_v24 = vrot.slane %v10699_v13, %v9251_v55  ;;  %v10729_v63 = vmul.f32 %v6080_v0, %v10574_v48 }
 0x554   :  { %v6084_v18 = vrot.slane %v6056_v41, %v9251_v55  ;;  %v10789_v0 = vrot.slane %v10738_v31, %v9248_v54  ;;  %v10800_v41 = vpop.f32.mrb[41].mxu0 }
 0x555   :  { %v7692_v47 = vpop.eup %7691 }
 0x556   :  { %v10733_v39 = vmul.f32 %v6084_v18, %v10610_v33  ;;  %v10741_v40 = vmul.f32 %v6084_v18, %v10589_v7  ;;  %v10744_v61 = vmul.f32 %v6084_v18, %v10594_v9  ;;  %v10747_v48 = vmul.f32 %v6084_v18, %v10597_v3 }
 0x557   :  { %v6051_v19 = vmul.f32 %v7692_v47, %v6004_v24  ;;  %v10750_v27 = vmul.f32 %v6084_v18, %v10600_v52  ;;  %v10753_v33 = vmul.f32 %v6084_v18, %v10605_v6  ;;  %v10756_v22 = vmul.f32 %v6084_v18, %v10608_v17 }
 0x558   :  { %v6008_v7 = vrot.slane %v10699_v13, %v9248_v54  ;;  %v10760_v26 = vpop.f32.mrb[88].mxu1  ;;  %v10765_v3 = vrot.slane %v10738_v31, %v9251_v55 }
 0x559   :  { %v6064_v9 = vrot.slane %v6051_v19, %v9251_v55  ;;  %v10767_v56 = vpop.f32.mrb[89].mxu1  ;;  %v7694_v6 = vpop.eup %7693 }
 0x55a   :  { %v10769_v52 = vpop.f32.mrb[90].mxu1  ;;  %v6052_v42 = vmul.f32 %v7694_v6, %v6008_v7 }
 0x55b   :  { %v6101_v23 = vmul.f32 %v6064_v9, %v10626_v57  ;;  %v6111_v17 = vmul.f32 %v6064_v9, %v10629_v32  ;;  %v5583_v62 = vadd.f32 %v10769_v52, %v10760_v26  ;;  %v10775_v8 = vpop.f32.mrb[91].mxu1  ;;  %v6121_v59 = vmul.f32 %v6064_v9, %v10632_v36 }
 0x55c   :  { %v5596_v44 = vadd.f32 %v10775_v8, %v10767_v56  ;;  %v6131_v12 = vmul.f32 %v6064_v9, %v10635_v35  ;;  %v6141_v51 = vmul.f32 %v6064_v9, %v10640_v11  ;;  %v10784_v57 = vmul.f32 %v6064_v9, %v10643_v53 }
 0x55d   :  { %v6225_v58 = vadd.f32 %v10765_v3, %v6101_v23  ;;  %v6068_v32 = vrot.slane %v6052_v42, %v9251_v55  ;;  %v10792_v36 = vmul.f32 %v6064_v9, %v10557_v21  ;;  %v6235_v24 = vadd.f32 %v10765_v3, %v6111_v17 }
 0x55e   :  { %v6265_v38 = vadd.f32 %v10765_v3, %v6141_v51  ;;  %v6275_v51 = vadd.f32 %v10765_v3, %v10784_v57 }
 0x55f   :  { %6295 = vxpose.xlu0.b32.start [1/7] (short) %v6225_v58, 128  ;;  %v6102_v5 = vmul.f32 %v6068_v32, %v10657_v60  ;;  %v6112_v35 = vmul.f32 %v6068_v32, %v10660_v15  ;;  %v6122_v11 = vmul.f32 %v6068_v32, %v10663_v4  ;;  %v6132_v53 = vmul.f32 %v6068_v32, %v10666_v34  ;;  %v10810_v15 = vpop.f32.mrb[42].mxu0 }
 0x560   :  { %v10797_v20 = vpop.f32.mrb[92].mxu1  ;;  %v6142_v21 = vmul.f32 %v6068_v32, %v10669_v30  ;;  %v10808_v60 = vmul.f32 %v6068_v32, %v10672_v2  ;;  %v10816_v7 = vpop.f32.mrb[43].mxu0  ;;  %v6162_v2 = vmul.f32 %v6068_v32, %v10586_v1 }
 0x561   :  { %v5584_v18 = vadd.f32 %v5583_v62, %v10797_v20  ;;  %v10804_v47 = vpop.f32.mrb[93].mxu1  ;;  %v6226_v4 = vadd.f32 %v10789_v0, %v6102_v5  ;;  %v10821_v23 = vpop.f32.mrb[44].mxu0  ;;  %v6245_v62 = vadd.f32 %v10765_v3, %v6121_v59  ;;  %v6246_v59 = vadd.f32 %v10789_v0, %v6122_v11 }
 0x562   :  { %v5597_v19 = vadd.f32 %v5596_v44, %v10804_v47  ;;  %v10814_v34 = vpop.f32.mrb[94].mxu1  ;;  %12040 = vst [vmem:[#allocation9_spill] sm:$0xff] %v10821_v23  ;;  %v10825_v17 = vpop.f32.mrb[45].mxu0  ;;  %v6236_v44 = vadd.f32 %v10789_v0, %v6112_v35  ;;  %v6276_v57 = vadd.f32 %v10789_v0, %v10808_v60 }
 0x563   :  { %6296 = vxpose.xlu0.b32.cont [2/7] (short) %v6235_v24, 128  ;;  %v5585_v9 = vadd.f32 %v5584_v18, %v10814_v34  ;;  %v10819_v6 = vpop.f32.mrb[95].mxu1  ;;  %6327 = vxpose.xlu1.b32.start [1/7] (short) %v6226_v4, 128  ;;  %12041 = vst [vmem:[#allocation10_spill] sm:$0xff] %v10825_v17  ;;  %v5483_v42 = vpop.f32.mrb[46].mxu0  ;;  %v6255_v4 = vadd.f32 %v10765_v3, %v6131_v12 }
 0x564   :  { %v5598_v30 = vadd.f32 %v5597_v19, %v10819_v6  ;;  %v5484_v58 = vpop.f32.mrb[47].mxu0 }
 0x565   :  { %v10829_v5 = vpop.f32.mrb[32].mxu0 }
 0x566   :  { %12042 = vst [vmem:[#allocation11_spill] sm:$0xff] %v10829_v5  ;;  %v10833_v18 = vpop.f32.mrb[33].mxu0 }
 0x567   :  { %6297 = vxpose.xlu0.b32.cont [3/7] (short) %v6245_v62, 128  ;;  %6328 = vxpose.xlu1.b32.cont [2/7] (short) %v6236_v44, 128  ;;  %12043 = vst [vmem:[#allocation12_spill] sm:$0xff] %v10833_v18  ;;  %v10839_v19 = vpop.f32.mrb[34].mxu0 }
 0x568   :  { %v10831_v24 = vpop.f32.mrb[96].mxu1  ;;  %12044 = vst [vmem:[#allocation13_spill] sm:$0xff] %v10839_v19  ;;  %v5661_v42 = vadd.f32 %v10839_v19, %v10829_v5  ;;  %v10845_v44 = vpop.f32.mrb[35].mxu0 }
 0x569   :  { %v5586_v1 = vadd.f32 %v5585_v9, %v10831_v24  ;;  %v10837_v32 = vpop.f32.mrb[97].mxu1  ;;  %12045 = vst [vmem:[#allocation14_spill] sm:$0xff] %v10845_v44  ;;  %v5674_v12 = vadd.f32 %v10845_v44, %v10833_v18  ;;  %v10851_v9 = vpop.f32.mrb[36].mxu0 }
 0x56a   :  { %v5599_v35 = vadd.f32 %v5598_v30, %v10837_v32  ;;  %v5118_v62 = vpop.f32.mrb[98].mxu1  ;;  %12046 = vst [vmem:[#allocation15_spill] sm:$0xff] %v10851_v9  ;;  %v5662_v30 = vadd.f32 %v5661_v42, %v10851_v9  ;;  %v10855_v37 = vpop.f32.mrb[37].mxu0 }
 0x56b   :  { %6298 = vxpose.xlu0.b32.cont [4/7] (short) %v6255_v4, 128  ;;  %v5587_v58 = vadd.f32 %v5586_v1, %v5118_v62  ;;  %v10847_v54 = vpop.f32.mrb[99].mxu1  ;;  %6329 = vxpose.xlu1.b32.cont [3/7] (short) %v6246_v59, 128  ;;  %12047 = vst [vmem:[#allocation16_spill] sm:$0xff] %v10855_v37  ;;  %v5675_v19 = vadd.f32 %v5674_v12, %v10855_v37  ;;  %v10859_v4 = vpop.f32.mrb[38].mxu0 }
 0x56c   :  { %v5600_v11 = vadd.f32 %v5599_v35, %v10847_v54  ;;  %12048 = vst [vmem:[#allocation17_spill] sm:$0xff] %v10859_v4  ;;  %v6256_v1 = vadd.f32 %v10789_v0, %v6132_v53  ;;  %v10863_v5 = vadd.f32 %v5662_v30, %v10859_v4  ;;  %v10865_v44 = vpop.f32.mrb[39].mxu0  ;;  %v6266_v37 = vadd.f32 %v10789_v0, %v6142_v21 }
 0x56d   :  { %12049 = vst [vmem:[#allocation18_spill] sm:$0xff] %v10865_v44  ;;  %v10868_v59 = vadd.f32 %v5675_v19, %v10865_v44 }
 0x56f   :  { %6299 = vxpose.xlu0.b32.cont [5/7] (short) %v6265_v38, 128  ;;  %6330 = vxpose.xlu1.b32.cont [4/7] (short) %v6256_v1, 128  ;;  %v6285_v1 = vadd.f32 %v10765_v3, %v10792_v36 }
 0x570   :  { %v5124_v35 = vpop.f32.mrb[100].mxu1 }
 0x571   :  { %v5588_v42 = vsel %vm4386_vm1, %v5124_v35, 0.0  ;;  %v5126_v12 = vpop.f32.mrb[101].mxu1 }
 0x572   :  { %v5589_v53 = vadd.f32 %v5588_v42, %v5587_v58  ;;  %v5601_v30 = vsel %vm4386_vm1, %v5126_v12, 0.0  ;;  %v5128_v18 = vpop.f32.mrb[102].mxu1 }
 0x573   :  { %6300 = vxpose.xlu0.b32.cont [6/7] (short) %v6275_v51, 128  ;;  %v5602_v4 = vadd.f32 %v5601_v30, %v5600_v11  ;;  %v5129_v38 = vpop.f32.mrb[103].mxu1  ;;  %6331 = vxpose.xlu1.b32.cont [5/7] (short) %v6266_v37, 128  ;;  %v6286_v18 = vadd.f32 %v10789_v0, %v6162_v2 }
 0x574   :  { %v5590_v19 = vrot.slane %v5589_v53, 4 }
 0x575   :  { %v5603_v44 = vrot.slane %v5602_v4, 4 }
 0x576   :  { %v5591_v9 = vadd.f32 %v5590_v19, %v5589_v53 }
 0x577   :  { %6301 = vxpose.xlu0.b32.end [7/7] (short) %v6285_v1, 128  ;;  %v5604_v17 = vadd.f32 %v5603_v44, %v5602_v4  ;;  %6332 = vxpose.xlu1.b32.cont [6/7] (short) %v6276_v57, 128 }
 0x578   :  { %v5592_v21 = vrot.slane %v5591_v9, 2 }
 0x579   :  { %v5605_v58 = vrot.slane %v5604_v17, 2 }
 0x57a   :  { %v5593_v51 = vadd.f32 %v5592_v21, %v5591_v9 }
 0x57b   :  { %v5606_v11 = vadd.f32 %v5605_v58, %v5604_v17  ;;  %6333 = vxpose.xlu1.b32.end [7/7] (short) %v6286_v18, 128 }
 0x57c   :  { %v5594_v37 = vrot.slane %v5593_v51, 1 }
 0x57d   :  { %v5607_v42 = vrot.slane %v5606_v11, 1 }
 0x57e   :  { %v5595_v30 = vadd.f32 %v5594_v37, %v5593_v51 }
 0x57f   :  { %v5608_v38 = vadd.f32 %v5607_v42, %v5606_v11 }
 0x580   :  { %v5689_v3 = vmul.f32 0.020408163, %v5595_v30 }
 0x581   :  { %v5690_v36 = vmul.f32 0.020408163, %v5608_v38 }
 0x582   :  { %v10881_v23 = vsub.f32 %v10760_v26, %v5689_v3  ;;  %v10884_v60 = vsub.f32 %v10769_v52, %v5689_v3  ;;  %v10887_v44 = vsub.f32 %v10797_v20, %v5689_v3  ;;  %v10890_v0 = vsub.f32 %v10814_v34, %v5689_v3 }
 0x583   :  { %v10893_v2 = vsub.f32 %v10831_v24, %v5689_v3  ;;  %v10895_v17 = vsub.f32 %v5118_v62, %v5689_v3  ;;  %v10897_v9 = vsub.f32 %v5124_v35, %v5689_v3  ;;  %v10900_v4 = vsub.f32 %v10767_v56, %v5690_v36 }
 0x584   :  { %v5769_v26 = vmul.f32 %v10881_v23, %v10881_v23  ;;  %v5779_v52 = vmul.f32 %v10884_v60, %v10884_v60  ;;  %v5789_v20 = vmul.f32 %v10887_v44, %v10887_v44  ;;  %v10909_v34 = vsub.f32 %v10775_v8, %v5690_v36 }
 0x585   :  { %v10912_v62 = vsub.f32 %v10804_v47, %v5690_v36  ;;  %v10915_v35 = vsub.f32 %v10819_v6, %v5690_v36  ;;  %v10918_v56 = vsub.f32 %v10837_v32, %v5690_v36  ;;  %v10921_v53 = vsub.f32 %v10847_v54, %v5690_v36 }
 0x586   :  { %v5863_v24 = vadd.f32 %v5779_v52, %v5769_v26  ;;  %v10923_v19 = vsub.f32 %v5126_v12, %v5690_v36  ;;  %v5770_v1 = vmul.f32 %v10900_v4, %v10900_v4  ;;  %v5799_v8 = vmul.f32 %v10890_v0, %v10890_v0 }
 0x587   :  { %v5780_v47 = vmul.f32 %v10909_v34, %v10909_v34  ;;  %v5809_v6 = vmul.f32 %v10893_v2, %v10893_v2  ;;  %v5790_v54 = vmul.f32 %v10912_v62, %v10912_v62  ;;  %v5829_v12 = vmul.f32 %v10897_v9, %v10897_v9 }
 0x588   :  { %v5864_v57 = vadd.f32 %v5863_v24, %v5789_v20  ;;  %v5819_v58 = vmul.f32 %v10895_v17, %v10895_v17  ;;  %v5800_v51 = vmul.f32 %v10915_v35, %v10915_v35  ;;  %v5810_v42 = vmul.f32 %v10918_v56, %v10918_v56 }
 0x589   :  { %v5876_v21 = vadd.f32 %v5780_v47, %v5770_v1  ;;  %v5868_v38 = vsel %vm4386_vm1, %v5829_v12, 0.0  ;;  %v5830_v3 = vmul.f32 %v10923_v19, %v10923_v19  ;;  %v5820_v26 = vmul.f32 %v10921_v53, %v10921_v53 }
 0x58a   :  { %v5865_v32 = vadd.f32 %v5864_v57, %v5799_v8 }
 0x58b   :  { %v5877_v11 = vadd.f32 %v5876_v21, %v5790_v54  ;;  %v5881_v1 = vsel %vm4386_vm1, %v5830_v3, 0.0 }
 0x58c   :  { %v5866_v18 = vadd.f32 %v5865_v32, %v5809_v6  ;;  %v6194_v32 = vrot.slane %v10738_v31, %v9775_v50 }
 0x58d   :  { %v5878_v30 = vadd.f32 %v5877_v11, %v5800_v51  ;;  %v6198_v51 = vrot.slane %v10738_v31, %v9772_v49 }
 0x58e   :  { %v5867_v37 = vadd.f32 %v5866_v18, %v5819_v58  ;;  %v6229_v18 = vadd.f32 %v6194_v32, %v10712_v25  ;;  %v6249_v25 = vadd.f32 %v6194_v32, %v10718_v16 }
 0x58f   :  { %v5879_v52 = vadd.f32 %v5878_v30, %v5810_v42  ;;  %v6230_v3 = vadd.f32 %v6198_v51, %v10741_v40  ;;  %v6012_v40 = vrot.slane %v10699_v13, %v9507_v46 }
 0x590   :  { %v5869_v36 = vadd.f32 %v5868_v38, %v5867_v37  ;;  %v6239_v38 = vadd.f32 %v6194_v32, %v10715_v43  ;;  %v6250_v43 = vadd.f32 %v6198_v51, %v10747_v48 }
 0x591   :  { %v5880_v24 = vadd.f32 %v5879_v52, %v5820_v26  ;;  %v6240_v52 = vadd.f32 %v6198_v51, %v10744_v61 }
 0x592   :  { %v5870_v20 = vrot.slane %v5869_v36, 4 }
 0x593   :  { %v5882_v57 = vadd.f32 %v5881_v1, %v5880_v24  ;;  %v6269_v24 = vadd.f32 %v6194_v32, %v10724_v10  ;;  %v6260_v1 = vadd.f32 %v6198_v51, %v10750_v27 }
 0x594   :  { %v5871_v8 = vadd.f32 %v5870_v20, %v5869_v36  ;;  %v6259_v20 = vadd.f32 %v6194_v32, %v10721_v29  ;;  %v6279_v29 = vadd.f32 %v6194_v32, %v10729_v63 }
 0x595   :  { %v5883_v6 = vrot.slane %v5882_v57, 4 }
 0x596   :  { %v5872_v47 = vrot.slane %v5871_v8, 2 }
 0x597   :  { %v5884_v21 = vadd.f32 %v5883_v6, %v5882_v57  ;;  %v6270_v57 = vadd.f32 %v6198_v51, %v10753_v33  ;;  %v6289_v6 = vadd.f32 %v6194_v32, %v10709_v28  ;;  %v6280_v32 = vadd.f32 %v6198_v51, %v10756_v22 }
 0x598   :  { %v5873_v54 = vadd.f32 %v5872_v47, %v5871_v8  ;;  %v6016_v8 = vrot.slane %v10699_v13, %v9504_v45 }
 0x599   :  { %v5885_v58 = vrot.slane %v5884_v21, 2 }
 0x59a   :  { %v5874_v12 = vrot.slane %v5873_v54, 1 }
 0x59b   :  { %v5886_v37 = vadd.f32 %v5885_v58, %v5884_v21 }
 0x59c   :  { %v5875_v11 = vadd.f32 %v5874_v12, %v5873_v54  ;;  %6423 = vxpose.xlu0.b32.start [1/7] (short) %v6229_v18, 128 }
 0x59d   :  { %v5887_v30 = vrot.slane %v5886_v37, 1 }
 0x59e   :  { %v5969_v42 = vmul.f32 0.020408163, %v5875_v11 }
 0x59f   :  { %v5888_v50 = vadd.f32 %v5887_v30, %v5886_v37 }
 0x5a0   :  { %v5979_v36 = vadd.f32 1e-05, %v5969_v42  ;;  %6424 = vxpose.xlu0.b32.cont [2/7] (short) %v6239_v38, 128  ;;  %6455 = vxpose.xlu1.b32.start [1/7] (short) %v6230_v3, 128 }
 0x5a1   :  { %v5970_v26 = vmul.f32 0.020408163, %v5888_v50 }
 0x5a2   :  { %7695 = vrsqrt.f32 %v5979_v36 }
 0x5a3   :  { %v5980_v49 = vadd.f32 1e-05, %v5970_v26 }
 0x5a4   :  { %6425 = vxpose.xlu0.b32.cont [3/7] (short) %v6249_v25, 128  ;;  %6456 = vxpose.xlu1.b32.cont [2/7] (short) %v6240_v52, 128 }
 0x5a5   :  { %7697 = vrsqrt.f32 %v5980_v49 }
 0x5a8   :  { %6426 = vxpose.xlu0.b32.cont [4/7] (short) %v6259_v20, 128  ;;  %6457 = vxpose.xlu1.b32.cont [3/7] (short) %v6250_v43, 128 }
 0x5ac   :  { %v7696_v16 = vpop.eup %7695  ;;  %6427 = vxpose.xlu0.b32.cont [5/7] (short) %v6269_v24, 128  ;;  %6458 = vxpose.xlu1.b32.cont [4/7] (short) %v6260_v1, 128 }
 0x5ad   :  { %v6053_v61 = vmul.f32 %v7696_v16, %v6012_v40 }
 0x5af   :  { %v6072_v48 = vrot.slane %v6053_v61, %v9251_v55  ;;  %v7698_v47 = vpop.eup %7697  ;;  %v11054_v61 = vrot.slane %v10738_v31, %v9507_v46 }
 0x5b0   :  { %6428 = vxpose.xlu0.b32.cont [6/7] (short) %v6279_v29, 128  ;;  %v6054_v27 = vmul.f32 %v7698_v47, %v6016_v8  ;;  %6459 = vxpose.xlu1.b32.cont [5/7] (short) %v6270_v57, 128 }
 0x5b1   :  { %v10971_v10 = vmul.f32 %v6072_v48, %v10897_v9  ;;  %v6103_v54 = vmul.f32 %v6072_v48, %v10881_v23  ;;  %v10975_v21 = vmul.f32 %v6072_v48, %v10884_v60  ;;  %v10978_v63 = vmul.f32 %v6072_v48, %v10887_v44 }
 0x5b2   :  { %v10981_v12 = vmul.f32 %v6072_v48, %v10890_v0  ;;  %v10984_v33 = vmul.f32 %v6072_v48, %v10893_v2  ;;  %v10987_v28 = vmul.f32 %v6072_v48, %v10895_v17  ;;  %v6076_v9 = vrot.slane %v6054_v27, %v9251_v55 }
 0x5b4   :  { %6429 = vxpose.xlu0.b32.end [7/7] (short) %v6289_v6, 128  ;;  %v10992_v23 = vmul.f32 %v6076_v9, %v10923_v19  ;;  %6460 = vxpose.xlu1.b32.cont [6/7] (short) %v6280_v32, 128  ;;  %v6104_v60 = vmul.f32 %v6076_v9, %v10900_v4  ;;  %v10996_v44 = vmul.f32 %v6076_v9, %v10909_v34 }
 0x5b5   :  { %v10999_v0 = vmul.f32 %v6076_v9, %v10912_v62  ;;  %v11002_v2 = vmul.f32 %v6076_v9, %v10915_v35  ;;  %v11005_v17 = vmul.f32 %v6076_v9, %v10918_v56  ;;  %v11008_v22 = vmul.f32 %v6076_v9, %v10921_v53 }
 0x5b6   :  { %v6290_v19 = vadd.f32 %v6198_v51, %v10733_v39  ;;  %v6227_v6 = vadd.f32 %v11054_v61, %v6103_v54  ;;  %v11059_v32 = vrot.slane %v10738_v31, %v9504_v45  ;;  %v6237_v54 = vadd.f32 %v11054_v61, %v10975_v21 }
 0x5b8   :  { %v11011_v58 = vpop.f32.mrb[104].mxu1  ;;  %6461 = vxpose.xlu1.b32.end [7/7] (short) %v6290_v19, 128 }
 0x5b9   :  { %v11013_v4 = vpop.f32.mrb[105].mxu1 }
 0x5ba   :  { %v11015_v34 = vpop.f32.mrb[106].mxu1 }
 0x5bb   :  { %v5635_v62 = vadd.f32 %v11015_v34, %v11011_v58  ;;  %v11019_v35 = vpop.f32.mrb[107].mxu1 }
 0x5bc   :  { %v5648_v56 = vadd.f32 %v11019_v35, %v11013_v4 }
 0x5c0   :  { %v11023_v18 = vpop.f32.mrb[108].mxu1 }
 0x5c1   :  { %v5636_v53 = vadd.f32 %v5635_v62, %v11023_v18  ;;  %v11026_v39 = vpop.f32.mrb[109].mxu1 }
 0x5c2   :  { %v5649_v51 = vadd.f32 %v5648_v56, %v11026_v39  ;;  %v11029_v11 = vpop.f32.mrb[110].mxu1 }
 0x5c3   :  { %v5637_v37 = vadd.f32 %v5636_v53, %v11029_v11  ;;  %v11032_v42 = vpop.f32.mrb[111].mxu1 }
 0x5c4   :  { %v5650_v30 = vadd.f32 %v5649_v51, %v11032_v42 }
 0x5c8   :  { %v11035_v38 = vpop.f32.mrb[112].mxu1 }
 0x5c9   :  { %v5638_v3 = vadd.f32 %v5637_v37, %v11035_v38  ;;  %v11038_v36 = vpop.f32.mrb[113].mxu1 }
 0x5ca   :  { %v5651_v50 = vadd.f32 %v5650_v30, %v11038_v36  ;;  %v11041_v26 = vpop.f32.mrb[114].mxu1 }
 0x5cb   :  { %v5639_v25 = vadd.f32 %v5638_v3, %v11041_v26  ;;  %v11044_v52 = vpop.f32.mrb[115].mxu1 }
 0x5cc   :  { %v5652_v49 = vadd.f32 %v5651_v50, %v11044_v52 }
 0x5d0   :  { %v5408_v20 = vpop.f32.mrb[116].mxu1 }
 0x5d1   :  { %v5640_v43 = vsel %vm4386_vm1, %v5408_v20, 0.0  ;;  %v11048_v40 = vpop.f32.mrb[117].mxu1 }
 0x5d2   :  { %v5641_v24 = vadd.f32 %v5640_v43, %v5639_v25  ;;  %v5653_v1 = vsel %vm4386_vm1, %v11048_v40, 0.0  ;;  %v5412_v16 = vpop.f32.mrb[118].mxu1 }
 0x5d3   :  { %v5654_v8 = vadd.f32 %v5653_v1, %v5652_v49  ;;  %v5413_v29 = vpop.f32.mrb[119].mxu1 }
 0x5d4   :  { %v5642_v48 = vrot.slane %v5641_v24, 4  ;;  %v6257_v29 = vadd.f32 %v11054_v61, %v10981_v12 }
 0x5d5   :  { %v5655_v57 = vrot.slane %v5654_v8, 4 }
 0x5d6   :  { %v5643_v47 = vadd.f32 %v5642_v48, %v5641_v24  ;;  %v12050_v48 = vld [vmem:[#allocation9_spill] sm:$0xff] }
 0x5d7   :  { %v5656_v27 = vadd.f32 %v5655_v57, %v5654_v8 }
 0x5d8   :  { %v5644_v9 = vrot.slane %v5643_v47, 2  ;;  %v5540_v19 = vpop.f32.mrb[120].mxu1 }
 0x5d9   :  { %6359 = vxpose.xlu0.b32.start [1/7] (short) %v6227_v6, 128  ;;  %v5657_v62 = vrot.slane %v5656_v27, 2  ;;  %v11062_v56 = vadd.f32 %v5540_v19, %v10705_v14  ;;  %v5542_v46 = vpop.f32.mrb[121].mxu1  ;;  %v6228_v14 = vadd.f32 %v11059_v32, %v6104_v60  ;;  %v6247_v60 = vadd.f32 %v11054_v61, %v10978_v63 }
 0x5da   :  { %v5645_v53 = vadd.f32 %v5644_v9, %v5643_v47  ;;  %v11065_v51 = vadd.f32 %v5542_v46, %v10800_v41  ;;  %v5544_v37 = vpop.f32.mrb[122].mxu1 }
 0x5db   :  { %v5658_v30 = vadd.f32 %v5657_v62, %v5656_v27  ;;  %v5664_v45 = vadd.f32 %v10863_v5, %v11062_v56  ;;  %v11072_v3 = vadd.f32 %v5544_v37, %v10810_v15  ;;  %v5546_v50 = vpop.f32.mrb[123].mxu1 }
 0x5dc   :  { %v5646_v25 = vrot.slane %v5645_v53, 1  ;;  %v5677_v49 = vadd.f32 %v10868_v59, %v11065_v51  ;;  %v11078_v41 = vadd.f32 %v5546_v50, %v10816_v7  ;;  %v6238_v7 = vadd.f32 %v11059_v32, %v10996_v44 }
 0x5dd   :  { %v5659_v43 = vrot.slane %v5658_v30, 1  ;;  %6360 = vxpose.xlu0.b32.cont [2/7] (short) %v6237_v54, 128  ;;  %v5665_v21 = vadd.f32 %v5664_v45, %v11072_v3  ;;  %6391 = vxpose.xlu1.b32.start [1/7] (short) %v6228_v14, 128 }
 0x5de   :  { %v5647_v24 = vadd.f32 %v5646_v25, %v5645_v53  ;;  %v11082_v15 = vadd.f32 %v5677_v49, %v11078_v41 }
 0x5df   :  { %v5660_v5 = vadd.f32 %v5659_v43, %v5658_v30  ;;  %v6311_v1 = vpop.trf.xlu0 }
 0x5e0   :  { %v5693_v16 = vmul.f32 0.020408163, %v5647_v24  ;;  %6616 = vst.msk [vmem:[%s12022_s8] sm:$0xff] %vm6615_vm3, %v6311_v1  ;;  %v5550_v59 = vpop.f32.mrb[124].mxu1  ;;  %v12051_v1 = vld [vmem:[#allocation10_spill] sm:$0xff] }
 0x5e1   :  { %v5694_v8 = vmul.f32 0.020408163, %v5660_v5  ;;  %6361 = vxpose.xlu0.b32.cont [3/7] (short) %v6247_v60, 128  ;;  %v11095_v57 = vadd.f32 %v5550_v59, %v12050_v48  ;;  %v5552_v47 = vpop.f32.mrb[125].mxu1  ;;  %6392 = vxpose.xlu1.b32.cont [2/7] (short) %v6238_v7, 128 }
 0x5e2   :  { %v11098_v63 = vsub.f32 %v11011_v58, %v5693_v16  ;;  %v11101_v44 = vsub.f32 %v11015_v34, %v5693_v16  ;;  %v11104_v6 = vsub.f32 %v11023_v18, %v5693_v16  ;;  %v11107_v27 = vsub.f32 %v11029_v11, %v5693_v16  ;;  %v5554_v9 = vpop.f32.mrb[126].mxu1 }
 0x5e3   :  { %v11110_v12 = vsub.f32 %v11035_v38, %v5693_v16  ;;  %v11113_v19 = vsub.f32 %v11041_v26, %v5693_v16  ;;  %v11115_v62 = vsub.f32 %v5408_v20, %v5693_v16  ;;  %v11118_v58 = vsub.f32 %v11013_v4, %v5694_v8  ;;  %v6312_v34 = vpop.trf.xlu0  ;;  %v5555_v46 = vpop.f32.mrb[127].mxu1 }
 0x5e4   :  { %v5773_v18 = vmul.f32 %v11098_v63, %v11098_v63  ;;  %v5783_v11 = vmul.f32 %v11101_v44, %v11101_v44  ;;  %v6343_v53 = vpop.trf.xlu1  ;;  %v6248_v38 = vadd.f32 %v11059_v32, %v10999_v0  ;;  %6617 = vst.msk [vmem:[%s12022_s8 + $0x8] sm:$0xff] %vm6615_vm3, %v6312_v34  ;;  %v5793_v4 = vmul.f32 %v11104_v6, %v11104_v6 }
 0x5e5   :  { %v11133_v26 = vsub.f32 %v11019_v35, %v5694_v8  ;;  %6632 = vst.msk [vmem:[%s12022_s8 + $0x80] sm:$0xff] %vm6615_vm3, %v6343_v53  ;;  %6362 = vxpose.xlu0.b32.cont [4/7] (short) %v6257_v29, 128  ;;  %v11140_v0 = vsub.f32 %v11026_v39, %v5694_v8  ;;  %v11143_v37 = vsub.f32 %v11032_v42, %v5694_v8  ;;  %v5666_v49 = vsel %vm4386_vm1, %v11095_v57, 0.0 }
 0x5e6   :  { %v5915_v20 = vadd.f32 %v5783_v11, %v5773_v18  ;;  %v11146_v30 = vsub.f32 %v11038_v36, %v5694_v8  ;;  %6393 = vxpose.xlu1.b32.cont [3/7] (short) %v6248_v38, 128  ;;  %v11149_v35 = vsub.f32 %v11044_v52, %v5694_v8  ;;  %v11152_v54 = vsub.f32 %v11048_v40, %v5694_v8 }
 0x5e7   :  { %v5774_v45 = vmul.f32 %v11118_v58, %v11118_v58  ;;  %v6313_v50 = vpop.trf.xlu0  ;;  %v6267_v39 = vadd.f32 %v11054_v61, %v10984_v33  ;;  %v5803_v42 = vmul.f32 %v11107_v27, %v11107_v27  ;;  %v5784_v36 = vmul.f32 %v11133_v26, %v11133_v26 }
 0x5e8   :  { %v5916_v25 = vadd.f32 %v5915_v20, %v5793_v4  ;;  %v6344_v14 = vpop.trf.xlu1  ;;  %v6258_v52 = vadd.f32 %v11059_v32, %v11002_v2  ;;  %6618 = vst.msk [vmem:[%s12022_s8 + $0x10] sm:$0xff] %vm6615_vm3, %v6313_v50  ;;  %v5813_v40 = vmul.f32 %v11110_v12, %v11110_v12  ;;  %v5794_v33 = vmul.f32 %v11140_v0, %v11140_v0 }
 0x5e9   :  { %6633 = vst.msk [vmem:[%s12022_s8 + $0x88] sm:$0xff] %vm6615_vm3, %v6344_v14  ;;  %6363 = vxpose.xlu0.b32.cont [5/7] (short) %v6267_v39, 128  ;;  %v6277_v2 = vadd.f32 %v11054_v61, %v10987_v28  ;;  %v5928_v24 = vadd.f32 %v5784_v36, %v5774_v45  ;;  %v5667_v5 = vadd.f32 %v5666_v49, %v5665_v21 }
 0x5ea   :  { %v5917_v43 = vadd.f32 %v5916_v25, %v5803_v42  ;;  %6394 = vxpose.xlu1.b32.cont [4/7] (short) %v6258_v52, 128  ;;  %v11181_v60 = vadd.f32 %v5552_v47, %v12051_v1  ;;  %v5823_v16 = vmul.f32 %v11113_v19, %v11113_v19  ;;  %v5833_v7 = vmul.f32 %v11115_v62, %v11115_v62 }
 0x5eb   :  { %v5804_v59 = vmul.f32 %v11143_v37, %v11143_v37  ;;  %v6268_v8 = vadd.f32 %v11059_v32, %v11005_v17  ;;  %v6314_v28 = vpop.trf.xlu0  ;;  %v5929_v48 = vadd.f32 %v5928_v24, %v5794_v33  ;;  %v5668_v9 = vrot.slane %v5667_v5, 4 }
 0x5ec   :  { %v5918_v29 = vadd.f32 %v5917_v43, %v5813_v40  ;;  %v6345_v21 = vpop.trf.xlu1  ;;  %v5679_v47 = vsel %vm4386_vm1, %v11181_v60, 0.0  ;;  %6619 = vst.msk [vmem:[%s12022_s8 + $0x18] sm:$0xff] %vm6615_vm3, %v6314_v28  ;;  %v6287_v34 = vadd.f32 %v11054_v61, %v10971_v10  ;;  %v5814_v18 = vmul.f32 %v11146_v30, %v11146_v30 }
 0x5ed   :  { %6634 = vst.msk [vmem:[%s12022_s8 + $0x90] sm:$0xff] %vm6615_vm3, %v6345_v21  ;;  %v5680_v17 = vadd.f32 %v5679_v47, %v11082_v15  ;;  %6364 = vxpose.xlu0.b32.cont [6/7] (short) %v6277_v2, 128  ;;  %v5930_v11 = vadd.f32 %v5929_v48, %v5804_v59  ;;  %v5669_v53 = vadd.f32 %v5668_v9, %v5667_v5  ;;  %v5920_v38 = vsel %vm4386_vm1, %v5833_v7, 0.0 }
 0x5ee   :  { %v5919_v46 = vadd.f32 %v5918_v29, %v5823_v16  ;;  %6395 = vxpose.xlu1.b32.cont [5/7] (short) %v6268_v8, 128  ;;  %v5834_v4 = vmul.f32 %v11152_v54, %v11152_v54  ;;  %v6278_v15 = vadd.f32 %v11059_v32, %v11008_v22  ;;  %v5824_v10 = vmul.f32 %v11149_v35, %v11149_v35 }
 0x5ef   :  { %v5681_v20 = vrot.slane %v5680_v17, 4  ;;  %v6315_v45 = vpop.trf.xlu0  ;;  %v5931_v61 = vadd.f32 %v5930_v11, %v5814_v18  ;;  %v5670_v39 = vrot.slane %v5669_v53, 2  ;;  %v6288_v5 = vadd.f32 %v11059_v32, %v10992_v23  ;;  %v12054_v11 = vld [vmem:[#allocation15_spill] sm:$0xff] }
 0x5f0   :  { %v5921_v50 = vadd.f32 %v5920_v38, %v5919_v46  ;;  %v6346_v42 = vpop.trf.xlu1  ;;  %6620 = vst.msk [vmem:[%s12022_s8 + $0x20] sm:$0xff] %vm6615_vm3, %v6315_v45  ;;  %v5933_v52 = vsel %vm4386_vm1, %v5834_v4, 0.0  ;;  %v12053_v46 = vld [vmem:[#allocation13_spill] sm:$0xff] }
 0x5f1   :  { %v5682_v25 = vadd.f32 %v5681_v20, %v5680_v17  ;;  %6635 = vst.msk [vmem:[%s12022_s8 + $0x98] sm:$0xff] %vm6615_vm3, %v6346_v42  ;;  %6365 = vxpose.xlu0.b32.end [7/7] (short) %v6287_v34, 128  ;;  %v5932_v36 = vadd.f32 %v5931_v61, %v5824_v10  ;;  %v5671_v14 = vadd.f32 %v5670_v39, %v5669_v53  ;;  %v12052_v17 = vld [vmem:[#allocation11_spill] sm:$0xff]  ;;  %v12055_v38 = vld [vmem:[#allocation17_spill] sm:$0xff] }
 0x5f2   :  { %v5922_v22 = vrot.slane %v5921_v50, 4  ;;  %6396 = vxpose.xlu1.b32.cont [6/7] (short) %v6278_v15, 128 }
 0x5f3   :  { %v5683_v40 = vrot.slane %v5682_v25, 2  ;;  %v6316_v33 = vpop.trf.xlu0  ;;  %v5934_v2 = vadd.f32 %v5933_v52, %v5932_v36  ;;  %v5672_v43 = vrot.slane %v5671_v14, 1 }
 0x5f4   :  { %v5923_v49 = vadd.f32 %v5922_v22, %v5921_v50  ;;  %v6347_v24 = vpop.trf.xlu1  ;;  %6621 = vst.msk [vmem:[%s12022_s8 + $0x28] sm:$0xff] %vm6615_vm3, %v6316_v33 }
 0x5f5   :  { %v5684_v1 = vadd.f32 %v5683_v40, %v5682_v25  ;;  %6636 = vst.msk [vmem:[%s12022_s8 + $0xa0] sm:$0xff] %vm6615_vm3, %v6347_v24  ;;  %v5935_v7 = vrot.slane %v5934_v2, 4  ;;  %v5673_v59 = vadd.f32 %v5672_v43, %v5671_v14  ;;  %v12056_v24 = vld [vmem:[#allocation12_spill] sm:$0xff] }
 0x5f6   :  { %v5924_v16 = vrot.slane %v5923_v49, 2  ;;  %6397 = vxpose.xlu1.b32.end [7/7] (short) %v6288_v5, 128 }
 0x5f7   :  { %v5685_v8 = vrot.slane %v5684_v1, 1  ;;  %v6317_v28 = vpop.trf.xlu0  ;;  %v5936_v48 = vadd.f32 %v5935_v7, %v5934_v2  ;;  %v5695_v23 = vmul.f32 0.020408163, %v5673_v59  ;;  %v12058_v7 = vld [vmem:[#allocation16_spill] sm:$0xff] }
 0x5f8   :  { %v5925_v29 = vadd.f32 %v5924_v16, %v5923_v49  ;;  %v6348_v32 = vpop.trf.xlu1  ;;  %6622 = vst.msk [vmem:[%s12022_s8 + $0x30] sm:$0xff] %vm6615_vm3, %v6317_v28  ;;  %v12059_v28 = vld [vmem:[#allocation18_spill] sm:$0xff] }
 0x5f9   :  { %v5686_v9 = vadd.f32 %v5685_v8, %v5684_v1  ;;  %6637 = vst.msk [vmem:[%s12022_s8 + $0xa8] sm:$0xff] %vm6615_vm3, %v6348_v32  ;;  %v5937_v47 = vrot.slane %v5936_v48, 2  ;;  %v11241_v34 = vsub.f32 %v12052_v17, %v5695_v23  ;;  %v11244_v18 = vsub.f32 %v12053_v46, %v5695_v23  ;;  %v12057_v1 = vld [vmem:[#allocation14_spill] sm:$0xff] }
 0x5fa   :  { %v5926_v21 = vrot.slane %v5925_v29, 1  ;;  %v11247_v53 = vsub.f32 %v12054_v11, %v5695_v23  ;;  %v11250_v4 = vsub.f32 %v12055_v38, %v5695_v23  ;;  %v11253_v20 = vsub.f32 %v11062_v56, %v5695_v23 }
 0x5fb   :  { %v11256_v15 = vsub.f32 %v11072_v3, %v5695_v23  ;;  %v6318_v45 = vpop.trf.xlu0  ;;  %v5938_v10 = vadd.f32 %v5937_v47, %v5936_v48  ;;  %v11259_v61 = vsub.f32 %v11095_v57, %v5695_v23  ;;  %v5775_v39 = vmul.f32 %v11241_v34, %v11241_v34 }
 0x5fc   :  { %v5927_v50 = vadd.f32 %v5926_v21, %v5925_v29  ;;  %v6349_v42 = vpop.trf.xlu1  ;;  %6623 = vst.msk [vmem:[%s12022_s8 + $0x38] sm:$0xff] %vm6615_vm3, %v6318_v45  ;;  %v5785_v56 = vmul.f32 %v11244_v18, %v11244_v18  ;;  %v5795_v25 = vmul.f32 %v11247_v53, %v11247_v53  ;;  %v5696_v36 = vmul.f32 0.020408163, %v5686_v9 }
 0x5fd   :  { %6638 = vst.msk [vmem:[%s12022_s8 + $0xb0] sm:$0xff] %vm6615_vm3, %v6349_v42  ;;  %v5939_v57 = vrot.slane %v5938_v10, 1  ;;  %v5805_v33 = vmul.f32 %v11250_v4, %v11250_v4  ;;  %v5815_v49 = vmul.f32 %v11253_v20, %v11253_v20  ;;  %v5835_v46 = vmul.f32 %v11259_v61, %v11259_v61 }
 0x5fe   :  { %v5973_v3 = vmul.f32 0.020408163, %v5927_v50  ;;  %v5941_v22 = vadd.f32 %v5785_v56, %v5775_v39  ;;  %v11284_v5 = vsub.f32 %v12056_v24, %v5696_v36  ;;  %v11287_v16 = vsub.f32 %v12057_v1, %v5696_v36  ;;  %v7707_v1 = vld [vmem:[%s12020_s6] sm:$0xff] }
 0x5ff   :  { %v6319_v14 = vpop.trf.xlu0  ;;  %v5940_v40 = vadd.f32 %v5939_v57, %v5938_v10  ;;  %v11290_v59 = vsub.f32 %v12058_v7, %v5696_v36  ;;  %v11297_v29 = vsub.f32 %v12059_v28, %v5696_v36  ;;  %v11300_v48 = vsub.f32 %v11065_v51, %v5696_v36  ;;  %v12060_v57 = vld [vmem:[#allocation8_spill] sm:$0xff]  ;;  %v12061_v7 = vld [vmem:[#allocation7_spill] sm:$0xff] }
 0x600   :  { %v5983_v52 = vadd.f32 1e-05, %v5973_v3  ;;  %v6350_v2 = vpop.trf.xlu1  ;;  %6624 = vst.msk [vmem:[%s12022_s8 + $0x40] sm:$0xff] %vm6615_vm3, %v6319_v14  ;;  %v5942_v43 = vadd.f32 %v5941_v22, %v5795_v25  ;;  %v11303_v32 = vsub.f32 %v11078_v41, %v5696_v36  ;;  %v11306_v9 = vsub.f32 %v11181_v60, %v5696_v36 }
 0x601   :  { %6639 = vst.msk [vmem:[%s12022_s8 + $0xb8] sm:$0xff] %vm6615_vm3, %v6350_v2  ;;  %v5974_v8 = vmul.f32 0.020408163, %v5940_v40  ;;  %v5776_v21 = vmul.f32 %v11284_v5, %v11284_v5  ;;  %v5786_v11 = vmul.f32 %v11287_v16, %v11287_v16  ;;  %v5825_v41 = vmul.f32 %v11256_v15, %v11256_v15 }
 0x602   :  { %7699 = vrsqrt.f32 %v5983_v52  ;;  %v5943_v23 = vadd.f32 %v5942_v43, %v5805_v33  ;;  %v5796_v38 = vmul.f32 %v11290_v59, %v11290_v59  ;;  %v5946_v39 = vsel %vm4386_vm1, %v5835_v46, 0.0 }
 0x603   :  { %v6320_v47 = vpop.trf.xlu0  ;;  %v5984_v17 = vadd.f32 1e-05, %v5974_v8  ;;  %v5954_v45 = vadd.f32 %v5786_v11, %v5776_v21  ;;  %v5806_v42 = vmul.f32 %v11297_v29, %v11297_v29  ;;  %v6028_v25 = vrot.slane %v10699_v13, %v12060_v57 }
 0x604   :  { %v6351_v51 = vpop.trf.xlu1  ;;  %6625 = vst.msk [vmem:[%s12022_s8 + $0x48] sm:$0xff] %vm6615_vm3, %v6320_v47  ;;  %v5944_v60 = vadd.f32 %v5943_v23, %v5815_v49  ;;  %v5816_v36 = vmul.f32 %v11300_v48, %v11300_v48  ;;  %v5836_v40 = vmul.f32 %v11306_v9, %v11306_v9  ;;  %v5826_v2 = vmul.f32 %v11303_v32, %v11303_v32 }
 0x605   :  { %6640 = vst.msk [vmem:[%s12022_s8 + $0xc0] sm:$0xff] %vm6615_vm3, %v6351_v51  ;;  %7701 = vrsqrt.f32 %v5984_v17  ;;  %v5955_v56 = vadd.f32 %v5954_v45, %v5796_v38  ;;  %v6032_v8 = vrot.slane %v7707_v1, %v12061_v7  ;;  %v11361_v11 = vrot.slane %v10738_v31, %v12060_v57 }
 0x606   :  { %v5945_v50 = vadd.f32 %v5944_v60, %v5825_v41  ;;  %v5959_v17 = vsel %vm4386_vm1, %v5836_v40, 0.0 }
 0x607   :  { %v6321_v10 = vpop.trf.xlu0  ;;  %v5956_v14 = vadd.f32 %v5955_v56, %v5806_v42 }
 0x608   :  { %v6352_v3 = vpop.trf.xlu1  ;;  %6626 = vst.msk [vmem:[%s12022_s8 + $0x50] sm:$0xff] %vm6615_vm3, %v6321_v10  ;;  %v5947_v22 = vadd.f32 %v5946_v39, %v5945_v50 }
 0x609   :  { %6641 = vst.msk [vmem:[%s12022_s8 + $0xc8] sm:$0xff] %vm6615_vm3, %v6352_v3  ;;  %v5957_v13 = vadd.f32 %v5956_v14, %v5816_v36 }
 0x60a   :  { %v5948_v52 = vrot.slane %v5947_v22, 4 }
 0x60b   :  { %v6322_v33 = vpop.trf.xlu0  ;;  %v5958_v23 = vadd.f32 %v5957_v13, %v5826_v2 }
 0x60c   :  { %v7700_v49 = vpop.eup %7699  ;;  %v6353_v43 = vpop.trf.xlu1  ;;  %6627 = vst.msk [vmem:[%s12022_s8 + $0x58] sm:$0xff] %vm6615_vm3, %v6322_v33  ;;  %v5949_v28 = vadd.f32 %v5948_v52, %v5947_v22 }
 0x60d   :  { %v6057_v24 = vmul.f32 %v7700_v49, %v6028_v25  ;;  %6642 = vst.msk [vmem:[%s12022_s8 + $0xd0] sm:$0xff] %vm6615_vm3, %v6353_v43  ;;  %v5960_v41 = vadd.f32 %v5959_v17, %v5958_v23 }
 0x60e   :  { %v5950_v47 = vrot.slane %v5949_v28, 2 }
 0x60f   :  { %v6088_v21 = vrot.slane %v6057_v24, %v9251_v55  ;;  %v6323_v46 = vpop.trf.xlu0  ;;  %v7702_v51 = vpop.eup %7701  ;;  %v5961_v10 = vrot.slane %v5960_v41, 4 }
 0x610   :  { %v6354_v60 = vpop.trf.xlu1  ;;  %6628 = vst.msk [vmem:[%s12022_s8 + $0x60] sm:$0xff] %vm6615_vm3, %v6323_v46  ;;  %v6058_v45 = vmul.f32 %v7702_v51, %v6032_v8  ;;  %v5951_v50 = vadd.f32 %v5950_v47, %v5949_v28 }
 0x611   :  { %v11368_v38 = vmul.f32 %v6088_v21, %v11115_v62  ;;  %6643 = vst.msk [vmem:[%s12022_s8 + $0xd8] sm:$0xff] %vm6615_vm3, %v6354_v60  ;;  %v6107_v31 = vmul.f32 %v6088_v21, %v11098_v63  ;;  %v6117_v39 = vmul.f32 %v6088_v21, %v11101_v44  ;;  %v6127_v42 = vmul.f32 %v6088_v21, %v11104_v6  ;;  %v7708_v63 = vld [vmem:[%s12021_s7] sm:$0xff] }
 0x612   :  { %v6137_v56 = vmul.f32 %v6088_v21, %v11107_v27  ;;  %v6092_v3 = vrot.slane %v6058_v45, %v9251_v55  ;;  %v5952_v62 = vrot.slane %v5951_v50, 1  ;;  %v6147_v22 = vmul.f32 %v6088_v21, %v11110_v12 }
 0x613   :  { %v6324_v57 = vpop.trf.xlu0  ;;  %v6231_v25 = vadd.f32 %v11361_v11, %v6107_v31  ;;  %v5962_v36 = vadd.f32 %v5961_v10, %v5960_v41  ;;  %v11389_v44 = vrot.slane %v7708_v63, %v12061_v7 }
 0x614   :  { %v6355_v14 = vpop.trf.xlu1  ;;  %6629 = vst.msk [vmem:[%s12022_s8 + $0x68] sm:$0xff] %vm6615_vm3, %v6324_v57  ;;  %v11392_v6 = vmul.f32 %v6092_v3, %v11152_v54  ;;  %v5953_v27 = vadd.f32 %v5952_v62, %v5951_v50  ;;  %v6108_v12 = vmul.f32 %v6092_v3, %v11118_v58  ;;  %v6118_v52 = vmul.f32 %v6092_v3, %v11133_v26  ;;  %v12062_v57 = vld [vmem:[#allocation6_spill] sm:$0xff] }
 0x615   :  { %6644 = vst.msk [vmem:[%s12022_s8 + $0xe0] sm:$0xff] %vm6615_vm3, %v6355_v14  ;;  %v5963_v40 = vrot.slane %v5962_v36, 2  ;;  %v6128_v33 = vmul.f32 %v6092_v3, %v11140_v0  ;;  %v6138_v49 = vmul.f32 %v6092_v3, %v11143_v37  ;;  %v6148_v54 = vmul.f32 %v6092_v3, %v11146_v30 }
 0x616   :  { %v5975_v2 = vmul.f32 0.020408163, %v5953_v27  ;;  %v6232_v58 = vadd.f32 %v11389_v44, %v6108_v12  ;;  %v6157_v26 = vmul.f32 %v6088_v21, %v11113_v19  ;;  %v6241_v0 = vadd.f32 %v11361_v11, %v6117_v39  ;;  %v5998_v21 = vld [vmem:[%s12020_s6 + $0x8] sm:$0x3] }
 0x617   :  { %v6325_v13 = vpop.trf.xlu0  ;;  %6487 = vxpose.xlu0.b32.start [1/7] (short) %v6231_v25, 128  ;;  %v5964_v43 = vadd.f32 %v5963_v40, %v5962_v36  ;;  %v6158_v37 = vmul.f32 %v6092_v3, %v11149_v35  ;;  %v6251_v19 = vadd.f32 %v11361_v11, %v6127_v42  ;;  %v6242_v23 = vadd.f32 %v11389_v44, %v6118_v52 }
 0x618   :  { %v6356_v24 = vpop.trf.xlu1  ;;  %6630 = vst.msk [vmem:[%s12022_s8 + $0x70] sm:$0xff] %vm6615_vm3, %v6325_v13  ;;  %v5985_v1 = vadd.f32 1e-05, %v5975_v2  ;;  %v6261_v51 = vadd.f32 %v11361_v11, %v6137_v56  ;;  %v6036_v41 = vrot.slane %v5998_v21, %v9251_v55  ;;  %v6252_v60 = vadd.f32 %v11389_v44, %v6128_v33 }
 0x619   :  { %6645 = vst.msk [vmem:[%s12022_s8 + $0xe8] sm:$0xff] %vm6615_vm3, %v6356_v24  ;;  %v5965_v30 = vrot.slane %v5964_v43, 1  ;;  %v6271_v10 = vadd.f32 %v11361_v11, %v6147_v22  ;;  %v6262_v42 = vadd.f32 %v11389_v44, %v6138_v49  ;;  %v6040_v25 = vrot.slane %v5998_v21, %v12062_v57 }
 0x61a   :  { %7703 = vrsqrt.f32 %v5985_v1  ;;  %v6272_v22 = vadd.f32 %v11389_v44, %v6148_v54  ;;  %v6281_v36 = vadd.f32 %v11361_v11, %v6157_v26 }
 0x61b   :  { %v6326_v7 = vpop.trf.xlu0  ;;  %6488 = vxpose.xlu0.b32.cont [2/7] (short) %v6241_v0, 128  ;;  %v5966_v8 = vadd.f32 %v5965_v30, %v5964_v43  ;;  %v6292_v43 = vadd.f32 %v11389_v44, %v11392_v6 }
 0x61c   :  { %v6357_v28 = vpop.trf.xlu1  ;;  %6631 = vst.msk [vmem:[%s12022_s8 + $0x78] sm:$0xff] %vm6615_vm3, %v6326_v7  ;;  %6519 = vxpose.xlu1.b32.start [1/7] (short) %v6232_v58, 128 }
 0x61d   :  { %6646 = vst.msk [vmem:[%s12022_s8 + $0xf0] sm:$0xff] %vm6615_vm3, %v6357_v28  ;;  %v5976_v35 = vmul.f32 0.020408163, %v5966_v8  ;;  %v6172_v8 = vld [vmem:[%s12021_s7 + $0x8] sm:$0x3] }
 0x61f   :  { %v6439_v47 = vpop.trf.xlu0  ;;  %6489 = vxpose.xlu0.b32.cont [3/7] (short) %v6251_v19, 128  ;;  %v5986_v17 = vadd.f32 1e-05, %v5976_v35  ;;  %v6210_v35 = vrot.slane %v6172_v8, %v9251_v55 }
 0x620   :  { %v6358_v46 = vpop.trf.xlu1  ;;  %6680 = vst.msk [vmem:[%s12022_s8 + $0x200] sm:$0xff] %vm6615_vm3, %v6439_v47  ;;  %6520 = vxpose.xlu1.b32.cont [2/7] (short) %v6242_v23, 128 }
 0x621   :  { %6647 = vst.msk [vmem:[%s12022_s8 + $0xf8] sm:$0xff] %vm6615_vm3, %v6358_v46  ;;  %7705 = vrsqrt.f32 %v5986_v17  ;;  %v6214_v17 = vrot.slane %v6172_v8, %v12062_v57 }
 0x623   :  { %v6440_v45 = vpop.trf.xlu0  ;;  %6490 = vxpose.xlu0.b32.cont [4/7] (short) %v6261_v51, 128 }
 0x624   :  { %v6471_v50 = vpop.trf.xlu1  ;;  %6681 = vst.msk [vmem:[%s12022_s8 + $0x208] sm:$0xff] %vm6615_vm3, %v6440_v45  ;;  %6521 = vxpose.xlu1.b32.cont [3/7] (short) %v6252_v60, 128  ;;  %v7704_v31 = vpop.eup %7703 }
 0x625   :  { %6696 = vst.msk [vmem:[%s12022_s8 + $0x280] sm:$0xff] %vm6615_vm3, %v6471_v50  ;;  %v6059_v39 = vmul.f32 %v7704_v31, %v6036_v41 }
 0x627   :  { %v6441_v56 = vpop.trf.xlu0  ;;  %6491 = vxpose.xlu0.b32.cont [5/7] (short) %v6271_v10, 128  ;;  %v6096_v3 = vrot.slane %v6059_v39, %v9251_v55 }
 0x628   :  { %v6472_v62 = vpop.trf.xlu1  ;;  %6682 = vst.msk [vmem:[%s12022_s8 + $0x210] sm:$0xff] %vm6615_vm3, %v6441_v56  ;;  %6522 = vxpose.xlu1.b32.cont [4/7] (short) %v6262_v42, 128 }
 0x629   :  { %6697 = vst.msk [vmem:[%s12022_s8 + $0x288] sm:$0xff] %vm6615_vm3, %v6472_v62  ;;  %v11462_v14 = vmul.f32 %v6096_v3, %v11259_v61  ;;  %v11465_v63 = vmul.f32 %v6096_v3, %v11241_v34  ;;  %v11468_v27 = vmul.f32 %v6096_v3, %v11244_v18  ;;  %v11471_v12 = vmul.f32 %v6096_v3, %v11247_v53 }
 0x62a   :  { %v11474_v40 = vmul.f32 %v6096_v3, %v11250_v4  ;;  %v11477_v33 = vmul.f32 %v6096_v3, %v11253_v20  ;;  %v11480_v61 = vmul.f32 %v6096_v3, %v11256_v15  ;;  %v6291_v53 = vadd.f32 %v11361_v11, %v11368_v38 }
 0x62b   :  { %v6442_v52 = vpop.trf.xlu0  ;;  %6492 = vxpose.xlu0.b32.cont [6/7] (short) %v6281_v36, 128  ;;  %v7706_v49 = vpop.eup %7705  ;;  %v6282_v4 = vadd.f32 %v11389_v44, %v6158_v37  ;;  %v6233_v47 = vadd.f32 %v6210_v35, %v11465_v63  ;;  %v6253_v50 = vadd.f32 %v6210_v35, %v11471_v12 }
 0x62c   :  { %v6473_v34 = vpop.trf.xlu1  ;;  %6683 = vst.msk [vmem:[%s12022_s8 + $0x218] sm:$0xff] %vm6615_vm3, %v6442_v52  ;;  %6523 = vxpose.xlu1.b32.cont [5/7] (short) %v6272_v22, 128  ;;  %v6060_v18 = vmul.f32 %v7706_v49, %v6040_v25  ;;  %v6263_v42 = vadd.f32 %v6210_v35, %v11474_v40  ;;  %v6273_v57 = vadd.f32 %v6210_v35, %v11477_v33 }
 0x62d   :  { %6698 = vst.msk [vmem:[%s12022_s8 + $0x290] sm:$0xff] %vm6615_vm3, %v6473_v34  ;;  %v6283_v63 = vadd.f32 %v6210_v35, %v11480_v61  ;;  %v6293_v40 = vadd.f32 %v6210_v35, %v11462_v14 }
 0x62e   :  { %v6100_v20 = vrot.slane %v6060_v18, %v9251_v55  ;;  %v6243_v55 = vadd.f32 %v6210_v35, %v11468_v27 }
 0x62f   :  { %v6443_v15 = vpop.trf.xlu0  ;;  %6493 = vxpose.xlu0.b32.end [7/7] (short) %v6291_v53, 128 }
 0x630   :  { %v6474_v2 = vpop.trf.xlu1  ;;  %6684 = vst.msk [vmem:[%s12022_s8 + $0x220] sm:$0xff] %vm6615_vm3, %v6443_v15  ;;  %6524 = vxpose.xlu1.b32.cont [6/7] (short) %v6282_v4, 128  ;;  %v11499_v13 = vmul.f32 %v6100_v20, %v11306_v9  ;;  %v6110_v11 = vmul.f32 %v6100_v20, %v11284_v5  ;;  %v6120_v38 = vmul.f32 %v6100_v20, %v11287_v16 }
 0x631   :  { %6699 = vst.msk [vmem:[%s12022_s8 + $0x298] sm:$0xff] %vm6615_vm3, %v6474_v2  ;;  %v11508_v54 = vmul.f32 %v6100_v20, %v11290_v59  ;;  %v11513_v24 = vmul.f32 %v6100_v20, %v11297_v29  ;;  %v11516_v9 = vmul.f32 %v6100_v20, %v11300_v48  ;;  %v11519_v58 = vmul.f32 %v6100_v20, %v11303_v32 }
 0x632   :  { %v6234_v41 = vadd.f32 %v6214_v17, %v6110_v11  ;;  %v6244_v31 = vadd.f32 %v6214_v17, %v6120_v38  ;;  %v6294_v34 = vadd.f32 %v6214_v17, %v11499_v13 }
 0x633   :  { %v6444_v26 = vpop.trf.xlu0  ;;  %v6254_v56 = vadd.f32 %v6214_v17, %v11508_v54  ;;  %v6264_v25 = vadd.f32 %v6214_v17, %v11513_v24  ;;  %v6274_v27 = vadd.f32 %v6214_v17, %v11516_v9  ;;  %v6284_v33 = vadd.f32 %v6214_v17, %v11519_v58 }
 0x634   :  { %v6475_v1 = vpop.trf.xlu1  ;;  %6685 = vst.msk [vmem:[%s12022_s8 + $0x228] sm:$0xff] %vm6615_vm3, %v6444_v26  ;;  %6525 = vxpose.xlu1.b32.end [7/7] (short) %v6292_v43, 128 }
 0x635   :  { %6700 = vst.msk [vmem:[%s12022_s8 + $0x2a0] sm:$0xff] %vm6615_vm3, %v6475_v1 }
 0x637   :  { %v6445_v5 = vpop.trf.xlu0 }
 0x638   :  { %v6476_v16 = vpop.trf.xlu1  ;;  %6686 = vst.msk [vmem:[%s12022_s8 + $0x230] sm:$0xff] %vm6615_vm3, %v6445_v5 }
 0x639   :  { %6701 = vst.msk [vmem:[%s12022_s8 + $0x2a8] sm:$0xff] %vm6615_vm3, %v6476_v16 }
 0x63b   :  { %v6446_v59 = vpop.trf.xlu0 }
 0x63c   :  { %v6477_v29 = vpop.trf.xlu1  ;;  %6687 = vst.msk [vmem:[%s12022_s8 + $0x238] sm:$0xff] %vm6615_vm3, %v6446_v59 }
 0x63d   :  { %6702 = vst.msk [vmem:[%s12022_s8 + $0x2b0] sm:$0xff] %vm6615_vm3, %v6477_v29 }
 0x63f   :  { %v6447_v48 = vpop.trf.xlu0 }
 0x640   :  { %v6478_v32 = vpop.trf.xlu1  ;;  %6688 = vst.msk [vmem:[%s12022_s8 + $0x240] sm:$0xff] %vm6615_vm3, %v6447_v48 }
 0x641   :  { %6703 = vst.msk [vmem:[%s12022_s8 + $0x2b8] sm:$0xff] %vm6615_vm3, %v6478_v32 }
 0x643   :  { %v6448_v44 = vpop.trf.xlu0 }
 0x644   :  { %v6479_v6 = vpop.trf.xlu1  ;;  %6689 = vst.msk [vmem:[%s12022_s8 + $0x248] sm:$0xff] %vm6615_vm3, %v6448_v44 }
 0x645   :  { %6704 = vst.msk [vmem:[%s12022_s8 + $0x2c0] sm:$0xff] %vm6615_vm3, %v6479_v6 }
 0x647   :  { %v6449_v0 = vpop.trf.xlu0 }
 0x648   :  { %v6480_v37 = vpop.trf.xlu1  ;;  %6690 = vst.msk [vmem:[%s12022_s8 + $0x250] sm:$0xff] %vm6615_vm3, %v6449_v0 }
 0x649   :  { %6705 = vst.msk [vmem:[%s12022_s8 + $0x2c8] sm:$0xff] %vm6615_vm3, %v6480_v37 }
 0x64b   :  { %v6450_v30 = vpop.trf.xlu0 }
 0x64c   :  { %v6481_v7 = vpop.trf.xlu1  ;;  %6691 = vst.msk [vmem:[%s12022_s8 + $0x258] sm:$0xff] %vm6615_vm3, %v6450_v30 }
 0x64d   :  { %6706 = vst.msk [vmem:[%s12022_s8 + $0x2d0] sm:$0xff] %vm6615_vm3, %v6481_v7 }
 0x64f   :  { %v6451_v28 = vpop.trf.xlu0 }
 0x650   :  { %v6482_v19 = vpop.trf.xlu1  ;;  %6692 = vst.msk [vmem:[%s12022_s8 + $0x260] sm:$0xff] %vm6615_vm3, %v6451_v28 }
 0x651   :  { %6707 = vst.msk [vmem:[%s12022_s8 + $0x2d8] sm:$0xff] %vm6615_vm3, %v6482_v19 }
 0x653   :  { %v6452_v23 = vpop.trf.xlu0 }
 0x654   :  { %v6483_v21 = vpop.trf.xlu1  ;;  %6693 = vst.msk [vmem:[%s12022_s8 + $0x268] sm:$0xff] %vm6615_vm3, %v6452_v23 }
 0x655   :  { %6708 = vst.msk [vmem:[%s12022_s8 + $0x2e0] sm:$0xff] %vm6615_vm3, %v6483_v21 }
 0x657   :  { %v6453_v46 = vpop.trf.xlu0  ;;  %6551 = vxpose.xlu0.b32.start [1/7] (short) %v6233_v47, 128 }
 0x658   :  { %v6484_v51 = vpop.trf.xlu1  ;;  %6694 = vst.msk [vmem:[%s12022_s8 + $0x270] sm:$0xff] %vm6615_vm3, %v6453_v46 }
 0x659   :  { %6709 = vst.msk [vmem:[%s12022_s8 + $0x2e8] sm:$0xff] %vm6615_vm3, %v6484_v51 }
 0x65b   :  { %v6454_v60 = vpop.trf.xlu0  ;;  %6552 = vxpose.xlu0.b32.cont [2/7] (short) %v6243_v55, 128 }
 0x65c   :  { %v6485_v45 = vpop.trf.xlu1  ;;  %6583 = vxpose.xlu1.b32.start [1/7] (short) %v6234_v41, 128  ;;  %6695 = vst.msk [vmem:[%s12022_s8 + $0x278] sm:$0xff] %vm6615_vm3, %v6454_v60 }
 0x65d   :  { %6710 = vst.msk [vmem:[%s12022_s8 + $0x2f0] sm:$0xff] %vm6615_vm3, %v6485_v45 }
 0x65f   :  { %v6375_v10 = vpop.trf.xlu0  ;;  %6553 = vxpose.xlu0.b32.cont [3/7] (short) %v6253_v50, 128 }
 0x660   :  { %v6486_v39 = vpop.trf.xlu1  ;;  %6584 = vxpose.xlu1.b32.cont [2/7] (short) %v6244_v31, 128  ;;  %6648 = vst.msk [vmem:[%s12022_s8 + $0x100] sm:$0xff] %vm6615_vm3, %v6375_v10 }
 0x661   :  { %6711 = vst.msk [vmem:[%s12022_s8 + $0x2f8] sm:$0xff] %vm6615_vm3, %v6486_v39 }
 0x663   :  { %v6376_v3 = vpop.trf.xlu0  ;;  %6554 = vxpose.xlu0.b32.cont [4/7] (short) %v6263_v42, 128 }
 0x664   :  { %v6407_v62 = vpop.trf.xlu1  ;;  %6585 = vxpose.xlu1.b32.cont [3/7] (short) %v6254_v56, 128  ;;  %6649 = vst.msk [vmem:[%s12022_s8 + $0x108] sm:$0xff] %vm6615_vm3, %v6376_v3 }
 0x665   :  { %6664 = vst.msk [vmem:[%s12022_s8 + $0x180] sm:$0xff] %vm6615_vm3, %v6407_v62 }
 0x667   :  { %v6377_v22 = vpop.trf.xlu0  ;;  %6555 = vxpose.xlu0.b32.cont [5/7] (short) %v6273_v57, 128 }
 0x668   :  { %v6408_v36 = vpop.trf.xlu1  ;;  %6586 = vxpose.xlu1.b32.cont [4/7] (short) %v6264_v25, 128  ;;  %6650 = vst.msk [vmem:[%s12022_s8 + $0x110] sm:$0xff] %vm6615_vm3, %v6377_v22 }
 0x669   :  { %6665 = vst.msk [vmem:[%s12022_s8 + $0x188] sm:$0xff] %vm6615_vm3, %v6408_v36 }
 0x66b   :  { %v6378_v12 = vpop.trf.xlu0  ;;  %6556 = vxpose.xlu0.b32.cont [6/7] (short) %v6283_v63, 128 }
 0x66c   :  { %v6409_v52 = vpop.trf.xlu1  ;;  %6587 = vxpose.xlu1.b32.cont [5/7] (short) %v6274_v27, 128  ;;  %6651 = vst.msk [vmem:[%s12022_s8 + $0x118] sm:$0xff] %vm6615_vm3, %v6378_v12 }
 0x66d   :  { %6666 = vst.msk [vmem:[%s12022_s8 + $0x190] sm:$0xff] %vm6615_vm3, %v6409_v52 }
 0x66f   :  { %v6379_v61 = vpop.trf.xlu0  ;;  %6557 = vxpose.xlu0.b32.end [7/7] (short) %v6293_v40, 128 }
 0x670   :  { %v6410_v49 = vpop.trf.xlu1  ;;  %6588 = vxpose.xlu1.b32.cont [6/7] (short) %v6284_v33, 128  ;;  %6652 = vst.msk [vmem:[%s12022_s8 + $0x120] sm:$0xff] %vm6615_vm3, %v6379_v61 }
 0x671   :  { %6667 = vst.msk [vmem:[%s12022_s8 + $0x198] sm:$0xff] %vm6615_vm3, %v6410_v49 }
 0x673   :  { %v6380_v18 = vpop.trf.xlu0 }
 0x674   :  { %v6411_v14 = vpop.trf.xlu1  ;;  %6589 = vxpose.xlu1.b32.end [7/7] (short) %v6294_v34, 128  ;;  %6653 = vst.msk [vmem:[%s12022_s8 + $0x128] sm:$0xff] %vm6615_vm3, %v6380_v18 }
 0x675   :  { %6668 = vst.msk [vmem:[%s12022_s8 + $0x1a0] sm:$0xff] %vm6615_vm3, %v6411_v14 }
 0x677   :  { %v6381_v53 = vpop.trf.xlu0 }
 0x678   :  { %v6412_v4 = vpop.trf.xlu1  ;;  %6654 = vst.msk [vmem:[%s12022_s8 + $0x130] sm:$0xff] %vm6615_vm3, %v6381_v53 }
 0x679   :  { %6669 = vst.msk [vmem:[%s12022_s8 + $0x1a8] sm:$0xff] %vm6615_vm3, %v6412_v4 }
 0x67b   :  { %v6382_v20 = vpop.trf.xlu0 }
 0x67c   :  { %v6413_v15 = vpop.trf.xlu1  ;;  %6655 = vst.msk [vmem:[%s12022_s8 + $0x138] sm:$0xff] %vm6615_vm3, %v6382_v20 }
 0x67d   :  { %6670 = vst.msk [vmem:[%s12022_s8 + $0x1b0] sm:$0xff] %vm6615_vm3, %v6413_v15 }
 0x67f   :  { %v6383_v2 = vpop.trf.xlu0 }
 0x680   :  { %v6414_v13 = vpop.trf.xlu1  ;;  %6656 = vst.msk [vmem:[%s12022_s8 + $0x140] sm:$0xff] %vm6615_vm3, %v6383_v2 }
 0x681   :  { %6671 = vst.msk [vmem:[%s12022_s8 + $0x1b8] sm:$0xff] %vm6615_vm3, %v6414_v13 }
 0x683   :  { %v6384_v11 = vpop.trf.xlu0 }
 0x684   :  { %v6415_v38 = vpop.trf.xlu1  ;;  %6657 = vst.msk [vmem:[%s12022_s8 + $0x148] sm:$0xff] %vm6615_vm3, %v6384_v11 }
 0x685   :  { %6672 = vst.msk [vmem:[%s12022_s8 + $0x1c0] sm:$0xff] %vm6615_vm3, %v6415_v38 }
 0x687   :  { %v6385_v54 = vpop.trf.xlu0 }
 0x688   :  { %v6416_v43 = vpop.trf.xlu1  ;;  %6658 = vst.msk [vmem:[%s12022_s8 + $0x150] sm:$0xff] %vm6615_vm3, %v6385_v54 }
 0x689   :  { %6673 = vst.msk [vmem:[%s12022_s8 + $0x1c8] sm:$0xff] %vm6615_vm3, %v6416_v43 }
 0x68b   :  { %v6386_v24 = vpop.trf.xlu0 }
 0x68c   :  { %v6417_v9 = vpop.trf.xlu1  ;;  %6659 = vst.msk [vmem:[%s12022_s8 + $0x158] sm:$0xff] %vm6615_vm3, %v6386_v24 }
 0x68d   :  { %6674 = vst.msk [vmem:[%s12022_s8 + $0x1d0] sm:$0xff] %vm6615_vm3, %v6417_v9 }
 0x68f   :  { %v6387_v58 = vpop.trf.xlu0 }
 0x690   :  { %v6418_v26 = vpop.trf.xlu1  ;;  %6660 = vst.msk [vmem:[%s12022_s8 + $0x160] sm:$0xff] %vm6615_vm3, %v6387_v58 }
 0x691   :  { %6675 = vst.msk [vmem:[%s12022_s8 + $0x1d8] sm:$0xff] %vm6615_vm3, %v6418_v26 }
 0x693   :  { %v6388_v1 = vpop.trf.xlu0 }
 0x694   :  { %v6419_v5 = vpop.trf.xlu1  ;;  %6661 = vst.msk [vmem:[%s12022_s8 + $0x168] sm:$0xff] %vm6615_vm3, %v6388_v1 }
 0x695   :  { %6676 = vst.msk [vmem:[%s12022_s8 + $0x1e0] sm:$0xff] %vm6615_vm3, %v6419_v5 }
 0x697   :  { %v6389_v16 = vpop.trf.xlu0 }
 0x698   :  { %v6420_v59 = vpop.trf.xlu1  ;;  %6662 = vst.msk [vmem:[%s12022_s8 + $0x170] sm:$0xff] %vm6615_vm3, %v6389_v16 }
 0x699   :  { %6677 = vst.msk [vmem:[%s12022_s8 + $0x1e8] sm:$0xff] %vm6615_vm3, %v6420_v59 }
 0x69b   :  { %v6390_v29 = vpop.trf.xlu0 }
 0x69c   :  { %v6421_v48 = vpop.trf.xlu1  ;;  %6663 = vst.msk [vmem:[%s12022_s8 + $0x178] sm:$0xff] %vm6615_vm3, %v6390_v29 }
 0x69d   :  { %6678 = vst.msk [vmem:[%s12022_s8 + $0x1f0] sm:$0xff] %vm6615_vm3, %v6421_v48 }
 0x69f   :  { %v6503_v32 = vpop.trf.xlu0 }
 0x6a0   :  { %v6422_v44 = vpop.trf.xlu1  ;;  %6712 = vst.msk [vmem:[%s12022_s8 + $0x300] sm:$0xff] %vm6615_vm3, %v6503_v32 }
 0x6a1   :  { %6679 = vst.msk [vmem:[%s12022_s8 + $0x1f8] sm:$0xff] %vm6615_vm3, %v6422_v44 }
 0x6a3   :  { %v6504_v6 = vpop.trf.xlu0 }
 0x6a4   :  { %v6535_v0 = vpop.trf.xlu1  ;;  %6713 = vst.msk [vmem:[%s12022_s8 + $0x308] sm:$0xff] %vm6615_vm3, %v6504_v6 }
 0x6a5   :  { %6728 = vst.msk [vmem:[%s12022_s8 + $0x380] sm:$0xff] %vm6615_vm3, %v6535_v0 }
 0x6a7   :  { %v6505_v37 = vpop.trf.xlu0 }
 0x6a8   :  { %v6536_v30 = vpop.trf.xlu1  ;;  %6714 = vst.msk [vmem:[%s12022_s8 + $0x310] sm:$0xff] %vm6615_vm3, %v6505_v37 }
 0x6a9   :  { %6729 = vst.msk [vmem:[%s12022_s8 + $0x388] sm:$0xff] %vm6615_vm3, %v6536_v30 }
 0x6ab   :  { %v6506_v7 = vpop.trf.xlu0 }
 0x6ac   :  { %v6537_v8 = vpop.trf.xlu1  ;;  %6715 = vst.msk [vmem:[%s12022_s8 + $0x318] sm:$0xff] %vm6615_vm3, %v6506_v7 }
 0x6ad   :  { %6730 = vst.msk [vmem:[%s12022_s8 + $0x390] sm:$0xff] %vm6615_vm3, %v6537_v8 }
 0x6af   :  { %v6507_v28 = vpop.trf.xlu0 }
 0x6b0   :  { %v6538_v19 = vpop.trf.xlu1  ;;  %6716 = vst.msk [vmem:[%s12022_s8 + $0x320] sm:$0xff] %vm6615_vm3, %v6507_v28 }
 0x6b1   :  { %6731 = vst.msk [vmem:[%s12022_s8 + $0x398] sm:$0xff] %vm6615_vm3, %v6538_v19 }
 0x6b3   :  { %v6508_v35 = vpop.trf.xlu0 }
 0x6b4   :  { %v6539_v23 = vpop.trf.xlu1  ;;  %6717 = vst.msk [vmem:[%s12022_s8 + $0x328] sm:$0xff] %vm6615_vm3, %v6508_v35 }
 0x6b5   :  { %6732 = vst.msk [vmem:[%s12022_s8 + $0x3a0] sm:$0xff] %vm6615_vm3, %v6539_v23 }
 0x6b7   :  { %v6509_v21 = vpop.trf.xlu0 }
 0x6b8   :  { %v6540_v47 = vpop.trf.xlu1  ;;  %6718 = vst.msk [vmem:[%s12022_s8 + $0x330] sm:$0xff] %vm6615_vm3, %v6509_v21 }
 0x6b9   :  { %6733 = vst.msk [vmem:[%s12022_s8 + $0x3a8] sm:$0xff] %vm6615_vm3, %v6540_v47 }
 0x6bb   :  { %v6510_v17 = vpop.trf.xlu0 }
 0x6bc   :  { %v6541_v46 = vpop.trf.xlu1  ;;  %6719 = vst.msk [vmem:[%s12022_s8 + $0x338] sm:$0xff] %vm6615_vm3, %v6510_v17 }
 0x6bd   :  { %6734 = vst.msk [vmem:[%s12022_s8 + $0x3b0] sm:$0xff] %vm6615_vm3, %v6541_v46 }
 0x6bf   :  { %v6511_v51 = vpop.trf.xlu0 }
 0x6c0   :  { %v6542_v55 = vpop.trf.xlu1  ;;  %6720 = vst.msk [vmem:[%s12022_s8 + $0x340] sm:$0xff] %vm6615_vm3, %v6511_v51 }
 0x6c1   :  { %6735 = vst.msk [vmem:[%s12022_s8 + $0x3b8] sm:$0xff] %vm6615_vm3, %v6542_v55 }
 0x6c3   :  { %v6512_v41 = vpop.trf.xlu0 }
 0x6c4   :  { %v6543_v60 = vpop.trf.xlu1  ;;  %6721 = vst.msk [vmem:[%s12022_s8 + $0x348] sm:$0xff] %vm6615_vm3, %v6512_v41 }
 0x6c5   :  { %6736 = vst.msk [vmem:[%s12022_s8 + $0x3c0] sm:$0xff] %vm6615_vm3, %v6543_v60 }
 0x6c7   :  { %v6513_v45 = vpop.trf.xlu0 }
 0x6c8   :  { %v6544_v50 = vpop.trf.xlu1  ;;  %6722 = vst.msk [vmem:[%s12022_s8 + $0x350] sm:$0xff] %vm6615_vm3, %v6513_v45 }
 0x6c9   :  { %6737 = vst.msk [vmem:[%s12022_s8 + $0x3c8] sm:$0xff] %vm6615_vm3, %v6544_v50 }
 0x6cb   :  { %v6514_v31 = vpop.trf.xlu0 }
 0x6cc   :  { %v6545_v10 = vpop.trf.xlu1  ;;  %6723 = vst.msk [vmem:[%s12022_s8 + $0x358] sm:$0xff] %vm6615_vm3, %v6514_v31 }
 0x6cd   :  { %6738 = vst.msk [vmem:[%s12022_s8 + $0x3d0] sm:$0xff] %vm6615_vm3, %v6545_v10 }
 0x6cf   :  { %v6515_v39 = vpop.trf.xlu0 }
 0x6d0   :  { %v6546_v42 = vpop.trf.xlu1  ;;  %6724 = vst.msk [vmem:[%s12022_s8 + $0x360] sm:$0xff] %vm6615_vm3, %v6515_v39 }
 0x6d1   :  { %6739 = vst.msk [vmem:[%s12022_s8 + $0x3d8] sm:$0xff] %vm6615_vm3, %v6546_v42 }
 0x6d3   :  { %v6516_v56 = vpop.trf.xlu0 }
 0x6d4   :  { %v6547_v3 = vpop.trf.xlu1  ;;  %6725 = vst.msk [vmem:[%s12022_s8 + $0x368] sm:$0xff] %vm6615_vm3, %v6516_v56 }
 0x6d5   :  { %6740 = vst.msk [vmem:[%s12022_s8 + $0x3e0] sm:$0xff] %vm6615_vm3, %v6547_v3 }
 0x6d7   :  { %v6517_v62 = vpop.trf.xlu0 }
 0x6d8   :  { %v6548_v57 = vpop.trf.xlu1  ;;  %6726 = vst.msk [vmem:[%s12022_s8 + $0x370] sm:$0xff] %vm6615_vm3, %v6517_v62 }
 0x6d9   :  { %6741 = vst.msk [vmem:[%s12022_s8 + $0x3e8] sm:$0xff] %vm6615_vm3, %v6548_v57 }
 0x6db   :  { %v6518_v25 = vpop.trf.xlu0 }
 0x6dc   :  { %v6549_v22 = vpop.trf.xlu1  ;;  %6727 = vst.msk [vmem:[%s12022_s8 + $0x378] sm:$0xff] %vm6615_vm3, %v6518_v25 }
 0x6dd   :  { %6742 = vst.msk [vmem:[%s12022_s8 + $0x3f0] sm:$0xff] %vm6615_vm3, %v6549_v22 }
 0x6df   :  { %v6567_v36 = vpop.trf.xlu0 }
 0x6e0   :  { %v6550_v63 = vpop.trf.xlu1  ;;  %6744 = vst.msk [vmem:[%s12022_s8 + $0x400] sm:$0xff] %vm6615_vm3, %v6567_v36 }
 0x6e1   :  { %6743 = vst.msk [vmem:[%s12022_s8 + $0x3f8] sm:$0xff] %vm6615_vm3, %v6550_v63 }
 0x6e3   :  { %v6568_v27 = vpop.trf.xlu0 }
 0x6e4   :  { %v6599_v12 = vpop.trf.xlu1  ;;  %6745 = vst.msk [vmem:[%s12022_s8 + $0x408] sm:$0xff] %vm6615_vm3, %v6568_v27 }
 0x6e5   :  { %6760 = vst.msk [vmem:[%s12022_s8 + $0x480] sm:$0xff] %vm6615_vm3, %v6599_v12 }
 0x6e7   :  { %v6569_v52 = vpop.trf.xlu0 }
 0x6e8   :  { %v6600_v40 = vpop.trf.xlu1  ;;  %6746 = vst.msk [vmem:[%s12022_s8 + $0x410] sm:$0xff] %vm6615_vm3, %v6569_v52 }
 0x6e9   :  { %6761 = vst.msk [vmem:[%s12022_s8 + $0x488] sm:$0xff] %vm6615_vm3, %v6600_v40 }
 0x6eb   :  { %v6570_v33 = vpop.trf.xlu0 }
 0x6ec   :  { %v6601_v61 = vpop.trf.xlu1  ;;  %6747 = vst.msk [vmem:[%s12022_s8 + $0x418] sm:$0xff] %vm6615_vm3, %v6570_v33 }
 0x6ed   :  { %6762 = vst.msk [vmem:[%s12022_s8 + $0x490] sm:$0xff] %vm6615_vm3, %v6601_v61 }
 0x6ef   :  { %v6571_v49 = vpop.trf.xlu0 }
 0x6f0   :  { %v6602_v34 = vpop.trf.xlu1  ;;  %6748 = vst.msk [vmem:[%s12022_s8 + $0x420] sm:$0xff] %vm6615_vm3, %v6571_v49 }
 0x6f1   :  { %6763 = vst.msk [vmem:[%s12022_s8 + $0x498] sm:$0xff] %vm6615_vm3, %v6602_v34 }
 0x6f3   :  { %v6572_v18 = vpop.trf.xlu0 }
 0x6f4   :  { %v6603_v14 = vpop.trf.xlu1  ;;  %6749 = vst.msk [vmem:[%s12022_s8 + $0x428] sm:$0xff] %vm6615_vm3, %v6572_v18 }
 0x6f5   :  { %6764 = vst.msk [vmem:[%s12022_s8 + $0x4a0] sm:$0xff] %vm6615_vm3, %v6603_v14 }
 0x6f7   :  { %v6573_v53 = vpop.trf.xlu0 }
 0x6f8   :  { %v6604_v4 = vpop.trf.xlu1  ;;  %6750 = vst.msk [vmem:[%s12022_s8 + $0x430] sm:$0xff] %vm6615_vm3, %v6573_v53 }
 0x6f9   :  { %6765 = vst.msk [vmem:[%s12022_s8 + $0x4a8] sm:$0xff] %vm6615_vm3, %v6604_v4 }
 0x6fb   :  { %v6574_v20 = vpop.trf.xlu0 }
 0x6fc   :  { %v6605_v15 = vpop.trf.xlu1  ;;  %6751 = vst.msk [vmem:[%s12022_s8 + $0x438] sm:$0xff] %vm6615_vm3, %v6574_v20 }
 0x6fd   :  { %6766 = vst.msk [vmem:[%s12022_s8 + $0x4b0] sm:$0xff] %vm6615_vm3, %v6605_v15 }
 0x6ff   :  { %v6575_v2 = vpop.trf.xlu0 }
 0x700   :  { %v6606_v13 = vpop.trf.xlu1  ;;  %6752 = vst.msk [vmem:[%s12022_s8 + $0x440] sm:$0xff] %vm6615_vm3, %v6575_v2 }
 0x701   :  { %6767 = vst.msk [vmem:[%s12022_s8 + $0x4b8] sm:$0xff] %vm6615_vm3, %v6606_v13 }
 0x703   :  { %v6576_v11 = vpop.trf.xlu0 }
 0x704   :  { %v6607_v38 = vpop.trf.xlu1  ;;  %6753 = vst.msk [vmem:[%s12022_s8 + $0x448] sm:$0xff] %vm6615_vm3, %v6576_v11 }
 0x705   :  { %6768 = vst.msk [vmem:[%s12022_s8 + $0x4c0] sm:$0xff] %vm6615_vm3, %v6607_v38 }
 0x707   :  { %v6577_v54 = vpop.trf.xlu0 }
 0x708   :  { %v6608_v43 = vpop.trf.xlu1  ;;  %6754 = vst.msk [vmem:[%s12022_s8 + $0x450] sm:$0xff] %vm6615_vm3, %v6577_v54 }
 0x709   :  { %6769 = vst.msk [vmem:[%s12022_s8 + $0x4c8] sm:$0xff] %vm6615_vm3, %v6608_v43 }
 0x70b   :  { %v6578_v24 = vpop.trf.xlu0 }
 0x70c   :  { %v6609_v9 = vpop.trf.xlu1  ;;  %6755 = vst.msk [vmem:[%s12022_s8 + $0x458] sm:$0xff] %vm6615_vm3, %v6578_v24 }
 0x70d   :  { %6770 = vst.msk [vmem:[%s12022_s8 + $0x4d0] sm:$0xff] %vm6615_vm3, %v6609_v9 }
 0x70f   :  { %v6579_v58 = vpop.trf.xlu0 }
 0x710   :  { %v6610_v26 = vpop.trf.xlu1  ;;  %6756 = vst.msk [vmem:[%s12022_s8 + $0x460] sm:$0xff] %vm6615_vm3, %v6579_v58 }
 0x711   :  { %6771 = vst.msk [vmem:[%s12022_s8 + $0x4d8] sm:$0xff] %vm6615_vm3, %v6610_v26 }
 0x713   :  { %v6580_v1 = vpop.trf.xlu0 }
 0x714   :  { %v6611_v5 = vpop.trf.xlu1  ;;  %6757 = vst.msk [vmem:[%s12022_s8 + $0x468] sm:$0xff] %vm6615_vm3, %v6580_v1 }
 0x715   :  { %6772 = vst.msk [vmem:[%s12022_s8 + $0x4e0] sm:$0xff] %vm6615_vm3, %v6611_v5 }
 0x717   :  { %v6581_v16 = vpop.trf.xlu0 }
 0x718   :  { %v6612_v59 = vpop.trf.xlu1  ;;  %6758 = vst.msk [vmem:[%s12022_s8 + $0x470] sm:$0xff] %vm6615_vm3, %v6581_v16 }
 0x719   :  { %6773 = vst.msk [vmem:[%s12022_s8 + $0x4e8] sm:$0xff] %vm6615_vm3, %v6612_v59 }
 0x71b   :  { %v6582_v29 = vpop.trf.xlu0 }
 0x71c   :  { %v6613_v48 = vpop.trf.xlu1  ;;  %6759 = vst.msk [vmem:[%s12022_s8 + $0x478] sm:$0xff] %vm6615_vm3, %v6582_v29 }
 0x71d   :  { %6774 = vst.msk [vmem:[%s12022_s8 + $0x4f0] sm:$0xff] %vm6615_vm3, %v6613_v48 }
 0x720   :  { %v6614_v32 = vpop.trf.xlu1 }
 0x721   :  { %6775 = vst.msk [vmem:[%s12022_s8 + $0x4f8] sm:$0xff] %vm6615_vm3, %v6614_v32 }
 0x722   :  { %6780 = vsyncmov [#allocation3] }
 0x725   :  { %s6781_s12 = vpop.sfrf %6780 }
 0x726   :  { %p7036_p0 = scmp.ne.s32.totalorder %s6781_s12, 0 }
 0x728   :  { %6785 = shalt.err (%p7036_p0)  }

</bundles_post_ra>
